<compile_context>
chip_gen: v7x
topology: tpu7x:2x2x1
jax: 0.10.0
libtpu: 0.0.40
codegen_flags: <defaults>
</compile_context>

<pallas_src>
import functools

import jax
import jax.numpy as jnp
from jax.experimental import pallas as pl
from jax.experimental.pallas import tpu as pltpu


# ----------------------------------------------------------------------------
# Parameter ordering (wrapper flattens / kernel unpacks with the same order).
# Per-layer parameters are stacked along a leading layer axis.
# ----------------------------------------------------------------------------
_PARAM_ORDER = (
    "input_proj_w", "input_proj_b", "pos_embed", "bottleneck",
    "output_proj_w", "output_proj_b",
    # encoder (stacked over num_layers_e)
    "enc_wq", "enc_bq", "enc_wk", "enc_bk", "enc_wv", "enc_bv", "enc_wo", "enc_bo",
    "enc_ln1_g", "enc_ln1_b", "enc_ln2_g", "enc_ln2_b",
    "enc_ff1_w", "enc_ff1_b", "enc_ff2_w", "enc_ff2_b",
    # decoder (stacked over num_layers_d)
    "dec_swq", "dec_sbq", "dec_swk", "dec_sbk", "dec_swv", "dec_sbv", "dec_swo", "dec_sbo",
    "dec_cwq", "dec_cbq", "dec_cwk", "dec_cbk", "dec_cwv", "dec_cbv", "dec_cwo", "dec_cbo",
    "dec_ln1_g", "dec_ln1_b", "dec_ln2_g", "dec_ln2_b", "dec_ln3_g", "dec_ln3_b",
    "dec_ff1_w", "dec_ff1_b", "dec_ff2_w", "dec_ff2_b",
)


# ----------------------------------------------------------------------------
# In-kernel helpers (operate on loaded VMEM values, traced into the kernel)
# ----------------------------------------------------------------------------
def _layer_norm(x, g, b, eps):
    mu = jnp.mean(x, axis=-1, keepdims=True)
    xc = x - mu
    var = jnp.mean(xc * xc, axis=-1, keepdims=True)
    return xc * jax.lax.rsqrt(var + eps) * g + b


def _ffn(x, w1, b1, w2, b2):
    # relu(x @ W1 + b1) @ W2 + b2, the 2048-wide intermediate stays in VMEM.
    h = jnp.dot(x, w1, preferred_element_type=jnp.float32) + b1
    h = jnp.maximum(h, 0.0)
    return jnp.dot(h, w2, preferred_element_type=jnp.float32) + b2


def _attention(xq, xkv, wq, bq, wk, bk, wv, bv, wo, bo, num_heads):
    """Multi-head attention matching nn.MultiheadAttention (batch handled by grid)."""
    hid = wq.shape[-1]
    dh = hid // num_heads
    scale = 1.0 / float(dh) ** 0.5
    # Fold the 1/sqrt(dh) scale into q (fewer elements than scaling scores).
    q = (jnp.dot(xq, wq, preferred_element_type=jnp.float32) + bq) * scale
    k = jnp.dot(xkv, wk, preferred_element_type=jnp.float32) + bk
    v = jnp.dot(xkv, wv, preferred_element_type=jnp.float32) + bv
    lq = xq.shape[0]
    acc = jnp.zeros((lq, hid), jnp.float32)
    for hh in range(num_heads):           # static, tiny head count
        sl = slice(hh * dh, (hh + 1) * dh)
        qh, kh, vh = q[:, sl], k[:, sl], v[:, sl]
        s = jax.lax.dot_general(qh, kh, (((1,), (1,)), ((), ())),
                                preferred_element_type=jnp.float32)
        s = s - jnp.max(s, axis=-1, keepdims=True)
        pexp = jnp.exp(s)
        pexp = pexp * pl.reciprocal(jnp.sum(pexp, axis=-1, keepdims=True),
                                    approx=True)
        ctx = jnp.dot(pexp, vh, preferred_element_type=jnp.float32)   # (Lq, dh)
        # Accumulate ctx_h @ Wo[head rows] — avoids the lane concat of heads,
        # keeps the attention output lane-dense.  Row slice is 8-aligned.
        acc = acc + jnp.dot(ctx, wo[sl, :], preferred_element_type=jnp.float32)
    return acc + bo


# ----------------------------------------------------------------------------
# Fully fused forward kernel (one batch element per grid step)
# ----------------------------------------------------------------------------
def _fused_forward_kernel(*refs, num_heads_e, num_heads_d, eps, num_enc, num_dec):
    assert len(refs) == len(_PARAM_ORDER) + 2
    x_ref = refs[0]
    o_ref = refs[-1]
    p = dict(zip(_PARAM_ORDER, refs[1:-1]))

    x = x_ref[0].astype(jnp.float32)                 # (L, D)
    seq_len = x.shape[0]
    hidden = p["input_proj_w"].shape[-1]

    # ---- input projection + positional embedding --------------------------
    h = jnp.dot(x, p["input_proj_w"][...], preferred_element_type=jnp.float32)
    h = h + p["input_proj_b"][...] + p["pos_embed"][...]

    # ---- prepend bottleneck token ------------------------------------------
    enc = jnp.concatenate([p["bottleneck"][...], h], axis=0)    # (L+1, H)

    # ---- encoder stack (post-norm) -----------------------------------------
    for li in range(num_enc):
        sa = _attention(enc, enc,
                        p["enc_wq"][li], p["enc_bq"][li],
                        p["enc_wk"][li], p["enc_bk"][li],
                        p["enc_wv"][li], p["enc_bv"][li],
                        p["enc_wo"][li], p["enc_bo"][li], num_heads_e)
        enc = _layer_norm(enc + sa, p["enc_ln1_g"][li], p["enc_ln1_b"][li], eps)
        ff = _ffn(enc, p["enc_ff1_w"][li], p["enc_ff1_b"][li],
                  p["enc_ff2_w"][li], p["enc_ff2_b"][li])
        enc = _layer_norm(enc + ff, p["enc_ln2_g"][li], p["enc_ln2_b"][li], eps)

    mem = enc[1:, :]                                 # drop bottleneck token, (L, H)

    # ---- decoder stack (tgt = zeros_like(memory), post-norm) ---------------
    dec = jnp.zeros((seq_len, hidden), jnp.float32)
    for li in range(num_dec):
        if li == 0:
            # tgt == 0  =>  q = bq, k = bk, v = bv (identical rows) => uniform
            # attention over identical rows => self-attn output = bv@Wo + bo.
            # Residual with zeros is the same row; exact algebraic shortcut.
            row = jnp.dot(p["dec_sbv"][li], p["dec_swo"][li],
                          preferred_element_type=jnp.float32) + p["dec_sbo"][li]
            row = _layer_norm(row, p["dec_ln1_g"][li], p["dec_ln1_b"][li], eps)
            dec = jnp.broadcast_to(row, (seq_len, hidden))
        else:
            sa = _attention(dec, dec,
                            p["dec_swq"][li], p["dec_sbq"][li],
                            p["dec_swk"][li], p["dec_sbk"][li],
                            p["dec_swv"][li], p["dec_sbv"][li],
                            p["dec_swo"][li], p["dec_sbo"][li], num_heads_d)
            dec = _layer_norm(dec + sa, p["dec_ln1_g"][li], p["dec_ln1_b"][li], eps)

        ca = _attention(dec, mem,
                        p["dec_cwq"][li], p["dec_cbq"][li],
                        p["dec_cwk"][li], p["dec_cbk"][li],
                        p["dec_cwv"][li], p["dec_cbv"][li],
                        p["dec_cwo"][li], p["dec_cbo"][li], num_heads_d)
        dec = _layer_norm(dec + ca, p["dec_ln2_g"][li], p["dec_ln2_b"][li], eps)

        ff = _ffn(dec, p["dec_ff1_w"][li], p["dec_ff1_b"][li],
                  p["dec_ff2_w"][li], p["dec_ff2_b"][li])
        dec = _layer_norm(dec + ff, p["dec_ln3_g"][li], p["dec_ln3_b"][li], eps)

    # ---- output projection --------------------------------------------------
    out = jnp.dot(dec, p["output_proj_w"][...], preferred_element_type=jnp.float32)
    out = out + p["output_proj_b"][...]
    o_ref[0] = out.astype(o_ref.dtype)


def _const_spec(shape):
    """Full-array block, same block at every grid step (fetched once)."""
    zeros = (0,) * len(shape)
    return pl.BlockSpec(shape, lambda b, _z=zeros: _z)


def forward(params, x, *, num_heads_e, num_heads_d, eps):
    b, l, d = x.shape
    num_enc = params["enc_wq"].shape[0]
    num_dec = params["dec_swq"].shape[0]
    flat = [params[name] for name in _PARAM_ORDER]

    kernel = functools.partial(
        _fused_forward_kernel,
        num_heads_e=num_heads_e, num_heads_d=num_heads_d,
        eps=eps, num_enc=num_enc, num_dec=num_dec)

    in_specs = [pl.BlockSpec((1, l, d), lambda bb: (bb, 0, 0))]
    in_specs += [_const_spec(a.shape) for a in flat]

    return pl.pallas_call(
        kernel,
        out_shape=jax.ShapeDtypeStruct((b, l, d), x.dtype),
        grid=(b,),
        in_specs=in_specs,
        out_specs=pl.BlockSpec((1, l, d), lambda bb: (bb, 0, 0)),
        compiler_params=pltpu.CompilerParams(
            dimension_semantics=("parallel",),       # v7x: one batch elem per TC
            vmem_limit_bytes=32 * 1024 * 1024,       # headroom; fits every gen
        ),
    )(x, *flat)


# ----------------------------------------------------------------------------
# Deterministic synthetic parameter initialization (stacked layer layout)
# ----------------------------------------------------------------------------
def init_params(key, d, seq_len, hidden, ff, num_layers_e, num_layers_d):
    keys = iter(jax.random.split(key, 64))

    def rnd(shape, scale=0.02):
        return jax.random.normal(next(keys), shape, jnp.float32) * scale

    p = {
        "input_proj_w": rnd((d, hidden)),
        "input_proj_b": rnd((1, hidden)),
        "pos_embed": rnd((seq_len, hidden)),
        # trunc_normal(std=0.02) approximated with normal*0.02 (synthetic init)
        "bottleneck": rnd((1, hidden)),
        "output_proj_w": rnd((hidden, d)),
        "output_proj_b": rnd((1, d)),
    }

    def add_attn(prefix, n):
        for wn, bn in (("wq", "bq"), ("wk", "bk"), ("wv", "bv"), ("wo", "bo")):
            p[prefix + wn] = rnd((n, hidden, hidden))
            p[prefix + bn] = rnd((n, 1, hidden))

    # encoder
    add_attn("enc_", num_layers_e)
    for nm in ("ln1", "ln2"):
        p[f"enc_{nm}_g"] = jnp.ones((num_layers_e, 1, hidden), jnp.float32)
        p[f"enc_{nm}_b"] = jnp.zeros((num_layers_e, 1, hidden), jnp.float32)
    p["enc_ff1_w"] = rnd((num_layers_e, hidden, ff))
    p["enc_ff1_b"] = rnd((num_layers_e, 1, ff))
    p["enc_ff2_w"] = rnd((num_layers_e, ff, hidden))
    p["enc_ff2_b"] = rnd((num_layers_e, 1, hidden))

    # decoder
    add_attn("dec_s", num_layers_d)
    add_attn("dec_c", num_layers_d)
    for nm in ("ln1", "ln2", "ln3"):
        p[f"dec_{nm}_g"] = jnp.ones((num_layers_d, 1, hidden), jnp.float32)
        p[f"dec_{nm}_b"] = jnp.zeros((num_layers_d, 1, hidden), jnp.float32)
    p["dec_ff1_w"] = rnd((num_layers_d, hidden, ff))
    p["dec_ff1_b"] = rnd((num_layers_d, 1, ff))
    p["dec_ff2_w"] = rnd((num_layers_d, ff, hidden))
    p["dec_ff2_b"] = rnd((num_layers_d, 1, hidden))
    return p


# ----------------------------------------------------------------------------
if __name__ == "__main__":
    # Small, module-consistent config.
    B, L, D = 2, 8, 4
    H = 32
    NUM_HEADS_E = 4
    NUM_HEADS_D = 4
    NUM_LAYERS_E = 2
    NUM_LAYERS_D = 2
    FF = 2048          # nn.TransformerEncoder/DecoderLayer default dim_feedforward
    LN_EPS = 1e-5
    # p_dropout ignored (eval / inference); retrieval=None; gradient clipping
    # only installs backward hooks.

    root = jax.random.PRNGKey(0)
    k_params, k_x = jax.random.split(root)
    params = init_params(k_params, D, L, H, FF, NUM_LAYERS_E, NUM_LAYERS_D)
    x = jax.random.normal(k_x, (B, L, D), jnp.float32)

    fwd = jax.jit(functools.partial(
        forward, num_heads_e=NUM_HEADS_E, num_heads_d=NUM_HEADS_D, eps=LN_EPS))
    out = jax.block_until_ready(fwd(params, x))

    assert out.shape == (B, L, D), out.shape
    assert bool(jnp.all(jnp.isfinite(out)))
    print("KERNEL_OK")
</pallas_src>

<mosaic_0001>
module attributes {stable_mosaic.version = 11 : i64} {
  func.func @_fused_forward_kernel(%arg0: i32, %arg1: memref<1x8x4xf32, #tpu.memory_space<vmem>>, %arg2: memref<4x32xf32, #tpu.memory_space<vmem>>, %arg3: memref<1x32xf32, #tpu.memory_space<vmem>>, %arg4: memref<8x32xf32, #tpu.memory_space<vmem>>, %arg5: memref<1x32xf32, #tpu.memory_space<vmem>>, %arg6: memref<32x4xf32, #tpu.memory_space<vmem>>, %arg7: memref<1x4xf32, #tpu.memory_space<vmem>>, %arg8: memref<2x32x32xf32, #tpu.memory_space<vmem>>, %arg9: memref<2x1x32xf32, #tpu.memory_space<vmem>>, %arg10: memref<2x32x32xf32, #tpu.memory_space<vmem>>, %arg11: memref<2x1x32xf32, #tpu.memory_space<vmem>>, %arg12: memref<2x32x32xf32, #tpu.memory_space<vmem>>, %arg13: memref<2x1x32xf32, #tpu.memory_space<vmem>>, %arg14: memref<2x32x32xf32, #tpu.memory_space<vmem>>, %arg15: memref<2x1x32xf32, #tpu.memory_space<vmem>>, %arg16: memref<2x1x32xf32, #tpu.memory_space<vmem>>, %arg17: memref<2x1x32xf32, #tpu.memory_space<vmem>>, %arg18: memref<2x1x32xf32, #tpu.memory_space<vmem>>, %arg19: memref<2x1x32xf32, #tpu.memory_space<vmem>>, %arg20: memref<2x32x2048xf32, #tpu.memory_space<vmem>>, %arg21: memref<2x1x2048xf32, #tpu.memory_space<vmem>>, %arg22: memref<2x2048x32xf32, #tpu.memory_space<vmem>>, %arg23: memref<2x1x32xf32, #tpu.memory_space<vmem>>, %arg24: memref<2x32x32xf32, #tpu.memory_space<vmem>>, %arg25: memref<2x1x32xf32, #tpu.memory_space<vmem>>, %arg26: memref<2x32x32xf32, #tpu.memory_space<vmem>>, %arg27: memref<2x1x32xf32, #tpu.memory_space<vmem>>, %arg28: memref<2x32x32xf32, #tpu.memory_space<vmem>>, %arg29: memref<2x1x32xf32, #tpu.memory_space<vmem>>, %arg30: memref<2x32x32xf32, #tpu.memory_space<vmem>>, %arg31: memref<2x1x32xf32, #tpu.memory_space<vmem>>, %arg32: memref<2x32x32xf32, #tpu.memory_space<vmem>>, %arg33: memref<2x1x32xf32, #tpu.memory_space<vmem>>, %arg34: memref<2x32x32xf32, #tpu.memory_space<vmem>>, %arg35: memref<2x1x32xf32, #tpu.memory_space<vmem>>, %arg36: memref<2x32x32xf32, #tpu.memory_space<vmem>>, %arg37: memref<2x1x32xf32, #tpu.memory_space<vmem>>, %arg38: memref<2x32x32xf32, #tpu.memory_space<vmem>>, %arg39: memref<2x1x32xf32, #tpu.memory_space<vmem>>, %arg40: memref<2x1x32xf32, #tpu.memory_space<vmem>>, %arg41: memref<2x1x32xf32, #tpu.memory_space<vmem>>, %arg42: memref<2x1x32xf32, #tpu.memory_space<vmem>>, %arg43: memref<2x1x32xf32, #tpu.memory_space<vmem>>, %arg44: memref<2x1x32xf32, #tpu.memory_space<vmem>>, %arg45: memref<2x1x32xf32, #tpu.memory_space<vmem>>, %arg46: memref<2x32x2048xf32, #tpu.memory_space<vmem>>, %arg47: memref<2x1x2048xf32, #tpu.memory_space<vmem>>, %arg48: memref<2x2048x32xf32, #tpu.memory_space<vmem>>, %arg49: memref<2x1x32xf32, #tpu.memory_space<vmem>>, %arg50: memref<1x8x4xf32, #tpu.memory_space<vmem>>) attributes {dimension_semantics = [#tpu.dimension_semantics<parallel>], iteration_bounds = array<i64: 2>, scalar_prefetch = 0 : i64, scratch_operands = 0 : i64, tpu.core_type = #tpu.core_type<tc>, window_params = [{transform_indices = @transform_0, window_bounds = array<i64: 1, 8, 4>}, {pipeline_mode = #tpu.pipeline_mode<synchronous>, transform_indices = @transform_1, window_bounds = array<i64: 4, 32>}, {pipeline_mode = #tpu.pipeline_mode<synchronous>, transform_indices = @transform_2, window_bounds = array<i64: 1, 32>}, {pipeline_mode = #tpu.pipeline_mode<synchronous>, transform_indices = @transform_3, window_bounds = array<i64: 8, 32>}, {pipeline_mode = #tpu.pipeline_mode<synchronous>, transform_indices = @transform_4, window_bounds = array<i64: 1, 32>}, {pipeline_mode = #tpu.pipeline_mode<synchronous>, transform_indices = @transform_5, window_bounds = array<i64: 32, 4>}, {pipeline_mode = #tpu.pipeline_mode<synchronous>, transform_indices = @transform_6, window_bounds = array<i64: 1, 4>}, {pipeline_mode = #tpu.pipeline_mode<synchronous>, transform_indices = @transform_7, window_bounds = array<i64: 2, 32, 32>}, {pipeline_mode = #tpu.pipeline_mode<synchronous>, transform_indices = @transform_8, window_bounds = array<i64: 2, 1, 32>}, {pipeline_mode = #tpu.pipeline_mode<synchronous>, transform_indices = @transform_9, window_bounds = array<i64: 2, 32, 32>}, {pipeline_mode = #tpu.pipeline_mode<synchronous>, transform_indices = @transform_10, window_bounds = array<i64: 2, 1, 32>}, {pipeline_mode = #tpu.pipeline_mode<synchronous>, transform_indices = @transform_11, window_bounds = array<i64: 2, 32, 32>}, {pipeline_mode = #tpu.pipeline_mode<synchronous>, transform_indices = @transform_12, window_bounds = array<i64: 2, 1, 32>}, {pipeline_mode = #tpu.pipeline_mode<synchronous>, transform_indices = @transform_13, window_bounds = array<i64: 2, 32, 32>}, {pipeline_mode = #tpu.pipeline_mode<synchronous>, transform_indices = @transform_14, window_bounds = array<i64: 2, 1, 32>}, {pipeline_mode = #tpu.pipeline_mode<synchronous>, transform_indices = @transform_15, window_bounds = array<i64: 2, 1, 32>}, {pipeline_mode = #tpu.pipeline_mode<synchronous>, transform_indices = @transform_16, window_bounds = array<i64: 2, 1, 32>}, {pipeline_mode = #tpu.pipeline_mode<synchronous>, transform_indices = @transform_17, window_bounds = array<i64: 2, 1, 32>}, {pipeline_mode = #tpu.pipeline_mode<synchronous>, transform_indices = @transform_18, window_bounds = array<i64: 2, 1, 32>}, {pipeline_mode = #tpu.pipeline_mode<synchronous>, transform_indices = @transform_19, window_bounds = array<i64: 2, 32, 2048>}, {pipeline_mode = #tpu.pipeline_mode<synchronous>, transform_indices = @transform_20, window_bounds = array<i64: 2, 1, 2048>}, {pipeline_mode = #tpu.pipeline_mode<synchronous>, transform_indices = @transform_21, window_bounds = array<i64: 2, 2048, 32>}, {pipeline_mode = #tpu.pipeline_mode<synchronous>, transform_indices = @transform_22, window_bounds = array<i64: 2, 1, 32>}, {pipeline_mode = #tpu.pipeline_mode<synchronous>, transform_indices = @transform_23, window_bounds = array<i64: 2, 32, 32>}, {pipeline_mode = #tpu.pipeline_mode<synchronous>, transform_indices = @transform_24, window_bounds = array<i64: 2, 1, 32>}, {pipeline_mode = #tpu.pipeline_mode<synchronous>, transform_indices = @transform_25, window_bounds = array<i64: 2, 32, 32>}, {pipeline_mode = #tpu.pipeline_mode<synchronous>, transform_indices = @transform_26, window_bounds = array<i64: 2, 1, 32>}, {pipeline_mode = #tpu.pipeline_mode<synchronous>, transform_indices = @transform_27, window_bounds = array<i64: 2, 32, 32>}, {pipeline_mode = #tpu.pipeline_mode<synchronous>, transform_indices = @transform_28, window_bounds = array<i64: 2, 1, 32>}, {pipeline_mode = #tpu.pipeline_mode<synchronous>, transform_indices = @transform_29, window_bounds = array<i64: 2, 32, 32>}, {pipeline_mode = #tpu.pipeline_mode<synchronous>, transform_indices = @transform_30, window_bounds = array<i64: 2, 1, 32>}, {pipeline_mode = #tpu.pipeline_mode<synchronous>, transform_indices = @transform_31, window_bounds = array<i64: 2, 32, 32>}, {pipeline_mode = #tpu.pipeline_mode<synchronous>, transform_indices = @transform_32, window_bounds = array<i64: 2, 1, 32>}, {pipeline_mode = #tpu.pipeline_mode<synchronous>, transform_indices = @transform_33, window_bounds = array<i64: 2, 32, 32>}, {pipeline_mode = #tpu.pipeline_mode<synchronous>, transform_indices = @transform_34, window_bounds = array<i64: 2, 1, 32>}, {pipeline_mode = #tpu.pipeline_mode<synchronous>, transform_indices = @transform_35, window_bounds = array<i64: 2, 32, 32>}, {pipeline_mode = #tpu.pipeline_mode<synchronous>, transform_indices = @transform_36, window_bounds = array<i64: 2, 1, 32>}, {pipeline_mode = #tpu.pipeline_mode<synchronous>, transform_indices = @transform_37, window_bounds = array<i64: 2, 32, 32>}, {pipeline_mode = #tpu.pipeline_mode<synchronous>, transform_indices = @transform_38, window_bounds = array<i64: 2, 1, 32>}, {pipeline_mode = #tpu.pipeline_mode<synchronous>, transform_indices = @transform_39, window_bounds = array<i64: 2, 1, 32>}, {pipeline_mode = #tpu.pipeline_mode<synchronous>, transform_indices = @transform_40, window_bounds = array<i64: 2, 1, 32>}, {pipeline_mode = #tpu.pipeline_mode<synchronous>, transform_indices = @transform_41, window_bounds = array<i64: 2, 1, 32>}, {pipeline_mode = #tpu.pipeline_mode<synchronous>, transform_indices = @transform_42, window_bounds = array<i64: 2, 1, 32>}, {pipeline_mode = #tpu.pipeline_mode<synchronous>, transform_indices = @transform_43, window_bounds = array<i64: 2, 1, 32>}, {pipeline_mode = #tpu.pipeline_mode<synchronous>, transform_indices = @transform_44, window_bounds = array<i64: 2, 1, 32>}, {pipeline_mode = #tpu.pipeline_mode<synchronous>, transform_indices = @transform_45, window_bounds = array<i64: 2, 32, 2048>}, {pipeline_mode = #tpu.pipeline_mode<synchronous>, transform_indices = @transform_46, window_bounds = array<i64: 2, 1, 2048>}, {pipeline_mode = #tpu.pipeline_mode<synchronous>, transform_indices = @transform_47, window_bounds = array<i64: 2, 2048, 32>}, {pipeline_mode = #tpu.pipeline_mode<synchronous>, transform_indices = @transform_48, window_bounds = array<i64: 2, 1, 32>}, {transform_indices = @transform_49, window_bounds = array<i64: 1, 8, 4>}]} {
    %c0 = arith.constant 0 : index
    %c0_0 = arith.constant 0 : index
    %c0_1 = arith.constant 0 : index
    %0 = vector.load %arg1[%c0, %c0_0, %c0_1] : memref<1x8x4xf32, #tpu.memory_space<vmem>>, vector<1x8x4xf32>
    %1 = vector.shape_cast %0 : vector<1x8x4xf32> to vector<8x4xf32>
    %c0_2 = arith.constant 0 : index
    %c0_3 = arith.constant 0 : index
    %2 = vector.load %arg2[%c0_2, %c0_3] : memref<4x32xf32, #tpu.memory_space<vmem>>, vector<4x32xf32>
    %cst = arith.constant dense<0.000000e+00> : vector<8x32xf32>
    %3 = tpu.matmul %1, %2, %cst {dimension_numbers = #tpu.dot_dimension_numbers<[1], [0], [0], [1], [0, 0, 1, 1], [], []>} : vector<8x4xf32>, vector<4x32xf32>, vector<8x32xf32> -> vector<8x32xf32>
    %c0_4 = arith.constant 0 : index
    %c0_5 = arith.constant 0 : index
    %4 = vector.load %arg3[%c0_4, %c0_5] : memref<1x32xf32, #tpu.memory_space<vmem>>, vector<1x32xf32>
    %5 = vector.broadcast %4 : vector<1x32xf32> to vector<8x32xf32>
    %6 = arith.addf %3, %5 : vector<8x32xf32>
    %c0_6 = arith.constant 0 : index
    %c0_7 = arith.constant 0 : index
    %7 = vector.load %arg4[%c0_6, %c0_7] : memref<8x32xf32, #tpu.memory_space<vmem>>, vector<8x32xf32>
    %8 = arith.addf %6, %7 : vector<8x32xf32>
    %c0_8 = arith.constant 0 : index
    %c0_9 = arith.constant 0 : index
    %9 = vector.load %arg5[%c0_8, %c0_9] : memref<1x32xf32, #tpu.memory_space<vmem>>, vector<1x32xf32>
    %10 = tpu.concatenate %9, %8 in 0 : vector<1x32xf32>, vector<8x32xf32> -> vector<9x32xf32>
    %c0_10 = arith.constant 0 : index
    %c0_11 = arith.constant 0 : index
    %c0_12 = arith.constant 0 : index
    %11 = vector.load %arg8[%c0_10, %c0_11, %c0_12] : memref<2x32x32xf32, #tpu.memory_space<vmem>>, vector<1x32x32xf32>
    %12 = vector.shape_cast %11 : vector<1x32x32xf32> to vector<32x32xf32>
    %c0_13 = arith.constant 0 : index
    %c0_14 = arith.constant 0 : index
    %c0_15 = arith.constant 0 : index
    %13 = vector.load %arg9[%c0_13, %c0_14, %c0_15] : memref<2x1x32xf32, #tpu.memory_space<vmem>>, vector<1x1x32xf32>
    %14 = vector.shape_cast %13 : vector<1x1x32xf32> to vector<1x32xf32>
    %c0_16 = arith.constant 0 : index
    %c0_17 = arith.constant 0 : index
    %c0_18 = arith.constant 0 : index
    %15 = vector.load %arg10[%c0_16, %c0_17, %c0_18] : memref<2x32x32xf32, #tpu.memory_space<vmem>>, vector<1x32x32xf32>
    %16 = vector.shape_cast %15 : vector<1x32x32xf32> to vector<32x32xf32>
    %c0_19 = arith.constant 0 : index
    %c0_20 = arith.constant 0 : index
    %c0_21 = arith.constant 0 : index
    %17 = vector.load %arg11[%c0_19, %c0_20, %c0_21] : memref<2x1x32xf32, #tpu.memory_space<vmem>>, vector<1x1x32xf32>
    %18 = vector.shape_cast %17 : vector<1x1x32xf32> to vector<1x32xf32>
    %c0_22 = arith.constant 0 : index
    %c0_23 = arith.constant 0 : index
    %c0_24 = arith.constant 0 : index
    %19 = vector.load %arg12[%c0_22, %c0_23, %c0_24] : memref<2x32x32xf32, #tpu.memory_space<vmem>>, vector<1x32x32xf32>
    %20 = vector.shape_cast %19 : vector<1x32x32xf32> to vector<32x32xf32>
    %c0_25 = arith.constant 0 : index
    %c0_26 = arith.constant 0 : index
    %c0_27 = arith.constant 0 : index
    %21 = vector.load %arg13[%c0_25, %c0_26, %c0_27] : memref<2x1x32xf32, #tpu.memory_space<vmem>>, vector<1x1x32xf32>
    %22 = vector.shape_cast %21 : vector<1x1x32xf32> to vector<1x32xf32>
    %c0_28 = arith.constant 0 : index
    %c0_29 = arith.constant 0 : index
    %c0_30 = arith.constant 0 : index
    %23 = vector.load %arg14[%c0_28, %c0_29, %c0_30] : memref<2x32x32xf32, #tpu.memory_space<vmem>>, vector<1x32x32xf32>
    %24 = vector.shape_cast %23 : vector<1x32x32xf32> to vector<32x32xf32>
    %c0_31 = arith.constant 0 : index
    %c0_32 = arith.constant 0 : index
    %c0_33 = arith.constant 0 : index
    %25 = vector.load %arg15[%c0_31, %c0_32, %c0_33] : memref<2x1x32xf32, #tpu.memory_space<vmem>>, vector<1x1x32xf32>
    %26 = vector.shape_cast %25 : vector<1x1x32xf32> to vector<1x32xf32>
    %cst_34 = arith.constant dense<0.000000e+00> : vector<9x32xf32>
    %27 = tpu.matmul %10, %12, %cst_34 {dimension_numbers = #tpu.dot_dimension_numbers<[1], [0], [0], [1], [0, 0, 1, 1], [], []>} : vector<9x32xf32>, vector<32x32xf32>, vector<9x32xf32> -> vector<9x32xf32>
    %28 = vector.broadcast %14 : vector<1x32xf32> to vector<9x32xf32>
    %29 = arith.addf %27, %28 : vector<9x32xf32>
    %cst_35 = arith.constant 0.353553385 : f32
    %30 = vector.broadcast %cst_35 : f32 to vector<9x32xf32>
    %31 = arith.mulf %29, %30 : vector<9x32xf32>
    %cst_36 = arith.constant dense<0.000000e+00> : vector<9x32xf32>
    %32 = tpu.matmul %10, %16, %cst_36 {dimension_numbers = #tpu.dot_dimension_numbers<[1], [0], [0], [1], [0, 0, 1, 1], [], []>} : vector<9x32xf32>, vector<32x32xf32>, vector<9x32xf32> -> vector<9x32xf32>
    %33 = vector.broadcast %18 : vector<1x32xf32> to vector<9x32xf32>
    %34 = arith.addf %32, %33 : vector<9x32xf32>
    %cst_37 = arith.constant dense<0.000000e+00> : vector<9x32xf32>
    %35 = tpu.matmul %10, %20, %cst_37 {dimension_numbers = #tpu.dot_dimension_numbers<[1], [0], [0], [1], [0, 0, 1, 1], [], []>} : vector<9x32xf32>, vector<32x32xf32>, vector<9x32xf32> -> vector<9x32xf32>
    %36 = vector.broadcast %22 : vector<1x32xf32> to vector<9x32xf32>
    %37 = arith.addf %35, %36 : vector<9x32xf32>
    %cst_38 = arith.constant 0.000000e+00 : f32
    %38 = vector.broadcast %cst_38 : f32 to vector<9x32xf32>
    %39 = vector.extract_strided_slice %31 {offsets = [0, 0], sizes = [9, 8], strides = [1, 1]} : vector<9x32xf32> to vector<9x8xf32>
    %40 = vector.extract_strided_slice %34 {offsets = [0, 0], sizes = [9, 8], strides = [1, 1]} : vector<9x32xf32> to vector<9x8xf32>
    %41 = vector.extract_strided_slice %37 {offsets = [0, 0], sizes = [9, 8], strides = [1, 1]} : vector<9x32xf32> to vector<9x8xf32>
    %cst_39 = arith.constant dense<0.000000e+00> : vector<9x9xf32>
    %42 = tpu.matmul %39, %40, %cst_39 {dimension_numbers = #tpu.dot_dimension_numbers<[1], [1], [0], [0], [0, 0, 1, 0], [], []>} : vector<9x8xf32>, vector<9x8xf32>, vector<9x9xf32> -> vector<9x9xf32>
    %cst_40 = arith.constant dense<0xFF800000> : vector<9xf32>
    %43 = vector.multi_reduction <maximumf>, %42, %cst_40 [1] : vector<9x9xf32> to vector<9xf32>
    %44 = vector.shape_cast %43 : vector<9xf32> to vector<9x1xf32>
    %45 = vector.broadcast %44 : vector<9x1xf32> to vector<9x9xf32>
    %46 = arith.subf %42, %45 : vector<9x9xf32>
    %47 = math.exp %46 : vector<9x9xf32>
    %cst_41 = arith.constant dense<0.000000e+00> : vector<9xf32>
    %48 = vector.multi_reduction <add>, %47, %cst_41 [1] : vector<9x9xf32> to vector<9xf32>
    %49 = vector.shape_cast %48 : vector<9xf32> to vector<9x1xf32>
    %50 = tpu.reciprocal %49 {approx = true} : vector<9x1xf32> -> vector<9x1xf32>
    %51 = vector.broadcast %50 : vector<9x1xf32> to vector<9x9xf32>
    %52 = arith.mulf %47, %51 : vector<9x9xf32>
    %cst_42 = arith.constant dense<0.000000e+00> : vector<9x8xf32>
    %53 = tpu.matmul %52, %41, %cst_42 {dimension_numbers = #tpu.dot_dimension_numbers<[1], [0], [0], [1], [0, 0, 1, 1], [], []>} : vector<9x9xf32>, vector<9x8xf32>, vector<9x8xf32> -> vector<9x8xf32>
    %54 = vector.extract_strided_slice %24 {offsets = [0, 0], sizes = [8, 32], strides = [1, 1]} : vector<32x32xf32> to vector<8x32xf32>
    %cst_43 = arith.constant dense<0.000000e+00> : vector<9x32xf32>
    %55 = tpu.matmul %53, %54, %cst_43 {dimension_numbers = #tpu.dot_dimension_numbers<[1], [0], [0], [1], [0, 0, 1, 1], [], []>} : vector<9x8xf32>, vector<8x32xf32>, vector<9x32xf32> -> vector<9x32xf32>
    %56 = arith.addf %38, %55 : vector<9x32xf32>
    %57 = vector.extract_strided_slice %31 {offsets = [0, 8], sizes = [9, 8], strides = [1, 1]} : vector<9x32xf32> to vector<9x8xf32>
    %58 = vector.extract_strided_slice %34 {offsets = [0, 8], sizes = [9, 8], strides = [1, 1]} : vector<9x32xf32> to vector<9x8xf32>
    %59 = vector.extract_strided_slice %37 {offsets = [0, 8], sizes = [9, 8], strides = [1, 1]} : vector<9x32xf32> to vector<9x8xf32>
    %cst_44 = arith.constant dense<0.000000e+00> : vector<9x9xf32>
    %60 = tpu.matmul %57, %58, %cst_44 {dimension_numbers = #tpu.dot_dimension_numbers<[1], [1], [0], [0], [0, 0, 1, 0], [], []>} : vector<9x8xf32>, vector<9x8xf32>, vector<9x9xf32> -> vector<9x9xf32>
    %cst_45 = arith.constant dense<0xFF800000> : vector<9xf32>
    %61 = vector.multi_reduction <maximumf>, %60, %cst_45 [1] : vector<9x9xf32> to vector<9xf32>
    %62 = vector.shape_cast %61 : vector<9xf32> to vector<9x1xf32>
    %63 = vector.broadcast %62 : vector<9x1xf32> to vector<9x9xf32>
    %64 = arith.subf %60, %63 : vector<9x9xf32>
    %65 = math.exp %64 : vector<9x9xf32>
    %cst_46 = arith.constant dense<0.000000e+00> : vector<9xf32>
    %66 = vector.multi_reduction <add>, %65, %cst_46 [1] : vector<9x9xf32> to vector<9xf32>
    %67 = vector.shape_cast %66 : vector<9xf32> to vector<9x1xf32>
    %68 = tpu.reciprocal %67 {approx = true} : vector<9x1xf32> -> vector<9x1xf32>
    %69 = vector.broadcast %68 : vector<9x1xf32> to vector<9x9xf32>
    %70 = arith.mulf %65, %69 : vector<9x9xf32>
    %cst_47 = arith.constant dense<0.000000e+00> : vector<9x8xf32>
    %71 = tpu.matmul %70, %59, %cst_47 {dimension_numbers = #tpu.dot_dimension_numbers<[1], [0], [0], [1], [0, 0, 1, 1], [], []>} : vector<9x9xf32>, vector<9x8xf32>, vector<9x8xf32> -> vector<9x8xf32>
    %72 = vector.extract_strided_slice %24 {offsets = [8, 0], sizes = [8, 32], strides = [1, 1]} : vector<32x32xf32> to vector<8x32xf32>
    %cst_48 = arith.constant dense<0.000000e+00> : vector<9x32xf32>
    %73 = tpu.matmul %71, %72, %cst_48 {dimension_numbers = #tpu.dot_dimension_numbers<[1], [0], [0], [1], [0, 0, 1, 1], [], []>} : vector<9x8xf32>, vector<8x32xf32>, vector<9x32xf32> -> vector<9x32xf32>
    %74 = arith.addf %56, %73 : vector<9x32xf32>
    %75 = vector.extract_strided_slice %31 {offsets = [0, 16], sizes = [9, 8], strides = [1, 1]} : vector<9x32xf32> to vector<9x8xf32>
    %76 = vector.extract_strided_slice %34 {offsets = [0, 16], sizes = [9, 8], strides = [1, 1]} : vector<9x32xf32> to vector<9x8xf32>
    %77 = vector.extract_strided_slice %37 {offsets = [0, 16], sizes = [9, 8], strides = [1, 1]} : vector<9x32xf32> to vector<9x8xf32>
    %cst_49 = arith.constant dense<0.000000e+00> : vector<9x9xf32>
    %78 = tpu.matmul %75, %76, %cst_49 {dimension_numbers = #tpu.dot_dimension_numbers<[1], [1], [0], [0], [0, 0, 1, 0], [], []>} : vector<9x8xf32>, vector<9x8xf32>, vector<9x9xf32> -> vector<9x9xf32>
    %cst_50 = arith.constant dense<0xFF800000> : vector<9xf32>
    %79 = vector.multi_reduction <maximumf>, %78, %cst_50 [1] : vector<9x9xf32> to vector<9xf32>
    %80 = vector.shape_cast %79 : vector<9xf32> to vector<9x1xf32>
    %81 = vector.broadcast %80 : vector<9x1xf32> to vector<9x9xf32>
    %82 = arith.subf %78, %81 : vector<9x9xf32>
    %83 = math.exp %82 : vector<9x9xf32>
    %cst_51 = arith.constant dense<0.000000e+00> : vector<9xf32>
    %84 = vector.multi_reduction <add>, %83, %cst_51 [1] : vector<9x9xf32> to vector<9xf32>
    %85 = vector.shape_cast %84 : vector<9xf32> to vector<9x1xf32>
    %86 = tpu.reciprocal %85 {approx = true} : vector<9x1xf32> -> vector<9x1xf32>
    %87 = vector.broadcast %86 : vector<9x1xf32> to vector<9x9xf32>
    %88 = arith.mulf %83, %87 : vector<9x9xf32>
    %cst_52 = arith.constant dense<0.000000e+00> : vector<9x8xf32>
    %89 = tpu.matmul %88, %77, %cst_52 {dimension_numbers = #tpu.dot_dimension_numbers<[1], [0], [0], [1], [0, 0, 1, 1], [], []>} : vector<9x9xf32>, vector<9x8xf32>, vector<9x8xf32> -> vector<9x8xf32>
    %90 = vector.extract_strided_slice %24 {offsets = [16, 0], sizes = [8, 32], strides = [1, 1]} : vector<32x32xf32> to vector<8x32xf32>
    %cst_53 = arith.constant dense<0.000000e+00> : vector<9x32xf32>
    %91 = tpu.matmul %89, %90, %cst_53 {dimension_numbers = #tpu.dot_dimension_numbers<[1], [0], [0], [1], [0, 0, 1, 1], [], []>} : vector<9x8xf32>, vector<8x32xf32>, vector<9x32xf32> -> vector<9x32xf32>
    %92 = arith.addf %74, %91 : vector<9x32xf32>
    %93 = vector.extract_strided_slice %31 {offsets = [0, 24], sizes = [9, 8], strides = [1, 1]} : vector<9x32xf32> to vector<9x8xf32>
    %94 = vector.extract_strided_slice %34 {offsets = [0, 24], sizes = [9, 8], strides = [1, 1]} : vector<9x32xf32> to vector<9x8xf32>
    %95 = vector.extract_strided_slice %37 {offsets = [0, 24], sizes = [9, 8], strides = [1, 1]} : vector<9x32xf32> to vector<9x8xf32>
    %cst_54 = arith.constant dense<0.000000e+00> : vector<9x9xf32>
    %96 = tpu.matmul %93, %94, %cst_54 {dimension_numbers = #tpu.dot_dimension_numbers<[1], [1], [0], [0], [0, 0, 1, 0], [], []>} : vector<9x8xf32>, vector<9x8xf32>, vector<9x9xf32> -> vector<9x9xf32>
    %cst_55 = arith.constant dense<0xFF800000> : vector<9xf32>
    %97 = vector.multi_reduction <maximumf>, %96, %cst_55 [1] : vector<9x9xf32> to vector<9xf32>
    %98 = vector.shape_cast %97 : vector<9xf32> to vector<9x1xf32>
    %99 = vector.broadcast %98 : vector<9x1xf32> to vector<9x9xf32>
    %100 = arith.subf %96, %99 : vector<9x9xf32>
    %101 = math.exp %100 : vector<9x9xf32>
    %cst_56 = arith.constant dense<0.000000e+00> : vector<9xf32>
    %102 = vector.multi_reduction <add>, %101, %cst_56 [1] : vector<9x9xf32> to vector<9xf32>
    %103 = vector.shape_cast %102 : vector<9xf32> to vector<9x1xf32>
    %104 = tpu.reciprocal %103 {approx = true} : vector<9x1xf32> -> vector<9x1xf32>
    %105 = vector.broadcast %104 : vector<9x1xf32> to vector<9x9xf32>
    %106 = arith.mulf %101, %105 : vector<9x9xf32>
    %cst_57 = arith.constant dense<0.000000e+00> : vector<9x8xf32>
    %107 = tpu.matmul %106, %95, %cst_57 {dimension_numbers = #tpu.dot_dimension_numbers<[1], [0], [0], [1], [0, 0, 1, 1], [], []>} : vector<9x9xf32>, vector<9x8xf32>, vector<9x8xf32> -> vector<9x8xf32>
    %108 = vector.extract_strided_slice %24 {offsets = [24, 0], sizes = [8, 32], strides = [1, 1]} : vector<32x32xf32> to vector<8x32xf32>
    %cst_58 = arith.constant dense<0.000000e+00> : vector<9x32xf32>
    %109 = tpu.matmul %107, %108, %cst_58 {dimension_numbers = #tpu.dot_dimension_numbers<[1], [0], [0], [1], [0, 0, 1, 1], [], []>} : vector<9x8xf32>, vector<8x32xf32>, vector<9x32xf32> -> vector<9x32xf32>
    %110 = arith.addf %92, %109 : vector<9x32xf32>
    %111 = vector.broadcast %26 : vector<1x32xf32> to vector<9x32xf32>
    %112 = arith.addf %110, %111 : vector<9x32xf32>
    %113 = arith.addf %10, %112 : vector<9x32xf32>
    %c0_59 = arith.constant 0 : index
    %c0_60 = arith.constant 0 : index
    %c0_61 = arith.constant 0 : index
    %114 = vector.load %arg16[%c0_59, %c0_60, %c0_61] : memref<2x1x32xf32, #tpu.memory_space<vmem>>, vector<1x1x32xf32>
    %115 = vector.shape_cast %114 : vector<1x1x32xf32> to vector<1x32xf32>
    %c0_62 = arith.constant 0 : index
    %c0_63 = arith.constant 0 : index
    %c0_64 = arith.constant 0 : index
    %116 = vector.load %arg17[%c0_62, %c0_63, %c0_64] : memref<2x1x32xf32, #tpu.memory_space<vmem>>, vector<1x1x32xf32>
    %117 = vector.shape_cast %116 : vector<1x1x32xf32> to vector<1x32xf32>
    %cst_65 = arith.constant dense<0.000000e+00> : vector<9xf32>
    %118 = vector.multi_reduction <add>, %113, %cst_65 [1] : vector<9x32xf32> to vector<9xf32>
    %119 = vector.shape_cast %118 : vector<9xf32> to vector<9x1xf32>
    %cst_66 = arith.constant 3.200000e+01 : f32
    %120 = vector.broadcast %cst_66 : f32 to vector<9x1xf32>
    %121 = arith.divf %119, %120 : vector<9x1xf32>
    %122 = vector.broadcast %121 : vector<9x1xf32> to vector<9x32xf32>
    %123 = arith.subf %113, %122 : vector<9x32xf32>
    %124 = arith.mulf %123, %123 : vector<9x32xf32>
    %cst_67 = arith.constant dense<0.000000e+00> : vector<9xf32>
    %125 = vector.multi_reduction <add>, %124, %cst_67 [1] : vector<9x32xf32> to vector<9xf32>
    %126 = vector.shape_cast %125 : vector<9xf32> to vector<9x1xf32>
    %cst_68 = arith.constant 3.200000e+01 : f32
    %127 = vector.broadcast %cst_68 : f32 to vector<9x1xf32>
    %128 = arith.divf %126, %127 : vector<9x1xf32>
    %cst_69 = arith.constant 9.99999974E-6 : f32
    %129 = vector.broadcast %cst_69 : f32 to vector<9x1xf32>
    %130 = arith.addf %128, %129 : vector<9x1xf32>
    %131 = math.rsqrt %130 : vector<9x1xf32>
    %132 = vector.broadcast %131 : vector<9x1xf32> to vector<9x32xf32>
    %133 = arith.mulf %123, %132 : vector<9x32xf32>
    %134 = vector.broadcast %115 : vector<1x32xf32> to vector<9x32xf32>
    %135 = arith.mulf %133, %134 : vector<9x32xf32>
    %136 = vector.broadcast %117 : vector<1x32xf32> to vector<9x32xf32>
    %137 = arith.addf %135, %136 : vector<9x32xf32>
    %c0_70 = arith.constant 0 : index
    %c0_71 = arith.constant 0 : index
    %c0_72 = arith.constant 0 : index
    %138 = vector.load %arg20[%c0_70, %c0_71, %c0_72] : memref<2x32x2048xf32, #tpu.memory_space<vmem>>, vector<1x32x2048xf32>
    %139 = vector.shape_cast %138 : vector<1x32x2048xf32> to vector<32x2048xf32>
    %c0_73 = arith.constant 0 : index
    %c0_74 = arith.constant 0 : index
    %c0_75 = arith.constant 0 : index
    %140 = vector.load %arg21[%c0_73, %c0_74, %c0_75] : memref<2x1x2048xf32, #tpu.memory_space<vmem>>, vector<1x1x2048xf32>
    %141 = vector.shape_cast %140 : vector<1x1x2048xf32> to vector<1x2048xf32>
    %c0_76 = arith.constant 0 : index
    %c0_77 = arith.constant 0 : index
    %c0_78 = arith.constant 0 : index
    %142 = vector.load %arg22[%c0_76, %c0_77, %c0_78] : memref<2x2048x32xf32, #tpu.memory_space<vmem>>, vector<1x2048x32xf32>
    %143 = vector.shape_cast %142 : vector<1x2048x32xf32> to vector<2048x32xf32>
    %c0_79 = arith.constant 0 : index
    %c0_80 = arith.constant 0 : index
    %c0_81 = arith.constant 0 : index
    %144 = vector.load %arg23[%c0_79, %c0_80, %c0_81] : memref<2x1x32xf32, #tpu.memory_space<vmem>>, vector<1x1x32xf32>
    %145 = vector.shape_cast %144 : vector<1x1x32xf32> to vector<1x32xf32>
    %cst_82 = arith.constant dense<0.000000e+00> : vector<9x2048xf32>
    %146 = tpu.matmul %137, %139, %cst_82 {dimension_numbers = #tpu.dot_dimension_numbers<[1], [0], [0], [1], [0, 0, 1, 1], [], []>} : vector<9x32xf32>, vector<32x2048xf32>, vector<9x2048xf32> -> vector<9x2048xf32>
    %147 = vector.broadcast %141 : vector<1x2048xf32> to vector<9x2048xf32>
    %148 = arith.addf %146, %147 : vector<9x2048xf32>
    %cst_83 = arith.constant 0.000000e+00 : f32
    %149 = vector.broadcast %cst_83 : f32 to vector<9x2048xf32>
    %150 = arith.maximumf %148, %149 : vector<9x2048xf32>
    %cst_84 = arith.constant dense<0.000000e+00> : vector<9x32xf32>
    %151 = tpu.matmul %150, %143, %cst_84 {dimension_numbers = #tpu.dot_dimension_numbers<[1], [0], [0], [1], [0, 0, 1, 1], [], []>} : vector<9x2048xf32>, vector<2048x32xf32>, vector<9x32xf32> -> vector<9x32xf32>
    %152 = vector.broadcast %145 : vector<1x32xf32> to vector<9x32xf32>
    %153 = arith.addf %151, %152 : vector<9x32xf32>
    %154 = arith.addf %137, %153 : vector<9x32xf32>
    %c0_85 = arith.constant 0 : index
    %c0_86 = arith.constant 0 : index
    %c0_87 = arith.constant 0 : index
    %155 = vector.load %arg18[%c0_85, %c0_86, %c0_87] : memref<2x1x32xf32, #tpu.memory_space<vmem>>, vector<1x1x32xf32>
    %156 = vector.shape_cast %155 : vector<1x1x32xf32> to vector<1x32xf32>
    %c0_88 = arith.constant 0 : index
    %c0_89 = arith.constant 0 : index
    %c0_90 = arith.constant 0 : index
    %157 = vector.load %arg19[%c0_88, %c0_89, %c0_90] : memref<2x1x32xf32, #tpu.memory_space<vmem>>, vector<1x1x32xf32>
    %158 = vector.shape_cast %157 : vector<1x1x32xf32> to vector<1x32xf32>
    %cst_91 = arith.constant dense<0.000000e+00> : vector<9xf32>
    %159 = vector.multi_reduction <add>, %154, %cst_91 [1] : vector<9x32xf32> to vector<9xf32>
    %160 = vector.shape_cast %159 : vector<9xf32> to vector<9x1xf32>
    %cst_92 = arith.constant 3.200000e+01 : f32
    %161 = vector.broadcast %cst_92 : f32 to vector<9x1xf32>
    %162 = arith.divf %160, %161 : vector<9x1xf32>
    %163 = vector.broadcast %162 : vector<9x1xf32> to vector<9x32xf32>
    %164 = arith.subf %154, %163 : vector<9x32xf32>
    %165 = arith.mulf %164, %164 : vector<9x32xf32>
    %cst_93 = arith.constant dense<0.000000e+00> : vector<9xf32>
    %166 = vector.multi_reduction <add>, %165, %cst_93 [1] : vector<9x32xf32> to vector<9xf32>
    %167 = vector.shape_cast %166 : vector<9xf32> to vector<9x1xf32>
    %cst_94 = arith.constant 3.200000e+01 : f32
    %168 = vector.broadcast %cst_94 : f32 to vector<9x1xf32>
    %169 = arith.divf %167, %168 : vector<9x1xf32>
    %cst_95 = arith.constant 9.99999974E-6 : f32
    %170 = vector.broadcast %cst_95 : f32 to vector<9x1xf32>
    %171 = arith.addf %169, %170 : vector<9x1xf32>
    %172 = math.rsqrt %171 : vector<9x1xf32>
    %173 = vector.broadcast %172 : vector<9x1xf32> to vector<9x32xf32>
    %174 = arith.mulf %164, %173 : vector<9x32xf32>
    %175 = vector.broadcast %156 : vector<1x32xf32> to vector<9x32xf32>
    %176 = arith.mulf %174, %175 : vector<9x32xf32>
    %177 = vector.broadcast %158 : vector<1x32xf32> to vector<9x32xf32>
    %178 = arith.addf %176, %177 : vector<9x32xf32>
    %c1 = arith.constant 1 : index
    %c0_96 = arith.constant 0 : index
    %c0_97 = arith.constant 0 : index
    %179 = vector.load %arg8[%c1, %c0_96, %c0_97] : memref<2x32x32xf32, #tpu.memory_space<vmem>>, vector<1x32x32xf32>
    %180 = vector.shape_cast %179 : vector<1x32x32xf32> to vector<32x32xf32>
    %c1_98 = arith.constant 1 : index
    %c0_99 = arith.constant 0 : index
    %c0_100 = arith.constant 0 : index
    %181 = vector.load %arg9[%c1_98, %c0_99, %c0_100] : memref<2x1x32xf32, #tpu.memory_space<vmem>>, vector<1x1x32xf32>
    %182 = vector.shape_cast %181 : vector<1x1x32xf32> to vector<1x32xf32>
    %c1_101 = arith.constant 1 : index
    %c0_102 = arith.constant 0 : index
    %c0_103 = arith.constant 0 : index
    %183 = vector.load %arg10[%c1_101, %c0_102, %c0_103] : memref<2x32x32xf32, #tpu.memory_space<vmem>>, vector<1x32x32xf32>
    %184 = vector.shape_cast %183 : vector<1x32x32xf32> to vector<32x32xf32>
    %c1_104 = arith.constant 1 : index
    %c0_105 = arith.constant 0 : index
    %c0_106 = arith.constant 0 : index
    %185 = vector.load %arg11[%c1_104, %c0_105, %c0_106] : memref<2x1x32xf32, #tpu.memory_space<vmem>>, vector<1x1x32xf32>
    %186 = vector.shape_cast %185 : vector<1x1x32xf32> to vector<1x32xf32>
    %c1_107 = arith.constant 1 : index
    %c0_108 = arith.constant 0 : index
    %c0_109 = arith.constant 0 : index
    %187 = vector.load %arg12[%c1_107, %c0_108, %c0_109] : memref<2x32x32xf32, #tpu.memory_space<vmem>>, vector<1x32x32xf32>
    %188 = vector.shape_cast %187 : vector<1x32x32xf32> to vector<32x32xf32>
    %c1_110 = arith.constant 1 : index
    %c0_111 = arith.constant 0 : index
    %c0_112 = arith.constant 0 : index
    %189 = vector.load %arg13[%c1_110, %c0_111, %c0_112] : memref<2x1x32xf32, #tpu.memory_space<vmem>>, vector<1x1x32xf32>
    %190 = vector.shape_cast %189 : vector<1x1x32xf32> to vector<1x32xf32>
    %c1_113 = arith.constant 1 : index
    %c0_114 = arith.constant 0 : index
    %c0_115 = arith.constant 0 : index
    %191 = vector.load %arg14[%c1_113, %c0_114, %c0_115] : memref<2x32x32xf32, #tpu.memory_space<vmem>>, vector<1x32x32xf32>
    %192 = vector.shape_cast %191 : vector<1x32x32xf32> to vector<32x32xf32>
    %c1_116 = arith.constant 1 : index
    %c0_117 = arith.constant 0 : index
    %c0_118 = arith.constant 0 : index
    %193 = vector.load %arg15[%c1_116, %c0_117, %c0_118] : memref<2x1x32xf32, #tpu.memory_space<vmem>>, vector<1x1x32xf32>
    %194 = vector.shape_cast %193 : vector<1x1x32xf32> to vector<1x32xf32>
    %cst_119 = arith.constant dense<0.000000e+00> : vector<9x32xf32>
    %195 = tpu.matmul %178, %180, %cst_119 {dimension_numbers = #tpu.dot_dimension_numbers<[1], [0], [0], [1], [0, 0, 1, 1], [], []>} : vector<9x32xf32>, vector<32x32xf32>, vector<9x32xf32> -> vector<9x32xf32>
    %196 = vector.broadcast %182 : vector<1x32xf32> to vector<9x32xf32>
    %197 = arith.addf %195, %196 : vector<9x32xf32>
    %cst_120 = arith.constant 0.353553385 : f32
    %198 = vector.broadcast %cst_120 : f32 to vector<9x32xf32>
    %199 = arith.mulf %197, %198 : vector<9x32xf32>
    %cst_121 = arith.constant dense<0.000000e+00> : vector<9x32xf32>
    %200 = tpu.matmul %178, %184, %cst_121 {dimension_numbers = #tpu.dot_dimension_numbers<[1], [0], [0], [1], [0, 0, 1, 1], [], []>} : vector<9x32xf32>, vector<32x32xf32>, vector<9x32xf32> -> vector<9x32xf32>
    %201 = vector.broadcast %186 : vector<1x32xf32> to vector<9x32xf32>
    %202 = arith.addf %200, %201 : vector<9x32xf32>
    %cst_122 = arith.constant dense<0.000000e+00> : vector<9x32xf32>
    %203 = tpu.matmul %178, %188, %cst_122 {dimension_numbers = #tpu.dot_dimension_numbers<[1], [0], [0], [1], [0, 0, 1, 1], [], []>} : vector<9x32xf32>, vector<32x32xf32>, vector<9x32xf32> -> vector<9x32xf32>
    %204 = vector.broadcast %190 : vector<1x32xf32> to vector<9x32xf32>
    %205 = arith.addf %203, %204 : vector<9x32xf32>
    %cst_123 = arith.constant 0.000000e+00 : f32
    %206 = vector.broadcast %cst_123 : f32 to vector<9x32xf32>
    %207 = vector.extract_strided_slice %199 {offsets = [0, 0], sizes = [9, 8], strides = [1, 1]} : vector<9x32xf32> to vector<9x8xf32>
    %208 = vector.extract_strided_slice %202 {offsets = [0, 0], sizes = [9, 8], strides = [1, 1]} : vector<9x32xf32> to vector<9x8xf32>
    %209 = vector.extract_strided_slice %205 {offsets = [0, 0], sizes = [9, 8], strides = [1, 1]} : vector<9x32xf32> to vector<9x8xf32>
    %cst_124 = arith.constant dense<0.000000e+00> : vector<9x9xf32>
    %210 = tpu.matmul %207, %208, %cst_124 {dimension_numbers = #tpu.dot_dimension_numbers<[1], [1], [0], [0], [0, 0, 1, 0], [], []>} : vector<9x8xf32>, vector<9x8xf32>, vector<9x9xf32> -> vector<9x9xf32>
    %cst_125 = arith.constant dense<0xFF800000> : vector<9xf32>
    %211 = vector.multi_reduction <maximumf>, %210, %cst_125 [1] : vector<9x9xf32> to vector<9xf32>
    %212 = vector.shape_cast %211 : vector<9xf32> to vector<9x1xf32>
    %213 = vector.broadcast %212 : vector<9x1xf32> to vector<9x9xf32>
    %214 = arith.subf %210, %213 : vector<9x9xf32>
    %215 = math.exp %214 : vector<9x9xf32>
    %cst_126 = arith.constant dense<0.000000e+00> : vector<9xf32>
    %216 = vector.multi_reduction <add>, %215, %cst_126 [1] : vector<9x9xf32> to vector<9xf32>
    %217 = vector.shape_cast %216 : vector<9xf32> to vector<9x1xf32>
    %218 = tpu.reciprocal %217 {approx = true} : vector<9x1xf32> -> vector<9x1xf32>
    %219 = vector.broadcast %218 : vector<9x1xf32> to vector<9x9xf32>
    %220 = arith.mulf %215, %219 : vector<9x9xf32>
    %cst_127 = arith.constant dense<0.000000e+00> : vector<9x8xf32>
    %221 = tpu.matmul %220, %209, %cst_127 {dimension_numbers = #tpu.dot_dimension_numbers<[1], [0], [0], [1], [0, 0, 1, 1], [], []>} : vector<9x9xf32>, vector<9x8xf32>, vector<9x8xf32> -> vector<9x8xf32>
    %222 = vector.extract_strided_slice %192 {offsets = [0, 0], sizes = [8, 32], strides = [1, 1]} : vector<32x32xf32> to vector<8x32xf32>
    %cst_128 = arith.constant dense<0.000000e+00> : vector<9x32xf32>
    %223 = tpu.matmul %221, %222, %cst_128 {dimension_numbers = #tpu.dot_dimension_numbers<[1], [0], [0], [1], [0, 0, 1, 1], [], []>} : vector<9x8xf32>, vector<8x32xf32>, vector<9x32xf32> -> vector<9x32xf32>
    %224 = arith.addf %206, %223 : vector<9x32xf32>
    %225 = vector.extract_strided_slice %199 {offsets = [0, 8], sizes = [9, 8], strides = [1, 1]} : vector<9x32xf32> to vector<9x8xf32>
    %226 = vector.extract_strided_slice %202 {offsets = [0, 8], sizes = [9, 8], strides = [1, 1]} : vector<9x32xf32> to vector<9x8xf32>
    %227 = vector.extract_strided_slice %205 {offsets = [0, 8], sizes = [9, 8], strides = [1, 1]} : vector<9x32xf32> to vector<9x8xf32>
    %cst_129 = arith.constant dense<0.000000e+00> : vector<9x9xf32>
    %228 = tpu.matmul %225, %226, %cst_129 {dimension_numbers = #tpu.dot_dimension_numbers<[1], [1], [0], [0], [0, 0, 1, 0], [], []>} : vector<9x8xf32>, vector<9x8xf32>, vector<9x9xf32> -> vector<9x9xf32>
    %cst_130 = arith.constant dense<0xFF800000> : vector<9xf32>
    %229 = vector.multi_reduction <maximumf>, %228, %cst_130 [1] : vector<9x9xf32> to vector<9xf32>
    %230 = vector.shape_cast %229 : vector<9xf32> to vector<9x1xf32>
    %231 = vector.broadcast %230 : vector<9x1xf32> to vector<9x9xf32>
    %232 = arith.subf %228, %231 : vector<9x9xf32>
    %233 = math.exp %232 : vector<9x9xf32>
    %cst_131 = arith.constant dense<0.000000e+00> : vector<9xf32>
    %234 = vector.multi_reduction <add>, %233, %cst_131 [1] : vector<9x9xf32> to vector<9xf32>
    %235 = vector.shape_cast %234 : vector<9xf32> to vector<9x1xf32>
    %236 = tpu.reciprocal %235 {approx = true} : vector<9x1xf32> -> vector<9x1xf32>
    %237 = vector.broadcast %236 : vector<9x1xf32> to vector<9x9xf32>
    %238 = arith.mulf %233, %237 : vector<9x9xf32>
    %cst_132 = arith.constant dense<0.000000e+00> : vector<9x8xf32>
    %239 = tpu.matmul %238, %227, %cst_132 {dimension_numbers = #tpu.dot_dimension_numbers<[1], [0], [0], [1], [0, 0, 1, 1], [], []>} : vector<9x9xf32>, vector<9x8xf32>, vector<9x8xf32> -> vector<9x8xf32>
    %240 = vector.extract_strided_slice %192 {offsets = [8, 0], sizes = [8, 32], strides = [1, 1]} : vector<32x32xf32> to vector<8x32xf32>
    %cst_133 = arith.constant dense<0.000000e+00> : vector<9x32xf32>
    %241 = tpu.matmul %239, %240, %cst_133 {dimension_numbers = #tpu.dot_dimension_numbers<[1], [0], [0], [1], [0, 0, 1, 1], [], []>} : vector<9x8xf32>, vector<8x32xf32>, vector<9x32xf32> -> vector<9x32xf32>
    %242 = arith.addf %224, %241 : vector<9x32xf32>
    %243 = vector.extract_strided_slice %199 {offsets = [0, 16], sizes = [9, 8], strides = [1, 1]} : vector<9x32xf32> to vector<9x8xf32>
    %244 = vector.extract_strided_slice %202 {offsets = [0, 16], sizes = [9, 8], strides = [1, 1]} : vector<9x32xf32> to vector<9x8xf32>
    %245 = vector.extract_strided_slice %205 {offsets = [0, 16], sizes = [9, 8], strides = [1, 1]} : vector<9x32xf32> to vector<9x8xf32>
    %cst_134 = arith.constant dense<0.000000e+00> : vector<9x9xf32>
    %246 = tpu.matmul %243, %244, %cst_134 {dimension_numbers = #tpu.dot_dimension_numbers<[1], [1], [0], [0], [0, 0, 1, 0], [], []>} : vector<9x8xf32>, vector<9x8xf32>, vector<9x9xf32> -> vector<9x9xf32>
    %cst_135 = arith.constant dense<0xFF800000> : vector<9xf32>
    %247 = vector.multi_reduction <maximumf>, %246, %cst_135 [1] : vector<9x9xf32> to vector<9xf32>
    %248 = vector.shape_cast %247 : vector<9xf32> to vector<9x1xf32>
    %249 = vector.broadcast %248 : vector<9x1xf32> to vector<9x9xf32>
    %250 = arith.subf %246, %249 : vector<9x9xf32>
    %251 = math.exp %250 : vector<9x9xf32>
    %cst_136 = arith.constant dense<0.000000e+00> : vector<9xf32>
    %252 = vector.multi_reduction <add>, %251, %cst_136 [1] : vector<9x9xf32> to vector<9xf32>
    %253 = vector.shape_cast %252 : vector<9xf32> to vector<9x1xf32>
    %254 = tpu.reciprocal %253 {approx = true} : vector<9x1xf32> -> vector<9x1xf32>
    %255 = vector.broadcast %254 : vector<9x1xf32> to vector<9x9xf32>
    %256 = arith.mulf %251, %255 : vector<9x9xf32>
    %cst_137 = arith.constant dense<0.000000e+00> : vector<9x8xf32>
    %257 = tpu.matmul %256, %245, %cst_137 {dimension_numbers = #tpu.dot_dimension_numbers<[1], [0], [0], [1], [0, 0, 1, 1], [], []>} : vector<9x9xf32>, vector<9x8xf32>, vector<9x8xf32> -> vector<9x8xf32>
    %258 = vector.extract_strided_slice %192 {offsets = [16, 0], sizes = [8, 32], strides = [1, 1]} : vector<32x32xf32> to vector<8x32xf32>
    %cst_138 = arith.constant dense<0.000000e+00> : vector<9x32xf32>
    %259 = tpu.matmul %257, %258, %cst_138 {dimension_numbers = #tpu.dot_dimension_numbers<[1], [0], [0], [1], [0, 0, 1, 1], [], []>} : vector<9x8xf32>, vector<8x32xf32>, vector<9x32xf32> -> vector<9x32xf32>
    %260 = arith.addf %242, %259 : vector<9x32xf32>
    %261 = vector.extract_strided_slice %199 {offsets = [0, 24], sizes = [9, 8], strides = [1, 1]} : vector<9x32xf32> to vector<9x8xf32>
    %262 = vector.extract_strided_slice %202 {offsets = [0, 24], sizes = [9, 8], strides = [1, 1]} : vector<9x32xf32> to vector<9x8xf32>
    %263 = vector.extract_strided_slice %205 {offsets = [0, 24], sizes = [9, 8], strides = [1, 1]} : vector<9x32xf32> to vector<9x8xf32>
    %cst_139 = arith.constant dense<0.000000e+00> : vector<9x9xf32>
    %264 = tpu.matmul %261, %262, %cst_139 {dimension_numbers = #tpu.dot_dimension_numbers<[1], [1], [0], [0], [0, 0, 1, 0], [], []>} : vector<9x8xf32>, vector<9x8xf32>, vector<9x9xf32> -> vector<9x9xf32>
    %cst_140 = arith.constant dense<0xFF800000> : vector<9xf32>
    %265 = vector.multi_reduction <maximumf>, %264, %cst_140 [1] : vector<9x9xf32> to vector<9xf32>
    %266 = vector.shape_cast %265 : vector<9xf32> to vector<9x1xf32>
    %267 = vector.broadcast %266 : vector<9x1xf32> to vector<9x9xf32>
    %268 = arith.subf %264, %267 : vector<9x9xf32>
    %269 = math.exp %268 : vector<9x9xf32>
    %cst_141 = arith.constant dense<0.000000e+00> : vector<9xf32>
    %270 = vector.multi_reduction <add>, %269, %cst_141 [1] : vector<9x9xf32> to vector<9xf32>
    %271 = vector.shape_cast %270 : vector<9xf32> to vector<9x1xf32>
    %272 = tpu.reciprocal %271 {approx = true} : vector<9x1xf32> -> vector<9x1xf32>
    %273 = vector.broadcast %272 : vector<9x1xf32> to vector<9x9xf32>
    %274 = arith.mulf %269, %273 : vector<9x9xf32>
    %cst_142 = arith.constant dense<0.000000e+00> : vector<9x8xf32>
    %275 = tpu.matmul %274, %263, %cst_142 {dimension_numbers = #tpu.dot_dimension_numbers<[1], [0], [0], [1], [0, 0, 1, 1], [], []>} : vector<9x9xf32>, vector<9x8xf32>, vector<9x8xf32> -> vector<9x8xf32>
    %276 = vector.extract_strided_slice %192 {offsets = [24, 0], sizes = [8, 32], strides = [1, 1]} : vector<32x32xf32> to vector<8x32xf32>
    %cst_143 = arith.constant dense<0.000000e+00> : vector<9x32xf32>
    %277 = tpu.matmul %275, %276, %cst_143 {dimension_numbers = #tpu.dot_dimension_numbers<[1], [0], [0], [1], [0, 0, 1, 1], [], []>} : vector<9x8xf32>, vector<8x32xf32>, vector<9x32xf32> -> vector<9x32xf32>
    %278 = arith.addf %260, %277 : vector<9x32xf32>
    %279 = vector.broadcast %194 : vector<1x32xf32> to vector<9x32xf32>
    %280 = arith.addf %278, %279 : vector<9x32xf32>
    %281 = arith.addf %178, %280 : vector<9x32xf32>
    %c1_144 = arith.constant 1 : index
    %c0_145 = arith.constant 0 : index
    %c0_146 = arith.constant 0 : index
    %282 = vector.load %arg16[%c1_144, %c0_145, %c0_146] : memref<2x1x32xf32, #tpu.memory_space<vmem>>, vector<1x1x32xf32>
    %283 = vector.shape_cast %282 : vector<1x1x32xf32> to vector<1x32xf32>
    %c1_147 = arith.constant 1 : index
    %c0_148 = arith.constant 0 : index
    %c0_149 = arith.constant 0 : index
    %284 = vector.load %arg17[%c1_147, %c0_148, %c0_149] : memref<2x1x32xf32, #tpu.memory_space<vmem>>, vector<1x1x32xf32>
    %285 = vector.shape_cast %284 : vector<1x1x32xf32> to vector<1x32xf32>
    %cst_150 = arith.constant dense<0.000000e+00> : vector<9xf32>
    %286 = vector.multi_reduction <add>, %281, %cst_150 [1] : vector<9x32xf32> to vector<9xf32>
    %287 = vector.shape_cast %286 : vector<9xf32> to vector<9x1xf32>
    %cst_151 = arith.constant 3.200000e+01 : f32
    %288 = vector.broadcast %cst_151 : f32 to vector<9x1xf32>
    %289 = arith.divf %287, %288 : vector<9x1xf32>
    %290 = vector.broadcast %289 : vector<9x1xf32> to vector<9x32xf32>
    %291 = arith.subf %281, %290 : vector<9x32xf32>
    %292 = arith.mulf %291, %291 : vector<9x32xf32>
    %cst_152 = arith.constant dense<0.000000e+00> : vector<9xf32>
    %293 = vector.multi_reduction <add>, %292, %cst_152 [1] : vector<9x32xf32> to vector<9xf32>
    %294 = vector.shape_cast %293 : vector<9xf32> to vector<9x1xf32>
    %cst_153 = arith.constant 3.200000e+01 : f32
    %295 = vector.broadcast %cst_153 : f32 to vector<9x1xf32>
    %296 = arith.divf %294, %295 : vector<9x1xf32>
    %cst_154 = arith.constant 9.99999974E-6 : f32
    %297 = vector.broadcast %cst_154 : f32 to vector<9x1xf32>
    %298 = arith.addf %296, %297 : vector<9x1xf32>
    %299 = math.rsqrt %298 : vector<9x1xf32>
    %300 = vector.broadcast %299 : vector<9x1xf32> to vector<9x32xf32>
    %301 = arith.mulf %291, %300 : vector<9x32xf32>
    %302 = vector.broadcast %283 : vector<1x32xf32> to vector<9x32xf32>
    %303 = arith.mulf %301, %302 : vector<9x32xf32>
    %304 = vector.broadcast %285 : vector<1x32xf32> to vector<9x32xf32>
    %305 = arith.addf %303, %304 : vector<9x32xf32>
    %c1_155 = arith.constant 1 : index
    %c0_156 = arith.constant 0 : index
    %c0_157 = arith.constant 0 : index
    %306 = vector.load %arg20[%c1_155, %c0_156, %c0_157] : memref<2x32x2048xf32, #tpu.memory_space<vmem>>, vector<1x32x2048xf32>
    %307 = vector.shape_cast %306 : vector<1x32x2048xf32> to vector<32x2048xf32>
    %c1_158 = arith.constant 1 : index
    %c0_159 = arith.constant 0 : index
    %c0_160 = arith.constant 0 : index
    %308 = vector.load %arg21[%c1_158, %c0_159, %c0_160] : memref<2x1x2048xf32, #tpu.memory_space<vmem>>, vector<1x1x2048xf32>
    %309 = vector.shape_cast %308 : vector<1x1x2048xf32> to vector<1x2048xf32>
    %c1_161 = arith.constant 1 : index
    %c0_162 = arith.constant 0 : index
    %c0_163 = arith.constant 0 : index
    %310 = vector.load %arg22[%c1_161, %c0_162, %c0_163] : memref<2x2048x32xf32, #tpu.memory_space<vmem>>, vector<1x2048x32xf32>
    %311 = vector.shape_cast %310 : vector<1x2048x32xf32> to vector<2048x32xf32>
    %c1_164 = arith.constant 1 : index
    %c0_165 = arith.constant 0 : index
    %c0_166 = arith.constant 0 : index
    %312 = vector.load %arg23[%c1_164, %c0_165, %c0_166] : memref<2x1x32xf32, #tpu.memory_space<vmem>>, vector<1x1x32xf32>
    %313 = vector.shape_cast %312 : vector<1x1x32xf32> to vector<1x32xf32>
    %cst_167 = arith.constant dense<0.000000e+00> : vector<9x2048xf32>
    %314 = tpu.matmul %305, %307, %cst_167 {dimension_numbers = #tpu.dot_dimension_numbers<[1], [0], [0], [1], [0, 0, 1, 1], [], []>} : vector<9x32xf32>, vector<32x2048xf32>, vector<9x2048xf32> -> vector<9x2048xf32>
    %315 = vector.broadcast %309 : vector<1x2048xf32> to vector<9x2048xf32>
    %316 = arith.addf %314, %315 : vector<9x2048xf32>
    %cst_168 = arith.constant 0.000000e+00 : f32
    %317 = vector.broadcast %cst_168 : f32 to vector<9x2048xf32>
    %318 = arith.maximumf %316, %317 : vector<9x2048xf32>
    %cst_169 = arith.constant dense<0.000000e+00> : vector<9x32xf32>
    %319 = tpu.matmul %318, %311, %cst_169 {dimension_numbers = #tpu.dot_dimension_numbers<[1], [0], [0], [1], [0, 0, 1, 1], [], []>} : vector<9x2048xf32>, vector<2048x32xf32>, vector<9x32xf32> -> vector<9x32xf32>
    %320 = vector.broadcast %313 : vector<1x32xf32> to vector<9x32xf32>
    %321 = arith.addf %319, %320 : vector<9x32xf32>
    %322 = arith.addf %305, %321 : vector<9x32xf32>
    %c1_170 = arith.constant 1 : index
    %c0_171 = arith.constant 0 : index
    %c0_172 = arith.constant 0 : index
    %323 = vector.load %arg18[%c1_170, %c0_171, %c0_172] : memref<2x1x32xf32, #tpu.memory_space<vmem>>, vector<1x1x32xf32>
    %324 = vector.shape_cast %323 : vector<1x1x32xf32> to vector<1x32xf32>
    %c1_173 = arith.constant 1 : index
    %c0_174 = arith.constant 0 : index
    %c0_175 = arith.constant 0 : index
    %325 = vector.load %arg19[%c1_173, %c0_174, %c0_175] : memref<2x1x32xf32, #tpu.memory_space<vmem>>, vector<1x1x32xf32>
    %326 = vector.shape_cast %325 : vector<1x1x32xf32> to vector<1x32xf32>
    %cst_176 = arith.constant dense<0.000000e+00> : vector<9xf32>
    %327 = vector.multi_reduction <add>, %322, %cst_176 [1] : vector<9x32xf32> to vector<9xf32>
    %328 = vector.shape_cast %327 : vector<9xf32> to vector<9x1xf32>
    %cst_177 = arith.constant 3.200000e+01 : f32
    %329 = vector.broadcast %cst_177 : f32 to vector<9x1xf32>
    %330 = arith.divf %328, %329 : vector<9x1xf32>
    %331 = vector.broadcast %330 : vector<9x1xf32> to vector<9x32xf32>
    %332 = arith.subf %322, %331 : vector<9x32xf32>
    %333 = arith.mulf %332, %332 : vector<9x32xf32>
    %cst_178 = arith.constant dense<0.000000e+00> : vector<9xf32>
    %334 = vector.multi_reduction <add>, %333, %cst_178 [1] : vector<9x32xf32> to vector<9xf32>
    %335 = vector.shape_cast %334 : vector<9xf32> to vector<9x1xf32>
    %cst_179 = arith.constant 3.200000e+01 : f32
    %336 = vector.broadcast %cst_179 : f32 to vector<9x1xf32>
    %337 = arith.divf %335, %336 : vector<9x1xf32>
    %cst_180 = arith.constant 9.99999974E-6 : f32
    %338 = vector.broadcast %cst_180 : f32 to vector<9x1xf32>
    %339 = arith.addf %337, %338 : vector<9x1xf32>
    %340 = math.rsqrt %339 : vector<9x1xf32>
    %341 = vector.broadcast %340 : vector<9x1xf32> to vector<9x32xf32>
    %342 = arith.mulf %332, %341 : vector<9x32xf32>
    %343 = vector.broadcast %324 : vector<1x32xf32> to vector<9x32xf32>
    %344 = arith.mulf %342, %343 : vector<9x32xf32>
    %345 = vector.broadcast %326 : vector<1x32xf32> to vector<9x32xf32>
    %346 = arith.addf %344, %345 : vector<9x32xf32>
    %347 = vector.extract_strided_slice %346 {offsets = [1, 0], sizes = [8, 32], strides = [1, 1]} : vector<9x32xf32> to vector<8x32xf32>
    %c0_181 = arith.constant 0 : index
    %c0_182 = arith.constant 0 : index
    %c0_183 = arith.constant 0 : index
    %348 = vector.load %arg29[%c0_181, %c0_182, %c0_183] : memref<2x1x32xf32, #tpu.memory_space<vmem>>, vector<1x1x32xf32>
    %349 = vector.shape_cast %348 : vector<1x1x32xf32> to vector<1x32xf32>
    %c0_184 = arith.constant 0 : index
    %c0_185 = arith.constant 0 : index
    %c0_186 = arith.constant 0 : index
    %350 = vector.load %arg30[%c0_184, %c0_185, %c0_186] : memref<2x32x32xf32, #tpu.memory_space<vmem>>, vector<1x32x32xf32>
    %351 = vector.shape_cast %350 : vector<1x32x32xf32> to vector<32x32xf32>
    %cst_187 = arith.constant dense<0.000000e+00> : vector<1x32xf32>
    %352 = tpu.matmul %349, %351, %cst_187 {dimension_numbers = #tpu.dot_dimension_numbers<[1], [0], [0], [1], [0, 0, 1, 1], [], []>} : vector<1x32xf32>, vector<32x32xf32>, vector<1x32xf32> -> vector<1x32xf32>
    %c0_188 = arith.constant 0 : index
    %c0_189 = arith.constant 0 : index
    %c0_190 = arith.constant 0 : index
    %353 = vector.load %arg31[%c0_188, %c0_189, %c0_190] : memref<2x1x32xf32, #tpu.memory_space<vmem>>, vector<1x1x32xf32>
    %354 = vector.shape_cast %353 : vector<1x1x32xf32> to vector<1x32xf32>
    %355 = arith.addf %352, %354 : vector<1x32xf32>
    %c0_191 = arith.constant 0 : index
    %c0_192 = arith.constant 0 : index
    %c0_193 = arith.constant 0 : index
    %356 = vector.load %arg40[%c0_191, %c0_192, %c0_193] : memref<2x1x32xf32, #tpu.memory_space<vmem>>, vector<1x1x32xf32>
    %357 = vector.shape_cast %356 : vector<1x1x32xf32> to vector<1x32xf32>
    %c0_194 = arith.constant 0 : index
    %c0_195 = arith.constant 0 : index
    %c0_196 = arith.constant 0 : index
    %358 = vector.load %arg41[%c0_194, %c0_195, %c0_196] : memref<2x1x32xf32, #tpu.memory_space<vmem>>, vector<1x1x32xf32>
    %359 = vector.shape_cast %358 : vector<1x1x32xf32> to vector<1x32xf32>
    %cst_197 = arith.constant dense<0.000000e+00> : vector<1xf32>
    %360 = vector.multi_reduction <add>, %355, %cst_197 [1] : vector<1x32xf32> to vector<1xf32>
    %361 = vector.shape_cast %360 : vector<1xf32> to vector<1x1xf32>
    %cst_198 = arith.constant 3.200000e+01 : f32
    %362 = vector.broadcast %cst_198 : f32 to vector<1x1xf32>
    %363 = arith.divf %361, %362 : vector<1x1xf32>
    %364 = vector.broadcast %363 : vector<1x1xf32> to vector<1x32xf32>
    %365 = arith.subf %355, %364 : vector<1x32xf32>
    %366 = arith.mulf %365, %365 : vector<1x32xf32>
    %cst_199 = arith.constant dense<0.000000e+00> : vector<1xf32>
    %367 = vector.multi_reduction <add>, %366, %cst_199 [1] : vector<1x32xf32> to vector<1xf32>
    %368 = vector.shape_cast %367 : vector<1xf32> to vector<1x1xf32>
    %cst_200 = arith.constant 3.200000e+01 : f32
    %369 = vector.broadcast %cst_200 : f32 to vector<1x1xf32>
    %370 = arith.divf %368, %369 : vector<1x1xf32>
    %cst_201 = arith.constant 9.99999974E-6 : f32
    %371 = vector.broadcast %cst_201 : f32 to vector<1x1xf32>
    %372 = arith.addf %370, %371 : vector<1x1xf32>
    %373 = math.rsqrt %372 : vector<1x1xf32>
    %374 = vector.broadcast %373 : vector<1x1xf32> to vector<1x32xf32>
    %375 = arith.mulf %365, %374 : vector<1x32xf32>
    %376 = arith.mulf %375, %357 : vector<1x32xf32>
    %377 = arith.addf %376, %359 : vector<1x32xf32>
    %378 = vector.shape_cast %377 : vector<1x32xf32> to vector<1x32xf32>
    %379 = vector.broadcast %378 : vector<1x32xf32> to vector<8x32xf32>
    %c0_202 = arith.constant 0 : index
    %c0_203 = arith.constant 0 : index
    %c0_204 = arith.constant 0 : index
    %380 = vector.load %arg32[%c0_202, %c0_203, %c0_204] : memref<2x32x32xf32, #tpu.memory_space<vmem>>, vector<1x32x32xf32>
    %381 = vector.shape_cast %380 : vector<1x32x32xf32> to vector<32x32xf32>
    %c0_205 = arith.constant 0 : index
    %c0_206 = arith.constant 0 : index
    %c0_207 = arith.constant 0 : index
    %382 = vector.load %arg33[%c0_205, %c0_206, %c0_207] : memref<2x1x32xf32, #tpu.memory_space<vmem>>, vector<1x1x32xf32>
    %383 = vector.shape_cast %382 : vector<1x1x32xf32> to vector<1x32xf32>
    %c0_208 = arith.constant 0 : index
    %c0_209 = arith.constant 0 : index
    %c0_210 = arith.constant 0 : index
    %384 = vector.load %arg34[%c0_208, %c0_209, %c0_210] : memref<2x32x32xf32, #tpu.memory_space<vmem>>, vector<1x32x32xf32>
    %385 = vector.shape_cast %384 : vector<1x32x32xf32> to vector<32x32xf32>
    %c0_211 = arith.constant 0 : index
    %c0_212 = arith.constant 0 : index
    %c0_213 = arith.constant 0 : index
    %386 = vector.load %arg35[%c0_211, %c0_212, %c0_213] : memref<2x1x32xf32, #tpu.memory_space<vmem>>, vector<1x1x32xf32>
    %387 = vector.shape_cast %386 : vector<1x1x32xf32> to vector<1x32xf32>
    %c0_214 = arith.constant 0 : index
    %c0_215 = arith.constant 0 : index
    %c0_216 = arith.constant 0 : index
    %388 = vector.load %arg36[%c0_214, %c0_215, %c0_216] : memref<2x32x32xf32, #tpu.memory_space<vmem>>, vector<1x32x32xf32>
    %389 = vector.shape_cast %388 : vector<1x32x32xf32> to vector<32x32xf32>
    %c0_217 = arith.constant 0 : index
    %c0_218 = arith.constant 0 : index
    %c0_219 = arith.constant 0 : index
    %390 = vector.load %arg37[%c0_217, %c0_218, %c0_219] : memref<2x1x32xf32, #tpu.memory_space<vmem>>, vector<1x1x32xf32>
    %391 = vector.shape_cast %390 : vector<1x1x32xf32> to vector<1x32xf32>
    %c0_220 = arith.constant 0 : index
    %c0_221 = arith.constant 0 : index
    %c0_222 = arith.constant 0 : index
    %392 = vector.load %arg38[%c0_220, %c0_221, %c0_222] : memref<2x32x32xf32, #tpu.memory_space<vmem>>, vector<1x32x32xf32>
    %393 = vector.shape_cast %392 : vector<1x32x32xf32> to vector<32x32xf32>
    %c0_223 = arith.constant 0 : index
    %c0_224 = arith.constant 0 : index
    %c0_225 = arith.constant 0 : index
    %394 = vector.load %arg39[%c0_223, %c0_224, %c0_225] : memref<2x1x32xf32, #tpu.memory_space<vmem>>, vector<1x1x32xf32>
    %395 = vector.shape_cast %394 : vector<1x1x32xf32> to vector<1x32xf32>
    %cst_226 = arith.constant dense<0.000000e+00> : vector<8x32xf32>
    %396 = tpu.matmul %379, %381, %cst_226 {dimension_numbers = #tpu.dot_dimension_numbers<[1], [0], [0], [1], [0, 0, 1, 1], [], []>} : vector<8x32xf32>, vector<32x32xf32>, vector<8x32xf32> -> vector<8x32xf32>
    %397 = vector.broadcast %383 : vector<1x32xf32> to vector<8x32xf32>
    %398 = arith.addf %396, %397 : vector<8x32xf32>
    %cst_227 = arith.constant 0.353553385 : f32
    %399 = vector.broadcast %cst_227 : f32 to vector<8x32xf32>
    %400 = arith.mulf %398, %399 : vector<8x32xf32>
    %cst_228 = arith.constant dense<0.000000e+00> : vector<8x32xf32>
    %401 = tpu.matmul %347, %385, %cst_228 {dimension_numbers = #tpu.dot_dimension_numbers<[1], [0], [0], [1], [0, 0, 1, 1], [], []>} : vector<8x32xf32>, vector<32x32xf32>, vector<8x32xf32> -> vector<8x32xf32>
    %402 = vector.broadcast %387 : vector<1x32xf32> to vector<8x32xf32>
    %403 = arith.addf %401, %402 : vector<8x32xf32>
    %cst_229 = arith.constant dense<0.000000e+00> : vector<8x32xf32>
    %404 = tpu.matmul %347, %389, %cst_229 {dimension_numbers = #tpu.dot_dimension_numbers<[1], [0], [0], [1], [0, 0, 1, 1], [], []>} : vector<8x32xf32>, vector<32x32xf32>, vector<8x32xf32> -> vector<8x32xf32>
    %405 = vector.broadcast %391 : vector<1x32xf32> to vector<8x32xf32>
    %406 = arith.addf %404, %405 : vector<8x32xf32>
    %cst_230 = arith.constant 0.000000e+00 : f32
    %407 = vector.broadcast %cst_230 : f32 to vector<8x32xf32>
    %408 = vector.extract_strided_slice %400 {offsets = [0, 0], sizes = [8, 8], strides = [1, 1]} : vector<8x32xf32> to vector<8x8xf32>
    %409 = vector.extract_strided_slice %403 {offsets = [0, 0], sizes = [8, 8], strides = [1, 1]} : vector<8x32xf32> to vector<8x8xf32>
    %410 = vector.extract_strided_slice %406 {offsets = [0, 0], sizes = [8, 8], strides = [1, 1]} : vector<8x32xf32> to vector<8x8xf32>
    %cst_231 = arith.constant dense<0.000000e+00> : vector<8x8xf32>
    %411 = tpu.matmul %408, %409, %cst_231 {dimension_numbers = #tpu.dot_dimension_numbers<[1], [1], [0], [0], [0, 0, 1, 0], [], []>} : vector<8x8xf32>, vector<8x8xf32>, vector<8x8xf32> -> vector<8x8xf32>
    %cst_232 = arith.constant dense<0xFF800000> : vector<8xf32>
    %412 = vector.multi_reduction <maximumf>, %411, %cst_232 [1] : vector<8x8xf32> to vector<8xf32>
    %413 = vector.shape_cast %412 : vector<8xf32> to vector<8x1xf32>
    %414 = vector.broadcast %413 : vector<8x1xf32> to vector<8x8xf32>
    %415 = arith.subf %411, %414 : vector<8x8xf32>
    %416 = math.exp %415 : vector<8x8xf32>
    %cst_233 = arith.constant dense<0.000000e+00> : vector<8xf32>
    %417 = vector.multi_reduction <add>, %416, %cst_233 [1] : vector<8x8xf32> to vector<8xf32>
    %418 = vector.shape_cast %417 : vector<8xf32> to vector<8x1xf32>
    %419 = tpu.reciprocal %418 {approx = true} : vector<8x1xf32> -> vector<8x1xf32>
    %420 = vector.broadcast %419 : vector<8x1xf32> to vector<8x8xf32>
    %421 = arith.mulf %416, %420 : vector<8x8xf32>
    %cst_234 = arith.constant dense<0.000000e+00> : vector<8x8xf32>
    %422 = tpu.matmul %421, %410, %cst_234 {dimension_numbers = #tpu.dot_dimension_numbers<[1], [0], [0], [1], [0, 0, 1, 1], [], []>} : vector<8x8xf32>, vector<8x8xf32>, vector<8x8xf32> -> vector<8x8xf32>
    %423 = vector.extract_strided_slice %393 {offsets = [0, 0], sizes = [8, 32], strides = [1, 1]} : vector<32x32xf32> to vector<8x32xf32>
    %cst_235 = arith.constant dense<0.000000e+00> : vector<8x32xf32>
    %424 = tpu.matmul %422, %423, %cst_235 {dimension_numbers = #tpu.dot_dimension_numbers<[1], [0], [0], [1], [0, 0, 1, 1], [], []>} : vector<8x8xf32>, vector<8x32xf32>, vector<8x32xf32> -> vector<8x32xf32>
    %425 = arith.addf %407, %424 : vector<8x32xf32>
    %426 = vector.extract_strided_slice %400 {offsets = [0, 8], sizes = [8, 8], strides = [1, 1]} : vector<8x32xf32> to vector<8x8xf32>
    %427 = vector.extract_strided_slice %403 {offsets = [0, 8], sizes = [8, 8], strides = [1, 1]} : vector<8x32xf32> to vector<8x8xf32>
    %428 = vector.extract_strided_slice %406 {offsets = [0, 8], sizes = [8, 8], strides = [1, 1]} : vector<8x32xf32> to vector<8x8xf32>
    %cst_236 = arith.constant dense<0.000000e+00> : vector<8x8xf32>
    %429 = tpu.matmul %426, %427, %cst_236 {dimension_numbers = #tpu.dot_dimension_numbers<[1], [1], [0], [0], [0, 0, 1, 0], [], []>} : vector<8x8xf32>, vector<8x8xf32>, vector<8x8xf32> -> vector<8x8xf32>
    %cst_237 = arith.constant dense<0xFF800000> : vector<8xf32>
    %430 = vector.multi_reduction <maximumf>, %429, %cst_237 [1] : vector<8x8xf32> to vector<8xf32>
    %431 = vector.shape_cast %430 : vector<8xf32> to vector<8x1xf32>
    %432 = vector.broadcast %431 : vector<8x1xf32> to vector<8x8xf32>
    %433 = arith.subf %429, %432 : vector<8x8xf32>
    %434 = math.exp %433 : vector<8x8xf32>
    %cst_238 = arith.constant dense<0.000000e+00> : vector<8xf32>
    %435 = vector.multi_reduction <add>, %434, %cst_238 [1] : vector<8x8xf32> to vector<8xf32>
    %436 = vector.shape_cast %435 : vector<8xf32> to vector<8x1xf32>
    %437 = tpu.reciprocal %436 {approx = true} : vector<8x1xf32> -> vector<8x1xf32>
    %438 = vector.broadcast %437 : vector<8x1xf32> to vector<8x8xf32>
    %439 = arith.mulf %434, %438 : vector<8x8xf32>
    %cst_239 = arith.constant dense<0.000000e+00> : vector<8x8xf32>
    %440 = tpu.matmul %439, %428, %cst_239 {dimension_numbers = #tpu.dot_dimension_numbers<[1], [0], [0], [1], [0, 0, 1, 1], [], []>} : vector<8x8xf32>, vector<8x8xf32>, vector<8x8xf32> -> vector<8x8xf32>
    %441 = vector.extract_strided_slice %393 {offsets = [8, 0], sizes = [8, 32], strides = [1, 1]} : vector<32x32xf32> to vector<8x32xf32>
    %cst_240 = arith.constant dense<0.000000e+00> : vector<8x32xf32>
    %442 = tpu.matmul %440, %441, %cst_240 {dimension_numbers = #tpu.dot_dimension_numbers<[1], [0], [0], [1], [0, 0, 1, 1], [], []>} : vector<8x8xf32>, vector<8x32xf32>, vector<8x32xf32> -> vector<8x32xf32>
    %443 = arith.addf %425, %442 : vector<8x32xf32>
    %444 = vector.extract_strided_slice %400 {offsets = [0, 16], sizes = [8, 8], strides = [1, 1]} : vector<8x32xf32> to vector<8x8xf32>
    %445 = vector.extract_strided_slice %403 {offsets = [0, 16], sizes = [8, 8], strides = [1, 1]} : vector<8x32xf32> to vector<8x8xf32>
    %446 = vector.extract_strided_slice %406 {offsets = [0, 16], sizes = [8, 8], strides = [1, 1]} : vector<8x32xf32> to vector<8x8xf32>
    %cst_241 = arith.constant dense<0.000000e+00> : vector<8x8xf32>
    %447 = tpu.matmul %444, %445, %cst_241 {dimension_numbers = #tpu.dot_dimension_numbers<[1], [1], [0], [0], [0, 0, 1, 0], [], []>} : vector<8x8xf32>, vector<8x8xf32>, vector<8x8xf32> -> vector<8x8xf32>
    %cst_242 = arith.constant dense<0xFF800000> : vector<8xf32>
    %448 = vector.multi_reduction <maximumf>, %447, %cst_242 [1] : vector<8x8xf32> to vector<8xf32>
    %449 = vector.shape_cast %448 : vector<8xf32> to vector<8x1xf32>
    %450 = vector.broadcast %449 : vector<8x1xf32> to vector<8x8xf32>
    %451 = arith.subf %447, %450 : vector<8x8xf32>
    %452 = math.exp %451 : vector<8x8xf32>
    %cst_243 = arith.constant dense<0.000000e+00> : vector<8xf32>
    %453 = vector.multi_reduction <add>, %452, %cst_243 [1] : vector<8x8xf32> to vector<8xf32>
    %454 = vector.shape_cast %453 : vector<8xf32> to vector<8x1xf32>
    %455 = tpu.reciprocal %454 {approx = true} : vector<8x1xf32> -> vector<8x1xf32>
    %456 = vector.broadcast %455 : vector<8x1xf32> to vector<8x8xf32>
    %457 = arith.mulf %452, %456 : vector<8x8xf32>
    %cst_244 = arith.constant dense<0.000000e+00> : vector<8x8xf32>
    %458 = tpu.matmul %457, %446, %cst_244 {dimension_numbers = #tpu.dot_dimension_numbers<[1], [0], [0], [1], [0, 0, 1, 1], [], []>} : vector<8x8xf32>, vector<8x8xf32>, vector<8x8xf32> -> vector<8x8xf32>
    %459 = vector.extract_strided_slice %393 {offsets = [16, 0], sizes = [8, 32], strides = [1, 1]} : vector<32x32xf32> to vector<8x32xf32>
    %cst_245 = arith.constant dense<0.000000e+00> : vector<8x32xf32>
    %460 = tpu.matmul %458, %459, %cst_245 {dimension_numbers = #tpu.dot_dimension_numbers<[1], [0], [0], [1], [0, 0, 1, 1], [], []>} : vector<8x8xf32>, vector<8x32xf32>, vector<8x32xf32> -> vector<8x32xf32>
    %461 = arith.addf %443, %460 : vector<8x32xf32>
    %462 = vector.extract_strided_slice %400 {offsets = [0, 24], sizes = [8, 8], strides = [1, 1]} : vector<8x32xf32> to vector<8x8xf32>
    %463 = vector.extract_strided_slice %403 {offsets = [0, 24], sizes = [8, 8], strides = [1, 1]} : vector<8x32xf32> to vector<8x8xf32>
    %464 = vector.extract_strided_slice %406 {offsets = [0, 24], sizes = [8, 8], strides = [1, 1]} : vector<8x32xf32> to vector<8x8xf32>
    %cst_246 = arith.constant dense<0.000000e+00> : vector<8x8xf32>
    %465 = tpu.matmul %462, %463, %cst_246 {dimension_numbers = #tpu.dot_dimension_numbers<[1], [1], [0], [0], [0, 0, 1, 0], [], []>} : vector<8x8xf32>, vector<8x8xf32>, vector<8x8xf32> -> vector<8x8xf32>
    %cst_247 = arith.constant dense<0xFF800000> : vector<8xf32>
    %466 = vector.multi_reduction <maximumf>, %465, %cst_247 [1] : vector<8x8xf32> to vector<8xf32>
    %467 = vector.shape_cast %466 : vector<8xf32> to vector<8x1xf32>
    %468 = vector.broadcast %467 : vector<8x1xf32> to vector<8x8xf32>
    %469 = arith.subf %465, %468 : vector<8x8xf32>
    %470 = math.exp %469 : vector<8x8xf32>
    %cst_248 = arith.constant dense<0.000000e+00> : vector<8xf32>
    %471 = vector.multi_reduction <add>, %470, %cst_248 [1] : vector<8x8xf32> to vector<8xf32>
    %472 = vector.shape_cast %471 : vector<8xf32> to vector<8x1xf32>
    %473 = tpu.reciprocal %472 {approx = true} : vector<8x1xf32> -> vector<8x1xf32>
    %474 = vector.broadcast %473 : vector<8x1xf32> to vector<8x8xf32>
    %475 = arith.mulf %470, %474 : vector<8x8xf32>
    %cst_249 = arith.constant dense<0.000000e+00> : vector<8x8xf32>
    %476 = tpu.matmul %475, %464, %cst_249 {dimension_numbers = #tpu.dot_dimension_numbers<[1], [0], [0], [1], [0, 0, 1, 1], [], []>} : vector<8x8xf32>, vector<8x8xf32>, vector<8x8xf32> -> vector<8x8xf32>
    %477 = vector.extract_strided_slice %393 {offsets = [24, 0], sizes = [8, 32], strides = [1, 1]} : vector<32x32xf32> to vector<8x32xf32>
    %cst_250 = arith.constant dense<0.000000e+00> : vector<8x32xf32>
    %478 = tpu.matmul %476, %477, %cst_250 {dimension_numbers = #tpu.dot_dimension_numbers<[1], [0], [0], [1], [0, 0, 1, 1], [], []>} : vector<8x8xf32>, vector<8x32xf32>, vector<8x32xf32> -> vector<8x32xf32>
    %479 = arith.addf %461, %478 : vector<8x32xf32>
    %480 = vector.broadcast %395 : vector<1x32xf32> to vector<8x32xf32>
    %481 = arith.addf %479, %480 : vector<8x32xf32>
    %482 = arith.addf %379, %481 : vector<8x32xf32>
    %c0_251 = arith.constant 0 : index
    %c0_252 = arith.constant 0 : index
    %c0_253 = arith.constant 0 : index
    %483 = vector.load %arg42[%c0_251, %c0_252, %c0_253] : memref<2x1x32xf32, #tpu.memory_space<vmem>>, vector<1x1x32xf32>
    %484 = vector.shape_cast %483 : vector<1x1x32xf32> to vector<1x32xf32>
    %c0_254 = arith.constant 0 : index
    %c0_255 = arith.constant 0 : index
    %c0_256 = arith.constant 0 : index
    %485 = vector.load %arg43[%c0_254, %c0_255, %c0_256] : memref<2x1x32xf32, #tpu.memory_space<vmem>>, vector<1x1x32xf32>
    %486 = vector.shape_cast %485 : vector<1x1x32xf32> to vector<1x32xf32>
    %cst_257 = arith.constant dense<0.000000e+00> : vector<8xf32>
    %487 = vector.multi_reduction <add>, %482, %cst_257 [1] : vector<8x32xf32> to vector<8xf32>
    %488 = vector.shape_cast %487 : vector<8xf32> to vector<8x1xf32>
    %cst_258 = arith.constant 3.200000e+01 : f32
    %489 = vector.broadcast %cst_258 : f32 to vector<8x1xf32>
    %490 = arith.divf %488, %489 : vector<8x1xf32>
    %491 = vector.broadcast %490 : vector<8x1xf32> to vector<8x32xf32>
    %492 = arith.subf %482, %491 : vector<8x32xf32>
    %493 = arith.mulf %492, %492 : vector<8x32xf32>
    %cst_259 = arith.constant dense<0.000000e+00> : vector<8xf32>
    %494 = vector.multi_reduction <add>, %493, %cst_259 [1] : vector<8x32xf32> to vector<8xf32>
    %495 = vector.shape_cast %494 : vector<8xf32> to vector<8x1xf32>
    %cst_260 = arith.constant 3.200000e+01 : f32
    %496 = vector.broadcast %cst_260 : f32 to vector<8x1xf32>
    %497 = arith.divf %495, %496 : vector<8x1xf32>
    %cst_261 = arith.constant 9.99999974E-6 : f32
    %498 = vector.broadcast %cst_261 : f32 to vector<8x1xf32>
    %499 = arith.addf %497, %498 : vector<8x1xf32>
    %500 = math.rsqrt %499 : vector<8x1xf32>
    %501 = vector.broadcast %500 : vector<8x1xf32> to vector<8x32xf32>
    %502 = arith.mulf %492, %501 : vector<8x32xf32>
    %503 = vector.broadcast %484 : vector<1x32xf32> to vector<8x32xf32>
    %504 = arith.mulf %502, %503 : vector<8x32xf32>
    %505 = vector.broadcast %486 : vector<1x32xf32> to vector<8x32xf32>
    %506 = arith.addf %504, %505 : vector<8x32xf32>
    %c0_262 = arith.constant 0 : index
    %c0_263 = arith.constant 0 : index
    %c0_264 = arith.constant 0 : index
    %507 = vector.load %arg46[%c0_262, %c0_263, %c0_264] : memref<2x32x2048xf32, #tpu.memory_space<vmem>>, vector<1x32x2048xf32>
    %508 = vector.shape_cast %507 : vector<1x32x2048xf32> to vector<32x2048xf32>
    %c0_265 = arith.constant 0 : index
    %c0_266 = arith.constant 0 : index
    %c0_267 = arith.constant 0 : index
    %509 = vector.load %arg47[%c0_265, %c0_266, %c0_267] : memref<2x1x2048xf32, #tpu.memory_space<vmem>>, vector<1x1x2048xf32>
    %510 = vector.shape_cast %509 : vector<1x1x2048xf32> to vector<1x2048xf32>
    %c0_268 = arith.constant 0 : index
    %c0_269 = arith.constant 0 : index
    %c0_270 = arith.constant 0 : index
    %511 = vector.load %arg48[%c0_268, %c0_269, %c0_270] : memref<2x2048x32xf32, #tpu.memory_space<vmem>>, vector<1x2048x32xf32>
    %512 = vector.shape_cast %511 : vector<1x2048x32xf32> to vector<2048x32xf32>
    %c0_271 = arith.constant 0 : index
    %c0_272 = arith.constant 0 : index
    %c0_273 = arith.constant 0 : index
    %513 = vector.load %arg49[%c0_271, %c0_272, %c0_273] : memref<2x1x32xf32, #tpu.memory_space<vmem>>, vector<1x1x32xf32>
    %514 = vector.shape_cast %513 : vector<1x1x32xf32> to vector<1x32xf32>
    %cst_274 = arith.constant dense<0.000000e+00> : vector<8x2048xf32>
    %515 = tpu.matmul %506, %508, %cst_274 {dimension_numbers = #tpu.dot_dimension_numbers<[1], [0], [0], [1], [0, 0, 1, 1], [], []>} : vector<8x32xf32>, vector<32x2048xf32>, vector<8x2048xf32> -> vector<8x2048xf32>
    %516 = vector.broadcast %510 : vector<1x2048xf32> to vector<8x2048xf32>
    %517 = arith.addf %515, %516 : vector<8x2048xf32>
    %cst_275 = arith.constant 0.000000e+00 : f32
    %518 = vector.broadcast %cst_275 : f32 to vector<8x2048xf32>
    %519 = arith.maximumf %517, %518 : vector<8x2048xf32>
    %cst_276 = arith.constant dense<0.000000e+00> : vector<8x32xf32>
    %520 = tpu.matmul %519, %512, %cst_276 {dimension_numbers = #tpu.dot_dimension_numbers<[1], [0], [0], [1], [0, 0, 1, 1], [], []>} : vector<8x2048xf32>, vector<2048x32xf32>, vector<8x32xf32> -> vector<8x32xf32>
    %521 = vector.broadcast %514 : vector<1x32xf32> to vector<8x32xf32>
    %522 = arith.addf %520, %521 : vector<8x32xf32>
    %523 = arith.addf %506, %522 : vector<8x32xf32>
    %c0_277 = arith.constant 0 : index
    %c0_278 = arith.constant 0 : index
    %c0_279 = arith.constant 0 : index
    %524 = vector.load %arg44[%c0_277, %c0_278, %c0_279] : memref<2x1x32xf32, #tpu.memory_space<vmem>>, vector<1x1x32xf32>
    %525 = vector.shape_cast %524 : vector<1x1x32xf32> to vector<1x32xf32>
    %c0_280 = arith.constant 0 : index
    %c0_281 = arith.constant 0 : index
    %c0_282 = arith.constant 0 : index
    %526 = vector.load %arg45[%c0_280, %c0_281, %c0_282] : memref<2x1x32xf32, #tpu.memory_space<vmem>>, vector<1x1x32xf32>
    %527 = vector.shape_cast %526 : vector<1x1x32xf32> to vector<1x32xf32>
    %cst_283 = arith.constant dense<0.000000e+00> : vector<8xf32>
    %528 = vector.multi_reduction <add>, %523, %cst_283 [1] : vector<8x32xf32> to vector<8xf32>
    %529 = vector.shape_cast %528 : vector<8xf32> to vector<8x1xf32>
    %cst_284 = arith.constant 3.200000e+01 : f32
    %530 = vector.broadcast %cst_284 : f32 to vector<8x1xf32>
    %531 = arith.divf %529, %530 : vector<8x1xf32>
    %532 = vector.broadcast %531 : vector<8x1xf32> to vector<8x32xf32>
    %533 = arith.subf %523, %532 : vector<8x32xf32>
    %534 = arith.mulf %533, %533 : vector<8x32xf32>
    %cst_285 = arith.constant dense<0.000000e+00> : vector<8xf32>
    %535 = vector.multi_reduction <add>, %534, %cst_285 [1] : vector<8x32xf32> to vector<8xf32>
    %536 = vector.shape_cast %535 : vector<8xf32> to vector<8x1xf32>
    %cst_286 = arith.constant 3.200000e+01 : f32
    %537 = vector.broadcast %cst_286 : f32 to vector<8x1xf32>
    %538 = arith.divf %536, %537 : vector<8x1xf32>
    %cst_287 = arith.constant 9.99999974E-6 : f32
    %539 = vector.broadcast %cst_287 : f32 to vector<8x1xf32>
    %540 = arith.addf %538, %539 : vector<8x1xf32>
    %541 = math.rsqrt %540 : vector<8x1xf32>
    %542 = vector.broadcast %541 : vector<8x1xf32> to vector<8x32xf32>
    %543 = arith.mulf %533, %542 : vector<8x32xf32>
    %544 = vector.broadcast %525 : vector<1x32xf32> to vector<8x32xf32>
    %545 = arith.mulf %543, %544 : vector<8x32xf32>
    %546 = vector.broadcast %527 : vector<1x32xf32> to vector<8x32xf32>
    %547 = arith.addf %545, %546 : vector<8x32xf32>
    %c1_288 = arith.constant 1 : index
    %c0_289 = arith.constant 0 : index
    %c0_290 = arith.constant 0 : index
    %548 = vector.load %arg24[%c1_288, %c0_289, %c0_290] : memref<2x32x32xf32, #tpu.memory_space<vmem>>, vector<1x32x32xf32>
    %549 = vector.shape_cast %548 : vector<1x32x32xf32> to vector<32x32xf32>
    %c1_291 = arith.constant 1 : index
    %c0_292 = arith.constant 0 : index
    %c0_293 = arith.constant 0 : index
    %550 = vector.load %arg25[%c1_291, %c0_292, %c0_293] : memref<2x1x32xf32, #tpu.memory_space<vmem>>, vector<1x1x32xf32>
    %551 = vector.shape_cast %550 : vector<1x1x32xf32> to vector<1x32xf32>
    %c1_294 = arith.constant 1 : index
    %c0_295 = arith.constant 0 : index
    %c0_296 = arith.constant 0 : index
    %552 = vector.load %arg26[%c1_294, %c0_295, %c0_296] : memref<2x32x32xf32, #tpu.memory_space<vmem>>, vector<1x32x32xf32>
    %553 = vector.shape_cast %552 : vector<1x32x32xf32> to vector<32x32xf32>
    %c1_297 = arith.constant 1 : index
    %c0_298 = arith.constant 0 : index
    %c0_299 = arith.constant 0 : index
    %554 = vector.load %arg27[%c1_297, %c0_298, %c0_299] : memref<2x1x32xf32, #tpu.memory_space<vmem>>, vector<1x1x32xf32>
    %555 = vector.shape_cast %554 : vector<1x1x32xf32> to vector<1x32xf32>
    %c1_300 = arith.constant 1 : index
    %c0_301 = arith.constant 0 : index
    %c0_302 = arith.constant 0 : index
    %556 = vector.load %arg28[%c1_300, %c0_301, %c0_302] : memref<2x32x32xf32, #tpu.memory_space<vmem>>, vector<1x32x32xf32>
    %557 = vector.shape_cast %556 : vector<1x32x32xf32> to vector<32x32xf32>
    %c1_303 = arith.constant 1 : index
    %c0_304 = arith.constant 0 : index
    %c0_305 = arith.constant 0 : index
    %558 = vector.load %arg29[%c1_303, %c0_304, %c0_305] : memref<2x1x32xf32, #tpu.memory_space<vmem>>, vector<1x1x32xf32>
    %559 = vector.shape_cast %558 : vector<1x1x32xf32> to vector<1x32xf32>
    %c1_306 = arith.constant 1 : index
    %c0_307 = arith.constant 0 : index
    %c0_308 = arith.constant 0 : index
    %560 = vector.load %arg30[%c1_306, %c0_307, %c0_308] : memref<2x32x32xf32, #tpu.memory_space<vmem>>, vector<1x32x32xf32>
    %561 = vector.shape_cast %560 : vector<1x32x32xf32> to vector<32x32xf32>
    %c1_309 = arith.constant 1 : index
    %c0_310 = arith.constant 0 : index
    %c0_311 = arith.constant 0 : index
    %562 = vector.load %arg31[%c1_309, %c0_310, %c0_311] : memref<2x1x32xf32, #tpu.memory_space<vmem>>, vector<1x1x32xf32>
    %563 = vector.shape_cast %562 : vector<1x1x32xf32> to vector<1x32xf32>
    %cst_312 = arith.constant dense<0.000000e+00> : vector<8x32xf32>
    %564 = tpu.matmul %547, %549, %cst_312 {dimension_numbers = #tpu.dot_dimension_numbers<[1], [0], [0], [1], [0, 0, 1, 1], [], []>} : vector<8x32xf32>, vector<32x32xf32>, vector<8x32xf32> -> vector<8x32xf32>
    %565 = vector.broadcast %551 : vector<1x32xf32> to vector<8x32xf32>
    %566 = arith.addf %564, %565 : vector<8x32xf32>
    %cst_313 = arith.constant 0.353553385 : f32
    %567 = vector.broadcast %cst_313 : f32 to vector<8x32xf32>
    %568 = arith.mulf %566, %567 : vector<8x32xf32>
    %cst_314 = arith.constant dense<0.000000e+00> : vector<8x32xf32>
    %569 = tpu.matmul %547, %553, %cst_314 {dimension_numbers = #tpu.dot_dimension_numbers<[1], [0], [0], [1], [0, 0, 1, 1], [], []>} : vector<8x32xf32>, vector<32x32xf32>, vector<8x32xf32> -> vector<8x32xf32>
    %570 = vector.broadcast %555 : vector<1x32xf32> to vector<8x32xf32>
    %571 = arith.addf %569, %570 : vector<8x32xf32>
    %cst_315 = arith.constant dense<0.000000e+00> : vector<8x32xf32>
    %572 = tpu.matmul %547, %557, %cst_315 {dimension_numbers = #tpu.dot_dimension_numbers<[1], [0], [0], [1], [0, 0, 1, 1], [], []>} : vector<8x32xf32>, vector<32x32xf32>, vector<8x32xf32> -> vector<8x32xf32>
    %573 = vector.broadcast %559 : vector<1x32xf32> to vector<8x32xf32>
    %574 = arith.addf %572, %573 : vector<8x32xf32>
    %cst_316 = arith.constant 0.000000e+00 : f32
    %575 = vector.broadcast %cst_316 : f32 to vector<8x32xf32>
    %576 = vector.extract_strided_slice %568 {offsets = [0, 0], sizes = [8, 8], strides = [1, 1]} : vector<8x32xf32> to vector<8x8xf32>
    %577 = vector.extract_strided_slice %571 {offsets = [0, 0], sizes = [8, 8], strides = [1, 1]} : vector<8x32xf32> to vector<8x8xf32>
    %578 = vector.extract_strided_slice %574 {offsets = [0, 0], sizes = [8, 8], strides = [1, 1]} : vector<8x32xf32> to vector<8x8xf32>
    %cst_317 = arith.constant dense<0.000000e+00> : vector<8x8xf32>
    %579 = tpu.matmul %576, %577, %cst_317 {dimension_numbers = #tpu.dot_dimension_numbers<[1], [1], [0], [0], [0, 0, 1, 0], [], []>} : vector<8x8xf32>, vector<8x8xf32>, vector<8x8xf32> -> vector<8x8xf32>
    %cst_318 = arith.constant dense<0xFF800000> : vector<8xf32>
    %580 = vector.multi_reduction <maximumf>, %579, %cst_318 [1] : vector<8x8xf32> to vector<8xf32>
    %581 = vector.shape_cast %580 : vector<8xf32> to vector<8x1xf32>
    %582 = vector.broadcast %581 : vector<8x1xf32> to vector<8x8xf32>
    %583 = arith.subf %579, %582 : vector<8x8xf32>
    %584 = math.exp %583 : vector<8x8xf32>
    %cst_319 = arith.constant dense<0.000000e+00> : vector<8xf32>
    %585 = vector.multi_reduction <add>, %584, %cst_319 [1] : vector<8x8xf32> to vector<8xf32>
    %586 = vector.shape_cast %585 : vector<8xf32> to vector<8x1xf32>
    %587 = tpu.reciprocal %586 {approx = true} : vector<8x1xf32> -> vector<8x1xf32>
    %588 = vector.broadcast %587 : vector<8x1xf32> to vector<8x8xf32>
    %589 = arith.mulf %584, %588 : vector<8x8xf32>
    %cst_320 = arith.constant dense<0.000000e+00> : vector<8x8xf32>
    %590 = tpu.matmul %589, %578, %cst_320 {dimension_numbers = #tpu.dot_dimension_numbers<[1], [0], [0], [1], [0, 0, 1, 1], [], []>} : vector<8x8xf32>, vector<8x8xf32>, vector<8x8xf32> -> vector<8x8xf32>
    %591 = vector.extract_strided_slice %561 {offsets = [0, 0], sizes = [8, 32], strides = [1, 1]} : vector<32x32xf32> to vector<8x32xf32>
    %cst_321 = arith.constant dense<0.000000e+00> : vector<8x32xf32>
    %592 = tpu.matmul %590, %591, %cst_321 {dimension_numbers = #tpu.dot_dimension_numbers<[1], [0], [0], [1], [0, 0, 1, 1], [], []>} : vector<8x8xf32>, vector<8x32xf32>, vector<8x32xf32> -> vector<8x32xf32>
    %593 = arith.addf %575, %592 : vector<8x32xf32>
    %594 = vector.extract_strided_slice %568 {offsets = [0, 8], sizes = [8, 8], strides = [1, 1]} : vector<8x32xf32> to vector<8x8xf32>
    %595 = vector.extract_strided_slice %571 {offsets = [0, 8], sizes = [8, 8], strides = [1, 1]} : vector<8x32xf32> to vector<8x8xf32>
    %596 = vector.extract_strided_slice %574 {offsets = [0, 8], sizes = [8, 8], strides = [1, 1]} : vector<8x32xf32> to vector<8x8xf32>
    %cst_322 = arith.constant dense<0.000000e+00> : vector<8x8xf32>
    %597 = tpu.matmul %594, %595, %cst_322 {dimension_numbers = #tpu.dot_dimension_numbers<[1], [1], [0], [0], [0, 0, 1, 0], [], []>} : vector<8x8xf32>, vector<8x8xf32>, vector<8x8xf32> -> vector<8x8xf32>
    %cst_323 = arith.constant dense<0xFF800000> : vector<8xf32>
    %598 = vector.multi_reduction <maximumf>, %597, %cst_323 [1] : vector<8x8xf32> to vector<8xf32>
    %599 = vector.shape_cast %598 : vector<8xf32> to vector<8x1xf32>
    %600 = vector.broadcast %599 : vector<8x1xf32> to vector<8x8xf32>
    %601 = arith.subf %597, %600 : vector<8x8xf32>
    %602 = math.exp %601 : vector<8x8xf32>
    %cst_324 = arith.constant dense<0.000000e+00> : vector<8xf32>
    %603 = vector.multi_reduction <add>, %602, %cst_324 [1] : vector<8x8xf32> to vector<8xf32>
    %604 = vector.shape_cast %603 : vector<8xf32> to vector<8x1xf32>
    %605 = tpu.reciprocal %604 {approx = true} : vector<8x1xf32> -> vector<8x1xf32>
    %606 = vector.broadcast %605 : vector<8x1xf32> to vector<8x8xf32>
    %607 = arith.mulf %602, %606 : vector<8x8xf32>
    %cst_325 = arith.constant dense<0.000000e+00> : vector<8x8xf32>
    %608 = tpu.matmul %607, %596, %cst_325 {dimension_numbers = #tpu.dot_dimension_numbers<[1], [0], [0], [1], [0, 0, 1, 1], [], []>} : vector<8x8xf32>, vector<8x8xf32>, vector<8x8xf32> -> vector<8x8xf32>
    %609 = vector.extract_strided_slice %561 {offsets = [8, 0], sizes = [8, 32], strides = [1, 1]} : vector<32x32xf32> to vector<8x32xf32>
    %cst_326 = arith.constant dense<0.000000e+00> : vector<8x32xf32>
    %610 = tpu.matmul %608, %609, %cst_326 {dimension_numbers = #tpu.dot_dimension_numbers<[1], [0], [0], [1], [0, 0, 1, 1], [], []>} : vector<8x8xf32>, vector<8x32xf32>, vector<8x32xf32> -> vector<8x32xf32>
    %611 = arith.addf %593, %610 : vector<8x32xf32>
    %612 = vector.extract_strided_slice %568 {offsets = [0, 16], sizes = [8, 8], strides = [1, 1]} : vector<8x32xf32> to vector<8x8xf32>
    %613 = vector.extract_strided_slice %571 {offsets = [0, 16], sizes = [8, 8], strides = [1, 1]} : vector<8x32xf32> to vector<8x8xf32>
    %614 = vector.extract_strided_slice %574 {offsets = [0, 16], sizes = [8, 8], strides = [1, 1]} : vector<8x32xf32> to vector<8x8xf32>
    %cst_327 = arith.constant dense<0.000000e+00> : vector<8x8xf32>
    %615 = tpu.matmul %612, %613, %cst_327 {dimension_numbers = #tpu.dot_dimension_numbers<[1], [1], [0], [0], [0, 0, 1, 0], [], []>} : vector<8x8xf32>, vector<8x8xf32>, vector<8x8xf32> -> vector<8x8xf32>
    %cst_328 = arith.constant dense<0xFF800000> : vector<8xf32>
    %616 = vector.multi_reduction <maximumf>, %615, %cst_328 [1] : vector<8x8xf32> to vector<8xf32>
    %617 = vector.shape_cast %616 : vector<8xf32> to vector<8x1xf32>
    %618 = vector.broadcast %617 : vector<8x1xf32> to vector<8x8xf32>
    %619 = arith.subf %615, %618 : vector<8x8xf32>
    %620 = math.exp %619 : vector<8x8xf32>
    %cst_329 = arith.constant dense<0.000000e+00> : vector<8xf32>
    %621 = vector.multi_reduction <add>, %620, %cst_329 [1] : vector<8x8xf32> to vector<8xf32>
    %622 = vector.shape_cast %621 : vector<8xf32> to vector<8x1xf32>
    %623 = tpu.reciprocal %622 {approx = true} : vector<8x1xf32> -> vector<8x1xf32>
    %624 = vector.broadcast %623 : vector<8x1xf32> to vector<8x8xf32>
    %625 = arith.mulf %620, %624 : vector<8x8xf32>
    %cst_330 = arith.constant dense<0.000000e+00> : vector<8x8xf32>
    %626 = tpu.matmul %625, %614, %cst_330 {dimension_numbers = #tpu.dot_dimension_numbers<[1], [0], [0], [1], [0, 0, 1, 1], [], []>} : vector<8x8xf32>, vector<8x8xf32>, vector<8x8xf32> -> vector<8x8xf32>
    %627 = vector.extract_strided_slice %561 {offsets = [16, 0], sizes = [8, 32], strides = [1, 1]} : vector<32x32xf32> to vector<8x32xf32>
    %cst_331 = arith.constant dense<0.000000e+00> : vector<8x32xf32>
    %628 = tpu.matmul %626, %627, %cst_331 {dimension_numbers = #tpu.dot_dimension_numbers<[1], [0], [0], [1], [0, 0, 1, 1], [], []>} : vector<8x8xf32>, vector<8x32xf32>, vector<8x32xf32> -> vector<8x32xf32>
    %629 = arith.addf %611, %628 : vector<8x32xf32>
    %630 = vector.extract_strided_slice %568 {offsets = [0, 24], sizes = [8, 8], strides = [1, 1]} : vector<8x32xf32> to vector<8x8xf32>
    %631 = vector.extract_strided_slice %571 {offsets = [0, 24], sizes = [8, 8], strides = [1, 1]} : vector<8x32xf32> to vector<8x8xf32>
    %632 = vector.extract_strided_slice %574 {offsets = [0, 24], sizes = [8, 8], strides = [1, 1]} : vector<8x32xf32> to vector<8x8xf32>
    %cst_332 = arith.constant dense<0.000000e+00> : vector<8x8xf32>
    %633 = tpu.matmul %630, %631, %cst_332 {dimension_numbers = #tpu.dot_dimension_numbers<[1], [1], [0], [0], [0, 0, 1, 0], [], []>} : vector<8x8xf32>, vector<8x8xf32>, vector<8x8xf32> -> vector<8x8xf32>
    %cst_333 = arith.constant dense<0xFF800000> : vector<8xf32>
    %634 = vector.multi_reduction <maximumf>, %633, %cst_333 [1] : vector<8x8xf32> to vector<8xf32>
    %635 = vector.shape_cast %634 : vector<8xf32> to vector<8x1xf32>
    %636 = vector.broadcast %635 : vector<8x1xf32> to vector<8x8xf32>
    %637 = arith.subf %633, %636 : vector<8x8xf32>
    %638 = math.exp %637 : vector<8x8xf32>
    %cst_334 = arith.constant dense<0.000000e+00> : vector<8xf32>
    %639 = vector.multi_reduction <add>, %638, %cst_334 [1] : vector<8x8xf32> to vector<8xf32>
    %640 = vector.shape_cast %639 : vector<8xf32> to vector<8x1xf32>
    %641 = tpu.reciprocal %640 {approx = true} : vector<8x1xf32> -> vector<8x1xf32>
    %642 = vector.broadcast %641 : vector<8x1xf32> to vector<8x8xf32>
    %643 = arith.mulf %638, %642 : vector<8x8xf32>
    %cst_335 = arith.constant dense<0.000000e+00> : vector<8x8xf32>
    %644 = tpu.matmul %643, %632, %cst_335 {dimension_numbers = #tpu.dot_dimension_numbers<[1], [0], [0], [1], [0, 0, 1, 1], [], []>} : vector<8x8xf32>, vector<8x8xf32>, vector<8x8xf32> -> vector<8x8xf32>
    %645 = vector.extract_strided_slice %561 {offsets = [24, 0], sizes = [8, 32], strides = [1, 1]} : vector<32x32xf32> to vector<8x32xf32>
    %cst_336 = arith.constant dense<0.000000e+00> : vector<8x32xf32>
    %646 = tpu.matmul %644, %645, %cst_336 {dimension_numbers = #tpu.dot_dimension_numbers<[1], [0], [0], [1], [0, 0, 1, 1], [], []>} : vector<8x8xf32>, vector<8x32xf32>, vector<8x32xf32> -> vector<8x32xf32>
    %647 = arith.addf %629, %646 : vector<8x32xf32>
    %648 = vector.broadcast %563 : vector<1x32xf32> to vector<8x32xf32>
    %649 = arith.addf %647, %648 : vector<8x32xf32>
    %650 = arith.addf %547, %649 : vector<8x32xf32>
    %c1_337 = arith.constant 1 : index
    %c0_338 = arith.constant 0 : index
    %c0_339 = arith.constant 0 : index
    %651 = vector.load %arg40[%c1_337, %c0_338, %c0_339] : memref<2x1x32xf32, #tpu.memory_space<vmem>>, vector<1x1x32xf32>
    %652 = vector.shape_cast %651 : vector<1x1x32xf32> to vector<1x32xf32>
    %c1_340 = arith.constant 1 : index
    %c0_341 = arith.constant 0 : index
    %c0_342 = arith.constant 0 : index
    %653 = vector.load %arg41[%c1_340, %c0_341, %c0_342] : memref<2x1x32xf32, #tpu.memory_space<vmem>>, vector<1x1x32xf32>
    %654 = vector.shape_cast %653 : vector<1x1x32xf32> to vector<1x32xf32>
    %cst_343 = arith.constant dense<0.000000e+00> : vector<8xf32>
    %655 = vector.multi_reduction <add>, %650, %cst_343 [1] : vector<8x32xf32> to vector<8xf32>
    %656 = vector.shape_cast %655 : vector<8xf32> to vector<8x1xf32>
    %cst_344 = arith.constant 3.200000e+01 : f32
    %657 = vector.broadcast %cst_344 : f32 to vector<8x1xf32>
    %658 = arith.divf %656, %657 : vector<8x1xf32>
    %659 = vector.broadcast %658 : vector<8x1xf32> to vector<8x32xf32>
    %660 = arith.subf %650, %659 : vector<8x32xf32>
    %661 = arith.mulf %660, %660 : vector<8x32xf32>
    %cst_345 = arith.constant dense<0.000000e+00> : vector<8xf32>
    %662 = vector.multi_reduction <add>, %661, %cst_345 [1] : vector<8x32xf32> to vector<8xf32>
    %663 = vector.shape_cast %662 : vector<8xf32> to vector<8x1xf32>
    %cst_346 = arith.constant 3.200000e+01 : f32
    %664 = vector.broadcast %cst_346 : f32 to vector<8x1xf32>
    %665 = arith.divf %663, %664 : vector<8x1xf32>
    %cst_347 = arith.constant 9.99999974E-6 : f32
    %666 = vector.broadcast %cst_347 : f32 to vector<8x1xf32>
    %667 = arith.addf %665, %666 : vector<8x1xf32>
    %668 = math.rsqrt %667 : vector<8x1xf32>
    %669 = vector.broadcast %668 : vector<8x1xf32> to vector<8x32xf32>
    %670 = arith.mulf %660, %669 : vector<8x32xf32>
    %671 = vector.broadcast %652 : vector<1x32xf32> to vector<8x32xf32>
    %672 = arith.mulf %670, %671 : vector<8x32xf32>
    %673 = vector.broadcast %654 : vector<1x32xf32> to vector<8x32xf32>
    %674 = arith.addf %672, %673 : vector<8x32xf32>
    %c1_348 = arith.constant 1 : index
    %c0_349 = arith.constant 0 : index
    %c0_350 = arith.constant 0 : index
    %675 = vector.load %arg32[%c1_348, %c0_349, %c0_350] : memref<2x32x32xf32, #tpu.memory_space<vmem>>, vector<1x32x32xf32>
    %676 = vector.shape_cast %675 : vector<1x32x32xf32> to vector<32x32xf32>
    %c1_351 = arith.constant 1 : index
    %c0_352 = arith.constant 0 : index
    %c0_353 = arith.constant 0 : index
    %677 = vector.load %arg33[%c1_351, %c0_352, %c0_353] : memref<2x1x32xf32, #tpu.memory_space<vmem>>, vector<1x1x32xf32>
    %678 = vector.shape_cast %677 : vector<1x1x32xf32> to vector<1x32xf32>
    %c1_354 = arith.constant 1 : index
    %c0_355 = arith.constant 0 : index
    %c0_356 = arith.constant 0 : index
    %679 = vector.load %arg34[%c1_354, %c0_355, %c0_356] : memref<2x32x32xf32, #tpu.memory_space<vmem>>, vector<1x32x32xf32>
    %680 = vector.shape_cast %679 : vector<1x32x32xf32> to vector<32x32xf32>
    %c1_357 = arith.constant 1 : index
    %c0_358 = arith.constant 0 : index
    %c0_359 = arith.constant 0 : index
    %681 = vector.load %arg35[%c1_357, %c0_358, %c0_359] : memref<2x1x32xf32, #tpu.memory_space<vmem>>, vector<1x1x32xf32>
    %682 = vector.shape_cast %681 : vector<1x1x32xf32> to vector<1x32xf32>
    %c1_360 = arith.constant 1 : index
    %c0_361 = arith.constant 0 : index
    %c0_362 = arith.constant 0 : index
    %683 = vector.load %arg36[%c1_360, %c0_361, %c0_362] : memref<2x32x32xf32, #tpu.memory_space<vmem>>, vector<1x32x32xf32>
    %684 = vector.shape_cast %683 : vector<1x32x32xf32> to vector<32x32xf32>
    %c1_363 = arith.constant 1 : index
    %c0_364 = arith.constant 0 : index
    %c0_365 = arith.constant 0 : index
    %685 = vector.load %arg37[%c1_363, %c0_364, %c0_365] : memref<2x1x32xf32, #tpu.memory_space<vmem>>, vector<1x1x32xf32>
    %686 = vector.shape_cast %685 : vector<1x1x32xf32> to vector<1x32xf32>
    %c1_366 = arith.constant 1 : index
    %c0_367 = arith.constant 0 : index
    %c0_368 = arith.constant 0 : index
    %687 = vector.load %arg38[%c1_366, %c0_367, %c0_368] : memref<2x32x32xf32, #tpu.memory_space<vmem>>, vector<1x32x32xf32>
    %688 = vector.shape_cast %687 : vector<1x32x32xf32> to vector<32x32xf32>
    %c1_369 = arith.constant 1 : index
    %c0_370 = arith.constant 0 : index
    %c0_371 = arith.constant 0 : index
    %689 = vector.load %arg39[%c1_369, %c0_370, %c0_371] : memref<2x1x32xf32, #tpu.memory_space<vmem>>, vector<1x1x32xf32>
    %690 = vector.shape_cast %689 : vector<1x1x32xf32> to vector<1x32xf32>
    %cst_372 = arith.constant dense<0.000000e+00> : vector<8x32xf32>
    %691 = tpu.matmul %674, %676, %cst_372 {dimension_numbers = #tpu.dot_dimension_numbers<[1], [0], [0], [1], [0, 0, 1, 1], [], []>} : vector<8x32xf32>, vector<32x32xf32>, vector<8x32xf32> -> vector<8x32xf32>
    %692 = vector.broadcast %678 : vector<1x32xf32> to vector<8x32xf32>
    %693 = arith.addf %691, %692 : vector<8x32xf32>
    %cst_373 = arith.constant 0.353553385 : f32
    %694 = vector.broadcast %cst_373 : f32 to vector<8x32xf32>
    %695 = arith.mulf %693, %694 : vector<8x32xf32>
    %cst_374 = arith.constant dense<0.000000e+00> : vector<8x32xf32>
    %696 = tpu.matmul %347, %680, %cst_374 {dimension_numbers = #tpu.dot_dimension_numbers<[1], [0], [0], [1], [0, 0, 1, 1], [], []>} : vector<8x32xf32>, vector<32x32xf32>, vector<8x32xf32> -> vector<8x32xf32>
    %697 = vector.broadcast %682 : vector<1x32xf32> to vector<8x32xf32>
    %698 = arith.addf %696, %697 : vector<8x32xf32>
    %cst_375 = arith.constant dense<0.000000e+00> : vector<8x32xf32>
    %699 = tpu.matmul %347, %684, %cst_375 {dimension_numbers = #tpu.dot_dimension_numbers<[1], [0], [0], [1], [0, 0, 1, 1], [], []>} : vector<8x32xf32>, vector<32x32xf32>, vector<8x32xf32> -> vector<8x32xf32>
    %700 = vector.broadcast %686 : vector<1x32xf32> to vector<8x32xf32>
    %701 = arith.addf %699, %700 : vector<8x32xf32>
    %cst_376 = arith.constant 0.000000e+00 : f32
    %702 = vector.broadcast %cst_376 : f32 to vector<8x32xf32>
    %703 = vector.extract_strided_slice %695 {offsets = [0, 0], sizes = [8, 8], strides = [1, 1]} : vector<8x32xf32> to vector<8x8xf32>
    %704 = vector.extract_strided_slice %698 {offsets = [0, 0], sizes = [8, 8], strides = [1, 1]} : vector<8x32xf32> to vector<8x8xf32>
    %705 = vector.extract_strided_slice %701 {offsets = [0, 0], sizes = [8, 8], strides = [1, 1]} : vector<8x32xf32> to vector<8x8xf32>
    %cst_377 = arith.constant dense<0.000000e+00> : vector<8x8xf32>
    %706 = tpu.matmul %703, %704, %cst_377 {dimension_numbers = #tpu.dot_dimension_numbers<[1], [1], [0], [0], [0, 0, 1, 0], [], []>} : vector<8x8xf32>, vector<8x8xf32>, vector<8x8xf32> -> vector<8x8xf32>
    %cst_378 = arith.constant dense<0xFF800000> : vector<8xf32>
    %707 = vector.multi_reduction <maximumf>, %706, %cst_378 [1] : vector<8x8xf32> to vector<8xf32>
    %708 = vector.shape_cast %707 : vector<8xf32> to vector<8x1xf32>
    %709 = vector.broadcast %708 : vector<8x1xf32> to vector<8x8xf32>
    %710 = arith.subf %706, %709 : vector<8x8xf32>
    %711 = math.exp %710 : vector<8x8xf32>
    %cst_379 = arith.constant dense<0.000000e+00> : vector<8xf32>
    %712 = vector.multi_reduction <add>, %711, %cst_379 [1] : vector<8x8xf32> to vector<8xf32>
    %713 = vector.shape_cast %712 : vector<8xf32> to vector<8x1xf32>
    %714 = tpu.reciprocal %713 {approx = true} : vector<8x1xf32> -> vector<8x1xf32>
    %715 = vector.broadcast %714 : vector<8x1xf32> to vector<8x8xf32>
    %716 = arith.mulf %711, %715 : vector<8x8xf32>
    %cst_380 = arith.constant dense<0.000000e+00> : vector<8x8xf32>
    %717 = tpu.matmul %716, %705, %cst_380 {dimension_numbers = #tpu.dot_dimension_numbers<[1], [0], [0], [1], [0, 0, 1, 1], [], []>} : vector<8x8xf32>, vector<8x8xf32>, vector<8x8xf32> -> vector<8x8xf32>
    %718 = vector.extract_strided_slice %688 {offsets = [0, 0], sizes = [8, 32], strides = [1, 1]} : vector<32x32xf32> to vector<8x32xf32>
    %cst_381 = arith.constant dense<0.000000e+00> : vector<8x32xf32>
    %719 = tpu.matmul %717, %718, %cst_381 {dimension_numbers = #tpu.dot_dimension_numbers<[1], [0], [0], [1], [0, 0, 1, 1], [], []>} : vector<8x8xf32>, vector<8x32xf32>, vector<8x32xf32> -> vector<8x32xf32>
    %720 = arith.addf %702, %719 : vector<8x32xf32>
    %721 = vector.extract_strided_slice %695 {offsets = [0, 8], sizes = [8, 8], strides = [1, 1]} : vector<8x32xf32> to vector<8x8xf32>
    %722 = vector.extract_strided_slice %698 {offsets = [0, 8], sizes = [8, 8], strides = [1, 1]} : vector<8x32xf32> to vector<8x8xf32>
    %723 = vector.extract_strided_slice %701 {offsets = [0, 8], sizes = [8, 8], strides = [1, 1]} : vector<8x32xf32> to vector<8x8xf32>
    %cst_382 = arith.constant dense<0.000000e+00> : vector<8x8xf32>
    %724 = tpu.matmul %721, %722, %cst_382 {dimension_numbers = #tpu.dot_dimension_numbers<[1], [1], [0], [0], [0, 0, 1, 0], [], []>} : vector<8x8xf32>, vector<8x8xf32>, vector<8x8xf32> -> vector<8x8xf32>
    %cst_383 = arith.constant dense<0xFF800000> : vector<8xf32>
    %725 = vector.multi_reduction <maximumf>, %724, %cst_383 [1] : vector<8x8xf32> to vector<8xf32>
    %726 = vector.shape_cast %725 : vector<8xf32> to vector<8x1xf32>
    %727 = vector.broadcast %726 : vector<8x1xf32> to vector<8x8xf32>
    %728 = arith.subf %724, %727 : vector<8x8xf32>
    %729 = math.exp %728 : vector<8x8xf32>
    %cst_384 = arith.constant dense<0.000000e+00> : vector<8xf32>
    %730 = vector.multi_reduction <add>, %729, %cst_384 [1] : vector<8x8xf32> to vector<8xf32>
    %731 = vector.shape_cast %730 : vector<8xf32> to vector<8x1xf32>
    %732 = tpu.reciprocal %731 {approx = true} : vector<8x1xf32> -> vector<8x1xf32>
    %733 = vector.broadcast %732 : vector<8x1xf32> to vector<8x8xf32>
    %734 = arith.mulf %729, %733 : vector<8x8xf32>
    %cst_385 = arith.constant dense<0.000000e+00> : vector<8x8xf32>
    %735 = tpu.matmul %734, %723, %cst_385 {dimension_numbers = #tpu.dot_dimension_numbers<[1], [0], [0], [1], [0, 0, 1, 1], [], []>} : vector<8x8xf32>, vector<8x8xf32>, vector<8x8xf32> -> vector<8x8xf32>
    %736 = vector.extract_strided_slice %688 {offsets = [8, 0], sizes = [8, 32], strides = [1, 1]} : vector<32x32xf32> to vector<8x32xf32>
    %cst_386 = arith.constant dense<0.000000e+00> : vector<8x32xf32>
    %737 = tpu.matmul %735, %736, %cst_386 {dimension_numbers = #tpu.dot_dimension_numbers<[1], [0], [0], [1], [0, 0, 1, 1], [], []>} : vector<8x8xf32>, vector<8x32xf32>, vector<8x32xf32> -> vector<8x32xf32>
    %738 = arith.addf %720, %737 : vector<8x32xf32>
    %739 = vector.extract_strided_slice %695 {offsets = [0, 16], sizes = [8, 8], strides = [1, 1]} : vector<8x32xf32> to vector<8x8xf32>
    %740 = vector.extract_strided_slice %698 {offsets = [0, 16], sizes = [8, 8], strides = [1, 1]} : vector<8x32xf32> to vector<8x8xf32>
    %741 = vector.extract_strided_slice %701 {offsets = [0, 16], sizes = [8, 8], strides = [1, 1]} : vector<8x32xf32> to vector<8x8xf32>
    %cst_387 = arith.constant dense<0.000000e+00> : vector<8x8xf32>
    %742 = tpu.matmul %739, %740, %cst_387 {dimension_numbers = #tpu.dot_dimension_numbers<[1], [1], [0], [0], [0, 0, 1, 0], [], []>} : vector<8x8xf32>, vector<8x8xf32>, vector<8x8xf32> -> vector<8x8xf32>
    %cst_388 = arith.constant dense<0xFF800000> : vector<8xf32>
    %743 = vector.multi_reduction <maximumf>, %742, %cst_388 [1] : vector<8x8xf32> to vector<8xf32>
    %744 = vector.shape_cast %743 : vector<8xf32> to vector<8x1xf32>
    %745 = vector.broadcast %744 : vector<8x1xf32> to vector<8x8xf32>
    %746 = arith.subf %742, %745 : vector<8x8xf32>
    %747 = math.exp %746 : vector<8x8xf32>
    %cst_389 = arith.constant dense<0.000000e+00> : vector<8xf32>
    %748 = vector.multi_reduction <add>, %747, %cst_389 [1] : vector<8x8xf32> to vector<8xf32>
    %749 = vector.shape_cast %748 : vector<8xf32> to vector<8x1xf32>
    %750 = tpu.reciprocal %749 {approx = true} : vector<8x1xf32> -> vector<8x1xf32>
    %751 = vector.broadcast %750 : vector<8x1xf32> to vector<8x8xf32>
    %752 = arith.mulf %747, %751 : vector<8x8xf32>
    %cst_390 = arith.constant dense<0.000000e+00> : vector<8x8xf32>
    %753 = tpu.matmul %752, %741, %cst_390 {dimension_numbers = #tpu.dot_dimension_numbers<[1], [0], [0], [1], [0, 0, 1, 1], [], []>} : vector<8x8xf32>, vector<8x8xf32>, vector<8x8xf32> -> vector<8x8xf32>
    %754 = vector.extract_strided_slice %688 {offsets = [16, 0], sizes = [8, 32], strides = [1, 1]} : vector<32x32xf32> to vector<8x32xf32>
    %cst_391 = arith.constant dense<0.000000e+00> : vector<8x32xf32>
    %755 = tpu.matmul %753, %754, %cst_391 {dimension_numbers = #tpu.dot_dimension_numbers<[1], [0], [0], [1], [0, 0, 1, 1], [], []>} : vector<8x8xf32>, vector<8x32xf32>, vector<8x32xf32> -> vector<8x32xf32>
    %756 = arith.addf %738, %755 : vector<8x32xf32>
    %757 = vector.extract_strided_slice %695 {offsets = [0, 24], sizes = [8, 8], strides = [1, 1]} : vector<8x32xf32> to vector<8x8xf32>
    %758 = vector.extract_strided_slice %698 {offsets = [0, 24], sizes = [8, 8], strides = [1, 1]} : vector<8x32xf32> to vector<8x8xf32>
    %759 = vector.extract_strided_slice %701 {offsets = [0, 24], sizes = [8, 8], strides = [1, 1]} : vector<8x32xf32> to vector<8x8xf32>
    %cst_392 = arith.constant dense<0.000000e+00> : vector<8x8xf32>
    %760 = tpu.matmul %757, %758, %cst_392 {dimension_numbers = #tpu.dot_dimension_numbers<[1], [1], [0], [0], [0, 0, 1, 0], [], []>} : vector<8x8xf32>, vector<8x8xf32>, vector<8x8xf32> -> vector<8x8xf32>
    %cst_393 = arith.constant dense<0xFF800000> : vector<8xf32>
    %761 = vector.multi_reduction <maximumf>, %760, %cst_393 [1] : vector<8x8xf32> to vector<8xf32>
    %762 = vector.shape_cast %761 : vector<8xf32> to vector<8x1xf32>
    %763 = vector.broadcast %762 : vector<8x1xf32> to vector<8x8xf32>
    %764 = arith.subf %760, %763 : vector<8x8xf32>
    %765 = math.exp %764 : vector<8x8xf32>
    %cst_394 = arith.constant dense<0.000000e+00> : vector<8xf32>
    %766 = vector.multi_reduction <add>, %765, %cst_394 [1] : vector<8x8xf32> to vector<8xf32>
    %767 = vector.shape_cast %766 : vector<8xf32> to vector<8x1xf32>
    %768 = tpu.reciprocal %767 {approx = true} : vector<8x1xf32> -> vector<8x1xf32>
    %769 = vector.broadcast %768 : vector<8x1xf32> to vector<8x8xf32>
    %770 = arith.mulf %765, %769 : vector<8x8xf32>
    %cst_395 = arith.constant dense<0.000000e+00> : vector<8x8xf32>
    %771 = tpu.matmul %770, %759, %cst_395 {dimension_numbers = #tpu.dot_dimension_numbers<[1], [0], [0], [1], [0, 0, 1, 1], [], []>} : vector<8x8xf32>, vector<8x8xf32>, vector<8x8xf32> -> vector<8x8xf32>
    %772 = vector.extract_strided_slice %688 {offsets = [24, 0], sizes = [8, 32], strides = [1, 1]} : vector<32x32xf32> to vector<8x32xf32>
    %cst_396 = arith.constant dense<0.000000e+00> : vector<8x32xf32>
    %773 = tpu.matmul %771, %772, %cst_396 {dimension_numbers = #tpu.dot_dimension_numbers<[1], [0], [0], [1], [0, 0, 1, 1], [], []>} : vector<8x8xf32>, vector<8x32xf32>, vector<8x32xf32> -> vector<8x32xf32>
    %774 = arith.addf %756, %773 : vector<8x32xf32>
    %775 = vector.broadcast %690 : vector<1x32xf32> to vector<8x32xf32>
    %776 = arith.addf %774, %775 : vector<8x32xf32>
    %777 = arith.addf %674, %776 : vector<8x32xf32>
    %c1_397 = arith.constant 1 : index
    %c0_398 = arith.constant 0 : index
    %c0_399 = arith.constant 0 : index
    %778 = vector.load %arg42[%c1_397, %c0_398, %c0_399] : memref<2x1x32xf32, #tpu.memory_space<vmem>>, vector<1x1x32xf32>
    %779 = vector.shape_cast %778 : vector<1x1x32xf32> to vector<1x32xf32>
    %c1_400 = arith.constant 1 : index
    %c0_401 = arith.constant 0 : index
    %c0_402 = arith.constant 0 : index
    %780 = vector.load %arg43[%c1_400, %c0_401, %c0_402] : memref<2x1x32xf32, #tpu.memory_space<vmem>>, vector<1x1x32xf32>
    %781 = vector.shape_cast %780 : vector<1x1x32xf32> to vector<1x32xf32>
    %cst_403 = arith.constant dense<0.000000e+00> : vector<8xf32>
    %782 = vector.multi_reduction <add>, %777, %cst_403 [1] : vector<8x32xf32> to vector<8xf32>
    %783 = vector.shape_cast %782 : vector<8xf32> to vector<8x1xf32>
    %cst_404 = arith.constant 3.200000e+01 : f32
    %784 = vector.broadcast %cst_404 : f32 to vector<8x1xf32>
    %785 = arith.divf %783, %784 : vector<8x1xf32>
    %786 = vector.broadcast %785 : vector<8x1xf32> to vector<8x32xf32>
    %787 = arith.subf %777, %786 : vector<8x32xf32>
    %788 = arith.mulf %787, %787 : vector<8x32xf32>
    %cst_405 = arith.constant dense<0.000000e+00> : vector<8xf32>
    %789 = vector.multi_reduction <add>, %788, %cst_405 [1] : vector<8x32xf32> to vector<8xf32>
    %790 = vector.shape_cast %789 : vector<8xf32> to vector<8x1xf32>
    %cst_406 = arith.constant 3.200000e+01 : f32
    %791 = vector.broadcast %cst_406 : f32 to vector<8x1xf32>
    %792 = arith.divf %790, %791 : vector<8x1xf32>
    %cst_407 = arith.constant 9.99999974E-6 : f32
    %793 = vector.broadcast %cst_407 : f32 to vector<8x1xf32>
    %794 = arith.addf %792, %793 : vector<8x1xf32>
    %795 = math.rsqrt %794 : vector<8x1xf32>
    %796 = vector.broadcast %795 : vector<8x1xf32> to vector<8x32xf32>
    %797 = arith.mulf %787, %796 : vector<8x32xf32>
    %798 = vector.broadcast %779 : vector<1x32xf32> to vector<8x32xf32>
    %799 = arith.mulf %797, %798 : vector<8x32xf32>
    %800 = vector.broadcast %781 : vector<1x32xf32> to vector<8x32xf32>
    %801 = arith.addf %799, %800 : vector<8x32xf32>
    %c1_408 = arith.constant 1 : index
    %c0_409 = arith.constant 0 : index
    %c0_410 = arith.constant 0 : index
    %802 = vector.load %arg46[%c1_408, %c0_409, %c0_410] : memref<2x32x2048xf32, #tpu.memory_space<vmem>>, vector<1x32x2048xf32>
    %803 = vector.shape_cast %802 : vector<1x32x2048xf32> to vector<32x2048xf32>
    %c1_411 = arith.constant 1 : index
    %c0_412 = arith.constant 0 : index
    %c0_413 = arith.constant 0 : index
    %804 = vector.load %arg47[%c1_411, %c0_412, %c0_413] : memref<2x1x2048xf32, #tpu.memory_space<vmem>>, vector<1x1x2048xf32>
    %805 = vector.shape_cast %804 : vector<1x1x2048xf32> to vector<1x2048xf32>
    %c1_414 = arith.constant 1 : index
    %c0_415 = arith.constant 0 : index
    %c0_416 = arith.constant 0 : index
    %806 = vector.load %arg48[%c1_414, %c0_415, %c0_416] : memref<2x2048x32xf32, #tpu.memory_space<vmem>>, vector<1x2048x32xf32>
    %807 = vector.shape_cast %806 : vector<1x2048x32xf32> to vector<2048x32xf32>
    %c1_417 = arith.constant 1 : index
    %c0_418 = arith.constant 0 : index
    %c0_419 = arith.constant 0 : index
    %808 = vector.load %arg49[%c1_417, %c0_418, %c0_419] : memref<2x1x32xf32, #tpu.memory_space<vmem>>, vector<1x1x32xf32>
    %809 = vector.shape_cast %808 : vector<1x1x32xf32> to vector<1x32xf32>
    %cst_420 = arith.constant dense<0.000000e+00> : vector<8x2048xf32>
    %810 = tpu.matmul %801, %803, %cst_420 {dimension_numbers = #tpu.dot_dimension_numbers<[1], [0], [0], [1], [0, 0, 1, 1], [], []>} : vector<8x32xf32>, vector<32x2048xf32>, vector<8x2048xf32> -> vector<8x2048xf32>
    %811 = vector.broadcast %805 : vector<1x2048xf32> to vector<8x2048xf32>
    %812 = arith.addf %810, %811 : vector<8x2048xf32>
    %cst_421 = arith.constant 0.000000e+00 : f32
    %813 = vector.broadcast %cst_421 : f32 to vector<8x2048xf32>
    %814 = arith.maximumf %812, %813 : vector<8x2048xf32>
    %cst_422 = arith.constant dense<0.000000e+00> : vector<8x32xf32>
    %815 = tpu.matmul %814, %807, %cst_422 {dimension_numbers = #tpu.dot_dimension_numbers<[1], [0], [0], [1], [0, 0, 1, 1], [], []>} : vector<8x2048xf32>, vector<2048x32xf32>, vector<8x32xf32> -> vector<8x32xf32>
    %816 = vector.broadcast %809 : vector<1x32xf32> to vector<8x32xf32>
    %817 = arith.addf %815, %816 : vector<8x32xf32>
    %818 = arith.addf %801, %817 : vector<8x32xf32>
    %c1_423 = arith.constant 1 : index
    %c0_424 = arith.constant 0 : index
    %c0_425 = arith.constant 0 : index
    %819 = vector.load %arg44[%c1_423, %c0_424, %c0_425] : memref<2x1x32xf32, #tpu.memory_space<vmem>>, vector<1x1x32xf32>
    %820 = vector.shape_cast %819 : vector<1x1x32xf32> to vector<1x32xf32>
    %c1_426 = arith.constant 1 : index
    %c0_427 = arith.constant 0 : index
    %c0_428 = arith.constant 0 : index
    %821 = vector.load %arg45[%c1_426, %c0_427, %c0_428] : memref<2x1x32xf32, #tpu.memory_space<vmem>>, vector<1x1x32xf32>
    %822 = vector.shape_cast %821 : vector<1x1x32xf32> to vector<1x32xf32>
    %cst_429 = arith.constant dense<0.000000e+00> : vector<8xf32>
    %823 = vector.multi_reduction <add>, %818, %cst_429 [1] : vector<8x32xf32> to vector<8xf32>
    %824 = vector.shape_cast %823 : vector<8xf32> to vector<8x1xf32>
    %cst_430 = arith.constant 3.200000e+01 : f32
    %825 = vector.broadcast %cst_430 : f32 to vector<8x1xf32>
    %826 = arith.divf %824, %825 : vector<8x1xf32>
    %827 = vector.broadcast %826 : vector<8x1xf32> to vector<8x32xf32>
    %828 = arith.subf %818, %827 : vector<8x32xf32>
    %829 = arith.mulf %828, %828 : vector<8x32xf32>
    %cst_431 = arith.constant dense<0.000000e+00> : vector<8xf32>
    %830 = vector.multi_reduction <add>, %829, %cst_431 [1] : vector<8x32xf32> to vector<8xf32>
    %831 = vector.shape_cast %830 : vector<8xf32> to vector<8x1xf32>
    %cst_432 = arith.constant 3.200000e+01 : f32
    %832 = vector.broadcast %cst_432 : f32 to vector<8x1xf32>
    %833 = arith.divf %831, %832 : vector<8x1xf32>
    %cst_433 = arith.constant 9.99999974E-6 : f32
    %834 = vector.broadcast %cst_433 : f32 to vector<8x1xf32>
    %835 = arith.addf %833, %834 : vector<8x1xf32>
    %836 = math.rsqrt %835 : vector<8x1xf32>
    %837 = vector.broadcast %836 : vector<8x1xf32> to vector<8x32xf32>
    %838 = arith.mulf %828, %837 : vector<8x32xf32>
    %839 = vector.broadcast %820 : vector<1x32xf32> to vector<8x32xf32>
    %840 = arith.mulf %838, %839 : vector<8x32xf32>
    %841 = vector.broadcast %822 : vector<1x32xf32> to vector<8x32xf32>
    %842 = arith.addf %840, %841 : vector<8x32xf32>
    %c0_434 = arith.constant 0 : index
    %c0_435 = arith.constant 0 : index
    %843 = vector.load %arg6[%c0_434, %c0_435] : memref<32x4xf32, #tpu.memory_space<vmem>>, vector<32x4xf32>
    %cst_436 = arith.constant dense<0.000000e+00> : vector<8x4xf32>
    %844 = tpu.matmul %842, %843, %cst_436 {dimension_numbers = #tpu.dot_dimension_numbers<[1], [0], [0], [1], [0, 0, 1, 1], [], []>} : vector<8x32xf32>, vector<32x4xf32>, vector<8x4xf32> -> vector<8x4xf32>
    %c0_437 = arith.constant 0 : index
    %c0_438 = arith.constant 0 : index
    %845 = vector.load %arg7[%c0_437, %c0_438] : memref<1x4xf32, #tpu.memory_space<vmem>>, vector<1x4xf32>
    %846 = vector.broadcast %845 : vector<1x4xf32> to vector<8x4xf32>
    %847 = arith.addf %844, %846 : vector<8x4xf32>
    %c0_439 = arith.constant 0 : index
    %c0_440 = arith.constant 0 : index
    %c0_441 = arith.constant 0 : index
    %848 = vector.load %arg50[%c0_439, %c0_440, %c0_441] : memref<1x8x4xf32, #tpu.memory_space<vmem>>, vector<1x8x4xf32>
    %849 = vector.shape_cast %848 : vector<1x8x4xf32> to vector<8x4xf32>
    %850 = vector.shape_cast %847 : vector<8x4xf32> to vector<1x8x4xf32>
    tpu.vector_store %arg50[%c0_439, %c0_440, %c0_441], %850 {strides = array<i32>} : memref<1x8x4xf32, #tpu.memory_space<vmem>>, vector<1x8x4xf32>,
    return
  }
  func.func @transform_0(%arg0: i32) -> (i32, i32, i32) {
    %c0_i32 = arith.constant 0 : i32
    %c0_i32_0 = arith.constant 0 : i32
    %c0_i32_1 = arith.constant 0 : i32
    return %arg0, %c0_i32, %c0_i32_0 : i32, i32, i32
  }
  func.func @transform_1(%arg0: i32) -> (i32, i32) {
    %c0_i32 = arith.constant 0 : i32
    %c0_i32_0 = arith.constant 0 : i32
    %c0_i32_1 = arith.constant 0 : i32
    return %c0_i32, %c0_i32_0 : i32, i32
  }
  func.func @transform_2(%arg0: i32) -> (i32, i32) {
    %c0_i32 = arith.constant 0 : i32
    %c0_i32_0 = arith.constant 0 : i32
    %c0_i32_1 = arith.constant 0 : i32
    return %c0_i32, %c0_i32_0 : i32, i32
  }
  func.func @transform_3(%arg0: i32) -> (i32, i32) {
    %c0_i32 = arith.constant 0 : i32
    %c0_i32_0 = arith.constant 0 : i32
    %c0_i32_1 = arith.constant 0 : i32
    return %c0_i32, %c0_i32_0 : i32, i32
  }
  func.func @transform_4(%arg0: i32) -> (i32, i32) {
    %c0_i32 = arith.constant 0 : i32
    %c0_i32_0 = arith.constant 0 : i32
    %c0_i32_1 = arith.constant 0 : i32
    return %c0_i32, %c0_i32_0 : i32, i32
  }
  func.func @transform_5(%arg0: i32) -> (i32, i32) {
    %c0_i32 = arith.constant 0 : i32
    %c0_i32_0 = arith.constant 0 : i32
    %c0_i32_1 = arith.constant 0 : i32
    return %c0_i32, %c0_i32_0 : i32, i32
  }
  func.func @transform_6(%arg0: i32) -> (i32, i32) {
    %c0_i32 = arith.constant 0 : i32
    %c0_i32_0 = arith.constant 0 : i32
    %c0_i32_1 = arith.constant 0 : i32
    return %c0_i32, %c0_i32_0 : i32, i32
  }
  func.func @transform_7(%arg0: i32) -> (i32, i32, i32) {
    %c0_i32 = arith.constant 0 : i32
    %c0_i32_0 = arith.constant 0 : i32
    %c0_i32_1 = arith.constant 0 : i32
    %c0_i32_2 = arith.constant 0 : i32
    return %c0_i32, %c0_i32_0, %c0_i32_1 : i32, i32, i32
  }
  func.func @transform_8(%arg0: i32) -> (i32, i32, i32) {
    %c0_i32 = arith.constant 0 : i32
    %c0_i32_0 = arith.constant 0 : i32
    %c0_i32_1 = arith.constant 0 : i32
    %c0_i32_2 = arith.constant 0 : i32
    return %c0_i32, %c0_i32_0, %c0_i32_1 : i32, i32, i32
  }
  func.func @transform_9(%arg0: i32) -> (i32, i32, i32) {
    %c0_i32 = arith.constant 0 : i32
    %c0_i32_0 = arith.constant 0 : i32
    %c0_i32_1 = arith.constant 0 : i32
    %c0_i32_2 = arith.constant 0 : i32
    return %c0_i32, %c0_i32_0, %c0_i32_1 : i32, i32, i32
  }
  func.func @transform_10(%arg0: i32) -> (i32, i32, i32) {
    %c0_i32 = arith.constant 0 : i32
    %c0_i32_0 = arith.constant 0 : i32
    %c0_i32_1 = arith.constant 0 : i32
    %c0_i32_2 = arith.constant 0 : i32
    return %c0_i32, %c0_i32_0, %c0_i32_1 : i32, i32, i32
  }
  func.func @transform_11(%arg0: i32) -> (i32, i32, i32) {
    %c0_i32 = arith.constant 0 : i32
    %c0_i32_0 = arith.constant 0 : i32
    %c0_i32_1 = arith.constant 0 : i32
    %c0_i32_2 = arith.constant 0 : i32
    return %c0_i32, %c0_i32_0, %c0_i32_1 : i32, i32, i32
  }
  func.func @transform_12(%arg0: i32) -> (i32, i32, i32) {
    %c0_i32 = arith.constant 0 : i32
    %c0_i32_0 = arith.constant 0 : i32
    %c0_i32_1 = arith.constant 0 : i32
    %c0_i32_2 = arith.constant 0 : i32
    return %c0_i32, %c0_i32_0, %c0_i32_1 : i32, i32, i32
  }
  func.func @transform_13(%arg0: i32) -> (i32, i32, i32) {
    %c0_i32 = arith.constant 0 : i32
    %c0_i32_0 = arith.constant 0 : i32
    %c0_i32_1 = arith.constant 0 : i32
    %c0_i32_2 = arith.constant 0 : i32
    return %c0_i32, %c0_i32_0, %c0_i32_1 : i32, i32, i32
  }
  func.func @transform_14(%arg0: i32) -> (i32, i32, i32) {
    %c0_i32 = arith.constant 0 : i32
    %c0_i32_0 = arith.constant 0 : i32
    %c0_i32_1 = arith.constant 0 : i32
    %c0_i32_2 = arith.constant 0 : i32
    return %c0_i32, %c0_i32_0, %c0_i32_1 : i32, i32, i32
  }
  func.func @transform_15(%arg0: i32) -> (i32, i32, i32) {
    %c0_i32 = arith.constant 0 : i32
    %c0_i32_0 = arith.constant 0 : i32
    %c0_i32_1 = arith.constant 0 : i32
    %c0_i32_2 = arith.constant 0 : i32
    return %c0_i32, %c0_i32_0, %c0_i32_1 : i32, i32, i32
  }
  func.func @transform_16(%arg0: i32) -> (i32, i32, i32) {
    %c0_i32 = arith.constant 0 : i32
    %c0_i32_0 = arith.constant 0 : i32
    %c0_i32_1 = arith.constant 0 : i32
    %c0_i32_2 = arith.constant 0 : i32
    return %c0_i32, %c0_i32_0, %c0_i32_1 : i32, i32, i32
  }
  func.func @transform_17(%arg0: i32) -> (i32, i32, i32) {
    %c0_i32 = arith.constant 0 : i32
    %c0_i32_0 = arith.constant 0 : i32
    %c0_i32_1 = arith.constant 0 : i32
    %c0_i32_2 = arith.constant 0 : i32
    return %c0_i32, %c0_i32_0, %c0_i32_1 : i32, i32, i32
  }
  func.func @transform_18(%arg0: i32) -> (i32, i32, i32) {
    %c0_i32 = arith.constant 0 : i32
    %c0_i32_0 = arith.constant 0 : i32
    %c0_i32_1 = arith.constant 0 : i32
    %c0_i32_2 = arith.constant 0 : i32
    return %c0_i32, %c0_i32_0, %c0_i32_1 : i32, i32, i32
  }
  func.func @transform_19(%arg0: i32) -> (i32, i32, i32) {
    %c0_i32 = arith.constant 0 : i32
    %c0_i32_0 = arith.constant 0 : i32
    %c0_i32_1 = arith.constant 0 : i32
    %c0_i32_2 = arith.constant 0 : i32
    return %c0_i32, %c0_i32_0, %c0_i32_1 : i32, i32, i32
  }
  func.func @transform_20(%arg0: i32) -> (i32, i32, i32) {
    %c0_i32 = arith.constant 0 : i32
    %c0_i32_0 = arith.constant 0 : i32
    %c0_i32_1 = arith.constant 0 : i32
    %c0_i32_2 = arith.constant 0 : i32
    return %c0_i32, %c0_i32_0, %c0_i32_1 : i32, i32, i32
  }
  func.func @transform_21(%arg0: i32) -> (i32, i32, i32) {
    %c0_i32 = arith.constant 0 : i32
    %c0_i32_0 = arith.constant 0 : i32
    %c0_i32_1 = arith.constant 0 : i32
    %c0_i32_2 = arith.constant 0 : i32
    return %c0_i32, %c0_i32_0, %c0_i32_1 : i32, i32, i32
  }
  func.func @transform_22(%arg0: i32) -> (i32, i32, i32) {
    %c0_i32 = arith.constant 0 : i32
    %c0_i32_0 = arith.constant 0 : i32
    %c0_i32_1 = arith.constant 0 : i32
    %c0_i32_2 = arith.constant 0 : i32
    return %c0_i32, %c0_i32_0, %c0_i32_1 : i32, i32, i32
  }
  func.func @transform_23(%arg0: i32) -> (i32, i32, i32) {
    %c0_i32 = arith.constant 0 : i32
    %c0_i32_0 = arith.constant 0 : i32
    %c0_i32_1 = arith.constant 0 : i32
    %c0_i32_2 = arith.constant 0 : i32
    return %c0_i32, %c0_i32_0, %c0_i32_1 : i32, i32, i32
  }
  func.func @transform_24(%arg0: i32) -> (i32, i32, i32) {
    %c0_i32 = arith.constant 0 : i32
    %c0_i32_0 = arith.constant 0 : i32
    %c0_i32_1 = arith.constant 0 : i32
    %c0_i32_2 = arith.constant 0 : i32
    return %c0_i32, %c0_i32_0, %c0_i32_1 : i32, i32, i32
  }
  func.func @transform_25(%arg0: i32) -> (i32, i32, i32) {
    %c0_i32 = arith.constant 0 : i32
    %c0_i32_0 = arith.constant 0 : i32
    %c0_i32_1 = arith.constant 0 : i32
    %c0_i32_2 = arith.constant 0 : i32
    return %c0_i32, %c0_i32_0, %c0_i32_1 : i32, i32, i32
  }
  func.func @transform_26(%arg0: i32) -> (i32, i32, i32) {
    %c0_i32 = arith.constant 0 : i32
    %c0_i32_0 = arith.constant 0 : i32
    %c0_i32_1 = arith.constant 0 : i32
    %c0_i32_2 = arith.constant 0 : i32
    return %c0_i32, %c0_i32_0, %c0_i32_1 : i32, i32, i32
  }
  func.func @transform_27(%arg0: i32) -> (i32, i32, i32) {
    %c0_i32 = arith.constant 0 : i32
    %c0_i32_0 = arith.constant 0 : i32
    %c0_i32_1 = arith.constant 0 : i32
    %c0_i32_2 = arith.constant 0 : i32
    return %c0_i32, %c0_i32_0, %c0_i32_1 : i32, i32, i32
  }
  func.func @transform_28(%arg0: i32) -> (i32, i32, i32) {
    %c0_i32 = arith.constant 0 : i32
    %c0_i32_0 = arith.constant 0 : i32
    %c0_i32_1 = arith.constant 0 : i32
    %c0_i32_2 = arith.constant 0 : i32
    return %c0_i32, %c0_i32_0, %c0_i32_1 : i32, i32, i32
  }
  func.func @transform_29(%arg0: i32) -> (i32, i32, i32) {
    %c0_i32 = arith.constant 0 : i32
    %c0_i32_0 = arith.constant 0 : i32
    %c0_i32_1 = arith.constant 0 : i32
    %c0_i32_2 = arith.constant 0 : i32
    return %c0_i32, %c0_i32_0, %c0_i32_1 : i32, i32, i32
  }
  func.func @transform_30(%arg0: i32) -> (i32, i32, i32) {
    %c0_i32 = arith.constant 0 : i32
    %c0_i32_0 = arith.constant 0 : i32
    %c0_i32_1 = arith.constant 0 : i32
    %c0_i32_2 = arith.constant 0 : i32
    return %c0_i32, %c0_i32_0, %c0_i32_1 : i32, i32, i32
  }
  func.func @transform_31(%arg0: i32) -> (i32, i32, i32) {
    %c0_i32 = arith.constant 0 : i32
    %c0_i32_0 = arith.constant 0 : i32
    %c0_i32_1 = arith.constant 0 : i32
    %c0_i32_2 = arith.constant 0 : i32
    return %c0_i32, %c0_i32_0, %c0_i32_1 : i32, i32, i32
  }
  func.func @transform_32(%arg0: i32) -> (i32, i32, i32) {
    %c0_i32 = arith.constant 0 : i32
    %c0_i32_0 = arith.constant 0 : i32
    %c0_i32_1 = arith.constant 0 : i32
    %c0_i32_2 = arith.constant 0 : i32
    return %c0_i32, %c0_i32_0, %c0_i32_1 : i32, i32, i32
  }
  func.func @transform_33(%arg0: i32) -> (i32, i32, i32) {
    %c0_i32 = arith.constant 0 : i32
    %c0_i32_0 = arith.constant 0 : i32
    %c0_i32_1 = arith.constant 0 : i32
    %c0_i32_2 = arith.constant 0 : i32
    return %c0_i32, %c0_i32_0, %c0_i32_1 : i32, i32, i32
  }
  func.func @transform_34(%arg0: i32) -> (i32, i32, i32) {
    %c0_i32 = arith.constant 0 : i32
    %c0_i32_0 = arith.constant 0 : i32
    %c0_i32_1 = arith.constant 0 : i32
    %c0_i32_2 = arith.constant 0 : i32
    return %c0_i32, %c0_i32_0, %c0_i32_1 : i32, i32, i32
  }
  func.func @transform_35(%arg0: i32) -> (i32, i32, i32) {
    %c0_i32 = arith.constant 0 : i32
    %c0_i32_0 = arith.constant 0 : i32
    %c0_i32_1 = arith.constant 0 : i32
    %c0_i32_2 = arith.constant 0 : i32
    return %c0_i32, %c0_i32_0, %c0_i32_1 : i32, i32, i32
  }
  func.func @transform_36(%arg0: i32) -> (i32, i32, i32) {
    %c0_i32 = arith.constant 0 : i32
    %c0_i32_0 = arith.constant 0 : i32
    %c0_i32_1 = arith.constant 0 : i32
    %c0_i32_2 = arith.constant 0 : i32
    return %c0_i32, %c0_i32_0, %c0_i32_1 : i32, i32, i32
  }
  func.func @transform_37(%arg0: i32) -> (i32, i32, i32) {
    %c0_i32 = arith.constant 0 : i32
    %c0_i32_0 = arith.constant 0 : i32
    %c0_i32_1 = arith.constant 0 : i32
    %c0_i32_2 = arith.constant 0 : i32
    return %c0_i32, %c0_i32_0, %c0_i32_1 : i32, i32, i32
  }
  func.func @transform_38(%arg0: i32) -> (i32, i32, i32) {
    %c0_i32 = arith.constant 0 : i32
    %c0_i32_0 = arith.constant 0 : i32
    %c0_i32_1 = arith.constant 0 : i32
    %c0_i32_2 = arith.constant 0 : i32
    return %c0_i32, %c0_i32_0, %c0_i32_1 : i32, i32, i32
  }
  func.func @transform_39(%arg0: i32) -> (i32, i32, i32) {
    %c0_i32 = arith.constant 0 : i32
    %c0_i32_0 = arith.constant 0 : i32
    %c0_i32_1 = arith.constant 0 : i32
    %c0_i32_2 = arith.constant 0 : i32
    return %c0_i32, %c0_i32_0, %c0_i32_1 : i32, i32, i32
  }
  func.func @transform_40(%arg0: i32) -> (i32, i32, i32) {
    %c0_i32 = arith.constant 0 : i32
    %c0_i32_0 = arith.constant 0 : i32
    %c0_i32_1 = arith.constant 0 : i32
    %c0_i32_2 = arith.constant 0 : i32
    return %c0_i32, %c0_i32_0, %c0_i32_1 : i32, i32, i32
  }
  func.func @transform_41(%arg0: i32) -> (i32, i32, i32) {
    %c0_i32 = arith.constant 0 : i32
    %c0_i32_0 = arith.constant 0 : i32
    %c0_i32_1 = arith.constant 0 : i32
    %c0_i32_2 = arith.constant 0 : i32
    return %c0_i32, %c0_i32_0, %c0_i32_1 : i32, i32, i32
  }
  func.func @transform_42(%arg0: i32) -> (i32, i32, i32) {
    %c0_i32 = arith.constant 0 : i32
    %c0_i32_0 = arith.constant 0 : i32
    %c0_i32_1 = arith.constant 0 : i32
    %c0_i32_2 = arith.constant 0 : i32
    return %c0_i32, %c0_i32_0, %c0_i32_1 : i32, i32, i32
  }
  func.func @transform_43(%arg0: i32) -> (i32, i32, i32) {
    %c0_i32 = arith.constant 0 : i32
    %c0_i32_0 = arith.constant 0 : i32
    %c0_i32_1 = arith.constant 0 : i32
    %c0_i32_2 = arith.constant 0 : i32
    return %c0_i32, %c0_i32_0, %c0_i32_1 : i32, i32, i32
  }
  func.func @transform_44(%arg0: i32) -> (i32, i32, i32) {
    %c0_i32 = arith.constant 0 : i32
    %c0_i32_0 = arith.constant 0 : i32
    %c0_i32_1 = arith.constant 0 : i32
    %c0_i32_2 = arith.constant 0 : i32
    return %c0_i32, %c0_i32_0, %c0_i32_1 : i32, i32, i32
  }
  func.func @transform_45(%arg0: i32) -> (i32, i32, i32) {
    %c0_i32 = arith.constant 0 : i32
    %c0_i32_0 = arith.constant 0 : i32
    %c0_i32_1 = arith.constant 0 : i32
    %c0_i32_2 = arith.constant 0 : i32
    return %c0_i32, %c0_i32_0, %c0_i32_1 : i32, i32, i32
  }
  func.func @transform_46(%arg0: i32) -> (i32, i32, i32) {
    %c0_i32 = arith.constant 0 : i32
    %c0_i32_0 = arith.constant 0 : i32
    %c0_i32_1 = arith.constant 0 : i32
    %c0_i32_2 = arith.constant 0 : i32
    return %c0_i32, %c0_i32_0, %c0_i32_1 : i32, i32, i32
  }
  func.func @transform_47(%arg0: i32) -> (i32, i32, i32) {
    %c0_i32 = arith.constant 0 : i32
    %c0_i32_0 = arith.constant 0 : i32
    %c0_i32_1 = arith.constant 0 : i32
    %c0_i32_2 = arith.constant 0 : i32
    return %c0_i32, %c0_i32_0, %c0_i32_1 : i32, i32, i32
  }
  func.func @transform_48(%arg0: i32) -> (i32, i32, i32) {
    %c0_i32 = arith.constant 0 : i32
    %c0_i32_0 = arith.constant 0 : i32
    %c0_i32_1 = arith.constant 0 : i32
    %c0_i32_2 = arith.constant 0 : i32
    return %c0_i32, %c0_i32_0, %c0_i32_1 : i32, i32, i32
  }
  func.func @transform_49(%arg0: i32) -> (i32, i32, i32) {
    %c0_i32 = arith.constant 0 : i32
    %c0_i32_0 = arith.constant 0 : i32
    %c0_i32_1 = arith.constant 0 : i32
    return %arg0, %c0_i32, %c0_i32_0 : i32, i32, i32
  }
}

</mosaic_0001>

<bundles_post_ra>
// kernel: forward.1
= control target key start
LH: loop header
LB: loop body
LE: loop exit
PB: predicated region body
PF: predicated region fallthrough
CT: control target
= control target key end

     0   :  { %s20189_s6 = smov 1   ;;  %s20190_s10 = smov 2   ;;  %s23315_s0 = inlined_call_operand.smem [shape: u32[50], index: -1, kind: input, shape index: {}] }
   0x1   :  { %s20261_s5 = sld [smem:[%s23315_s0]]   ;;  %s20191_s14 = smov 3  }
   0x2   :  { %s20266_s9 = sld [smem:[%s23315_s0 + %s20189_s6]]   ;;  %s20192_s18 = smov 4  }
   0x3   :  { %s20271_s13 = sld [smem:[%s23315_s0 + %s20190_s10]]   ;;  %s20193_s22 = smov 5  }
   0x4   :  { %s20276_s17 = sld [smem:[%s23315_s0 + %s20191_s14]]   ;;  %s20194_s26 = smov 6  }
   0x5   :  { %s20281_s21 = sld [smem:[%s23315_s0 + %s20192_s18]]   ;;  %s20195_s30 = smov 7  }
   0x6   :  { %s20286_s25 = sld [smem:[%s23315_s0 + %s20193_s22]]   ;;  %s20196_s4 = smov 8  }
   0x7   :  { %23383 = sst [smem:[#allocation16_spill]] %s20261_s5  ;;  %s20197_s10 = smov 9  }
   0x8   :  { %23384 = sst [smem:[#allocation17_spill]] %s20266_s9  ;;  %s20198_s15 = smov 10  }
   0x9   :  { %23385 = sst [smem:[#allocation18_spill]] %s20271_s13  ;;  %s20199_s20 = smov 11  }
   0xa   :  { %23386 = sst [smem:[#allocation19_spill]] %s20276_s17  ;;  %s20201_s1 = smov 13  }
   0xb   :  { %23387 = sst [smem:[#allocation20_spill]] %s20281_s21  ;;  %s20202_s7 = smov 14  }
   0xc   :  { %23388 = sst [smem:[#allocation21_spill]] %s20286_s25  ;;  %s20204_s22 = smov 16  }
   0xd   :  { %s20291_s29 = sld [smem:[%s23315_s0 + %s20194_s26]]   ;;  %s20200_s26 = smov 12  }
   0xe   :  { %s20296_s3 = sld [smem:[%s23315_s0 + %s20195_s30]]   ;;  %s20205_s28 = smov 17  }
   0xf   :  { %s20301_s8 = sld [smem:[%s23315_s0 + %s20196_s4]]  }
  0x10   :  { %s20306_s14 = sld [smem:[%s23315_s0 + %s20197_s10]]  }
  0x11   :  { %s20311_s19 = sld [smem:[%s23315_s0 + %s20198_s15]]   ;;  %s20203_s15 = smov 15  }
  0x12   :  { %s20316_s24 = sld [smem:[%s23315_s0 + %s20199_s20]]  }
  0x13   :  { %s20321_s30 = sld [smem:[%s23315_s0 + %s20200_s26]]  }
  0x14   :  { %23389 = sst [smem:[#allocation22_spill]] %s20296_s3 }
  0x15   :  { %23390 = sst [smem:[#allocation23_spill]] %s20301_s8 }
  0x16   :  { %23391 = sst [smem:[#allocation24_spill]] %s20306_s14 }
  0x17   :  { %23392 = sst [smem:[#allocation25_spill]] %s20311_s19 }
  0x18   :  { %23393 = sst [smem:[#allocation26_spill]] %s20316_s24 }
  0x19   :  { %s20326_s6 = sld [smem:[%s23315_s0 + %s20201_s1]]  }
  0x1a   :  { %s20331_s12 = sld [smem:[%s23315_s0 + %s20202_s7]]   ;;  %s20206_s7 = smov 18  }
  0x1b   :  { %s20336_s20 = sld [smem:[%s23315_s0 + %s20203_s15]]   ;;  %s20207_s15 = smov 19  }
  0x1c   :  { %s20341_s27 = sld [smem:[%s23315_s0 + %s20204_s22]]   ;;  %s20208_s22 = smov 20  }
  0x1d   :  { %s20346_s4 = sld [smem:[%s23315_s0 + %s20205_s28]]   ;;  %s20209_s28 = smov 21  }
  0x1e   :  { %s20351_s25 = sld [smem:[%s23315_s0 + %s20206_s7]]   ;;  %s20210_s7 = smov 22  }
  0x1f   :  { %23394 = sst [smem:[#allocation27_spill]] %s20326_s6 }
  0x20   :  { %23395 = sst [smem:[#allocation28_spill]] %s20331_s12 }
  0x21   :  { %23396 = sst [smem:[#allocation29_spill]] %s20336_s20 }
  0x22   :  { %23397 = sst [smem:[#allocation30_spill]] %s20341_s27 }
  0x23   :  { %23398 = sst [smem:[#allocation31_spill]] %s20346_s4 }
  0x24   :  { %23399 = sst [smem:[#allocation32_spill]] %s20351_s25 }
  0x25   :  { %s20356_s20 = sld [smem:[%s23315_s0 + %s20207_s15]]   ;;  %s20211_s15 = smov 23  }
  0x26   :  { %s20361_s27 = sld [smem:[%s23315_s0 + %s20208_s22]]   ;;  %s20212_s22 = smov 24  }
  0x27   :  { %s20366_s4 = sld [smem:[%s23315_s0 + %s20209_s28]]   ;;  %s20213_s28 = smov 25  }
  0x28   :  { %s20371_s25 = sld [smem:[%s23315_s0 + %s20210_s7]]   ;;  %s20214_s7 = smov 26  }
  0x2b   :  { %23400 = sst [smem:[#allocation33_spill]] %s20356_s20 }
  0x2c   :  { %23401 = sst [smem:[#allocation34_spill]] %s20361_s27 }
  0x2d   :  { %23402 = sst [smem:[#allocation35_spill]] %s20366_s4 }
  0x2e   :  { %23403 = sst [smem:[#allocation36_spill]] %s20371_s25 }
  0x2f   :  { %s20376_s20 = sld [smem:[%s23315_s0 + %s20211_s15]]   ;;  %s20215_s15 = smov 27  }
  0x30   :  { %s20381_s27 = sld [smem:[%s23315_s0 + %s20212_s22]]   ;;  %s20216_s22 = smov 28  }
  0x31   :  { %s20386_s4 = sld [smem:[%s23315_s0 + %s20213_s28]]   ;;  %s20217_s28 = smov 29  }
  0x32   :  { %s20391_s25 = sld [smem:[%s23315_s0 + %s20214_s7]]   ;;  %s20218_s7 = smov 30  }
  0x35   :  { %23404 = sst [smem:[#allocation37_spill]] %s20376_s20 }
  0x36   :  { %23405 = sst [smem:[#allocation38_spill]] %s20381_s27 }
  0x37   :  { %23406 = sst [smem:[#allocation39_spill]] %s20386_s4 }
  0x38   :  { %23407 = sst [smem:[#allocation40_spill]] %s20391_s25 }
  0x39   :  { %s20396_s20 = sld [smem:[%s23315_s0 + %s20215_s15]]   ;;  %s20219_s15 = smov 31  }
  0x3a   :  { %s20401_s27 = sld [smem:[%s23315_s0 + %s20216_s22]]   ;;  %s20220_s22 = smov 32  }
  0x3b   :  { %s20406_s4 = sld [smem:[%s23315_s0 + %s20217_s28]]   ;;  %s20221_s28 = smov 33  }
  0x3c   :  { %s20411_s25 = sld [smem:[%s23315_s0 + %s20218_s7]]   ;;  %s20222_s7 = smov 34  }
  0x3f   :  { %23408 = sst [smem:[#allocation41_spill]] %s20396_s20 }
  0x40   :  { %23409 = sst [smem:[#allocation42_spill]] %s20401_s27 }
  0x41   :  { %23410 = sst [smem:[#allocation43_spill]] %s20406_s4 }
  0x42   :  { %23411 = sst [smem:[#allocation44_spill]] %s20411_s25 }
  0x43   :  { %s20416_s20 = sld [smem:[%s23315_s0 + %s20219_s15]]   ;;  %s20223_s15 = smov 35  }
  0x44   :  { %s20421_s27 = sld [smem:[%s23315_s0 + %s20220_s22]]   ;;  %s20224_s22 = smov 36  }
  0x45   :  { %s20426_s4 = sld [smem:[%s23315_s0 + %s20221_s28]]   ;;  %s20225_s28 = smov 37  }
  0x46   :  { %s20431_s25 = sld [smem:[%s23315_s0 + %s20222_s7]]   ;;  %s20226_s7 = smov 38  }
  0x49   :  { %23412 = sst [smem:[#allocation45_spill]] %s20416_s20 }
  0x4a   :  { %23413 = sst [smem:[#allocation46_spill]] %s20421_s27 }
  0x4b   :  { %23414 = sst [smem:[#allocation47_spill]] %s20426_s4 }
  0x4c   :  { %23415 = sst [smem:[#allocation48_spill]] %s20431_s25 }
  0x4d   :  { %s20436_s20 = sld [smem:[%s23315_s0 + %s20223_s15]]   ;;  %s20227_s15 = smov 39  }
  0x4e   :  { %s20441_s27 = sld [smem:[%s23315_s0 + %s20224_s22]]   ;;  %s20228_s22 = smov 40  }
  0x4f   :  { %s20446_s4 = sld [smem:[%s23315_s0 + %s20225_s28]]   ;;  %s20229_s28 = smov 41  }
  0x50   :  { %s20451_s25 = sld [smem:[%s23315_s0 + %s20226_s7]]   ;;  %s20230_s7 = smov 42  }
  0x53   :  { %23416 = sst [smem:[#allocation49_spill]] %s20436_s20 }
  0x54   :  { %23417 = sst [smem:[#allocation50_spill]] %s20441_s27 }
  0x55   :  { %23418 = sst [smem:[#allocation51_spill]] %s20446_s4 }
  0x56   :  { %23419 = sst [smem:[#allocation52_spill]] %s20451_s25 }
  0x57   :  { %s20456_s20 = sld [smem:[%s23315_s0 + %s20227_s15]]   ;;  %s20231_s15 = smov 43  }
  0x58   :  { %s20461_s27 = sld [smem:[%s23315_s0 + %s20228_s22]]   ;;  %s20232_s22 = smov 44  }
  0x59   :  { %s20466_s4 = sld [smem:[%s23315_s0 + %s20229_s28]]   ;;  %s20233_s28 = smov 45  }
  0x5a   :  { %s20471_s25 = sld [smem:[%s23315_s0 + %s20230_s7]]   ;;  %s20234_s7 = smov 46  }
  0x5d   :  { %23420 = sst [smem:[#allocation53_spill]] %s20456_s20 }
  0x5e   :  { %23421 = sst [smem:[#allocation54_spill]] %s20461_s27 }
  0x5f   :  { %23422 = sst [smem:[#allocation55_spill]] %s20466_s4 }
  0x60   :  { %23423 = sst [smem:[#allocation56_spill]] %s20471_s25 }
  0x61   :  { %s20476_s20 = sld [smem:[%s23315_s0 + %s20231_s15]]   ;;  %s20235_s15 = smov 47  }
  0x62   :  { %s20481_s27 = sld [smem:[%s23315_s0 + %s20232_s22]]   ;;  %s20236_s22 = smov 48  }
  0x63   :  { %s20486_s4 = sld [smem:[%s23315_s0 + %s20233_s28]]   ;;  %s20237_s28 = smov 49  }
  0x64   :  { %s20491_s25 = sld [smem:[%s23315_s0 + %s20234_s7]]  }
  0x65   :  { %s20496_s12 = sld [smem:[%s23315_s0 + %s20235_s15]]  }
  0x66   :  { %s20501_s6 = sld [smem:[%s23315_s0 + %s20236_s22]]  }
  0x67   :  { %23424 = sst [smem:[#allocation57_spill]] %s20476_s20 }
  0x69   :  { %23425 = sst [smem:[#allocation58_spill]] %s20486_s4 }
  0x6a   :  { %s20506_s4 = sld [smem:[%s23315_s0 + %s20237_s28]]  }
  0x6c   :  { %23426 = sst [smem:[#allocation59_spill]] %s20501_s6 }
  0x6d   :  { %104 = vsyncpa [#allocation3], 0 }
  0x6e   :  { %105 = vsyncpa [#allocation5], 0 }
  0x6f   :  { %106 = vsyncpa [#allocation8], 0 }
  0x70   :  { %107 = vsyncpa [#allocation11], 0  ;;  %s20508_s7 = smov 0  }
  0x71 LB: > { %s23427_s24 = sld [smem:[#allocation26_spill]]  ;;  %s23428_s21 = sld [smem:[#allocation20_spill]]  ;;  %s20187_s7 = sphi %s20508_s7, %s113_s7  }
  0x72   : > { %s23429_s20 = sld [smem:[#allocation57_spill]]  ;;  %s23431_s14 = sld [smem:[#allocation24_spill]] }
  0x73   : > { %s23430_s19 = sld [smem:[#allocation25_spill]]  ;;  %s23432_s13 = sld [smem:[#allocation18_spill]] }
  0x74   : > { %s23433_s8 = sld [smem:[#allocation23_spill]]  ;;  %s23434_s6 = sld [smem:[#allocation59_spill]] }
  0x75   : > { %s23435_s3 = sld [smem:[#allocation22_spill]]  ;;  %s20238_s10 = smov [#allocation4]  }
  0x76   : > { %s1208_s11 = sshll.u32 %s20238_s10, 4  ;;  %s20514_s15 = sadd.s32 4294967295, %s20187_s7   ;;  %s20519_s11 = int_to_ptr.vmem [resolvable:$true] %s1208_s11 }
  0x77   : > { %p15254_p0 = scmp.ge.s32.totalorder %s20187_s7, 1  ;;  %p1178_p1 = scmp.lt.s32.totalorder %s20187_s7, 3 }
  0x78   : > { %p23346_p2 = scmp.eq.s32.totalorder %s20514_s15, 0  ;;  %s20239_s16 = smov [#allocation7]  }
  0x79   : > { %p20521_p3 = pnand %p15254_p0, %p1178_p1  ;;  %s1340_s18 = sshll.u32 %s20239_s16, 4  ;;  %s20527_s18 = int_to_ptr.vmem [resolvable:$true] %s1340_s18 }
  0x7a   : > { %s20240_s23 = smov [#allocation2]   ;;  %s20241_s28 = smov [#allocation6]  }
  0x7b   : > { %s23436_s0 = scalar_select %p20521_p3, 1, 0 }
  0x7c   : > { %p19694_p4 = pneg %p20521_p3  ;;  %s1194_s26 = sshll.u32 %s20240_s23, 4  ;;  %s20535_s26 = int_to_ptr.vmem [resolvable:$true] %s1194_s26 }
  0x7d   : > { %s20537_s1 = sshll.u32 %s20241_s28, 4  ;;  %s19997_s2 = scalar_lea.hbm %s23428_s21, 16  ;;  %s1223_s1 = int_to_ptr.vmem [resolvable:$true] %s20537_s1 }
  0x7e   : > { %p20531_p5 = pnand %p23346_p2, %p19694_p4  ;;  %p19998_p6 = scmp.ne.s32.totalorder %s23428_s21, %s19997_s2 }
  0x7f   : > { %p20004_p10 = scmp.lt.u32.totalorder %s19997_s2, %s23428_s21 }
  0x80   : > { %p20543_p7 = pneg %p20531_p5 }
  0x82   : > { %p20000_p8 = pnand %p20543_p7, %p19998_p6 }
  0x84   : > { %p20001_p9 = pneg %p20000_p8 }
  0x86   : > { %p20006_p11 = pnand %p20004_p10, %p20001_p9 }
  0x88   : > { %20009 = shalt.err (!%p20006_p11)
}
  0x89   : > { %s20010_s16 = scalar_lea.vmem %s20519_s11, 16  ;;  %s20017_s23 = scalar_lea.vmem %s20519_s11, 32 }
  0x8a   : > { %p20011_p12 = scmp.ne.s32.totalorder %s20519_s11, %s20010_s16  ;;  %p20018_p1 = scmp.lt.s32.totalorder %s20519_s11, %s20519_s11 }
  0x8b   : > { %p20019_p4 = scmp.lt.s32.totalorder %s20017_s23, %s20010_s16 }
  0x8c   : > { %p20013_p13 = pnand %p20011_p12, %p20543_p7 }
  0x8d   : > { %p20020_p2 = por %p20019_p4, %p20018_p1 }
  0x8e   : > { %p20014_p0 = pneg %p20013_p13 }
  0x90   : > { %p20021_p6 = pnand %p20020_p2, %p20014_p0 }
  0x92   : > { %20024 = shalt.err (!%p20021_p6)
}
  0x93   : > { %19700 = dma.hbm_to_vmem [thread:$0]  (!%p20531_p5), %s23428_s21, 16, %s20519_s11, [#allocation5]  }
  0x94   : > { %s20025_s28 = scalar_lea.hbm %s23429_s20, 32 }
  0x95   : > { %p20026_p8 = scmp.ne.s32.totalorder %s23429_s20, %s20025_s28  ;;  %p20032_p11 = scmp.lt.u32.totalorder %s20025_s28, %s23429_s20 }
  0x97   : > { %p20028_p9 = pnand %p20026_p8, %p20543_p7 }
  0x99   : > { %p20029_p10 = pneg %p20028_p9 }
  0x9b   : > { %p20034_p12 = pnand %p20032_p11, %p20029_p10 }
  0x9d   : > { %20037 = shalt.err (!%p20034_p12)
}
  0x9e   : > { %s20038_s2 = scalar_lea.vmem %s20527_s18, 32  ;;  %p20046_p1 = scmp.lt.s32.totalorder %s20527_s18, %s20527_s18 }
  0x9f   : > { %p20039_p2 = scmp.ne.s32.totalorder %s20527_s18, %s20038_s2  ;;  %p20047_p4 = scmp.lt.s32.totalorder %s20038_s2, %s20038_s2 }
  0xa1   : > { %p20041_p13 = pnand %p20039_p2, %p20543_p7  ;;  %p20048_p6 = por %p20047_p4, %p20046_p1 }
  0xa3   : > { %p20042_p0 = pneg %p20041_p13 }
  0xa5   : > { %p20049_p3 = pnand %p20048_p6, %p20042_p0 }
  0xa7   : > { %20052 = shalt.err (!%p20049_p3)
}
  0xa8   : > { %s23348_s11 = smov 16   ;;  %s23350_s16 = smov 1  }
  0xa9   : > { %19706 = dma.hbm_to_vmem [thread:$0]  (!%p20531_p5), %s23429_s20, 32, %s20527_s18, [#allocation8], %s23348_s11, %s23348_s11, %s23350_s16  }
  0xaa   : > { %s20053_s23 = scalar_lea.hbm %s23432_s13, 16 }
  0xab   : > { %p20054_p8 = scmp.ne.s32.totalorder %s23432_s13, %s20053_s23  ;;  %p20060_p3 = scmp.lt.u32.totalorder %s20053_s23, %s23432_s13 }
  0xad   : > { %p20056_p9 = pnand %p20054_p8, %p20543_p7 }
  0xaf   : > { %p20057_p10 = pneg %p20056_p9 }
  0xb1   : > { %p20062_p11 = pnand %p20060_p3, %p20057_p10 }
  0xb3   : > { %20065 = shalt.err (!%p20062_p11)
}
  0xb4   : > { %s20066_s28 = scalar_lea.vmem %s20535_s26, 16  ;;  %s20073_s2 = scalar_lea.vmem %s20535_s26, 32 }
  0xb5   : > { %p20067_p12 = scmp.ne.s32.totalorder %s20535_s26, %s20066_s28  ;;  %p20074_p0 = scmp.lt.s32.totalorder %s20535_s26, %s20535_s26 }
  0xb6   : > { %p20075_p1 = scmp.lt.s32.totalorder %s20073_s2, %s20066_s28 }
  0xb7   : > { %p20069_p2 = pnand %p20067_p12, %p20543_p7 }
  0xb8   : > { %p20076_p4 = por %p20075_p1, %p20074_p0 }
  0xb9   : > { %p20070_p13 = pneg %p20069_p2 }
  0xbb   : > { %p20077_p6 = pnand %p20076_p4, %p20070_p13 }
  0xbd   : > { %20080 = shalt.err (!%p20077_p6)
}
  0xbe   : > { %19697 = dma.hbm_to_vmem [thread:$0]  (!%p20531_p5), %s23432_s13, 16, %s20535_s26, [#allocation3]  }
  0xbf   : > { %s20081_s18 = scalar_lea.hbm %s20291_s29, 16 }
  0xc0   : > { %p20082_p8 = scmp.ne.s32.totalorder %s20291_s29, %s20081_s18  ;;  %p20088_p3 = scmp.lt.u32.totalorder %s20081_s18, %s20291_s29 }
  0xc2   : > { %p20084_p9 = pnand %p20082_p8, %p20543_p7 }
  0xc4   : > { %p20085_p10 = pneg %p20084_p9 }
  0xc6   : > { %p20090_p11 = pnand %p20088_p3, %p20085_p10 }
  0xc8   : > { %20093 = shalt.err (!%p20090_p11)
}
  0xc9   : > { %s20094_s23 = scalar_lea.vmem %s1223_s1, 16  ;;  %s20101_s28 = scalar_lea.vmem %s1223_s1, 32 }
  0xca   : > { %p20095_p12 = scmp.ne.s32.totalorder %s1223_s1, %s20094_s23  ;;  %p20102_p0 = scmp.lt.s32.totalorder %s1223_s1, %s1223_s1 }
  0xcb   : > { %p20103_p1 = scmp.lt.s32.totalorder %s20101_s28, %s20094_s23 }
  0xcc   : > { %p20097_p2 = pnand %p20095_p12, %p20543_p7 }
  0xcd   : > { %p20104_p4 = por %p20103_p1, %p20102_p0 }
  0xce   : > { %p20098_p13 = pneg %p20097_p2 }
  0xd0   : > { %p20105_p6 = pnand %p20104_p4, %p20098_p13 }
  0xd2   : > { %20108 = shalt.err (!%p20105_p6)
}
  0xd3   : > { %19703 = dma.hbm_to_vmem [thread:$0]  (!%p20531_p5), %s20291_s29, 16, %s1223_s1, [#allocation5]  }
  0xd4   : > { %s20244_s26 = smov [#allocation9]   ;;  %s20245_s18 = smov [#allocation10]  }
  0xd5   : > { %s1353_s2 = sshll.u32 %s20244_s26, 4  ;;  %s1375_s11 = sshll.u32 %s20245_s18, 4  ;;  %s1354_s2 = int_to_ptr.vmem [resolvable:$true] %s1353_s2  ;;  %s1376_s11 = int_to_ptr.vmem [resolvable:$true] %s1375_s11 }
  0xd6   : > { %s20109_s16 = scalar_lea.hbm %s20481_s27, 32 }
  0xd7   : > { %p20110_p8 = scmp.ne.s32.totalorder %s20481_s27, %s20109_s16  ;;  %p20116_p3 = scmp.lt.u32.totalorder %s20109_s16, %s20481_s27 }
  0xd9   : > { %p20112_p9 = pnand %p20110_p8, %p20543_p7 }
  0xdb   : > { %p20113_p10 = pneg %p20112_p9 }
  0xdd   : > { %p20118_p11 = pnand %p20116_p3, %p20113_p10 }
  0xdf   : > { %20121 = shalt.err (!%p20118_p11)
}
  0xe0   : > { %s20122_s23 = scalar_lea.vmem %s1354_s2, 32  ;;  %p20130_p0 = scmp.lt.s32.totalorder %s1354_s2, %s1354_s2 }
  0xe1   : > { %p20123_p12 = scmp.ne.s32.totalorder %s1354_s2, %s20122_s23  ;;  %p20131_p1 = scmp.lt.s32.totalorder %s20122_s23, %s20122_s23 }
  0xe3   : > { %p20125_p2 = pnand %p20123_p12, %p20543_p7  ;;  %p20132_p4 = por %p20131_p1, %p20130_p0 }
  0xe5   : > { %p20126_p13 = pneg %p20125_p2 }
  0xe7   : > { %p20133_p6 = pnand %p20132_p4, %p20126_p13 }
  0xe9   : > { %20136 = shalt.err (!%p20133_p6)
}
  0xea   : > { %s23439_s1 = smov 1   ;;  %s23440_s28 = smov 16  }
  0xeb   : > { %19709 = dma.hbm_to_vmem [thread:$0]  (!%p20531_p5), %s20481_s27, 32, %s1354_s2, [#allocation8], %s23440_s28, %s23440_s28, %s23439_s1  }
  0xec   : > { %s20137_s16 = scalar_lea.hbm %s23434_s6, 32 }
  0xed   : > { %p20138_p8 = scmp.ne.s32.totalorder %s23434_s6, %s20137_s16  ;;  %p20144_p3 = scmp.lt.u32.totalorder %s20137_s16, %s23434_s6 }
  0xef   : > { %p20140_p9 = pnand %p20138_p8, %p20543_p7 }
  0xf1   : > { %p20141_p10 = pneg %p20140_p9 }
  0xf3   : > { %p20146_p11 = pnand %p20144_p3, %p20141_p10 }
  0xf5   : > { %20149 = shalt.err (!%p20146_p11)
}
  0xf6   : > { %s20150_s26 = scalar_lea.vmem %s1376_s11, 32  ;;  %p20158_p0 = scmp.lt.s32.totalorder %s1376_s11, %s1376_s11 }
  0xf7   : > { %p20151_p12 = scmp.ne.s32.totalorder %s1376_s11, %s20150_s26  ;;  %p20159_p1 = scmp.lt.s32.totalorder %s20150_s26, %s20150_s26 }
  0xf9   : > { %p20153_p2 = pnand %p20151_p12, %p20543_p7  ;;  %p20160_p4 = por %p20159_p1, %p20158_p0 }
  0xfb   : > { %p20154_p13 = pneg %p20153_p2 }
  0xfd   : > { %p20161_p6 = pnand %p20160_p4, %p20154_p13 }
  0xff   : > { %20164 = shalt.err (!%p20161_p6)
}
 0x100   : > { %19712 = dma.hbm_to_vmem [thread:$0]  (!%p20531_p5), %s23434_s6, 32, %s1376_s11, [#allocation11], %s23440_s28, %s23440_s28, %s23439_s1  }
 0x101   : > { %p23441_p8 = scmp.ne.s32.totalorder %s23436_s0, 0 }
 0x103   : > { %1398 = sbr.rel (%p23441_p8) target bundleno = 17717 (0x4535), region = 216 }
 0x10a   : > { %p23442_p9 = scmp.eq.s32.totalorder %s20514_s15, 0 }
 0x10c   : > { %20170 = dma.done.wait (%p23442_p9), [#allocation3], 16   ;;  %p23443_p7 = pmov %p23442_p9 }
 0x10e   : > { %20172 = vsyncadd (%p23443_p7), [#allocation3], 4294967280  ;;  %p23444_p10 = pmov %p23443_p7 }
 0x10f   : > { %p23445_p3 = pmov %p23443_p7 }
 0x110   : > { %20174 = dma.done.wait (%p23444_p10), [#allocation5], 32  }
 0x111   : > { %20176 = vsyncadd (%p23445_p3), [#allocation5], 4294967264  ;;  %p23446_p11 = pmov %p23445_p3 }
 0x112   : > { %p23447_p5 = pmov %p23445_p3 }
 0x113   : > { %20178 = dma.done.wait (%p23446_p11), [#allocation8], 64  }
 0x114   : > { %20180 = vsyncadd (%p23447_p5), [#allocation8], 4294967232  ;;  %p23448_p12 = pmov %p23445_p3 }
 0x115   : > { %p23449_p2 = pmov %p23445_p3 }
 0x116   : > { %20182 = dma.done.wait (%p23448_p12), [#allocation11], 32  }
 0x117   : > { %20184 = vsyncadd (%p23449_p2), [#allocation11], 4294967264  ;;  %s23450_s5 = sld [smem:[#allocation16_spill]]  ;;  %s23451_s9 = sld [smem:[#allocation17_spill]]  ;;  %v23352_v0 = vmov 0.0   ;;  %vm20247_vm0 = vmmov 0  }
 0x118   : > { %p1532_p13 = scmp.lt.s32.totalorder %s20514_s15, 1  ;;  %17644 = vmatprep.subr.mxu0 %v23352_v0  ;;  %17646 = vmatprep.mubr.msk.f32.mxu0 %vm20247_vm0, %v23352_v0  ;;  %vm1553_vm1 = vcmask 1043456   ;;  %vm1549_vm2 = vcmask 31744   ;;  %v1635_v3 = vld [vmem:[%s23435_s3] sm:$0xff]  ;;  %v1636_v4 = vld [vmem:[%s23435_s3 + $0x8] sm:$0xff]  ;;  %v1637_v9 = vld [vmem:[%s23435_s3 + $0x10] sm:$0xff] }
 0x119   : > { %v18168_v5 = vpack.c.bf16 %v1636_v4, %v1635_v3  ;;  %v1640_v6 = vld [vmem:[%s23431_s14] sm:$0xff]  ;;  %v1641_v7 = vld [vmem:[%s23431_s14 + $0x8] sm:$0xff]  ;;  %v1638_v10 = vld [vmem:[%s23435_s3 + $0x18] sm:$0xff]  ;;  %s23452_s17 = sld [smem:[#allocation19_spill]]  ;;  %vm1633_vm3 = vcmask 1040384   ;;  %vm1661_vm4 = vcmask 261120  }
 0x11a   : > { %s23497_s15 = smov (!%p1532_p13, %s20514_s15), 1  ;;  %v18176_v8 = vpack.c.bf16 %v1641_v7, %v1640_v6  ;;  %v18172_v11 = vpack.c.bf16 %v1638_v10, %v1637_v9  ;;  %v1642_v12 = vld [vmem:[%s23431_s14 + $0x10] sm:$0xff]  ;;  %v1643_v13 = vld [vmem:[%s23431_s14 + $0x18] sm:$0xff]  ;;  %v1645_v15 = vld [vmem:[%s23427_s24] sm:$0xff]  ;;  %vm1906_vm5 = vcmask 64512   ;;  %s23362_s10 = smov 120  }
 0x11b   : > { %s23356_s0 = sshll.u32 %s23497_s15, 3  ;;  %18169 = vmatprep.subr.bf16.mxu1 %v18168_v5  ;;  %v18180_v14 = vpack.c.bf16 %v1643_v13, %v1642_v12  ;;  %v1646_v16 = vld [vmem:[%s23427_s24 + $0x8] sm:$0xff]  ;;  %v15271_v18 = vld [vmem:[#allocation2] ss:$0 sm:$0xff]  ;;  %v1629_v24 = vld [vmem:[#allocation4] sm:$0x1] }
 0x11c   : > { %18171 = vmatpush3.bf16.msra.mxu1 %v18168_v5  ;;  %v18184_v17 = vpack.c.bf16 %v1646_v16, %v1645_v15  ;;  %v1647_v25 = vld [vmem:[%s23427_s24 + $0x10] sm:$0xff]  ;;  %v1648_v26 = vld [vmem:[%s23427_s24 + $0x18] sm:$0xff]  ;;  %v15277_v30 = vld [vmem:[%s23430_s19] ss:$0 sm:$0xff]  ;;  %vm20249_vm7 = vmmov 1   ;;  %v23455_v49 = vmov 0 }
 0x11d   : > { %s1535_s22 = scalar_lea.vmem %s23450_s5, %s23356_s0  ;;  %v1541_v1 = vld [vmem:[%s23451_s9] sm:$0xf]  ;;  %18173 = vmatprep.subr.bf16.mxu1 %v18172_v11  ;;  %v18188_v29 = vpack.c.bf16 %v1648_v26, %v1647_v25  ;;  %vm20698_vm6 = vmpackc.low %vm1906_vm5, %vm1906_vm5  ;;  %vm1994_vm9 = vcmask 72704   ;;  %vm1998_vm10 = vcmask 65536   ;;  %s23359_s11 = smov 112   ;;  %vm3049_vm11 = vcmask 253952  }
 0x11e   : > { %v1540_v2 = vld [vmem:[%s1535_s22] sm:$0xff]  ;;  %17645 = vmatpush3.msk.msra.mxu0 %vm1553_vm1, %v1541_v1  ;;  %vm20716_vm8 = vmpackc.low %vm1633_vm3, %vm20249_vm7  ;;  %s23357_s2 = smov 104   ;;  %s23458_s18 = sld [smem:[#allocation27_spill]]  ;;  %vm8186_vm12 = vcmask 1046528  }
 0x11f   : > { %17647 = vmatmul.mubr.msk.f32.vlgmr.msra.gmra.mrb[0].mxu0 %vm1549_vm2, %v1540_v2  ;;  %18177 = vmatprep.subr.bf16.mxu0 %v18176_v8  ;;  %v1627_v20 = vld [vmem:[%s23452_s17] sm:$0xff]  ;;  %v23456_v49 = vsel %vm20716_vm8, 4294967295, %v23455_v49  ;;  %s23459_s23 = sld [smem:[#allocation28_spill]]  ;;  %s23460_s1 = sld [smem:[#allocation33_spill]] }
 0x120   : > { %18179 = vmatpush3.bf16.msra.mxu0 %v18176_v8  ;;  %18175 = vmatpush3.bf16.msra.mxu1 %v18172_v11  ;;  %v15274_v31 = vld [vmem:[%s23433_s8] ss:$0 sm:$0xff]  ;;  %23457 = vst [vmem:[#allocation60_spill] sm:$0xff] %v23456_v49  ;;  %s23461_s28 = sld [smem:[#allocation29_spill]]  ;;  %s23462_s16 = sld [smem:[#allocation30_spill]] }
 0x121   : > { %18181 = vmatprep.subr.bf16.mxu0 %v18180_v14  ;;  %18185 = vmatprep.subr.bf16.mxu1 %v18184_v17  ;;  %v15280_v43 = vld [vmem:[%s20321_s30] ss:$0 sm:$0xff]  ;;  %s23463_s26 = sld [smem:[#allocation35_spill]]  ;;  %s23464_s22 = sld [smem:[#allocation34_spill]] }
 0x122   : > { %s23465_s0 = sld [smem:[#allocation36_spill]]  ;;  %s23472_s5 = smov 120  }
 0x123   : > { %s23474_s6 = sld [smem:[#allocation42_spill]]  ;;  %s23477_s9 = sld [smem:[#allocation45_spill]] }
 0x124   : > { %18183 = vmatpush3.bf16.msra.mxu0 %v18180_v14  ;;  %s23478_s13 = sld [smem:[#allocation53_spill]]  ;;  %s23483_s17 = sld [smem:[#allocation50_spill]] }
 0x125   : > { %s23486_s20 = sld [smem:[#allocation58_spill]]  ;;  %s23487_s21 = sld [smem:[#allocation55_spill]] }
 0x127   : > { %v3335_v49 = vld [vmem:[%s23463_s26 + $0x598] sm:$0xff] }
 0x1f2   : > { %v1623_v19 = vpop.f32.mrb[0].mxu0 }
 0x1f3   : > { %v1624_v21 = vadd.f32 %v15271_v18, %v1623_v19  ;;  %v17648_v22 = vpop.f32.mrb[1].mxu0 }
 0x1f5   : > { %v1628_v23 = vadd.f32 %v1627_v20, %v1624_v21 }
 0x1f7   : > { %v20676_v27 = vrot.slane %v1628_v23, 7 }
 0x1f9   : > { %v20680_v28 = vsel %vm1633_vm3, %v1629_v24, %v20676_v27 }
 0x1fa   : > { %17657 = vmatprep.mubr.msk.f32.mxu1 %vm1661_vm4, %v20680_v28  ;;  %17668 = vmatprep.mubr.msk.f32.mxu0 %vm1661_vm4, %v20680_v28 }
 0x1fb   : > { %17658 = vmatmul.mubr.msk.f32.vlgmr.msra.gmra.mrb[0].mxu1 %vm1661_vm4, %v20676_v27  ;;  %17669 = vmatmul.mubr.msk.f32.vlgmr.msra.gmra.mrb[2].mxu0 %vm1661_vm4, %v20676_v27 }
 0x1fc   : > { %18187 = vmatpush3.bf16.msra.mxu1 %v18184_v17  ;;  %17679 = vmatprep.mubr.msk.f32.mxu1 %vm1661_vm4, %v20680_v28 }
 0x1fd   : > { %18189 = vmatprep.subr.bf16.mxu1 %v18188_v29 }
 0x200   : > { %18191 = vmatpush3.bf16.msra.mxu1 %v18188_v29 }
 0x203   : > { %17680 = vmatmul.mubr.msk.f32.vlgmr.msra.gmra.mrb[2].mxu1 %vm1661_vm4, %v20676_v27 }
 0x2ce   : > { %v17659_v32 = vpop.f32.mrb[0].mxu1  ;;  %v17670_v33 = vpop.f32.mrb[2].mxu0 }
 0x2cf   : > { %v1822_v34 = vadd.f32 %v17670_v33, %v15277_v30  ;;  %v1733_v35 = vpop.f32.mrb[1].mxu1  ;;  %v1816_v36 = vpop.f32.mrb[3].mxu0  ;;  %v1739_v44 = vadd.f32 %v17659_v32, %v15274_v31 }
 0x2d0   : > { %v1734_v37 = vadd.f32 %v15274_v31, %v1733_v35  ;;  %v1817_v38 = vadd.f32 %v15277_v30, %v1816_v36 }
 0x2d1   : > { %v20720_v50 = vmul.f32 0.35355338, %v1739_v44 }
 0x2d2   : > { %v20702_v40 = vmul.f32 0.35355338, %v1734_v37  ;;  %v18192_v41 = vpack.c.bf16 %v1822_v34, %v1817_v38  ;;  %v20704_v42 = vpack.i.bf16 %v1822_v34, %v1817_v38 }
 0x2d4   : > { %2102 = vrot.lane.b32.xlu1 %v20702_v40, %s23362_s10  ;;  %18194 = vmatprep.subr.msk.bf16.mxu0 %vm20698_vm6, %v18192_v41 }
 0x2d5   : > { %17686 = vmatprep.mubr.msk.f32.mxu0 %vm1906_vm5, %v20702_v40  ;;  %18197 = vmatpush3.bf16.xpose.msk.msra.mxu0 %vm20698_vm6, %v18192_v41 }
 0x2d6   : > { %v17681_v45 = vpop.f32.mrb[2].mxu1 }
 0x2d7   : > { %v1903_v46 = vadd.f32 %v17681_v45, %v15280_v43  ;;  %v1897_v47 = vpop.f32.mrb[3].mxu1 }
 0x2d8   : > { %v1898_v48 = vadd.f32 %v15280_v43, %v1897_v47 }
 0x2da   : > { %v18198_v51 = vpack.c.bf16 %v1903_v46, %v1898_v48  ;;  %v20722_v52 = vpack.i.bf16 %v1903_v46, %v1898_v48 }
 0x2dc   : > { %18200 = vmatprep.subr.msk.bf16.mxu0 %vm20716_vm8, %v18198_v51  ;;  %17687 = vmatmul.mubr.msk.f32.vlgmr.msra.gmra.mrb[4].mxu0 %vm1906_vm5, %v20720_v50 }
 0x2dd   : > { %18203 = vmatpush3.bf16.msk.msra.mxu0 %vm20716_vm8, %v18198_v51 }
 0x346   : > { %v2103_v8 = vpop.permute.xlu1 %2102 }
 0x3af   : > { %v17688_v53 = vpop.f32.mrb[4].mxu0 }
 0x3b0   : > { %v1985_v54 = vpop.f32.mrb[5].mxu0  ;;  %v1999_v56 = vsel %vm1998_vm10, %v17688_v53, -inf }
 0x3b1   : > { %v1995_v55 = vsel %vm1994_vm9, %v1985_v54, -inf }
 0x3b2   : > { %1996 = vmax.xlane.f32.xlu0 %v1995_v55 }
 0x3b6   : > { %2000 = vmax.xlane.f32.xlu0 %v1999_v56 }
 0x3cc   : > { %19798 = vrot.lane.b32.xlu0 %v20704_v42, %s23362_s10 }
 0x3d0   : > { %2466 = vrot.lane.b32.xlu0 %v20702_v40, %s23359_s11 }
 0x43f   : > { %v1997_v57 = vpop.xlane.xlu0 %1996 }
 0x440   : > { %v2002_v58 = vsub.f32 %v1985_v54, %v1997_v57 }
 0x442   : > { %v2004_v61 = vmul.f32 1.442695, %v2002_v58 }
 0x443   : > { %v2001_v59 = vpop.xlane.xlu0 %2000 }
 0x444   : > { %v2003_v60 = vsub.f32 %v17688_v53, %v2001_v59 }
 0x446   : > { %v2006_v62 = vmul.f32 1.442695, %v2003_v60 }
 0x447   : > { %v19799_v63 = vpop.permute.xlu0 %19798 }
 0x448   : > { %19857 = vpow2.f32 %v2006_v62  ;;  %v19801_v1 = vunpack.i.h.bf16 %v19799_v63  ;;  %v19800_v2 = vunpack.i.l.bf16 %v19799_v63 }
 0x449   : > { %19859 = vpow2.f32 %v2004_v61 }
 0x44a   : > { %v18204_v3 = vpack.c.bf16 %v19801_v1, %v19800_v2 }
 0x44b   : > { %v2467_v20 = vpop.permute.xlu0 %2466 }
 0x44c   : > { %18206 = vmatprep.subr.msk.bf16.mxu0 %vm20698_vm6, %v18204_v3 }
 0x452   : > { %v19858_v4 = vpop.eup %19857 }
 0x453   : > { %v2011_v5 = vsel %vm1998_vm10, %v19858_v4, 0.0  ;;  %v19860_v6 = vpop.eup %19859 }
 0x454   : > { %2012 = vadd.xlane.f32.xlu1 %v2011_v5  ;;  %v2008_v7 = vsel %vm1994_vm9, %v19860_v6, 0.0 }
 0x458   : > { %2009 = vadd.xlane.f32.xlu1 %v2008_v7 }
 0x469   : > { %2104 = vrot.lane.b32.xlu1 %v20720_v50, %s23362_s10 }
 0x46d   : > { %19803 = vrot.lane.b32.xlu1 %v20704_v42, %s23359_s11 }
 0x471   : > { %2468 = vrot.lane.b32.xlu1 %v20720_v50, %s23359_s11 }
 0x4e1   : > { %v2013_v9 = vpop.xlane.xlu1 %2012 }
 0x4e2   : > { %19861 = vrcp.f32 %v2013_v9 }
 0x4e5   : > { %v2010_v10 = vpop.xlane.xlu1 %2009 }
 0x4e6   : > { %19863 = vrcp.f32 %v2010_v10 }
 0x4e9   : > { %v2105_v11 = vpop.permute.xlu1 %2104 }
 0x4ec   : > { %v19862_v13 = vpop.eup %19861 }
 0x4ed   : > { %v19804_v12 = vpop.permute.xlu1 %19803  ;;  %v2017_v18 = vmul.f32 %v19862_v13, %v19858_v4 }
 0x4ee   : > { %v19806_v15 = vunpack.i.h.bf16 %v19804_v12  ;;  %v19805_v16 = vunpack.i.l.bf16 %v19804_v12 }
 0x4f0   : > { %v19864_v14 = vpop.eup %19863  ;;  %v18216_v19 = vpack.c.bf16 %v19806_v15, %v19805_v16  ;;  %v1650_v15 = vld [vmem:[%s23458_s18] sm:$0xff] }
 0x4f1   : > { %v2016_v17 = vmul.f32 %v19864_v14, %v19860_v6  ;;  %v2469_v21 = vpop.permute.xlu1 %2468  ;;  %v1651_v14 = vld [vmem:[%s23458_s18 + $0x8] sm:$0xff] }
 0x4f3   : > { %17693 = vmatprep.mubr.msk.f32.mxu0 %vm1994_vm9, %v2016_v17 }
 0x4f4   : > { %17694 = vmatmul.mubr.msk.f32.vlgmr.msra.gmra.mrb[6].mxu0 %vm1994_vm9, %v2017_v18 }
 0x4f5   : > { %18209 = vmatpush3.bf16.xpose.msk.msra.mxu0 %vm20698_vm6, %v18204_v3  ;;  %17700 = vmatprep.mubr.msk.f32.mxu0 %vm1906_vm5, %v2103_v8 }
 0x4f6   : > { %18218 = vmatprep.subr.msk.bf16.mxu0 %vm20698_vm6, %v18216_v19 }
 0x4fc   : > { %17701 = vmatmul.mubr.msk.f32.vlgmr.msra.gmra.mrb[8].mxu0 %vm1906_vm5, %v2105_v11 }
 0x4fd   : > { %18221 = vmatpush3.bf16.xpose.msk.msra.mxu0 %vm20698_vm6, %v18216_v19  ;;  %17724 = vmatprep.mubr.msk.f32.mxu0 %vm1906_vm5, %v2467_v20 }
 0x504   : > { %17725 = vmatmul.mubr.msk.f32.vlgmr.msra.gmra.mrb[10].mxu0 %vm1906_vm5, %v2469_v21 }
 0x5c7   : > { %v20758_v22 = vpop.f32.mrb[6].mxu0 }
 0x5c8   : > { %v20760_v23 = vpop.f32.mrb[7].mxu0 }
 0x5cf   : > { %v17702_v24 = vpop.f32.mrb[8].mxu0 }
 0x5d0   : > { %v2184_v25 = vpop.f32.mrb[9].mxu0  ;;  %v2196_v26 = vsel %vm1998_vm10, %v17702_v24, -inf }
 0x5d1   : > { %2197 = vmax.xlane.f32.xlu1 %v2196_v26  ;;  %v2193_v29 = vsel %vm1994_vm9, %v2184_v25, -inf }
 0x5d2   : > { %2194 = vmax.xlane.f32.xlu0 %v2193_v29 }
 0x5d7   : > { %v17726_v30 = vpop.f32.mrb[10].mxu0 }
 0x5d8   : > { %v2548_v31 = vpop.f32.mrb[11].mxu0  ;;  %v2560_v32 = vsel %vm1998_vm10, %v17726_v30, -inf }
 0x5d9   : > { %v2557_v55 = vsel %vm1994_vm9, %v2548_v31, -inf }
 0x5e2   : > { %19813 = vrot.lane.b32.xlu1 %v20704_v42, %s23357_s2 }
 0x5e6   : > { %2750 = vrot.lane.b32.xlu1 %v20702_v40, %s23357_s2 }
 0x5ea   : > { %2752 = vrot.lane.b32.xlu1 %v20720_v50, %s23357_s2 }
 0x60e   : > { %2561 = vmax.xlane.f32.xlu1 %v2560_v32 }
 0x65e   : > { %v2198_v33 = vpop.xlane.xlu1 %2197 }
 0x65f   : > { %v2200_v34 = vsub.f32 %v17702_v24, %v2198_v33  ;;  %v2195_v35 = vpop.xlane.xlu0 %2194 }
 0x660   : > { %v2199_v36 = vsub.f32 %v2184_v25, %v2195_v35 }
 0x661   : > { %v2203_v37 = vmul.f32 1.442695, %v2200_v34 }
 0x662   : > { %v2201_v38 = vmul.f32 1.442695, %v2199_v36  ;;  %v19814_v41 = vpop.permute.xlu1 %19813 }
 0x663   : > { %19865 = vpow2.f32 %v2203_v37  ;;  %v19816_v43 = vunpack.i.h.bf16 %v19814_v41  ;;  %v19815_v44 = vunpack.i.l.bf16 %v19814_v41 }
 0x664   : > { %19867 = vpow2.f32 %v2201_v38 }
 0x665   : > { %v18228_v42 = vpack.c.bf16 %v19816_v43, %v19815_v44  ;;  %v1652_v44 = vld [vmem:[%s23458_s18 + $0x10] sm:$0xff] }
 0x666   : > { %v2751_v45 = vpop.permute.xlu1 %2750 }
 0x667   : > { %18230 = vmatprep.subr.msk.bf16.mxu0 %vm20698_vm6, %v18228_v42  ;;  %17743 = vmatprep.mubr.msk.f32.mxu0 %vm1906_vm5, %v2751_v45 }
 0x668   : > { %18233 = vmatpush3.bf16.xpose.msk.msra.mxu0 %vm20698_vm6, %v18228_v42 }
 0x66a   : > { %v2753_v46 = vpop.permute.xlu1 %2752 }
 0x66d   : > { %v19866_v40 = vpop.eup %19865 }
 0x66e   : > { %v2208_v47 = vsel %vm1998_vm10, %v19866_v40, 0.0  ;;  %v19868_v48 = vpop.eup %19867 }
 0x66f   : > { %17744 = vmatmul.mubr.msk.f32.vlgmr.msra.gmra.mrb[12].mxu0 %vm1906_vm5, %v2753_v46  ;;  %2209 = vadd.xlane.f32.xlu0 %v2208_v47  ;;  %v2205_v50 = vsel %vm1994_vm9, %v19868_v48, 0.0 }
 0x670   : > { %3565 = vmatprep.mubr.f32.mxu0 %v23352_v0 }
 0x673   : > { %2206 = vadd.xlane.f32.xlu0 %v2205_v50 }
 0x689   : > { %19808 = vrot.lane.b32.xlu0 %v20722_v52, %s23362_s10 }
 0x69b   : > { %v2562_v51 = vpop.xlane.xlu1 %2561 }
 0x69c   : > { %v2564_v53 = vsub.f32 %v17726_v30, %v2562_v51 }
 0x69e   : > { %v2567_v54 = vmul.f32 1.442695, %v2564_v53 }
 0x6a0   : > { %19869 = vpow2.f32 %v2567_v54  ;;  %v1653_v54 = vld [vmem:[%s23458_s18 + $0x18] sm:$0xff] }
 0x6a8   : > { %2558 = vmax.xlane.f32.xlu0 %v2557_v55 }
 0x6aa   : > { %v20783_v56 = vpop.eup %19869 }
 0x6ab   : > { %v2572_v57 = vsel %vm1998_vm10, %v20783_v56, 0.0 }
 0x6ac   : > { %2573 = vadd.xlane.f32.xlu0 %v2572_v57 }
 0x6fc   : > { %v2210_v58 = vpop.xlane.xlu0 %2209 }
 0x6fd   : > { %19871 = vrcp.f32 %v2210_v58  ;;  %v15319_v58 = vld [vmem:[%s23459_s23] ss:$0 sm:$0xff] }
 0x700   : > { %v2207_v59 = vpop.xlane.xlu0 %2206 }
 0x701   : > { %19873 = vrcp.f32 %v2207_v59 }
 0x704   : > { %v19809_v60 = vpop.permute.xlu0 %19808 }
 0x705   : > { %v19811_v61 = vunpack.i.h.bf16 %v19809_v60  ;;  %v19810_v62 = vunpack.i.l.bf16 %v19809_v60 }
 0x707   : > { %v18210_v63 = vpack.c.bf16 %v19811_v61, %v19810_v62  ;;  %v19872_v1 = vpop.eup %19871 }
 0x708   : > { %v2214_v4 = vmul.f32 %v19872_v1, %v19866_v40 }
 0x709   : > { %18212 = vmatprep.subr.msk.bf16.mxu1 %vm20716_vm8, %v18210_v63 }
 0x70a   : > { %18215 = vmatpush3.bf16.msk.msra.mxu1 %vm20716_vm8, %v18210_v63 }
 0x70b   : > { %v19874_v2 = vpop.eup %19873  ;;  %17710 = vmatprep.subr.mxu1 %v1651_v14 }
 0x70c   : > { %v2213_v3 = vmul.f32 %v19874_v2, %v19868_v48 }
 0x70e   : > { %17707 = vmatprep.mubr.msk.f32.mxu1 %vm1994_vm9, %v2213_v3 }
 0x70f   : > { %17708 = vmatmul.mubr.msk.f32.vlgmr.msra.gmra.mrb[4].mxu1 %vm1994_vm9, %v2214_v4 }
 0x710   : > { %17711 = vmatpush3.msra.mxu1 %v1651_v14  ;;  %v3093_v14 = vld [vmem:[%s23460_s1 + $0x18] sm:$0xff] }
 0x711   : > { %17715 = vmatprep.subr.mxu1 %v1650_v15 }
 0x735   : > { %v2559_v5 = vpop.xlane.xlu0 %2558 }
 0x736   : > { %v2563_v6 = vsub.f32 %v2548_v31, %v2559_v5 }
 0x738   : > { %v2565_v7 = vmul.f32 1.442695, %v2563_v6 }
 0x739   : > { %v2574_v17 = vpop.xlane.xlu0 %2573 }
 0x73a   : > { %19875 = vpow2.f32 %v2565_v7 }
 0x742   : > { %v17745_v8 = vpop.f32.mrb[12].mxu0 }
 0x743   : > { %v2832_v9 = vpop.f32.mrb[13].mxu0  ;;  %v2844_v13 = vsel %vm1998_vm10, %v17745_v8, -inf }
 0x744   : > { %v19876_v10 = vpop.eup %19875  ;;  %v2841_v11 = vsel %vm1994_vm9, %v2832_v9, -inf }
 0x745   : > { %2842 = vmax.xlane.f32.xlu1 %v2841_v11  ;;  %v2569_v12 = vsel %vm1994_vm9, %v19876_v10, 0.0 }
 0x746   : > { %2570 = vadd.xlane.f32.xlu0 %v2569_v12  ;;  %v3091_v12 = vld [vmem:[%s23460_s1 + $0x8] sm:$0xff] }
 0x749   : > { %2845 = vmax.xlane.f32.xlu1 %v2844_v13  ;;  %v3107_v13 = vld [vmem:[%s23460_s1 + $0x88] sm:$0xff] }
 0x75c   : > { %19818 = vrot.lane.b32.xlu0 %v20722_v52, %s23359_s11  ;;  %s23467_s11 = sld [smem:[#allocation32_spill]] }
 0x7d2   : > { %v2843_v16 = vpop.xlane.xlu1 %2842 }
 0x7d3   : > { %v2847_v18 = vsub.f32 %v2832_v9, %v2843_v16  ;;  %v2571_v21 = vpop.xlane.xlu0 %2570  ;;  %v3109_v16 = vld [vmem:[%s23460_s1 + $0x98] sm:$0xff] }
 0x7d5   : > { %v2849_v24 = vmul.f32 1.442695, %v2847_v18  ;;  %v3106_v18 = vld [vmem:[%s23460_s1 + $0x80] sm:$0xff] }
 0x7d6   : > { %v2846_v19 = vpop.xlane.xlu1 %2845 }
 0x7d7   : > { %v2848_v20 = vsub.f32 %v17745_v8, %v2846_v19  ;;  %v19819_v26 = vpop.permute.xlu0 %19818  ;;  %v18248_v19 = vpack.c.bf16 %v3109_v16, %v3093_v14  ;;  %v3115_v14 = vld [vmem:[%s23460_s1 + $0xc8] sm:$0xff] }
 0x7d8   : > { %v19821_v29 = vunpack.i.h.bf16 %v19819_v26  ;;  %v19820_v30 = vunpack.i.l.bf16 %v19819_v26  ;;  %v3123_v26 = vld [vmem:[%s23460_s1 + $0x108] sm:$0xff] }
 0x7d9   : > { %v2851_v25 = vmul.f32 1.442695, %v2848_v20 }
 0x7da   : > { %v18222_v34 = vpack.c.bf16 %v19821_v29, %v19820_v30  ;;  %v3139_v29 = vld [vmem:[%s23460_s1 + $0x188] sm:$0xff]  ;;  %v3125_v30 = vld [vmem:[%s23460_s1 + $0x118] sm:$0xff] }
 0x7db   : > { %19877 = vpow2.f32 %v2851_v25 }
 0x7dc   : > { %19879 = vpow2.f32 %v2849_v24  ;;  %v3108_v24 = vld [vmem:[%s23460_s1 + $0x90] sm:$0xff] }
 0x7dd   : > { %19881 = vrcp.f32 %v2571_v21  ;;  %v3092_v21 = vld [vmem:[%s23460_s1 + $0x10] sm:$0xff] }
 0x7de   : > { %19883 = vrcp.f32 %v2574_v17  ;;  %v3090_v17 = vld [vmem:[%s23460_s1] sm:$0xff]  ;;  %v18250_v25 = vpack.c.bf16 %v3108_v24, %v3092_v21  ;;  %v3100_v21 = vld [vmem:[%s23460_s1 + $0x50] sm:$0xff] }
 0x7df   : > { %v18242_v20 = vpack.c.bf16 %v3106_v18, %v3090_v17  ;;  %v3098_v18 = vld [vmem:[%s23460_s1 + $0x40] sm:$0xff]  ;;  %v3116_v24 = vld [vmem:[%s23460_s1 + $0xd0] sm:$0xff] }
 0x7e2   : > { %v17709_v31 = vpop.f32.mrb[4].mxu1 }
 0x7e3   : > { %v2295_v32 = vpop.f32.mrb[5].mxu1 }
 0x7e4   : > { %17712 = vmatprep.mubr.msk.f32.mxu1 %vm1906_vm5, %v2295_v32  ;;  %v3141_v32 = vld [vmem:[%s23460_s1 + $0x198] sm:$0xff] }
 0x7e5   : > { %v19878_v33 = vpop.eup %19877  ;;  %17713 = vmatmul.mubr.msk.f32.vlgmr.msra.gmra.mrb[6].mxu1 %vm1906_vm5, %v17709_v31  ;;  %v18244_v31 = vpack.c.bf16 %v3139_v29, %v3123_v26  ;;  %v3131_v29 = vld [vmem:[%s23460_s1 + $0x148] sm:$0xff] }
 0x7e6   : > { %17716 = vmatpush3.msra.mxu1 %v1650_v15  ;;  %17717 = vmatprep.mubr.msk.f32.mxu1 %vm1906_vm5, %v20760_v23  ;;  %v2856_v35 = vsel %vm1998_vm10, %v19878_v33, 0.0  ;;  %v19880_v36 = vpop.eup %19879  ;;  %v18240_v15 = vpack.c.bf16 %v3107_v13, %v3091_v12  ;;  %v3099_v12 = vld [vmem:[%s23460_s1 + $0x48] sm:$0xff] }
 0x7e7   : > { %18224 = vmatprep.subr.msk.bf16.mxu1 %vm20716_vm8, %v18222_v34  ;;  %2857 = vadd.xlane.f32.xlu1 %v2856_v35  ;;  %v19882_v37 = vpop.eup %19881  ;;  %v2853_v38 = vsel %vm1994_vm9, %v19880_v36, 0.0  ;;  %v18252_v35 = vpack.c.bf16 %v3141_v32, %v3125_v30  ;;  %v3147_v30 = vld [vmem:[%s23460_s1 + $0x1c8] sm:$0xff]  ;;  %v3149_v32 = vld [vmem:[%s23460_s1 + $0x1d8] sm:$0xff] }
 0x7e8   : > { %v19884_v41 = vpop.eup %19883  ;;  %v2577_v43 = vmul.f32 %v19882_v37, %v19876_v10  ;;  %18241 = vmatprep.subr.bf16.mxu0 %v18240_v15  ;;  %v3124_v37 = vld [vmem:[%s23460_s1 + $0x110] sm:$0xff]  ;;  %v3101_v15 = vld [vmem:[%s23460_s1 + $0x58] sm:$0xff] }
 0x7e9   : > { %v2578_v23 = vmul.f32 %v19884_v41, %v20783_v56  ;;  %18243 = vmatpush1.bf16.msra.mxu0 %v18242_v20  ;;  %v3114_v20 = vld [vmem:[%s23460_s1 + $0xc0] sm:$0xff] }
 0x7ea   : > { %18245 = vmatprep.subr.bf16.mxu0 %v18244_v31  ;;  %v3133_v31 = vld [vmem:[%s23460_s1 + $0x158] sm:$0xff] }
 0x7eb   : > { %2854 = vadd.xlane.f32.xlu1 %v2853_v38  ;;  %v3140_v38 = vld [vmem:[%s23460_s1 + $0x190] sm:$0xff] }
 0x7ec   : > { %v18254_v41 = vpack.c.bf16 %v3140_v38, %v3124_v37  ;;  %v3132_v37 = vld [vmem:[%s23460_s1 + $0x150] sm:$0xff] }
 0x7ed   : > { %17718 = vmatmul.mubr.msk.f32.vlgmr.msra.gmra.mrb[6].mxu1 %vm1906_vm5, %v20758_v22  ;;  %v3148_v38 = vld [vmem:[%s23460_s1 + $0x1d0] sm:$0xff] }
 0x7ee   : > { %18227 = vmatpush3.bf16.msk.msra.mxu1 %vm20716_vm8, %v18222_v34  ;;  %17731 = vmatprep.mubr.msk.f32.mxu1 %vm1994_vm9, %v2577_v43  ;;  %v3138_v34 = vld [vmem:[%s23460_s1 + $0x180] sm:$0xff]  ;;  %v3095_v43 = vld [vmem:[%s23460_s1 + $0x28] sm:$0xff] }
 0x7ef   : > { %17734 = vmatprep.subr.mxu1 %v1652_v44 }
 0x7f1   : > { %17732 = vmatmul.mubr.msk.f32.vlgmr.msra.gmra.mrb[8].mxu1 %vm1994_vm9, %v2578_v23  ;;  %v3111_v23 = vld [vmem:[%s23460_s1 + $0xa8] sm:$0xff] }
 0x7f2   : > { %17735 = vmatpush3.msra.mxu1 %v1652_v44  ;;  %v3097_v44 = vld [vmem:[%s23460_s1 + $0x38] sm:$0xff] }
 0x7fc   : > { %19823 = vrot.lane.b32.xlu1 %v20722_v52, %s23357_s2  ;;  %s23466_s2 = sld [smem:[#allocation31_spill]] }
 0x874   : > { %v2858_v42 = vpop.xlane.xlu1 %2857 }
 0x878   : > { %v2855_v45 = vpop.xlane.xlu1 %2854 }
 0x879   : > { %19885 = vrcp.f32 %v2855_v45  ;;  %v3113_v45 = vld [vmem:[%s23460_s1 + $0xb8] sm:$0xff] }
 0x87a   : > { %19887 = vrcp.f32 %v2858_v42  ;;  %v18256_v42 = vpack.c.bf16 %v3111_v23, %v3095_v43  ;;  %v18284_v43 = vpack.c.bf16 %v3149_v32, %v3133_v31  ;;  %v3103_v23 = vld [vmem:[%s23460_s1 + $0x68] sm:$0xff]  ;;  %v3208_v32 = vld [vmem:[%s23463_s26 + $0x1a0] sm:$0xff] }
 0x87b   : > { %v3177_v31 = vld [vmem:[%s23463_s26 + $0xa8] sm:$0xff] }
 0x87c   : > { %v19824_v40 = vpop.permute.xlu1 %19823 }
 0x87d   : > { %v19826_v22 = vunpack.i.h.bf16 %v19824_v40  ;;  %v19825_v46 = vunpack.i.l.bf16 %v19824_v40  ;;  %v18264_v40 = vpack.c.bf16 %v3113_v45, %v3097_v44  ;;  %v3119_v44 = vld [vmem:[%s23460_s1 + $0xe8] sm:$0xff]  ;;  %v3121_v45 = vld [vmem:[%s23460_s1 + $0xf8] sm:$0xff] }
 0x87f   : > { %v18234_v47 = vpack.c.bf16 %v19826_v22, %v19825_v46 }
 0x881   : > { %18236 = vmatprep.subr.msk.bf16.mxu1 %vm20716_vm8, %v18234_v47 }
 0x883   : > { %v19886_v48 = vpop.eup %19885 }
 0x884   : > { %v19888_v53 = vpop.eup %19887  ;;  %v2861_v52 = vmul.f32 %v19886_v48, %v19880_v36 }
 0x885   : > { %v2862_v55 = vmul.f32 %v19888_v53, %v19878_v33  ;;  %v3122_v33 = vld [vmem:[%s23460_s1 + $0x100] sm:$0xff] }
 0x886   : > { %v18246_v36 = vpack.c.bf16 %v3138_v34, %v3122_v33  ;;  %v18274_v33 = vpack.c.bf16 %v3114_v20, %v3098_v18  ;;  %v18282_v34 = vpack.c.bf16 %v3116_v24, %v3100_v21  ;;  %v3158_v20 = vld [vmem:[%s23463_s26 + $0x10] sm:$0xff]  ;;  %v3159_v21 = vld [vmem:[%s23463_s26 + $0x18] sm:$0xff] }
 0x888   : > { %18247 = vmatpush1.bf16.msra.mxu0 %v18246_v36  ;;  %v3146_v36 = vld [vmem:[%s23460_s1 + $0x1c0] sm:$0xff] }
 0x889   : > { %18257 = vmatprep.subr.bf16.mxu0 %v18256_v42  ;;  %v3105_v42 = vld [vmem:[%s23460_s1 + $0x78] sm:$0xff] }
 0x8c4   : > { %v17733_v50 = vpop.f32.mrb[8].mxu1 }
 0x8c5   : > { %v2658_v51 = vpop.f32.mrb[9].mxu1 }
 0x8c6   : > { %17736 = vmatprep.mubr.msk.f32.mxu1 %vm1906_vm5, %v2658_v51 }
 0x8c7   : > { %17737 = vmatmul.mubr.msk.f32.vlgmr.msra.gmra.mrb[6].mxu1 %vm1906_vm5, %v17733_v50 }
 0x8c8   : > { %18239 = vmatpush3.bf16.msk.msra.mxu1 %vm20716_vm8, %v18234_v47  ;;  %17750 = vmatprep.mubr.msk.f32.mxu1 %vm1994_vm9, %v2861_v52  ;;  %v15320_v52 = vld [vmem:[%s23461_s28] ss:$0 sm:$0xff] }
 0x8c9   : > { %17753 = vmatprep.subr.mxu1 %v1653_v54 }
 0x8cb   : > { %17751 = vmatmul.mubr.msk.f32.vlgmr.msra.gmra.mrb[10].mxu1 %vm1994_vm9, %v2862_v55 }
 0x8cc   : > { %17754 = vmatpush3.msra.mxu1 %v1653_v54  ;;  %v3094_v54 = vld [vmem:[%s23460_s1 + $0x20] sm:$0xff] }
 0x8cd   : > { %18249 = vmatprep.subr.bf16.mxu1 %v18248_v19 }
 0x99e   : > { %v17752_v56 = vpop.f32.mrb[10].mxu1 }
 0x99f   : > { %v2942_v57 = vpop.f32.mrb[11].mxu1 }
 0x9a0   : > { %17755 = vmatprep.mubr.msk.f32.mxu1 %vm1906_vm5, %v2942_v57  ;;  %v3096_v57 = vld [vmem:[%s23460_s1 + $0x30] sm:$0xff] }
 0x9a1   : > { %17756 = vmatmul.mubr.msk.f32.vlgmr.msra.gmra.mrb[6].mxu1 %vm1906_vm5, %v17752_v56  ;;  %v3110_v56 = vld [vmem:[%s23460_s1 + $0xa0] sm:$0xff] }
 0x9a2   : > { %3642 = vmatprep.mubr.f32.mxu1 %v23352_v0  ;;  %18251 = vmatpush1.bf16.msra.mxu1 %v18250_v25  ;;  %v18272_v25 = vpack.c.bf16 %v3115_v14, %v3099_v12  ;;  %v3188_v12 = vld [vmem:[%s23463_s26 + $0x100] sm:$0xff]  ;;  %v3174_v14 = vld [vmem:[%s23463_s26 + $0x90] sm:$0xff] }
 0x9a3   : > { %18253 = vmatprep.subr.bf16.mxu1 %v18252_v35  ;;  %v3130_v35 = vld [vmem:[%s23460_s1 + $0x140] sm:$0xff] }
 0x9a6   : > { %18255 = vmatpush1.bf16.msra.mxu1 %v18254_v41  ;;  %v18276_v41 = vpack.c.bf16 %v3147_v30, %v3131_v29  ;;  %v3191_v29 = vld [vmem:[%s23463_s26 + $0x118] sm:$0xff]  ;;  %v3176_v30 = vld [vmem:[%s23463_s26 + $0xa0] sm:$0xff] }
 0x9a7   : > { %18265 = vmatprep.subr.bf16.mxu1 %v18264_v40  ;;  %v18278_v40 = vpack.c.bf16 %v3146_v36, %v3130_v35  ;;  %v3160_v36 = vld [vmem:[%s23463_s26 + $0x20] sm:$0xff] }
 0xa74   : > { %v17757_v59 = vpop.f32.mrb[6].mxu1 }
 0xa75   : > { %v3041_v60 = vadd.f32 %v17757_v59, %v15319_v58  ;;  %v3023_v61 = vpop.f32.mrb[7].mxu1  ;;  %v15321_v59 = vld [vmem:[%s23462_s16] ss:$0 sm:$0xff] }
 0xa76   : > { %v3040_v62 = vadd.f32 %v15319_v58, %v3023_v61  ;;  %v3112_v58 = vld [vmem:[%s23460_s1 + $0xb0] sm:$0xff] }
 0xa77   : > { %v3043_v63 = vadd.f32 %v3041_v60, %v20676_v27  ;;  %v3127_v60 = vld [vmem:[%s23460_s1 + $0x128] sm:$0xff] }
 0xa78   : > { %v3042_v1 = vadd.f32 %v3040_v62, %v20680_v28  ;;  %v3143_v62 = vld [vmem:[%s23460_s1 + $0x1a8] sm:$0xff] }
 0xa79   : > { %v3050_v2 = vsel %vm3049_vm11, %v3043_v63, 0.0 }
 0xa7a   : > { %3051 = vadd.xlane.f32.xlu1 %v3050_v2  ;;  %v3046_v3 = vsel %vm1661_vm4, %v3042_v1, 0.0 }
 0xa7b   : > { %3047 = vadd.xlane.f32.xlu0 %v3046_v3  ;;  %v18258_v3 = vpack.c.bf16 %v3110_v56, %v3094_v54  ;;  %v3151_v54 = vld [vmem:[%s23460_s1 + $0x1e8] sm:$0xff]  ;;  %v3153_v56 = vld [vmem:[%s23460_s1 + $0x1f8] sm:$0xff] }
 0xb07   : > { %v3052_v4 = vpop.xlane.xlu1 %3051 }
 0xb08   : > { %v3055_v5 = vmul.f32 0.03125, %v3052_v4  ;;  %v3048_v6 = vpop.xlane.xlu0 %3047  ;;  %v18266_v4 = vpack.c.bf16 %v3112_v58, %v3096_v57 }
 0xb09   : > { %v3054_v7 = vmul.f32 0.03125, %v3048_v6 }
 0xb0a   : > { %v20835_v8 = vsub.f32 %v3043_v63, %v3055_v5  ;;  %v3129_v63 = vld [vmem:[%s23460_s1 + $0x138] sm:$0xff]  ;;  %v3126_v5 = vld [vmem:[%s23460_s1 + $0x120] sm:$0xff] }
 0xb0b   : > { %v3056_v27 = vsub.f32 %v3042_v1, %v3054_v7  ;;  %v3145_v1 = vld [vmem:[%s23460_s1 + $0x1b8] sm:$0xff] }
 0xb0c   : > { %v3059_v10 = vmul.f32 %v20835_v8, %v20835_v8 }
 0xb0d   : > { %v3058_v28 = vmul.f32 %v3056_v27, %v3056_v27 }
 0xb0e   : > { %v3063_v11 = vsel %vm3049_vm11, %v3059_v10, 0.0  ;;  %v18260_v10 = vpack.c.bf16 %v3143_v62, %v3127_v60  ;;  %v3150_v60 = vld [vmem:[%s23460_s1 + $0x1e0] sm:$0xff]  ;;  %v3152_v62 = vld [vmem:[%s23460_s1 + $0x1f0] sm:$0xff] }
 0xb0f   : > { %v3060_v9 = vsel %vm1661_vm4, %v3058_v28, 0.0  ;;  %v3128_v28 = vld [vmem:[%s23460_s1 + $0x130] sm:$0xff] }
 0xb10   : > { %3061 = vadd.xlane.f32.xlu0 %v3060_v9  ;;  %v3144_v9 = vld [vmem:[%s23460_s1 + $0x1b0] sm:$0xff] }
 0xb11   : > { %v18270_v17 = vpack.c.bf16 %v3144_v9, %v3128_v28  ;;  %v3156_v28 = vld [vmem:[%s23463_s26] sm:$0xff]  ;;  %v3157_v9 = vld [vmem:[%s23463_s26 + $0x8] sm:$0xff] }
 0xb14   : > { %3064 = vadd.xlane.f32.xlu0 %v3063_v11  ;;  %v18268_v11 = vpack.c.bf16 %v3145_v1, %v3129_v63 }
 0xb9d   : > { %v3062_v22 = vpop.xlane.xlu0 %3061 }
 0xb9e   : > { %v3066_v46 = vmul.f32 0.03125, %v3062_v22  ;;  %v18286_v22 = vpack.c.bf16 %v3148_v38, %v3132_v37  ;;  %v3161_v37 = vld [vmem:[%s23463_s26 + $0x28] sm:$0xff]  ;;  %v18312_v38 = vpack.c.bf16 %v3177_v31, %v3176_v30 }
 0xb9f   : > { %v3201_v30 = vld [vmem:[%s23463_s26 + $0x168] sm:$0xff] }
 0xba0   : > { %v3068_v47 = vadd.f32 1e-05, %v3066_v46  ;;  %v3102_v46 = vld [vmem:[%s23460_s1 + $0x60] sm:$0xff] }
 0xba1   : > { %v3065_v48 = vpop.xlane.xlu0 %3064 }
 0xba2   : > { %19889 = vrsqrt.f32 %v3068_v47  ;;  %v3067_v50 = vmul.f32 0.03125, %v3065_v48  ;;  %v3118_v47 = vld [vmem:[%s23460_s1 + $0xe0] sm:$0xff]  ;;  %v3104_v48 = vld [vmem:[%s23460_s1 + $0x70] sm:$0xff] }
 0xba3   : > { %v18290_v57 = vpack.c.bf16 %v3118_v47, %v3102_v46  ;;  %v3162_v47 = vld [vmem:[%s23463_s26 + $0x30] sm:$0xff] }
 0xba4   : > { %v3069_v51 = vadd.f32 1e-05, %v3067_v50  ;;  %v3120_v50 = vld [vmem:[%s23460_s1 + $0xf0] sm:$0xff] }
 0xba5   : > { %v18298_v58 = vpack.c.bf16 %v3120_v50, %v3104_v48  ;;  %v3163_v48 = vld [vmem:[%s23463_s26 + $0x38] sm:$0xff] }
 0xba6   : > { %19891 = vrsqrt.f32 %v3069_v51  ;;  %v18288_v51 = vpack.c.bf16 %v3119_v44, %v3103_v23  ;;  %v3193_v23 = vld [vmem:[%s23463_s26 + $0x128] sm:$0xff]  ;;  %v3178_v44 = vld [vmem:[%s23463_s26 + $0xb0] sm:$0xff] }
 0xbac   : > { %v19890_v53 = vpop.eup %19889 }
 0xbad   : > { %v3072_v55 = vmul.f32 %v19890_v53, %v3056_v27  ;;  %v3142_v27 = vld [vmem:[%s23460_s1 + $0x1a0] sm:$0xff]  ;;  %v18296_v53 = vpack.c.bf16 %v3121_v45, %v3105_v42  ;;  %v3179_v42 = vld [vmem:[%s23463_s26 + $0xb8] sm:$0xff]  ;;  %v3210_v45 = vld [vmem:[%s23463_s26 + $0x1b0] sm:$0xff] }
 0xbae   : > { %v18262_v16 = vpack.c.bf16 %v3142_v27, %v3126_v5  ;;  %v3205_v5 = vld [vmem:[%s23463_s26 + $0x188] sm:$0xff]  ;;  %v18316_v50 = vpack.c.bf16 %v3179_v42, %v3178_v44  ;;  %v3202_v44 = vld [vmem:[%s23463_s26 + $0x170] sm:$0xff]  ;;  %v3203_v42 = vld [vmem:[%s23463_s26 + $0x178] sm:$0xff] }
 0xbaf   : > { %v3080_v61 = vmul.f32 %v15320_v52, %v3072_v55  ;;  %v3137_v55 = vld [vmem:[%s23460_s1 + $0x178] sm:$0xff] }
 0xbb0   : > { %v19892_v2 = vpop.eup %19891  ;;  %v18300_v1 = vpack.c.bf16 %v3153_v56, %v3137_v55  ;;  %v3181_v55 = vld [vmem:[%s23463_s26 + $0xc8] sm:$0xff]  ;;  %v3212_v56 = vld [vmem:[%s23463_s26 + $0x1c0] sm:$0xff] }
 0xbb1   : > { %v20872_v6 = vadd.f32 %v15321_v59, %v3080_v61  ;;  %v3073_v7 = vmul.f32 %v19892_v2, %v20835_v8  ;;  %v3117_v8 = vld [vmem:[%s23460_s1 + $0xd8] sm:$0xff]  ;;  %v3136_v61 = vld [vmem:[%s23460_s1 + $0x170] sm:$0xff]  ;;  %v3172_v2 = vld [vmem:[%s23463_s26 + $0x80] sm:$0xff] }
 0xbb2   : > { %v18280_v26 = vpack.c.bf16 %v3117_v8, %v3101_v15  ;;  %v18302_v27 = vpack.c.bf16 %v3152_v62, %v3136_v61  ;;  %v3175_v15 = vld [vmem:[%s23463_s26 + $0x98] sm:$0xff]  ;;  %v3206_v8 = vld [vmem:[%s23463_s26 + $0x190] sm:$0xff]  ;;  %v3165_v61 = vld [vmem:[%s23463_s26 + $0x48] sm:$0xff] }
 0xbb3   : > { %v3081_v13 = vmul.f32 %v15320_v52, %v3073_v7  ;;  %15322 = vmatmul.mubr.msk.f32.vlgmr.msra.gmra.mrb[14].mxu0 %vm1661_vm4, %v20872_v6  ;;  %15324 = vmatmul.mubr.msk.f32.vlgmr.msra.gmra.mrb[12].mxu1 %vm1661_vm4, %v20872_v6  ;;  %v3135_v52 = vld [vmem:[%s23460_s1 + $0x168] sm:$0xff]  ;;  %v18308_v24 = vpack.c.bf16 %v3175_v15, %v3174_v14  ;;  %v3199_v14 = vld [vmem:[%s23463_s26 + $0x158] sm:$0xff]  ;;  %v3184_v15 = vld [vmem:[%s23463_s26 + $0xe0] sm:$0xff] }
 0xbb4   : > { %18259 = vmatpush1.bf16.msra.mxu0 %v18258_v3  ;;  %18267 = vmatpush1.bf16.msra.mxu1 %v18266_v4  ;;  %v18292_v63 = vpack.c.bf16 %v3151_v54, %v3135_v52  ;;  %v3173_v3 = vld [vmem:[%s23463_s26 + $0x88] sm:$0xff]  ;;  %v3204_v4 = vld [vmem:[%s23463_s26 + $0x180] sm:$0xff]  ;;  %v3195_v52 = vld [vmem:[%s23463_s26 + $0x138] sm:$0xff] }
 0xbb5   : > { %v20887_v19 = vadd.f32 %v15321_v59, %v3081_v13  ;;  %3571 = vmatprep.mubr.f32.mxu0 %v23352_v0  ;;  %3648 = vmatprep.mubr.f32.mxu1 %v23352_v0  ;;  %v3134_v59 = vld [vmem:[%s23460_s1 + $0x160] sm:$0xff]  ;;  %v3189_v13 = vld [vmem:[%s23463_s26 + $0x108] sm:$0xff] }
 0xbb6   : > { %18261 = vmatprep.subr.bf16.mxu0 %v18260_v10  ;;  %18269 = vmatprep.subr.bf16.mxu1 %v18268_v11  ;;  %v18294_v7 = vpack.c.bf16 %v3150_v60, %v3134_v59  ;;  %v18304_v10 = vpack.c.bf16 %v3173_v3, %v3172_v2  ;;  %v18336_v11 = vpack.c.bf16 %v3205_v5, %v3204_v4  ;;  %v3180_v54 = vld [vmem:[%s23463_s26 + $0xc0] sm:$0xff]  ;;  %v3197_v2 = vld [vmem:[%s23463_s26 + $0x148] sm:$0xff]  ;;  %v3182_v3 = vld [vmem:[%s23463_s26 + $0xd0] sm:$0xff] }
 0xbb7   : > { %15323 = vmatmul.mubr.msk.f32.gmra.mrb[16].mxu0 %vm1661_vm4, %v20887_v19  ;;  %15325 = vmatmul.mubr.msk.f32.gmra.mrb[14].mxu1 %vm1661_vm4, %v20887_v19  ;;  %v18338_v18 = vpack.c.bf16 %v3189_v13, %v3188_v12  ;;  %v3164_v60 = vld [vmem:[%s23463_s26 + $0x40] sm:$0xff]  ;;  %v18320_v62 = vpack.c.bf16 %v3181_v55, %v3180_v54  ;;  %v3183_v4 = vld [vmem:[%s23463_s26 + $0xd8] sm:$0xff]  ;;  %v3214_v5 = vld [vmem:[%s23463_s26 + $0x1d0] sm:$0xff] }
 0xbb8   : > { %18263 = vmatpush1.bf16.msra.mxu0 %v18262_v16  ;;  %18271 = vmatpush1.bf16.msra.mxu1 %v18270_v17  ;;  %v3207_v16 = vld [vmem:[%s23463_s26 + $0x198] sm:$0xff]  ;;  %v18306_v17 = vpack.c.bf16 %v3157_v9, %v3156_v28  ;;  %v3166_v9 = vld [vmem:[%s23463_s26 + $0x50] sm:$0xff]  ;;  %v21035_v55 = vld [vmem:[%s23464_s22] sm:$0xff] }
 0xbb9   : > { %3719 = vmatprep.mubr.f32.mxu0 %v23352_v0  ;;  %3796 = vmatprep.mubr.f32.mxu1 %v23352_v0  ;;  %v3198_v13 = vld [vmem:[%s23463_s26 + $0x150] sm:$0xff] }
 0xbba   : > { %18273 = vmatprep.subr.bf16.mxu0 %v18272_v25  ;;  %18281 = vmatprep.subr.bf16.mxu1 %v18280_v26  ;;  %v18340_v25 = vpack.c.bf16 %v3207_v16, %v3206_v8  ;;  %v3190_v26 = vld [vmem:[%s23463_s26 + $0x110] sm:$0xff]  ;;  %v3185_v8 = vld [vmem:[%s23463_s26 + $0xe8] sm:$0xff]  ;;  %v3216_v16 = vld [vmem:[%s23463_s26 + $0x1e0] sm:$0xff] }
 0xbbb   : > { %15326 = vmatmul.mubr.msk.f32.vlgmr.msra.gmra.mrb[18].mxu0 %vm1661_vm4, %v20872_v6  ;;  %15328 = vmatmul.mubr.msk.f32.vlgmr.msra.gmra.mrb[16].mxu1 %vm1661_vm4, %v20872_v6  ;;  %v18342_v35 = vpack.c.bf16 %v3191_v29, %v3190_v26  ;;  %v3169_v26 = vld [vmem:[%s23463_s26 + $0x68] sm:$0xff]  ;;  %v3200_v29 = vld [vmem:[%s23463_s26 + $0x160] sm:$0xff] }
 0xbbc   : > { %18275 = vmatpush1.bf16.msra.mxu0 %v18274_v33  ;;  %18283 = vmatpush1.bf16.msra.mxu1 %v18282_v34  ;;  %v3209_v33 = vld [vmem:[%s23463_s26 + $0x1a8] sm:$0xff]  ;;  %v18310_v34 = vpack.c.bf16 %v3159_v21, %v3158_v20  ;;  %v18358_v20 = vpack.c.bf16 %v3199_v14, %v3198_v13  ;;  %v3168_v21 = vld [vmem:[%s23463_s26 + $0x60] sm:$0xff]  ;;  %v3271_v13 = vld [vmem:[%s23463_s26 + $0x398] sm:$0xff] }
 0xbbd   : > { %3725 = vmatprep.mubr.f32.mxu0 %v23352_v0  ;;  %3802 = vmatprep.mubr.f32.mxu1 %v23352_v0  ;;  %v18330_v31 = vpack.c.bf16 %v3169_v26, %v3168_v21 }
 0xbbe   : > { %18277 = vmatprep.subr.bf16.mxu0 %v18276_v41  ;;  %18285 = vmatprep.subr.bf16.mxu1 %v18284_v43  ;;  %v18344_v41 = vpack.c.bf16 %v3209_v33, %v3208_v32  ;;  %v3192_v43 = vld [vmem:[%s23463_s26 + $0x120] sm:$0xff]  ;;  %v18362_v32 = vpack.c.bf16 %v3201_v30, %v3200_v29  ;;  %v3186_v33 = vld [vmem:[%s23463_s26 + $0xf0] sm:$0xff] }
 0xbbf   : > { %15327 = vmatmul.mubr.msk.f32.gmra.mrb[20].mxu0 %vm1661_vm4, %v20887_v19  ;;  %15329 = vmatmul.mubr.msk.f32.gmra.mrb[18].mxu1 %vm1661_vm4, %v20887_v19  ;;  %v18346_v46 = vpack.c.bf16 %v3193_v23, %v3192_v43 }
 0xbc0   : > { %18279 = vmatpush1.bf16.msra.mxu0 %v18278_v40  ;;  %18287 = vmatpush1.bf16.msra.mxu1 %v18286_v22  ;;  %v3211_v40 = vld [vmem:[%s23463_s26 + $0x1b8] sm:$0xff]  ;;  %v18314_v22 = vpack.c.bf16 %v3161_v37, %v3160_v36 }
 0xbc1   : > { %3873 = vmatprep.mubr.f32.mxu0 %v23352_v0  ;;  %3950 = vmatprep.mubr.f32.mxu1 %v23352_v0  ;;  %v3219_v37 = vld [vmem:[%s23463_s26 + $0x1f8] sm:$0xff] }
 0xbc2   : > { %18289 = vmatprep.subr.bf16.mxu0 %v18288_v51  ;;  %18297 = vmatprep.subr.bf16.mxu1 %v18296_v53  ;;  %v18348_v51 = vpack.c.bf16 %v3211_v40, %v3210_v45  ;;  %v3194_v53 = vld [vmem:[%s23463_s26 + $0x130] sm:$0xff]  ;;  %v18366_v45 = vpack.c.bf16 %v3203_v42, %v3202_v44  ;;  %v3236_v40 = vld [vmem:[%s23463_s26 + $0x280] sm:$0xff] }
 0xbc3   : > { %15330 = vmatmul.mubr.msk.f32.vlgmr.msra.gmra.mrb[22].mxu0 %vm1661_vm4, %v20872_v6  ;;  %15332 = vmatmul.mubr.msk.f32.vlgmr.msra.gmra.mrb[20].mxu1 %vm1661_vm4, %v20872_v6  ;;  %v18350_v59 = vpack.c.bf16 %v3195_v52, %v3194_v53 }
 0xbc4   : > { %18291 = vmatpush1.bf16.msra.mxu0 %v18290_v57  ;;  %18299 = vmatpush1.bf16.msra.mxu1 %v18298_v58  ;;  %v3213_v57 = vld [vmem:[%s23463_s26 + $0x1c8] sm:$0xff]  ;;  %v18318_v58 = vpack.c.bf16 %v3163_v48, %v3162_v47 }
 0xbc5   : > { %3879 = vmatprep.mubr.f32.mxu0 %v23352_v0  ;;  %3956 = vmatprep.mubr.f32.mxu1 %v23352_v0  ;;  %v3269_v48 = vld [vmem:[%s23463_s26 + $0x388] sm:$0xff] }
 0xbc6   : > { %18293 = vmatprep.subr.bf16.mxu0 %v18292_v63  ;;  %18301 = vmatprep.subr.bf16.mxu1 %v18300_v1  ;;  %v18352_v63 = vpack.c.bf16 %v3213_v57, %v3212_v56  ;;  %v3196_v1 = vld [vmem:[%s23463_s26 + $0x140] sm:$0xff] }
 0xbc7   : > { %15331 = vmatmul.mubr.msk.f32.gmra.mrb[24].mxu0 %vm1661_vm4, %v20887_v19  ;;  %15333 = vmatmul.mubr.msk.f32.gmra.mrb[22].mxu1 %vm1661_vm4, %v20887_v19  ;;  %v18354_v28 = vpack.c.bf16 %v3197_v2, %v3196_v1 }
 0xbc8   : > { %18295 = vmatpush1.bf16.msra.mxu0 %v18294_v7  ;;  %18303 = vmatpush1.bf16.msra.mxu1 %v18302_v27  ;;  %v3215_v7 = vld [vmem:[%s23463_s26 + $0x1d8] sm:$0xff]  ;;  %v18322_v27 = vpack.c.bf16 %v3165_v61, %v3164_v60 }
 0xbc9   : > { %4027 = vmatprep.mubr.f32.mxu0 %v23352_v0  ;;  %4104 = vmatprep.mubr.f32.mxu1 %v23352_v0  ;;  %v18356_v12 = vpack.c.bf16 %v3215_v7, %v3214_v5  ;;  %v3253_v5 = vld [vmem:[%s23463_s26 + $0x308] sm:$0xff]  ;;  %v3238_v7 = vld [vmem:[%s23463_s26 + $0x290] sm:$0xff] }
 0xbca   : > { %18305 = vmatprep.subr.bf16.mxu0 %v18304_v10  ;;  %18337 = vmatprep.subr.bf16.mxu1 %v18336_v11  ;;  %v3167_v10 = vld [vmem:[%s23463_s26 + $0x58] sm:$0xff]  ;;  %v18324_v11 = vpack.c.bf16 %v3183_v4, %v3182_v3  ;;  %v3252_v4 = vld [vmem:[%s23463_s26 + $0x300] sm:$0xff] }
 0xbcb   : > { %15334 = vmatmul.mubr.msk.f32.vlgmr.msra.gmra.mrb[26].mxu0 %vm1661_vm4, %v20872_v6  ;;  %15336 = vmatmul.mubr.msk.f32.vlgmr.msra.gmra.mrb[24].mxu1 %vm1661_vm4, %v20872_v6 }
 0xbcc   : > { %4033 = vmatprep.mubr.f32.mxu0 %v23352_v0  ;;  %4110 = vmatprep.mubr.f32.mxu1 %v23352_v0  ;;  %v3334_v0 = vld [vmem:[%s23463_s26 + $0x590] sm:$0xff] }
 0xbcd   : > { %18307 = vmatpush3.bf16.msra.mxu0 %v18306_v17  ;;  %18339 = vmatpush3.bf16.msra.mxu1 %v18338_v18  ;;  %v3217_v17 = vld [vmem:[%s23463_s26 + $0x1e8] sm:$0xff]  ;;  %v18326_v18 = vpack.c.bf16 %v3167_v10, %v3166_v9 }
 0xbce   : > { %18309 = vmatprep.subr.bf16.mxu0 %v18308_v24  ;;  %18341 = vmatprep.subr.bf16.mxu1 %v18340_v25  ;;  %v18328_v24 = vpack.c.bf16 %v3185_v8, %v3184_v15  ;;  %v18360_v25 = vpack.c.bf16 %v3217_v17, %v3216_v16  ;;  %v18402_v17 = vpack.c.bf16 %v3253_v5, %v3252_v4 }
 0xbcf   : > { %15335 = vmatmul.mubr.msk.f32.gmra.mrb[28].mxu0 %vm1661_vm4, %v20887_v19  ;;  %15337 = vmatmul.mubr.msk.f32.gmra.mrb[26].mxu1 %vm1661_vm4, %v20887_v19 }
 0xbd1   : > { %18311 = vmatpush3.bf16.msra.mxu0 %v18310_v34  ;;  %18343 = vmatpush3.bf16.msra.mxu1 %v18342_v35  ;;  %v3187_v34 = vld [vmem:[%s23463_s26 + $0xf8] sm:$0xff]  ;;  %v3218_v35 = vld [vmem:[%s23463_s26 + $0x1f0] sm:$0xff] }
 0xbd2   : > { %18313 = vmatprep.subr.bf16.mxu0 %v18312_v38  ;;  %18345 = vmatprep.subr.bf16.mxu1 %v18344_v41  ;;  %v18332_v36 = vpack.c.bf16 %v3187_v34, %v3186_v33  ;;  %v3170_v38 = vld [vmem:[%s23463_s26 + $0x70] sm:$0xff]  ;;  %v3171_v41 = vld [vmem:[%s23463_s26 + $0x78] sm:$0xff]  ;;  %v18364_v43 = vpack.c.bf16 %v3219_v37, %v3218_v35 }
 0xbd3   : > { %v18334_v23 = vpack.c.bf16 %v3171_v41, %v3170_v38  ;;  %v3255_v41 = vld [vmem:[%s23463_s26 + $0x318] sm:$0xff] }
 0xbd5   : > { %18315 = vmatpush3.bf16.msra.mxu0 %v18314_v22  ;;  %18347 = vmatpush3.bf16.msra.mxu1 %v18346_v46  ;;  %v3237_v22 = vld [vmem:[%s23463_s26 + $0x288] sm:$0xff]  ;;  %v3268_v46 = vld [vmem:[%s23463_s26 + $0x380] sm:$0xff] }
 0xbd6   : > { %18317 = vmatprep.subr.bf16.mxu0 %v18316_v50  ;;  %18349 = vmatprep.subr.bf16.mxu1 %v18348_v51  ;;  %v18368_v47 = vpack.c.bf16 %v3237_v22, %v3236_v40  ;;  %v18400_v50 = vpack.c.bf16 %v3269_v48, %v3268_v46  ;;  %v3415_v51 = vlaneseq  ;;  %v3272_v40 = vld [vmem:[%s23463_s26 + $0x3a0] sm:$0xff]  ;;  %v3273_v22 = vld [vmem:[%s23463_s26 + $0x3a8] sm:$0xff] }
 0xbd7   : > { %v3224_v46 = vld [vmem:[%s23463_s26 + $0x220] sm:$0xff]  ;;  %v18408_v5 = vpack.c.bf16 %v3273_v22, %v3272_v40 }
 0xbd8   : > { %v21026_v53 = vshrl.u32 %v3415_v51, 7 }
 0xbd9   : > { %18319 = vmatpush3.bf16.msra.mxu0 %v18318_v58  ;;  %18351 = vmatpush3.bf16.msra.mxu1 %v18350_v59 }
 0xbda   : > { %18321 = vmatprep.subr.bf16.mxu0 %v18320_v62  ;;  %18353 = vmatprep.subr.bf16.mxu1 %v18352_v63  ;;  %v21029_v52 = vsub.s32 0, %v21026_v53  ;;  %v21032_v54 = vsub.s32 2, %v21026_v53  ;;  %v21038_v56 = vsub.s32 1, %v21026_v53  ;;  %v21041_v57 = vsub.s32 3, %v21026_v53  ;;  %v3220_v62 = vld [vmem:[%s23463_s26 + $0x200] sm:$0xff]  ;;  %v3221_v63 = vld [vmem:[%s23463_s26 + $0x208] sm:$0xff] }
 0xbdb   : > { %v21054_v1 = vsub.s32 5, %v21026_v53  ;;  %v21063_v8 = vsub.s32 7, %v21026_v53  ;;  %v18370_v16 = vpack.c.bf16 %v3221_v63, %v3220_v62 }
 0xbdc   : > { %v3418_v58 = vrot.slane %v21035_v55, %v21029_v52  ;;  %v3426_v59 = vrot.slane %v21035_v55, %v21032_v54  ;;  %v3422_v60 = vrot.slane %v21035_v55, %v21038_v56  ;;  %v3430_v61 = vrot.slane %v21035_v55, %v21041_v57 }
 0xbdd   : > { %18323 = vmatpush3.bf16.msra.mxu0 %v18322_v27  ;;  %18355 = vmatpush3.bf16.msra.mxu1 %v18354_v28  ;;  %v21076_v42 = vrot.slane %v21035_v55, %v21063_v8 }
 0xbde   : > { %18325 = vmatprep.subr.bf16.mxu0 %v18324_v11  ;;  %18357 = vmatprep.subr.bf16.mxu1 %v18356_v12  ;;  %v3239_v11 = vld [vmem:[%s23463_s26 + $0x298] sm:$0xff]  ;;  %v3270_v12 = vld [vmem:[%s23463_s26 + $0x390] sm:$0xff] }
 0xbdf   : > { %v18372_v29 = vpack.c.bf16 %v3239_v11, %v3238_v7  ;;  %v18404_v30 = vpack.c.bf16 %v3271_v13, %v3270_v12  ;;  %v3257_v7 = vld [vmem:[%s23463_s26 + $0x328] sm:$0xff]  ;;  %v3274_v11 = vld [vmem:[%s23463_s26 + $0x3b0] sm:$0xff]  ;;  %v3275_v12 = vld [vmem:[%s23463_s26 + $0x3b8] sm:$0xff] }
 0xbe1   : > { %18327 = vmatpush3.bf16.msra.mxu0 %v18326_v18  ;;  %18359 = vmatpush3.bf16.msra.mxu1 %v18358_v20  ;;  %v21067_v18 = vrot.slane %v21035_v55, %v21054_v1  ;;  %v3222_v20 = vld [vmem:[%s23463_s26 + $0x210] sm:$0xff] }
 0xbe2   : > { %18329 = vmatprep.subr.bf16.mxu0 %v18328_v24  ;;  %18361 = vmatprep.subr.bf16.mxu1 %v18360_v25 }
 0xbe5   : > { %18331 = vmatpush3.bf16.msra.mxu0 %v18330_v31  ;;  %18363 = vmatpush3.bf16.msra.mxu1 %v18362_v32  ;;  %v3223_v31 = vld [vmem:[%s23463_s26 + $0x218] sm:$0xff]  ;;  %v3254_v32 = vld [vmem:[%s23463_s26 + $0x310] sm:$0xff] }
 0xbe6   : > { %18333 = vmatprep.subr.bf16.mxu0 %v18332_v36  ;;  %18365 = vmatprep.subr.bf16.mxu1 %v18364_v43  ;;  %v3240_v43 = vld [vmem:[%s23463_s26 + $0x2a0] sm:$0xff] }
 0xbe9   : > { %18335 = vmatpush3.bf16.msra.mxu0 %v18334_v23  ;;  %18367 = vmatpush3.bf16.msra.mxu1 %v18366_v45  ;;  %v3241_v45 = vld [vmem:[%s23463_s26 + $0x2a8] sm:$0xff] }
 0xbea   : > { %18369 = vmatprep.subr.bf16.mxu0 %v18368_v47  ;;  %18401 = vmatprep.subr.bf16.mxu1 %v18400_v50  ;;  %v18376_v4 = vpack.c.bf16 %v3241_v45, %v3240_v43 }
 0xc86   : > { %v3567_v2 = vpop.f32.mrb[14].mxu0  ;;  %v3644_v3 = vpop.f32.mrb[12].mxu1 }
 0xc87   : > { %v3568_v27 = vadd.f32 %v3567_v2, %v3418_v58  ;;  %v3645_v28 = vadd.f32 %v3644_v3, %v3426_v59  ;;  %v3569_v9 = vpop.f32.mrb[15].mxu0  ;;  %v3646_v10 = vpop.f32.mrb[13].mxu1 }
 0xc88   : > { %v3570_v14 = vadd.f32 %v3569_v9, %v3422_v60  ;;  %v3647_v15 = vadd.f32 %v3646_v10, %v3430_v61  ;;  %v3243_v10 = vld [vmem:[%s23463_s26 + $0x2b8] sm:$0xff] }
 0xc89   : > { %v4117_v33 = vmax.f32 %v3568_v27, 0.0  ;;  %v4119_v34 = vmax.f32 %v3645_v28, 0.0  ;;  %v3242_v27 = vld [vmem:[%s23463_s26 + $0x2b0] sm:$0xff] }
 0xc8a   : > { %v4118_v21 = vmax.f32 %v3570_v14, 0.0  ;;  %v4120_v24 = vmax.f32 %v3647_v15, 0.0  ;;  %v3573_v25 = vpop.f32.mrb[16].mxu0  ;;  %v3650_v26 = vpop.f32.mrb[14].mxu1 }
 0xc8b   : > { %v3574_v35 = vadd.f32 %v3573_v25, %v3418_v58  ;;  %v3651_v36 = vadd.f32 %v3650_v26, %v3426_v59  ;;  %v3575_v37 = vpop.f32.mrb[17].mxu0  ;;  %v3652_v38 = vpop.f32.mrb[15].mxu1  ;;  %v18374_v58 = vpack.c.bf16 %v3223_v31, %v3222_v20  ;;  %v18406_v59 = vpack.c.bf16 %v3255_v41, %v3254_v32  ;;  %v3258_v31 = vld [vmem:[%s23463_s26 + $0x330] sm:$0xff]  ;;  %v3259_v32 = vld [vmem:[%s23463_s26 + $0x338] sm:$0xff] }
 0xc8c   : > { %v3576_v23 = vadd.f32 %v3575_v37, %v3422_v60  ;;  %v3653_v44 = vadd.f32 %v3652_v38, %v3430_v61  ;;  %4219 = vmatprep.mubr.f32.mxu0 %v4118_v21  ;;  %4294 = vmatprep.mubr.f32.mxu1 %v4120_v24  ;;  %v3225_v60 = vld [vmem:[%s23463_s26 + $0x228] sm:$0xff]  ;;  %v3256_v61 = vld [vmem:[%s23463_s26 + $0x320] sm:$0xff]  ;;  %v3226_v21 = vld [vmem:[%s23463_s26 + $0x230] sm:$0xff]  ;;  %v18414_v43 = vpack.c.bf16 %v3259_v32, %v3258_v31 }
 0xc8d   : > { %4220 = vmatmul.mubr.f32.vlgmr.msra.gmra.mrb[30].mxu0 %v4117_v33  ;;  %4295 = vmatmul.mubr.f32.vlgmr.msra.gmra.mrb[28].mxu1 %v4119_v34  ;;  %v4133_v62 = vmax.f32 %v3574_v35, 0.0  ;;  %v4135_v63 = vmax.f32 %v3651_v36, 0.0  ;;  %v18410_v20 = vpack.c.bf16 %v3257_v7, %v3256_v61  ;;  %v3227_v24 = vld [vmem:[%s23463_s26 + $0x238] sm:$0xff]  ;;  %v3244_v33 = vld [vmem:[%s23463_s26 + $0x2c0] sm:$0xff]  ;;  %v3245_v34 = vld [vmem:[%s23463_s26 + $0x2c8] sm:$0xff] }
 0xc8e   : > { %v4134_v47 = vmax.f32 %v3576_v23, 0.0  ;;  %v4136_v48 = vmax.f32 %v3653_v44, 0.0  ;;  %18371 = vmatpush3.bf16.msra.mxu0 %v18370_v16  ;;  %18403 = vmatpush3.bf16.msra.mxu1 %v18402_v17  ;;  %v21082_v50 = vpop.f32.mrb[18].mxu0  ;;  %v21084_v51 = vpop.f32.mrb[16].mxu1  ;;  %v18378_v17 = vpack.c.bf16 %v3225_v60, %v3224_v46  ;;  %v3276_v35 = vld [vmem:[%s23463_s26 + $0x3c0] sm:$0xff]  ;;  %v3277_v36 = vld [vmem:[%s23463_s26 + $0x3c8] sm:$0xff]  ;;  %v18382_v41 = vpack.c.bf16 %v3227_v24, %v3226_v21 }
 0xc8f   : > { %v3723_v2 = vpop.f32.mrb[19].mxu0  ;;  %v3800_v3 = vpop.f32.mrb[17].mxu1  ;;  %18373 = vmatprep.subr.bf16.mxu0 %v18372_v29  ;;  %18405 = vmatprep.subr.bf16.mxu1 %v18404_v30  ;;  %v18380_v29 = vpack.c.bf16 %v3243_v10, %v3242_v27  ;;  %v18412_v30 = vpack.c.bf16 %v3275_v12, %v3274_v11  ;;  %v3228_v23 = vld [vmem:[%s23463_s26 + $0x240] sm:$0xff]  ;;  %v3229_v44 = vld [vmem:[%s23463_s26 + $0x248] sm:$0xff]  ;;  %v18384_v22 = vpack.c.bf16 %v3245_v34, %v3244_v33  ;;  %v3278_v60 = vld [vmem:[%s23463_s26 + $0x3d0] sm:$0xff]  ;;  %v21153_v33 = vsub.s32 6, %v21026_v53 }
 0xc90   : > { %v3724_v28 = vadd.f32 %v3723_v2, %v21067_v18  ;;  %v3801_v9 = vadd.f32 %v3800_v3, %v21076_v42  ;;  %4224 = vmatprep.mubr.f32.mxu0 %v4134_v47  ;;  %4299 = vmatprep.mubr.f32.mxu1 %v4136_v48  ;;  %v18416_v46 = vpack.c.bf16 %v3277_v36, %v3276_v35  ;;  %v3260_v47 = vld [vmem:[%s23463_s26 + $0x340] sm:$0xff]  ;;  %v3261_v48 = vld [vmem:[%s23463_s26 + $0x348] sm:$0xff]  ;;  %v3279_v61 = vld [vmem:[%s23463_s26 + $0x3d8] sm:$0xff] }
 0xc91   : > { %4225 = vmatmul.mubr.f32.gmra.mrb[32].mxu0 %v4133_v62  ;;  %4300 = vmatmul.mubr.f32.gmra.mrb[30].mxu1 %v4135_v63  ;;  %v18386_v2 = vpack.c.bf16 %v3229_v44, %v3228_v23  ;;  %v18418_v3 = vpack.c.bf16 %v3261_v48, %v3260_v47  ;;  %v3262_v10 = vld [vmem:[%s23463_s26 + $0x350] sm:$0xff]  ;;  %v3263_v11 = vld [vmem:[%s23463_s26 + $0x358] sm:$0xff]  ;;  %v3248_v12 = vld [vmem:[%s23463_s26 + $0x2e0] sm:$0xff] }
 0xc92   : > { %v4122_v13 = vmax.f32 %v3724_v28, 0.0  ;;  %v4124_v14 = vmax.f32 %v3801_v9, 0.0  ;;  %18375 = vmatpush3.bf16.msra.mxu0 %v18374_v58  ;;  %18407 = vmatpush3.bf16.msra.mxu1 %v18406_v59  ;;  %v21095_v15 = vpop.f32.mrb[20].mxu0  ;;  %v21097_v16 = vpop.f32.mrb[18].mxu1  ;;  %v3246_v58 = vld [vmem:[%s23463_s26 + $0x2d0] sm:$0xff]  ;;  %v3247_v59 = vld [vmem:[%s23463_s26 + $0x2d8] sm:$0xff]  ;;  %v18420_v9 = vpack.c.bf16 %v3279_v61, %v3278_v60 }
 0xc93   : > { %v21101_v25 = vpop.f32.mrb[21].mxu0  ;;  %v21103_v26 = vpop.f32.mrb[19].mxu1  ;;  %18377 = vmatprep.subr.bf16.mxu0 %v18376_v4  ;;  %18409 = vmatprep.subr.bf16.mxu1 %v18408_v5  ;;  %v3230_v4 = vld [vmem:[%s23463_s26 + $0x250] sm:$0xff]  ;;  %v3231_v5 = vld [vmem:[%s23463_s26 + $0x258] sm:$0xff]  ;;  %v18388_v28 = vpack.c.bf16 %v3247_v59, %v3246_v58  ;;  %v3232_v31 = vld [vmem:[%s23463_s26 + $0x260] sm:$0xff] }
 0xc94   : > { %4369 = vmatprep.mubr.f32.mxu0 %v4122_v13  ;;  %4444 = vmatprep.mubr.f32.mxu1 %v4124_v14  ;;  %v3249_v13 = vld [vmem:[%s23463_s26 + $0x2e8] sm:$0xff]  ;;  %v3280_v14 = vld [vmem:[%s23463_s26 + $0x3e0] sm:$0xff]  ;;  %v3250_v44 = vld [vmem:[%s23463_s26 + $0x2f0] sm:$0xff] }
 0xc95   : > { %v3233_v32 = vld [vmem:[%s23463_s26 + $0x268] sm:$0xff]  ;;  %v18392_v36 = vpack.c.bf16 %v3249_v13, %v3248_v12  ;;  %v3283_v47 = vld [vmem:[%s23463_s26 + $0x3f8] sm:$0xff]  ;;  %v3234_v61 = vld [vmem:[%s23463_s26 + $0x270] sm:$0xff] }
 0xc96   : > { %18379 = vmatpush3.bf16.msra.mxu0 %v18378_v17  ;;  %18411 = vmatpush3.bf16.msra.mxu1 %v18410_v20  ;;  %v21111_v37 = vpop.f32.mrb[22].mxu0  ;;  %v21113_v38 = vpop.f32.mrb[20].mxu1  ;;  %v3281_v17 = vld [vmem:[%s23463_s26 + $0x3e8] sm:$0xff]  ;;  %v21144_v20 = vsub.s32 4, %v21026_v53  ;;  %v18394_v59 = vpack.c.bf16 %v3233_v32, %v3232_v31  ;;  %v3300_v12 = vld [vmem:[%s23463_s26 + $0x480] sm:$0xff] }
 0xc97   : > { %v21117_v45 = vpop.f32.mrb[23].mxu0  ;;  %v21119_v40 = vpop.f32.mrb[21].mxu1  ;;  %18381 = vmatprep.subr.bf16.mxu0 %v18380_v29  ;;  %18413 = vmatprep.subr.bf16.mxu1 %v18412_v30  ;;  %v18390_v29 = vpack.c.bf16 %v3231_v5, %v3230_v4  ;;  %v18422_v30 = vpack.c.bf16 %v3263_v11, %v3262_v10  ;;  %v3265_v23 = vld [vmem:[%s23463_s26 + $0x368] sm:$0xff]  ;;  %v3442_v4 = vrot.slane %v21035_v55, %v21153_v33  ;;  %v3267_v11 = vld [vmem:[%s23463_s26 + $0x378] sm:$0xff] }
 0xc98   : > { %v3434_v53 = vrot.slane %v21035_v55, %v21144_v20  ;;  %v3301_v13 = vld [vmem:[%s23463_s26 + $0x488] sm:$0xff]  ;;  %v3284_v55 = vld [vmem:[%s23463_s26 + $0x400] sm:$0xff] }
 0xc9a   : > { %18383 = vmatpush3.bf16.msra.mxu0 %v18382_v41  ;;  %18415 = vmatpush3.bf16.msra.mxu1 %v18414_v43  ;;  %v21127_v62 = vpop.f32.mrb[24].mxu0  ;;  %v21129_v63 = vpop.f32.mrb[22].mxu1  ;;  %v18424_v41 = vpack.c.bf16 %v3281_v17, %v3280_v14  ;;  %v3264_v43 = vld [vmem:[%s23463_s26 + $0x360] sm:$0xff]  ;;  %v3333_v17 = vld [vmem:[%s23463_s26 + $0x588] sm:$0xff] }
 0xc9b   : > { %v21133_v7 = vpop.f32.mrb[25].mxu0  ;;  %v21135_v27 = vpop.f32.mrb[23].mxu1  ;;  %18385 = vmatprep.subr.bf16.mxu0 %v18384_v22  ;;  %18417 = vmatprep.subr.bf16.mxu1 %v18416_v46  ;;  %v3251_v22 = vld [vmem:[%s23463_s26 + $0x2f8] sm:$0xff]  ;;  %v3282_v46 = vld [vmem:[%s23463_s26 + $0x3f0] sm:$0xff]  ;;  %v18426_v60 = vpack.c.bf16 %v3265_v23, %v3264_v43  ;;  %v3332_v14 = vld [vmem:[%s23463_s26 + $0x580] sm:$0xff] }
 0xc9c   : > { %v18428_v10 = vpack.c.bf16 %v3283_v47, %v3282_v46  ;;  %v3317_v43 = vld [vmem:[%s23463_s26 + $0x508] sm:$0xff]  ;;  %v3302_v23 = vld [vmem:[%s23463_s26 + $0x490] sm:$0xff]  ;;  %v18464_v46 = vpack.c.bf16 %v3333_v17, %v3332_v14  ;;  %v3303_v47 = vld [vmem:[%s23463_s26 + $0x498] sm:$0xff] }
 0xc9d   : > { %v3319_v17 = vld [vmem:[%s23463_s26 + $0x518] sm:$0xff] }
 0xc9e   : > { %18387 = vmatpush3.bf16.msra.mxu0 %v18386_v2  ;;  %18419 = vmatpush3.bf16.msra.mxu1 %v18418_v3  ;;  %v21146_v21 = vpop.f32.mrb[26].mxu0  ;;  %v21148_v24 = vpop.f32.mrb[24].mxu1  ;;  %v3235_v2 = vld [vmem:[%s23463_s26 + $0x278] sm:$0xff]  ;;  %v3266_v3 = vld [vmem:[%s23463_s26 + $0x370] sm:$0xff] }
 0xc9f   : > { %v21155_v34 = vpop.f32.mrb[27].mxu0  ;;  %v21157_v35 = vpop.f32.mrb[25].mxu1  ;;  %18389 = vmatprep.subr.bf16.mxu0 %v18388_v28  ;;  %18421 = vmatprep.subr.bf16.mxu1 %v18420_v9  ;;  %v18396_v9 = vpack.c.bf16 %v3251_v22, %v3250_v44  ;;  %v18398_v31 = vpack.c.bf16 %v3235_v2, %v3234_v61  ;;  %v18430_v32 = vpack.c.bf16 %v3267_v11, %v3266_v3  ;;  %v3287_v11 = vld [vmem:[%s23463_s26 + $0x418] sm:$0xff] }
 0xca0   : > { %v3722_v44 = vadd.f32 %v21082_v50, %v3434_v53  ;;  %v3799_v22 = vadd.f32 %v21084_v51, %v3442_v4 }
 0xca2   : > { %18391 = vmatpush3.bf16.msra.mxu0 %v18390_v29  ;;  %18423 = vmatpush3.bf16.msra.mxu1 %v18422_v30  ;;  %v21167_v48 = vpop.f32.mrb[28].mxu0  ;;  %v21169_v58 = vpop.f32.mrb[26].mxu1  ;;  %v21186_v29 = vld [vmem:[%s23464_s22 + $0x8] sm:$0xff]  ;;  %v4121_v3 = vmax.f32 %v3722_v44, 0.0  ;;  %v3320_v44 = vld [vmem:[%s23463_s26 + $0x520] sm:$0xff] }
 0xca3   : > { %v21176_v5 = vpop.f32.mrb[29].mxu0  ;;  %v21178_v28 = vpop.f32.mrb[27].mxu1  ;;  %18393 = vmatprep.subr.bf16.mxu0 %v18392_v36  ;;  %18425 = vmatprep.subr.bf16.mxu1 %v18424_v41  ;;  %v3285_v30 = vld [vmem:[%s23463_s26 + $0x408] sm:$0xff]  ;;  %v18432_v36 = vpack.c.bf16 %v3301_v13, %v3300_v12  ;;  %v3316_v41 = vld [vmem:[%s23463_s26 + $0x500] sm:$0xff]  ;;  %v21204_v61 = vrot.slane %v21186_v29, %v21038_v56  ;;  %v21208_v50 = vrot.slane %v21186_v29, %v21041_v57 }
 0xca4   : > { %v18434_v51 = vpack.c.bf16 %v3285_v30, %v3284_v55  ;;  %v18466_v2 = vpack.c.bf16 %v3317_v43, %v3316_v41 }
 0xca5   : > { %v3878_v14 = vadd.f32 %v21117_v45, %v21204_v61 }
 0xca6   : > { %18395 = vmatpush3.bf16.msra.mxu0 %v18394_v59  ;;  %18427 = vmatpush3.bf16.msra.mxu1 %v18426_v60  ;;  %v3730_v59 = vadd.f32 %v21101_v25, %v21067_v18  ;;  %v3807_v60 = vadd.f32 %v21103_v26, %v21076_v42  ;;  %v18436_v18 = vpack.c.bf16 %v3303_v47, %v3302_v23  ;;  %v4123_v42 = vmax.f32 %v3799_v22, 0.0  ;;  %v3321_v22 = vld [vmem:[%s23463_s26 + $0x528] sm:$0xff]  ;;  %v3307_v47 = vld [vmem:[%s23463_s26 + $0x4b8] sm:$0xff] }
 0xca7   : > { %18397 = vmatprep.subr.bf16.mxu0 %v18396_v9  ;;  %18429 = vmatprep.subr.bf16.mxu1 %v18428_v10  ;;  %v18468_v25 = vpack.c.bf16 %v3335_v49, %v3334_v0  ;;  %v3728_v26 = vadd.f32 %v21095_v15, %v3434_v53  ;;  %v3805_v9 = vadd.f32 %v21097_v16, %v3442_v4  ;;  %v3286_v10 = vld [vmem:[%s23463_s26 + $0x410] sm:$0xff]  ;;  %v3304_v15 = vld [vmem:[%s23463_s26 + $0x4a0] sm:$0xff]  ;;  %v3305_v16 = vld [vmem:[%s23463_s26 + $0x4a8] sm:$0xff] }
 0xca8   : > { %v4138_v12 = vmax.f32 %v3730_v59, 0.0  ;;  %v4140_v13 = vmax.f32 %v3807_v60, 0.0  ;;  %v3955_v0 = vadd.f32 %v21119_v40, %v21208_v50  ;;  %v3318_v49 = vld [vmem:[%s23463_s26 + $0x510] sm:$0xff]  ;;  %v3336_v53 = vld [vmem:[%s23463_s26 + $0x5a0] sm:$0xff]  ;;  %v3337_v4 = vld [vmem:[%s23463_s26 + $0x5a8] sm:$0xff]  ;;  %v18438_v40 = vpack.c.bf16 %v3287_v11, %v3286_v10 }
 0xca9   : > { %v4137_v55 = vmax.f32 %v3728_v26, 0.0  ;;  %v4139_v45 = vmax.f32 %v3805_v9, 0.0  ;;  %v18470_v30 = vpack.c.bf16 %v3319_v17, %v3318_v49  ;;  %v18440_v43 = vpack.c.bf16 %v3305_v16, %v3304_v15  ;;  %v3338_v59 = vld [vmem:[%s23463_s26 + $0x5b0] sm:$0xff]  ;;  %v3339_v60 = vld [vmem:[%s23463_s26 + $0x5b8] sm:$0xff]  ;;  %v3308_v10 = vld [vmem:[%s23463_s26 + $0x4c0] sm:$0xff] }
 0xcaa   : > { %18399 = vmatpush3.bf16.msra.mxu0 %v18398_v31  ;;  %18431 = vmatpush3.bf16.msra.mxu1 %v18430_v32  ;;  %v3288_v31 = vld [vmem:[%s23463_s26 + $0x420] sm:$0xff]  ;;  %v3289_v32 = vld [vmem:[%s23463_s26 + $0x428] sm:$0xff]  ;;  %v4128_v41 = vmax.f32 %v3955_v0, 0.0  ;;  %v18472_v23 = vpack.c.bf16 %v3337_v4, %v3336_v53  ;;  %v3322_v26 = vld [vmem:[%s23463_s26 + $0x530] sm:$0xff] }
 0xcab   : > { %18433 = vmatprep.subr.bf16.mxu0 %v18432_v36  ;;  %18465 = vmatprep.subr.bf16.mxu1 %v18464_v46  ;;  %v4126_v36 = vmax.f32 %v3878_v14, 0.0  ;;  %v3306_v46 = vld [vmem:[%s23463_s26 + $0x4b0] sm:$0xff]  ;;  %v3323_v9 = vld [vmem:[%s23463_s26 + $0x538] sm:$0xff]  ;;  %v3309_v11 = vld [vmem:[%s23463_s26 + $0x4c8] sm:$0xff] }
 0xcac   : > { %v18478_v0 = vpack.c.bf16 %v3323_v9, %v3322_v26  ;;  %v3292_v49 = vld [vmem:[%s23463_s26 + $0x440] sm:$0xff]  ;;  %v3293_v17 = vld [vmem:[%s23463_s26 + $0x448] sm:$0xff]  ;;  %v18448_v15 = vpack.c.bf16 %v3309_v11, %v3308_v10  ;;  %v3314_v10 = vld [vmem:[%s23463_s26 + $0x4f0] sm:$0xff] }
 0xcad   : > { %4370 = vmatmul.mubr.f32.vlgmr.msra.gmra.mrb[34].mxu0 %v4121_v3  ;;  %4445 = vmatmul.mubr.f32.vlgmr.msra.gmra.mrb[32].mxu1 %v4123_v42  ;;  %v18444_v3 = vpack.c.bf16 %v3307_v47, %v3306_v46  ;;  %v18476_v42 = vpack.c.bf16 %v3339_v60, %v3338_v59  ;;  %v3324_v53 = vld [vmem:[%s23463_s26 + $0x540] sm:$0xff]  ;;  %v3325_v4 = vld [vmem:[%s23463_s26 + $0x548] sm:$0xff]  ;;  %v3315_v11 = vld [vmem:[%s23463_s26 + $0x4f8] sm:$0xff] }
 0xcae   : > { %4374 = vmatprep.mubr.f32.mxu0 %v4138_v12  ;;  %4449 = vmatprep.mubr.f32.mxu1 %v4140_v13  ;;  %v3340_v12 = vld [vmem:[%s23463_s26 + $0x5c0] sm:$0xff]  ;;  %v3341_v13 = vld [vmem:[%s23463_s26 + $0x5c8] sm:$0xff] }
 0xcaf   : > { %18435 = vmatpush3.bf16.msra.mxu0 %v18434_v51  ;;  %18467 = vmatpush3.bf16.msra.mxu1 %v18466_v2  ;;  %v18442_v51 = vpack.c.bf16 %v3289_v32, %v3288_v31  ;;  %v18474_v2 = vpack.c.bf16 %v3321_v22, %v3320_v44  ;;  %v18480_v16 = vpack.c.bf16 %v3341_v13, %v3340_v12  ;;  %v3326_v44 = vld [vmem:[%s23463_s26 + $0x550] sm:$0xff]  ;;  %v3327_v22 = vld [vmem:[%s23463_s26 + $0x558] sm:$0xff]  ;;  %v3312_v46 = vld [vmem:[%s23463_s26 + $0x4e0] sm:$0xff] }
 0xcb0   : > { %18437 = vmatprep.subr.bf16.mxu0 %v18436_v18  ;;  %18469 = vmatprep.subr.bf16.mxu1 %v18468_v25  ;;  %v3290_v18 = vld [vmem:[%s23463_s26 + $0x430] sm:$0xff]  ;;  %v3291_v25 = vld [vmem:[%s23463_s26 + $0x438] sm:$0xff]  ;;  %v18450_v31 = vpack.c.bf16 %v3293_v17, %v3292_v49  ;;  %v18482_v32 = vpack.c.bf16 %v3325_v4, %v3324_v53  ;;  %v3313_v47 = vld [vmem:[%s23463_s26 + $0x4e8] sm:$0xff]  ;;  %v3458_v53 = vrot.slane %v21186_v29, %v21032_v54 }
 0xcb1   : > { %4375 = vmatmul.mubr.f32.gmra.mrb[36].mxu0 %v4137_v55  ;;  %4450 = vmatmul.mubr.f32.gmra.mrb[34].mxu1 %v4139_v45  ;;  %v18446_v14 = vpack.c.bf16 %v3291_v25, %v3290_v18  ;;  %v3310_v55 = vld [vmem:[%s23463_s26 + $0x4d0] sm:$0xff]  ;;  %v3311_v45 = vld [vmem:[%s23463_s26 + $0x4d8] sm:$0xff]  ;;  %v3344_v59 = vld [vmem:[%s23463_s26 + $0x5e0] sm:$0xff]  ;;  %v18460_v4 = vpack.c.bf16 %v3315_v11, %v3314_v10 }
 0xcb2   : > { %4519 = vmatprep.mubr.f32.mxu0 %v4126_v36  ;;  %4594 = vmatprep.mubr.f32.mxu1 %v4128_v41  ;;  %v3294_v36 = vld [vmem:[%s23463_s26 + $0x450] sm:$0xff]  ;;  %v3295_v41 = vld [vmem:[%s23463_s26 + $0x458] sm:$0xff]  ;;  %v3345_v60 = vld [vmem:[%s23463_s26 + $0x5e8] sm:$0xff]  ;;  %v3959_v11 = vadd.f32 %v21129_v63, %v3458_v53 }
 0xcb3   : > { %18439 = vmatpush3.bf16.msra.mxu0 %v18438_v40  ;;  %18471 = vmatpush3.bf16.msra.mxu1 %v18470_v30  ;;  %v3342_v40 = vld [vmem:[%s23463_s26 + $0x5d0] sm:$0xff]  ;;  %v3343_v30 = vld [vmem:[%s23463_s26 + $0x5d8] sm:$0xff]  ;;  %v3296_v18 = vld [vmem:[%s23463_s26 + $0x460] sm:$0xff] }
 0xcb4   : > { %18441 = vmatprep.subr.bf16.mxu0 %v18440_v43  ;;  %18473 = vmatprep.subr.bf16.mxu1 %v18472_v23  ;;  %v18452_v43 = vpack.c.bf16 %v3311_v45, %v3310_v55  ;;  %v18484_v23 = vpack.c.bf16 %v3343_v30, %v3342_v40  ;;  %v3297_v25 = vld [vmem:[%s23463_s26 + $0x468] sm:$0xff]  ;;  %v3328_v26 = vld [vmem:[%s23463_s26 + $0x560] sm:$0xff]  ;;  %v3346_v12 = vld [vmem:[%s23463_s26 + $0x5f0] sm:$0xff] }
 0xcb5   : > { %v3329_v9 = vld [vmem:[%s23463_s26 + $0x568] sm:$0xff]  ;;  %v3347_v13 = vld [vmem:[%s23463_s26 + $0x5f8] sm:$0xff]  ;;  %v3298_v17 = vld [vmem:[%s23463_s26 + $0x470] sm:$0xff] }
 0xcb6   : > { %v18490_v49 = vpack.c.bf16 %v3329_v9, %v3328_v26  ;;  %v18492_v55 = vpack.c.bf16 %v3347_v13, %v3346_v12  ;;  %v3331_v45 = vld [vmem:[%s23463_s26 + $0x578] sm:$0xff]  ;;  %v3364_v40 = vld [vmem:[%s23463_s26 + $0x680] sm:$0xff]  ;;  %v3365_v30 = vld [vmem:[%s23463_s26 + $0x688] sm:$0xff]  ;;  %v21292_v26 = vrot.slane %v21186_v29, %v21054_v1 }
 0xcb7   : > { %18443 = vmatpush3.bf16.msra.mxu0 %v18442_v51  ;;  %18475 = vmatpush3.bf16.msra.mxu1 %v18474_v2  ;;  %v18454_v51 = vpack.c.bf16 %v3295_v41, %v3294_v36  ;;  %v18486_v2 = vpack.c.bf16 %v3327_v22, %v3326_v44  ;;  %v3348_v36 = vld [vmem:[%s23463_s26 + $0x600] sm:$0xff]  ;;  %v3349_v41 = vld [vmem:[%s23463_s26 + $0x608] sm:$0xff]  ;;  %v18496_v44 = vpack.c.bf16 %v3365_v30, %v3364_v40  ;;  %v3350_v12 = vld [vmem:[%s23463_s26 + $0x610] sm:$0xff] }
 0xcb8   : > { %18445 = vmatprep.subr.bf16.mxu0 %v18444_v3  ;;  %18477 = vmatprep.subr.bf16.mxu1 %v18476_v42  ;;  %v18456_v3 = vpack.c.bf16 %v3313_v47, %v3312_v46  ;;  %v18488_v42 = vpack.c.bf16 %v3345_v60, %v3344_v59  ;;  %v3380_v22 = vld [vmem:[%s23463_s26 + $0x700] sm:$0xff]  ;;  %v3381_v46 = vld [vmem:[%s23463_s26 + $0x708] sm:$0xff]  ;;  %v3366_v47 = vld [vmem:[%s23463_s26 + $0x690] sm:$0xff]  ;;  %v3953_v60 = vadd.f32 %v21113_v38, %v3458_v53 }
 0xcb9   : > { %v18498_v38 = vpack.c.bf16 %v3349_v41, %v3348_v36  ;;  %v18530_v9 = vpack.c.bf16 %v3381_v46, %v3380_v22  ;;  %v3351_v13 = vld [vmem:[%s23463_s26 + $0x618] sm:$0xff]  ;;  %v3369_v63 = vld [vmem:[%s23463_s26 + $0x6a8] sm:$0xff]  ;;  %v3352_v40 = vld [vmem:[%s23463_s26 + $0x620] sm:$0xff] }
 0xcba   : > { %v3401_v53 = vld [vmem:[%s23463_s26 + $0x7a8] sm:$0xff]  ;;  %v3371_v22 = vld [vmem:[%s23463_s26 + $0x6b8] sm:$0xff]  ;;  %v3402_v46 = vld [vmem:[%s23463_s26 + $0x7b0] sm:$0xff] }
 0xcbb   : > { %18447 = vmatpush3.bf16.msra.mxu0 %v18446_v14  ;;  %18479 = vmatpush3.bf16.msra.mxu1 %v18478_v0  ;;  %v3450_v14 = vrot.slane %v21186_v29, %v21029_v52  ;;  %v18458_v0 = vpack.c.bf16 %v3297_v25, %v3296_v18  ;;  %v3398_v18 = vld [vmem:[%s23463_s26 + $0x790] sm:$0xff]  ;;  %v3399_v25 = vld [vmem:[%s23463_s26 + $0x798] sm:$0xff]  ;;  %v3353_v30 = vld [vmem:[%s23463_s26 + $0x628] sm:$0xff] }
 0xcbc   : > { %18449 = vmatprep.subr.bf16.mxu0 %v18448_v15  ;;  %18481 = vmatprep.subr.bf16.mxu1 %v18480_v16  ;;  %v3299_v15 = vld [vmem:[%s23463_s26 + $0x478] sm:$0xff]  ;;  %v3330_v16 = vld [vmem:[%s23463_s26 + $0x570] sm:$0xff] }
 0xcbd   : > { %v3876_v59 = vadd.f32 %v21111_v37, %v3450_v14  ;;  %v21296_v37 = vrot.slane %v21186_v29, %v21063_v8 }
 0xcbf   : > { %18451 = vmatpush3.bf16.msra.mxu0 %v18450_v31  ;;  %18483 = vmatpush3.bf16.msra.mxu1 %v18482_v32  ;;  %v3396_v31 = vld [vmem:[%s23463_s26 + $0x780] sm:$0xff]  ;;  %v3397_v32 = vld [vmem:[%s23463_s26 + $0x788] sm:$0xff]  ;;  %v4125_v10 = vmax.f32 %v3876_v59, 0.0  ;;  %v18506_v59 = vpack.c.bf16 %v3353_v30, %v3352_v40 }
 0xcc0   : > { %18453 = vmatprep.subr.bf16.mxu0 %v18452_v43  ;;  %18485 = vmatprep.subr.bf16.mxu1 %v18484_v23  ;;  %v18462_v43 = vpack.c.bf16 %v3299_v15, %v3298_v17  ;;  %v18494_v23 = vpack.c.bf16 %v3331_v45, %v3330_v16  ;;  %v4032_v17 = vadd.f32 %v21155_v34, %v21292_v26  ;;  %v3382_v16 = vld [vmem:[%s23463_s26 + $0x710] sm:$0xff]  ;;  %v4143_v34 = vmax.f32 %v3959_v11, 0.0  ;;  %v3357_v11 = vld [vmem:[%s23463_s26 + $0x648] sm:$0xff]  ;;  %v3376_v40 = vld [vmem:[%s23463_s26 + $0x6e0] sm:$0xff] }
 0xcc1   : > { %v4109_v15 = vadd.f32 %v21157_v35, %v21296_v37  ;;  %v18502_v35 = vpack.c.bf16 %v3351_v13, %v3350_v12  ;;  %v3377_v30 = vld [vmem:[%s23463_s26 + $0x6e8] sm:$0xff] }
 0xcc3   : > { %18455 = vmatpush3.bf16.msra.mxu0 %v18454_v51  ;;  %18487 = vmatpush3.bf16.msra.mxu1 %v18486_v2  ;;  %v18528_v51 = vpack.c.bf16 %v3397_v32, %v3396_v31  ;;  %v3367_v2 = vld [vmem:[%s23463_s26 + $0x698] sm:$0xff]  ;;  %v4130_v31 = vmax.f32 %v4032_v17, 0.0  ;;  %v4132_v32 = vmax.f32 %v4109_v15, 0.0  ;;  %v3374_v17 = vld [vmem:[%s23463_s26 + $0x6d0] sm:$0xff] }
 0xcc4   : > { %18457 = vmatprep.subr.bf16.mxu0 %v18456_v3  ;;  %18489 = vmatprep.subr.bf16.mxu1 %v18488_v42  ;;  %v3884_v3 = vadd.f32 %v21133_v7, %v21204_v61  ;;  %v3961_v42 = vadd.f32 %v21135_v27, %v21208_v50  ;;  %v18500_v7 = vpack.c.bf16 %v3367_v2, %v3366_v47  ;;  %v4127_v27 = vmax.f32 %v3953_v60, 0.0  ;;  %v3403_v47 = vld [vmem:[%s23463_s26 + $0x7b8] sm:$0xff] }
 0xcc5   : > { %v18532_v61 = vpack.c.bf16 %v3399_v25, %v3398_v18  ;;  %v3882_v50 = vadd.f32 %v21127_v62, %v3450_v14  ;;  %v3368_v62 = vld [vmem:[%s23463_s26 + $0x6a0] sm:$0xff]  ;;  %v3355_v2 = vld [vmem:[%s23463_s26 + $0x638] sm:$0xff]  ;;  %v18540_v25 = vpack.c.bf16 %v3403_v47, %v3402_v46  ;;  %v3393_v47 = vld [vmem:[%s23463_s26 + $0x768] sm:$0xff] }
 0xcc6   : > { %v3400_v14 = vld [vmem:[%s23463_s26 + $0x7a0] sm:$0xff]  ;;  %v18504_v36 = vpack.c.bf16 %v3369_v63, %v3368_v62  ;;  %v3375_v15 = vld [vmem:[%s23463_s26 + $0x6d8] sm:$0xff] }
 0xcc7   : > { %18459 = vmatpush3.bf16.msra.mxu0 %v18458_v0  ;;  %18491 = vmatpush3.bf16.msra.mxu1 %v18490_v49  ;;  %v4142_v0 = vmax.f32 %v3884_v3, 0.0  ;;  %v4144_v49 = vmax.f32 %v3961_v42, 0.0  ;;  %v18536_v41 = vpack.c.bf16 %v3401_v53, %v3400_v14  ;;  %v3386_v3 = vld [vmem:[%s23463_s26 + $0x730] sm:$0xff]  ;;  %v3387_v42 = vld [vmem:[%s23463_s26 + $0x738] sm:$0xff]  ;;  %v3392_v46 = vld [vmem:[%s23463_s26 + $0x760] sm:$0xff] }
 0xcc8   : > { %18461 = vmatprep.subr.bf16.mxu0 %v18460_v4  ;;  %18493 = vmatprep.subr.bf16.mxu1 %v18492_v55  ;;  %v3383_v4 = vld [vmem:[%s23463_s26 + $0x718] sm:$0xff]  ;;  %v4141_v55 = vmax.f32 %v3882_v50, 0.0  ;;  %v3356_v50 = vld [vmem:[%s23463_s26 + $0x640] sm:$0xff]  ;;  %v3358_v14 = vld [vmem:[%s23463_s26 + $0x650] sm:$0xff] }
 0xcc9   : > { %v18534_v45 = vpack.c.bf16 %v3383_v4, %v3382_v16  ;;  %v3406_v16 = vld [vmem:[%s23463_s26 + $0x7d0] sm:$0xff]  ;;  %v3407_v4 = vld [vmem:[%s23463_s26 + $0x7d8] sm:$0xff]  ;;  %v18514_v62 = vpack.c.bf16 %v3357_v11, %v3356_v50 }
 0xcca   : > { %v3359_v53 = vld [vmem:[%s23463_s26 + $0x658] sm:$0xff] }
 0xccb   : > { %18463 = vmatpush3.bf16.msra.mxu0 %v18462_v43  ;;  %18495 = vmatpush3.bf16.msra.mxu1 %v18494_v23  ;;  %v3384_v43 = vld [vmem:[%s23463_s26 + $0x720] sm:$0xff]  ;;  %v3385_v23 = vld [vmem:[%s23463_s26 + $0x728] sm:$0xff] }
 0xccc   : > { %18497 = vmatprep.subr.bf16.mxu0 %v18496_v44  ;;  %18529 = vmatprep.subr.bf16.mxu1 %v18528_v51  ;;  %v3370_v44 = vld [vmem:[%s23463_s26 + $0x6b0] sm:$0xff]  ;;  %v18538_v60 = vpack.c.bf16 %v3385_v23, %v3384_v43  ;;  %v3360_v43 = vld [vmem:[%s23463_s26 + $0x660] sm:$0xff]  ;;  %v3361_v23 = vld [vmem:[%s23463_s26 + $0x668] sm:$0xff] }
 0xccd   : > { %v3354_v51 = vld [vmem:[%s23463_s26 + $0x630] sm:$0xff]  ;;  %v18508_v18 = vpack.c.bf16 %v3371_v22, %v3370_v44  ;;  %v18520_v44 = vpack.c.bf16 %v3377_v30, %v3376_v40 }
 0xcce   : > { %4520 = vmatmul.mubr.f32.vlgmr.msra.gmra.mrb[38].mxu0 %v4125_v10  ;;  %4595 = vmatmul.mubr.f32.vlgmr.msra.gmra.mrb[36].mxu1 %v4127_v27  ;;  %v18510_v10 = vpack.c.bf16 %v3355_v2, %v3354_v51  ;;  %v18542_v27 = vpack.c.bf16 %v3387_v42, %v3386_v3  ;;  %v3410_v51 = vld [vmem:[%s23463_s26 + $0x7f0] sm:$0xff]  ;;  %v3411_v2 = vld [vmem:[%s23463_s26 + $0x7f8] sm:$0xff]  ;;  %v18554_v3 = vpack.c.bf16 %v3393_v47, %v3392_v46 }
 0xccf   : > { %4524 = vmatprep.mubr.f32.mxu0 %v4142_v0  ;;  %4599 = vmatprep.mubr.f32.mxu1 %v4144_v49  ;;  %v3388_v0 = vld [vmem:[%s23463_s26 + $0x740] sm:$0xff]  ;;  %v3389_v49 = vld [vmem:[%s23463_s26 + $0x748] sm:$0xff]  ;;  %v3362_v42 = vld [vmem:[%s23463_s26 + $0x670] sm:$0xff] }
 0xcd0   : > { %18499 = vmatpush3.bf16.msra.mxu0 %v18498_v38  ;;  %18531 = vmatpush3.bf16.msra.mxu1 %v18530_v9  ;;  %v3372_v38 = vld [vmem:[%s23463_s26 + $0x6c0] sm:$0xff]  ;;  %v3373_v9 = vld [vmem:[%s23463_s26 + $0x6c8] sm:$0xff]  ;;  %v18546_v63 = vpack.c.bf16 %v3389_v49, %v3388_v0  ;;  %v4115_v0 = vadd.f32 %v21178_v28, %v21296_v37 }
 0xcd1   : > { %18501 = vmatprep.subr.bf16.mxu0 %v18500_v7  ;;  %18533 = vmatprep.subr.bf16.mxu1 %v18532_v61  ;;  %v3404_v7 = vld [vmem:[%s23463_s26 + $0x7c0] sm:$0xff]  ;;  %v3405_v61 = vld [vmem:[%s23463_s26 + $0x7c8] sm:$0xff]  ;;  %v18512_v12 = vpack.c.bf16 %v3373_v9, %v3372_v38  ;;  %v3474_v38 = vrot.slane %v21186_v29, %v21153_v33 }
 0xcd2   : > { %4525 = vmatmul.mubr.f32.gmra.mrb[40].mxu0 %v4141_v55  ;;  %4600 = vmatmul.mubr.f32.gmra.mrb[38].mxu1 %v4143_v34  ;;  %v18544_v13 = vpack.c.bf16 %v3405_v61, %v3404_v7  ;;  %v18516_v55 = vpack.c.bf16 %v3375_v15, %v3374_v17  ;;  %v18548_v34 = vpack.c.bf16 %v3407_v4, %v3406_v16  ;;  %v3363_v61 = vld [vmem:[%s23463_s26 + $0x678] sm:$0xff]  ;;  %v4148_v4 = vmax.f32 %v4115_v0, 0.0  ;;  %v15338_v37 = vld [vmem:[%s23465_s0] ss:$0 sm:$0xff] }
 0xcd3   : > { %4669 = vmatprep.mubr.f32.mxu0 %v4130_v31  ;;  %4744 = vmatprep.mubr.f32.mxu1 %v4132_v32  ;;  %v3408_v31 = vld [vmem:[%s23463_s26 + $0x7e0] sm:$0xff]  ;;  %v3409_v32 = vld [vmem:[%s23463_s26 + $0x7e8] sm:$0xff]  ;;  %v18556_v7 = vpack.c.bf16 %v3411_v2, %v3410_v51  ;;  %v18526_v50 = vpack.c.bf16 %v3363_v61, %v3362_v42  ;;  %v4113_v16 = vadd.f32 %v21169_v58, %v3474_v38 }
 0xcd4   : > { %18503 = vmatpush3.bf16.msra.mxu0 %v18502_v35  ;;  %18535 = vmatpush3.bf16.msra.mxu1 %v18534_v45  ;;  %v3390_v35 = vld [vmem:[%s23463_s26 + $0x750] sm:$0xff]  ;;  %v3391_v45 = vld [vmem:[%s23463_s26 + $0x758] sm:$0xff]  ;;  %v18552_v22 = vpack.c.bf16 %v3409_v32, %v3408_v31 }
 0xcd5   : > { %18505 = vmatprep.subr.bf16.mxu0 %v18504_v36  ;;  %18537 = vmatprep.subr.bf16.mxu1 %v18536_v41  ;;  %v18518_v36 = vpack.c.bf16 %v3359_v53, %v3358_v14  ;;  %v18550_v41 = vpack.c.bf16 %v3391_v45, %v3390_v35 }
 0xcd8   : > { %18507 = vmatpush3.bf16.msra.mxu0 %v18506_v59  ;;  %18539 = vmatpush3.bf16.msra.mxu1 %v18538_v60  ;;  %v3378_v59 = vld [vmem:[%s23463_s26 + $0x6f0] sm:$0xff]  ;;  %v3379_v60 = vld [vmem:[%s23463_s26 + $0x6f8] sm:$0xff] }
 0xcd9   : > { %18509 = vmatprep.subr.bf16.mxu0 %v18508_v18  ;;  %18541 = vmatprep.subr.bf16.mxu1 %v18540_v25  ;;  %v3466_v18 = vrot.slane %v21186_v29, %v21144_v20  ;;  %v18522_v25 = vpack.c.bf16 %v3361_v23, %v3360_v43  ;;  %v18524_v9 = vpack.c.bf16 %v3379_v60, %v3378_v59 }
 0xcda   : > { %v4038_v29 = vadd.f32 %v21176_v5, %v21292_v26  ;;  %v4147_v5 = vmax.f32 %v4113_v16, 0.0 }
 0xcdb   : > { %v4036_v15 = vadd.f32 %v21167_v48, %v3466_v18 }
 0xcdc   : > { %18511 = vmatpush3.bf16.msra.mxu0 %v18510_v10  ;;  %18543 = vmatpush3.bf16.msra.mxu1 %v18542_v27  ;;  %v3394_v10 = vld [vmem:[%s23463_s26 + $0x770] sm:$0xff]  ;;  %v3395_v27 = vld [vmem:[%s23463_s26 + $0x778] sm:$0xff] }
 0xcdd   : > { %18513 = vmatprep.subr.bf16.mxu0 %v18512_v12  ;;  %18545 = vmatprep.subr.bf16.mxu1 %v18544_v13  ;;  %v18558_v11 = vpack.c.bf16 %v3395_v27, %v3394_v10  ;;  %v4030_v12 = vadd.f32 %v21146_v21, %v3466_v18  ;;  %v4107_v13 = vadd.f32 %v21148_v24, %v3474_v38  ;;  %v4146_v21 = vmax.f32 %v4038_v29, 0.0 }
 0xcde   : > { %v4145_v24 = vmax.f32 %v4036_v15, 0.0 }
 0xcdf   : > { %v4129_v49 = vmax.f32 %v4030_v12, 0.0  ;;  %v4131_v17 = vmax.f32 %v4107_v13, 0.0 }
 0xce0   : > { %18515 = vmatpush3.bf16.msra.mxu0 %v18514_v62  ;;  %18547 = vmatpush3.bf16.msra.mxu1 %v18546_v63 }
 0xce1   : > { %18517 = vmatprep.subr.bf16.mxu0 %v18516_v55  ;;  %18549 = vmatprep.subr.bf16.mxu1 %v18548_v34 }
 0xce4   : > { %18519 = vmatpush3.bf16.msra.mxu0 %v18518_v36  ;;  %18551 = vmatpush3.bf16.msra.mxu1 %v18550_v41 }
 0xce5   : > { %18521 = vmatprep.subr.bf16.mxu0 %v18520_v44  ;;  %18553 = vmatprep.subr.bf16.mxu1 %v18552_v22 }
 0xce8   : > { %18523 = vmatpush3.bf16.msra.mxu0 %v18522_v25  ;;  %18555 = vmatpush3.bf16.msra.mxu1 %v18554_v3 }
 0xce9   : > { %18525 = vmatprep.subr.bf16.mxu0 %v18524_v9  ;;  %18557 = vmatprep.subr.bf16.mxu1 %v18556_v7 }
 0xcec   : > { %18527 = vmatpush3.bf16.msra.mxu0 %v18526_v50  ;;  %18559 = vmatpush3.bf16.msra.mxu1 %v18558_v11 }
 0xcef   : > { %4670 = vmatmul.mubr.f32.vlgmr.msra.gmra.mrb[42].mxu0 %v4129_v49  ;;  %4745 = vmatmul.mubr.f32.vlgmr.msra.gmra.mrb[40].mxu1 %v4131_v17 }
 0xcf0   : > { %4674 = vmatprep.mubr.f32.mxu0 %v4146_v21  ;;  %4749 = vmatprep.mubr.f32.mxu1 %v4148_v4 }
 0xcf3   : > { %4675 = vmatmul.mubr.f32.gmra.mrb[44].mxu0 %v4145_v24  ;;  %4750 = vmatmul.mubr.f32.gmra.mrb[42].mxu1 %v4147_v5 }
 0xd60   : > { %v16319_v28 = vpop.f32.mrb[30].mxu0  ;;  %v16357_v26 = vpop.f32.mrb[28].mxu1 }
 0xd61   : > { %v16320_v62 = vpop.f32.mrb[31].mxu0  ;;  %v16358_v63 = vpop.f32.mrb[29].mxu1 }
 0xd62   : > { %v16321_v14 = vadd.f32 %v16320_v62, %v16319_v28  ;;  %v16359_v53 = vadd.f32 %v16358_v63, %v16357_v26 }
 0xd64   : > { %v4222_v48 = vadd.f32 %v16321_v14, %v15338_v37  ;;  %v16322_v55 = vpop.f32.mrb[32].mxu0  ;;  %v16360_v58 = vpop.f32.mrb[30].mxu1 }
 0xd65   : > { %v16323_v34 = vpop.f32.mrb[33].mxu0  ;;  %v16361_v35 = vpop.f32.mrb[31].mxu1 }
 0xd66   : > { %v4297_v45 = vadd.f32 %v16359_v53, %v4222_v48  ;;  %v16324_v40 = vadd.f32 %v16323_v34, %v16322_v55  ;;  %v16362_v30 = vadd.f32 %v16361_v35, %v16360_v58 }
 0xd68   : > { %v4227_v31 = vadd.f32 %v16324_v40, %v15338_v37 }
 0xd6a   : > { %v4302_v32 = vadd.f32 %v16362_v30, %v4227_v31 }
 0xd80   : > { %v16395_v36 = vpop.f32.mrb[34].mxu0  ;;  %v16433_v41 = vpop.f32.mrb[32].mxu1 }
 0xd81   : > { %v16396_v43 = vpop.f32.mrb[35].mxu0  ;;  %v16434_v23 = vpop.f32.mrb[33].mxu1 }
 0xd82   : > { %v16397_v44 = vadd.f32 %v16396_v43, %v16395_v36  ;;  %v16435_v22 = vadd.f32 %v16434_v23, %v16433_v41 }
 0xd84   : > { %v4372_v46 = vadd.f32 %v16397_v44, %v4297_v45  ;;  %v16398_v47 = vpop.f32.mrb[36].mxu0  ;;  %v16436_v59 = vpop.f32.mrb[34].mxu1 }
 0xd85   : > { %v16399_v60 = vpop.f32.mrb[37].mxu0  ;;  %v16437_v51 = vpop.f32.mrb[35].mxu1 }
 0xd86   : > { %v4447_v2 = vadd.f32 %v16435_v22, %v4372_v46  ;;  %v16400_v18 = vadd.f32 %v16399_v60, %v16398_v47  ;;  %v16438_v25 = vadd.f32 %v16437_v51, %v16436_v59  ;;  %v15341_v47 = vld [vmem:[%s23435_s3 + $0x20] sm:$0xff]  ;;  %v15342_v59 = vld [vmem:[%s23435_s3 + $0x28] sm:$0xff] }
 0xd87   : > { %v15346_v60 = vld [vmem:[%s23431_s14 + $0x20] sm:$0xff]  ;;  %v18560_v51 = vpack.c.bf16 %v15342_v59, %v15341_v47 }
 0xd88   : > { %v4377_v3 = vadd.f32 %v16400_v18, %v4302_v32  ;;  %v15343_v18 = vld [vmem:[%s23435_s3 + $0x30] sm:$0xff] }
 0xd89   : > { %18561 = vmatprep.subr.bf16.mxu0 %v18560_v51 }
 0xd8a   : > { %v4452_v42 = vadd.f32 %v16438_v25, %v4377_v3  ;;  %v15344_v25 = vld [vmem:[%s23435_s3 + $0x38] sm:$0xff]  ;;  %18563 = vmatpush3.bf16.msra.mxu0 %v18560_v51  ;;  %s23469_s3 = smov 112  }
 0xda1   : > { %v16471_v38 = vpop.f32.mrb[38].mxu0  ;;  %v16509_v9 = vpop.f32.mrb[36].mxu1 }
 0xda2   : > { %v16472_v7 = vpop.f32.mrb[39].mxu0  ;;  %v16510_v61 = vpop.f32.mrb[37].mxu1 }
 0xda3   : > { %v16473_v10 = vadd.f32 %v16472_v7, %v16471_v38  ;;  %v16511_v27 = vadd.f32 %v16510_v61, %v16509_v9  ;;  %v15348_v38 = vld [vmem:[%s23431_s14 + $0x30] sm:$0xff]  ;;  %v15349_v9 = vld [vmem:[%s23431_s14 + $0x38] sm:$0xff]  ;;  %v15351_v61 = vld [vmem:[%s23427_s24 + $0x20] sm:$0xff] }
 0xda4   : > { %v18572_v7 = vpack.c.bf16 %v15349_v9, %v15348_v38 }
 0xda5   : > { %v4522_v50 = vadd.f32 %v16473_v10, %v4447_v2  ;;  %v16474_v11 = vpop.f32.mrb[40].mxu0  ;;  %v16512_v12 = vpop.f32.mrb[38].mxu1  ;;  %v15347_v2 = vld [vmem:[%s23431_s14 + $0x28] sm:$0xff]  ;;  %s23479_s14 = sld [smem:[#allocation54_spill]] }
 0xda6   : > { %v16475_v13 = vpop.f32.mrb[41].mxu0  ;;  %v16513_v29 = vpop.f32.mrb[39].mxu1  ;;  %v18568_v3 = vpack.c.bf16 %v15347_v2, %v15346_v60  ;;  %v15352_v10 = vld [vmem:[%s23427_s24 + $0x28] sm:$0xff] }
 0xda7   : > { %v4597_v0 = vadd.f32 %v16511_v27, %v4522_v50  ;;  %v16476_v49 = vadd.f32 %v16475_v13, %v16474_v11  ;;  %v16514_v17 = vadd.f32 %v16513_v29, %v16512_v12  ;;  %v18576_v27 = vpack.c.bf16 %v15352_v10, %v15351_v61 }
 0xda8   : > { %18569 = vmatprep.subr.bf16.mxu1 %v18568_v3 }
 0xda9   : > { %v4527_v15 = vadd.f32 %v16476_v49, %v4452_v42  ;;  %v18564_v42 = vpack.c.bf16 %v15344_v25, %v15343_v18  ;;  %18571 = vmatpush3.bf16.msra.mxu1 %v18568_v3 }
 0xdaa   : > { %18573 = vmatprep.subr.bf16.mxu1 %v18572_v7 }
 0xdab   : > { %v4602_v16 = vadd.f32 %v16514_v17, %v4527_v15  ;;  %18565 = vmatprep.subr.bf16.mxu0 %v18564_v42  ;;  %v15339_v17 = vld [vmem:[%s23466_s2] ss:$0 sm:$0xff] }
 0xdac   : > { %18567 = vmatpush3.bf16.msra.mxu0 %v18564_v42 }
 0xdad   : > { %18575 = vmatpush3.bf16.msra.mxu1 %v18572_v7  ;;  %18577 = vmatprep.subr.bf16.mxu0 %v18576_v27 }
 0xdc2   : > { %v16547_v21 = vpop.f32.mrb[42].mxu0  ;;  %v16585_v4 = vpop.f32.mrb[40].mxu1 }
 0xdc3   : > { %v16548_v24 = vpop.f32.mrb[43].mxu0  ;;  %v16586_v5 = vpop.f32.mrb[41].mxu1 }
 0xdc4   : > { %v16549_v28 = vadd.f32 %v16548_v24, %v16547_v21  ;;  %v16587_v26 = vadd.f32 %v16586_v5, %v16585_v4 }
 0xdc6   : > { %v4672_v37 = vadd.f32 %v16549_v28, %v4597_v0  ;;  %v16550_v62 = vpop.f32.mrb[44].mxu0  ;;  %v16588_v63 = vpop.f32.mrb[42].mxu1  ;;  %v15353_v28 = vld [vmem:[%s23427_s24 + $0x30] sm:$0xff] }
 0xdc7   : > { %v16551_v14 = vpop.f32.mrb[45].mxu0  ;;  %v16589_v53 = vpop.f32.mrb[43].mxu1 }
 0xdc8   : > { %v4747_v48 = vadd.f32 %v16587_v26, %v4672_v37  ;;  %v16552_v55 = vadd.f32 %v16551_v14, %v16550_v62  ;;  %v16590_v58 = vadd.f32 %v16589_v53, %v16588_v63  ;;  %v15354_v26 = vld [vmem:[%s23427_s24 + $0x38] sm:$0xff]  ;;  %v15364_v14 = vld [vmem:[%s23430_s19 + $0x1] ss:$0 sm:$0xff]  ;;  %s23485_s19 = sld [smem:[#allocation52_spill]]  ;;  %s23490_s24 = sld [smem:[#allocation39_spill]] }
 0xdc9   : > { %v18580_v63 = vpack.c.bf16 %v15354_v26, %v15353_v28  ;;  %v15361_v53 = vld [vmem:[%s23433_s8 + $0x1] ss:$0 sm:$0xff]  ;;  %s23476_s8 = sld [smem:[#allocation47_spill]] }
 0xdca   : > { %v4677_v34 = vadd.f32 %v16552_v55, %v4602_v16  ;;  %v4755_v35 = vadd.f32 %v4747_v48, %v20872_v6  ;;  %v15340_v16 = vld [vmem:[%s23467_s11] ss:$0 sm:$0xff] }
 0xdcc   : > { %v4752_v45 = vadd.f32 %v16590_v58, %v4677_v34  ;;  %v4759_v40 = vsel %vm1661_vm4, %v4755_v35, 0.0 }
 0xdcd   : > { %4760 = vadd.xlane.f32.xlu0 %v4759_v40 }
 0xdce   : > { %v4756_v30 = vadd.f32 %v4752_v45, %v20887_v19 }
 0xdd0   : > { %v4762_v31 = vsel %vm3049_vm11, %v4756_v30, 0.0 }
 0xdd1   : > { %4763 = vadd.xlane.f32.xlu0 %v4762_v31 }
 0xe5a   : > { %v4761_v32 = vpop.xlane.xlu0 %4760 }
 0xe5b   : > { %v4765_v36 = vmul.f32 0.03125, %v4761_v32 }
 0xe5d   : > { %v4767_v41 = vsub.f32 %v4755_v35, %v4765_v36  ;;  %v15367_v36 = vld [vmem:[%s20321_s30 + $0x1] ss:$0 sm:$0xff] }
 0xe5e   : > { %v4764_v43 = vpop.xlane.xlu0 %4763 }
 0xe5f   : > { %v4766_v6 = vmul.f32 0.03125, %v4764_v43  ;;  %v4769_v23 = vmul.f32 %v4767_v41, %v4767_v41 }
 0xe61   : > { %v4768_v44 = vsub.f32 %v4756_v30, %v4766_v6  ;;  %v4771_v22 = vsel %vm1661_vm4, %v4769_v23, 0.0 }
 0xe62   : > { %4772 = vadd.xlane.f32.xlu0 %v4771_v22 }
 0xe63   : > { %v4770_v46 = vmul.f32 %v4768_v44, %v4768_v44 }
 0xe65   : > { %v4774_v19 = vsel %vm3049_vm11, %v4770_v46, 0.0 }
 0xe66   : > { %4775 = vadd.xlane.f32.xlu1 %v4774_v19 }
 0xeef   : > { %v4773_v50 = vpop.xlane.xlu0 %4772 }
 0xef0   : > { %v4777_v11 = vmul.f32 0.03125, %v4773_v50 }
 0xef2   : > { %v4779_v12 = vadd.f32 1e-05, %v4777_v11 }
 0xef3   : > { %v4776_v13 = vpop.xlane.xlu1 %4775 }
 0xef4   : > { %19893 = vrsqrt.f32 %v4779_v12  ;;  %v4778_v29 = vmul.f32 0.03125, %v4776_v13 }
 0xef6   : > { %v4780_v0 = vadd.f32 1e-05, %v4778_v29 }
 0xef8   : > { %19895 = vrsqrt.f32 %v4780_v0 }
 0xefe   : > { %v19894_v49 = vpop.eup %19893 }
 0xeff   : > { %v4783_v15 = vmul.f32 %v19894_v49, %v4767_v41 }
 0xf01   : > { %v4791_v21 = vmul.f32 %v15339_v17, %v4783_v15 }
 0xf02   : > { %v19896_v4 = vpop.eup %19895 }
 0xf03   : > { %v4784_v24 = vmul.f32 %v19896_v4, %v4768_v44  ;;  %v21387_v5 = vadd.f32 %v15340_v16, %v4791_v21 }
 0xf05   : > { %v4792_v37 = vmul.f32 %v15339_v17, %v4784_v24  ;;  %17766 = vmatprep.mubr.msk.f32.mxu0 %vm1661_vm4, %v21387_v5  ;;  %17777 = vmatprep.mubr.msk.f32.mxu1 %vm1661_vm4, %v21387_v5 }
 0xf07   : > { %v21395_v62 = vadd.f32 %v15340_v16, %v4792_v37 }
 0xf09   : > { %17767 = vmatmul.mubr.msk.f32.vlgmr.msra.gmra.mrb[46].mxu0 %vm1661_vm4, %v21395_v62  ;;  %17778 = vmatmul.mubr.msk.f32.vlgmr.msra.gmra.mrb[44].mxu1 %vm1661_vm4, %v21395_v62 }
 0xf0a   : > { %18579 = vmatpush3.bf16.msra.mxu0 %v18576_v27  ;;  %17788 = vmatprep.mubr.msk.f32.mxu0 %vm1661_vm4, %v21387_v5 }
 0xf0b   : > { %18581 = vmatprep.subr.bf16.mxu0 %v18580_v63 }
 0xf0e   : > { %18583 = vmatpush3.bf16.msra.mxu0 %v18580_v63 }
 0xf11   : > { %17789 = vmatmul.mubr.msk.f32.vlgmr.msra.gmra.mrb[48].mxu0 %vm1661_vm4, %v21395_v62 }
 0xfdc   : > { %v17768_v48 = vpop.f32.mrb[46].mxu0  ;;  %v17779_v55 = vpop.f32.mrb[44].mxu1 }
 0xfdd   : > { %v4996_v58 = vadd.f32 %v17779_v55, %v15364_v14  ;;  %v4907_v34 = vpop.f32.mrb[47].mxu0  ;;  %v4990_v35 = vpop.f32.mrb[45].mxu1  ;;  %v4913_v41 = vadd.f32 %v17768_v48, %v15361_v53 }
 0xfde   : > { %v4908_v45 = vadd.f32 %v15361_v53, %v4907_v34  ;;  %v4991_v40 = vadd.f32 %v15364_v14, %v4990_v35 }
 0xfdf   : > { %v21418_v22 = vmul.f32 0.35355338, %v4913_v41 }
 0xfe0   : > { %v21407_v30 = vmul.f32 0.35355338, %v4908_v45  ;;  %v18584_v31 = vpack.c.bf16 %v4996_v58, %v4991_v40  ;;  %v21409_v32 = vpack.i.bf16 %v4996_v58, %v4991_v40 }
 0xfe2   : > { %18586 = vmatprep.subr.msk.bf16.mxu1 %vm20698_vm6, %v18584_v31  ;;  %17795 = vmatprep.mubr.msk.f32.mxu1 %vm1906_vm5, %v21407_v30 }
 0xfe3   : > { %18589 = vmatpush3.bf16.xpose.msk.msra.mxu1 %vm20698_vm6, %v18584_v31 }
 0xfe4   : > { %v17790_v43 = vpop.f32.mrb[48].mxu0 }
 0xfe5   : > { %v5077_v6 = vadd.f32 %v17790_v43, %v15367_v36  ;;  %v5071_v23 = vpop.f32.mrb[49].mxu0 }
 0xfe6   : > { %v5072_v44 = vadd.f32 %v15367_v36, %v5071_v23 }
 0xfe8   : > { %v18590_v46 = vpack.c.bf16 %v5077_v6, %v5072_v44  ;;  %v21420_v19 = vpack.i.bf16 %v5077_v6, %v5072_v44 }
 0xfea   : > { %18592 = vmatprep.subr.msk.bf16.mxu0 %vm20716_vm8, %v18590_v46  ;;  %17796 = vmatmul.mubr.msk.f32.vlgmr.msra.gmra.mrb[46].mxu1 %vm1906_vm5, %v21418_v22 }
 0xfeb   : > { %18595 = vmatpush3.bf16.msk.msra.mxu0 %vm20716_vm8, %v18590_v46 }
0x10bd   : > { %v17797_v59 = vpop.f32.mrb[46].mxu1 }
0x10be   : > { %v5158_v60 = vpop.f32.mrb[47].mxu1  ;;  %v5170_v51 = vsel %vm1998_vm10, %v17797_v59, -inf }
0x10bf   : > { %5171 = vmax.xlane.f32.xlu1 %v5170_v51  ;;  %v5167_v2 = vsel %vm1994_vm9, %v5158_v60, -inf }
0x10c0   : > { %5168 = vmax.xlane.f32.xlu0 %v5167_v2 }
0x114c   : > { %v5172_v18 = vpop.xlane.xlu1 %5171 }
0x114d   : > { %v5174_v25 = vsub.f32 %v17797_v59, %v5172_v18  ;;  %v5169_v3 = vpop.xlane.xlu0 %5168 }
0x114e   : > { %v5173_v42 = vsub.f32 %v5158_v60, %v5169_v3 }
0x114f   : > { %v5177_v38 = vmul.f32 1.442695, %v5174_v25  ;;  %v23471_v25 = vmov 0.0  }
0x1150   : > { %v5175_v9 = vmul.f32 1.442695, %v5173_v42 }
0x1151   : > { %19897 = vpow2.f32 %v5177_v38 }
0x1152   : > { %19899 = vpow2.f32 %v5175_v9 }
0x115b   : > { %v19898_v7 = vpop.eup %19897 }
0x115c   : > { %v19900_v61 = vpop.eup %19899  ;;  %v5182_v10 = vsel %vm1998_vm10, %v19898_v7, 0.0 }
0x115d   : > { %5183 = vadd.xlane.f32.xlu1 %v5182_v10  ;;  %v5179_v27 = vsel %vm1994_vm9, %v19900_v61, 0.0 }
0x115e   : > { %5180 = vadd.xlane.f32.xlu0 %v5179_v27 }
0x116e   : > { %5273 = vrot.lane.b32.xlu1 %v21407_v30, %s23362_s10 }
0x1172   : > { %5275 = vrot.lane.b32.xlu1 %v21418_v22, %s23362_s10 }
0x1174   : > { %19828 = vrot.lane.b32.xlu0 %v21409_v32, %s23362_s10  ;;  %s23470_s10 = smov 104  }
0x1176   : > { %19833 = vrot.lane.b32.xlu1 %v21409_v32, %s23469_s3 }
0x1178   : > { %5637 = vrot.lane.b32.xlu0 %v21407_v30, %s23469_s3 }
0x117a   : > { %5639 = vrot.lane.b32.xlu1 %v21418_v22, %s23469_s3 }
0x11ea   : > { %v5184_v50 = vpop.xlane.xlu1 %5183 }
0x11eb   : > { %19901 = vrcp.f32 %v5184_v50  ;;  %v5181_v11 = vpop.xlane.xlu0 %5180 }
0x11ec   : > { %19903 = vrcp.f32 %v5181_v11 }
0x11ee   : > { %v5274_v12 = vpop.permute.xlu1 %5273 }
0x11ef   : > { %v19829_v13 = vpop.permute.xlu0 %19828 }
0x11f0   : > { %v19831_v29 = vunpack.i.h.bf16 %v19829_v13  ;;  %v19830_v0 = vunpack.i.l.bf16 %v19829_v13 }
0x11f2   : > { %v18596_v49 = vpack.c.bf16 %v19831_v29, %v19830_v0  ;;  %v5276_v17 = vpop.permute.xlu1 %5275 }
0x11f3   : > { %v5638_v63 = vpop.permute.xlu0 %5637 }
0x11f4   : > { %18598 = vmatprep.subr.msk.bf16.mxu0 %vm20698_vm6, %v18596_v49 }
0x11f5   : > { %v19902_v15 = vpop.eup %19901 }
0x11f6   : > { %v19904_v16 = vpop.eup %19903  ;;  %v19834_v21 = vpop.permute.xlu1 %19833  ;;  %v5188_v26 = vmul.f32 %v19902_v15, %v19898_v7 }
0x11f7   : > { %v19836_v4 = vunpack.i.h.bf16 %v19834_v21  ;;  %v19835_v24 = vunpack.i.l.bf16 %v19834_v21  ;;  %v5187_v28 = vmul.f32 %v19904_v16, %v19900_v61 }
0x11f9   : > { %v18608_v37 = vpack.c.bf16 %v19836_v4, %v19835_v24  ;;  %17802 = vmatprep.mubr.msk.f32.mxu0 %vm1994_vm9, %v5187_v28 }
0x11fa   : > { %17803 = vmatmul.mubr.msk.f32.vlgmr.msra.gmra.mrb[50].mxu0 %vm1994_vm9, %v5188_v26  ;;  %v5640_v14 = vpop.permute.xlu1 %5639 }
0x11fb   : > { %18601 = vmatpush3.bf16.xpose.msk.msra.mxu0 %vm20698_vm6, %v18596_v49  ;;  %17809 = vmatprep.mubr.msk.f32.mxu0 %vm1906_vm5, %v5274_v12 }
0x11fc   : > { %18610 = vmatprep.subr.msk.bf16.mxu0 %vm20698_vm6, %v18608_v37 }
0x1202   : > { %17810 = vmatmul.mubr.msk.f32.vlgmr.msra.gmra.mrb[52].mxu0 %vm1906_vm5, %v5276_v17 }
0x1203   : > { %18613 = vmatpush3.bf16.xpose.msk.msra.mxu0 %vm20698_vm6, %v18608_v37  ;;  %17833 = vmatprep.mubr.msk.f32.mxu0 %vm1906_vm5, %v5638_v63 }
0x120a   : > { %17834 = vmatmul.mubr.msk.f32.vlgmr.msra.gmra.mrb[54].mxu0 %vm1906_vm5, %v5640_v14  ;;  %v15357_v14 = vld [vmem:[%s23458_s18 + $0x28] sm:$0xff] }
0x12cd   : > { %v21458_v53 = vpop.f32.mrb[50].mxu0 }
0x12ce   : > { %v21460_v48 = vpop.f32.mrb[51].mxu0 }
0x12d5   : > { %v17811_v55 = vpop.f32.mrb[52].mxu0 }
0x12d6   : > { %v5355_v58 = vpop.f32.mrb[53].mxu0  ;;  %v5367_v34 = vsel %vm1998_vm10, %v17811_v55, -inf }
0x12d7   : > { %5368 = vmax.xlane.f32.xlu1 %v5367_v34  ;;  %v5364_v35 = vsel %vm1994_vm9, %v5355_v58, -inf }
0x12d8   : > { %5365 = vmax.xlane.f32.xlu0 %v5364_v35 }
0x12dd   : > { %v17835_v45 = vpop.f32.mrb[54].mxu0 }
0x12de   : > { %v5719_v40 = vpop.f32.mrb[55].mxu0  ;;  %v5731_v31 = vsel %vm1998_vm10, %v17835_v45, -inf }
0x12df   : > { %v5728_v9 = vsel %vm1994_vm9, %v5719_v40, -inf }
0x12e8   : > { %19843 = vrot.lane.b32.xlu1 %v21409_v32, %s23470_s10 }
0x12ec   : > { %5921 = vrot.lane.b32.xlu1 %v21407_v30, %s23470_s10 }
0x12f0   : > { %5923 = vrot.lane.b32.xlu1 %v21418_v22, %s23470_s10 }
0x1314   : > { %5732 = vmax.xlane.f32.xlu1 %v5731_v31 }
0x1364   : > { %v5369_v36 = vpop.xlane.xlu1 %5368 }
0x1365   : > { %v5371_v41 = vsub.f32 %v17811_v55, %v5369_v36  ;;  %v5366_v43 = vpop.xlane.xlu0 %5365  ;;  %v15356_v55 = vld [vmem:[%s23458_s18 + $0x20] sm:$0xff] }
0x1366   : > { %v5370_v6 = vsub.f32 %v5355_v58, %v5366_v43 }
0x1367   : > { %v5374_v23 = vmul.f32 1.442695, %v5371_v41 }
0x1368   : > { %v5372_v44 = vmul.f32 1.442695, %v5370_v6  ;;  %v19844_v46 = vpop.permute.xlu1 %19843 }
0x1369   : > { %19905 = vpow2.f32 %v5374_v23  ;;  %v19846_v59 = vunpack.i.h.bf16 %v19844_v46  ;;  %v19845_v60 = vunpack.i.l.bf16 %v19844_v46 }
0x136a   : > { %19907 = vpow2.f32 %v5372_v44 }
0x136b   : > { %v18620_v32 = vpack.c.bf16 %v19846_v59, %v19845_v60 }
0x136c   : > { %v5922_v51 = vpop.permute.xlu1 %5921 }
0x136d   : > { %18622 = vmatprep.subr.msk.bf16.mxu0 %vm20698_vm6, %v18620_v32  ;;  %17852 = vmatprep.mubr.msk.f32.mxu0 %vm1906_vm5, %v5922_v51 }
0x136e   : > { %18625 = vmatpush3.bf16.xpose.msk.msra.mxu0 %vm20698_vm6, %v18620_v32 }
0x1370   : > { %v5924_v22 = vpop.permute.xlu1 %5923 }
0x1373   : > { %v19906_v30 = vpop.eup %19905 }
0x1374   : > { %v5379_v2 = vsel %vm1998_vm10, %v19906_v30, 0.0  ;;  %v19908_v18 = vpop.eup %19907 }
0x1375   : > { %17853 = vmatmul.mubr.msk.f32.vlgmr.msra.gmra.mrb[56].mxu0 %vm1906_vm5, %v5924_v22  ;;  %5380 = vadd.xlane.f32.xlu0 %v5379_v2  ;;  %v5376_v3 = vsel %vm1994_vm9, %v19908_v18, 0.0 }
0x1376   : > { %6740 = vmatprep.mubr.f32.mxu0 %v23471_v25 }
0x1379   : > { %5377 = vadd.xlane.f32.xlu0 %v5376_v3  ;;  %v15358_v3 = vld [vmem:[%s23458_s18 + $0x30] sm:$0xff] }
0x138f   : > { %19838 = vrot.lane.b32.xlu0 %v21420_v19, %s23472_s5 }
0x13a1   : > { %v5733_v42 = vpop.xlane.xlu1 %5732 }
0x13a2   : > { %v5735_v38 = vsub.f32 %v17835_v45, %v5733_v42 }
0x13a4   : > { %v5738_v39 = vmul.f32 1.442695, %v5735_v38 }
0x13a6   : > { %19909 = vpow2.f32 %v5738_v39 }
0x13ae   : > { %5729 = vmax.xlane.f32.xlu0 %v5728_v9 }
0x13b0   : > { %v21483_v7 = vpop.eup %19909 }
0x13b1   : > { %v5743_v61 = vsel %vm1998_vm10, %v21483_v7, 0.0 }
0x13b2   : > { %5744 = vadd.xlane.f32.xlu0 %v5743_v61 }
0x1402   : > { %v5381_v10 = vpop.xlane.xlu0 %5380 }
0x1403   : > { %19911 = vrcp.f32 %v5381_v10 }
0x1406   : > { %v5378_v27 = vpop.xlane.xlu0 %5377 }
0x1407   : > { %19913 = vrcp.f32 %v5378_v27 }
0x140a   : > { %v19839_v50 = vpop.permute.xlu0 %19838 }
0x140b   : > { %v19841_v11 = vunpack.i.h.bf16 %v19839_v50  ;;  %v19840_v12 = vunpack.i.l.bf16 %v19839_v50 }
0x140d   : > { %v18602_v13 = vpack.c.bf16 %v19841_v11, %v19840_v12  ;;  %v19912_v29 = vpop.eup %19911  ;;  %v15359_v11 = vld [vmem:[%s23458_s18 + $0x38] sm:$0xff]  ;;  %s23484_s18 = sld [smem:[#allocation51_spill]] }
0x140e   : > { %v5385_v17 = vmul.f32 %v19912_v29, %v19906_v30 }
0x140f   : > { %18604 = vmatprep.subr.msk.bf16.mxu1 %vm20716_vm8, %v18602_v13 }
0x1410   : > { %18607 = vmatpush3.bf16.msk.msra.mxu1 %vm20716_vm8, %v18602_v13 }
0x1411   : > { %v19914_v0 = vpop.eup %19913  ;;  %17819 = vmatprep.subr.mxu1 %v15357_v14 }
0x1412   : > { %v5384_v49 = vmul.f32 %v19914_v0, %v19908_v18  ;;  %v15406_v0 = vld [vmem:[%s23459_s23 + $0x1] ss:$0 sm:$0xff]  ;;  %s23489_s23 = sld [smem:[#allocation37_spill]] }
0x1414   : > { %17816 = vmatprep.mubr.msk.f32.mxu1 %vm1994_vm9, %v5384_v49 }
0x1415   : > { %17817 = vmatmul.mubr.msk.f32.vlgmr.msra.gmra.mrb[48].mxu1 %vm1994_vm9, %v5385_v17 }
0x1416   : > { %17820 = vmatpush3.msra.mxu1 %v15357_v14 }
0x1417   : > { %17824 = vmatprep.subr.mxu1 %v15356_v55 }
0x143b   : > { %v5730_v15 = vpop.xlane.xlu0 %5729 }
0x143c   : > { %v5734_v16 = vsub.f32 %v5719_v40, %v5730_v15 }
0x143e   : > { %v5736_v21 = vmul.f32 1.442695, %v5734_v16 }
0x143f   : > { %v5745_v34 = vpop.xlane.xlu0 %5744 }
0x1440   : > { %19915 = vpow2.f32 %v5736_v21 }
0x1448   : > { %v17854_v4 = vpop.f32.mrb[56].mxu0 }
0x1449   : > { %v6003_v24 = vpop.f32.mrb[57].mxu0  ;;  %v6015_v63 = vsel %vm1998_vm10, %v17854_v4, -inf }
0x144a   : > { %v19916_v28 = vpop.eup %19915  ;;  %v6012_v26 = vsel %vm1994_vm9, %v6003_v24, -inf }
0x144b   : > { %6013 = vmax.xlane.f32.xlu1 %v6012_v26  ;;  %v5740_v37 = vsel %vm1994_vm9, %v19916_v28, 0.0 }
0x144c   : > { %5741 = vadd.xlane.f32.xlu0 %v5740_v37 }
0x144f   : > { %6016 = vmax.xlane.f32.xlu1 %v6015_v63 }
0x1462   : > { %19848 = vrot.lane.b32.xlu0 %v21420_v19, %s23469_s3 }
0x14d8   : > { %v6014_v58 = vpop.xlane.xlu1 %6013 }
0x14d9   : > { %v6018_v35 = vsub.f32 %v6003_v24, %v6014_v58  ;;  %v5742_v31 = vpop.xlane.xlu0 %5741 }
0x14db   : > { %v6020_v36 = vmul.f32 1.442695, %v6018_v35  ;;  %v15412_v35 = vld [vmem:[%s23460_s1 + $0x208] sm:$0xff] }
0x14dc   : > { %v6017_v45 = vpop.xlane.xlu1 %6016 }
0x14dd   : > { %v6019_v40 = vsub.f32 %v17854_v4, %v6017_v45  ;;  %v19849_v43 = vpop.permute.xlu0 %19848  ;;  %v15428_v45 = vld [vmem:[%s23460_s1 + $0x288] sm:$0xff] }
0x14de   : > { %v19851_v6 = vunpack.i.h.bf16 %v19849_v43  ;;  %v19850_v23 = vunpack.i.l.bf16 %v19849_v43  ;;  %v15427_v43 = vld [vmem:[%s23460_s1 + $0x280] sm:$0xff] }
0x14df   : > { %v6022_v41 = vmul.f32 1.442695, %v6019_v40  ;;  %v15414_v40 = vld [vmem:[%s23460_s1 + $0x218] sm:$0xff] }
0x14e0   : > { %v18614_v60 = vpack.c.bf16 %v19851_v6, %v19850_v23 }
0x14e1   : > { %19917 = vpow2.f32 %v6022_v41  ;;  %v15411_v41 = vld [vmem:[%s23460_s1 + $0x200] sm:$0xff] }
0x14e2   : > { %19919 = vpow2.f32 %v6020_v36  ;;  %v15430_v36 = vld [vmem:[%s23460_s1 + $0x298] sm:$0xff]  ;;  %v18634_v23 = vpack.c.bf16 %v15427_v43, %v15411_v41  ;;  %v15420_v43 = vld [vmem:[%s23460_s1 + $0x248] sm:$0xff] }
0x14e3   : > { %19921 = vrcp.f32 %v5742_v31  ;;  %v18632_v31 = vpack.c.bf16 %v15428_v45, %v15412_v35  ;;  %v18640_v6 = vpack.c.bf16 %v15430_v36, %v15414_v40  ;;  %v15463_v45 = vld [vmem:[%s23460_s1 + $0x3a0] sm:$0xff]  ;;  %v15449_v40 = vld [vmem:[%s23460_s1 + $0x330] sm:$0xff] }
0x14e4   : > { %19923 = vrcp.f32 %v5745_v34 }
0x14e5   : > { %18633 = vmatprep.subr.bf16.mxu0 %v18632_v31  ;;  %v15465_v31 = vld [vmem:[%s23460_s1 + $0x3b0] sm:$0xff] }
0x14e6   : > { %18635 = vmatpush1.bf16.msra.mxu0 %v18634_v23  ;;  %v15436_v23 = vld [vmem:[%s23460_s1 + $0x2c8] sm:$0xff] }
0x14e8   : > { %v17818_v44 = vpop.f32.mrb[48].mxu1 }
0x14e9   : > { %v5466_v46 = vpop.f32.mrb[49].mxu1 }
0x14ea   : > { %17821 = vmatprep.mubr.msk.f32.mxu1 %vm1906_vm5, %v5466_v46  ;;  %v15429_v46 = vld [vmem:[%s23460_s1 + $0x290] sm:$0xff] }
0x14eb   : > { %v19918_v59 = vpop.eup %19917  ;;  %17822 = vmatmul.mubr.msk.f32.vlgmr.msra.gmra.mrb[50].mxu1 %vm1906_vm5, %v17818_v44  ;;  %v15413_v44 = vld [vmem:[%s23460_s1 + $0x210] sm:$0xff] }
0x14ec   : > { %17825 = vmatpush3.msra.mxu1 %v15356_v55  ;;  %17826 = vmatprep.mubr.msk.f32.mxu1 %vm1906_vm5, %v21460_v48  ;;  %v6027_v32 = vsel %vm1998_vm10, %v19918_v59, 0.0  ;;  %v19920_v51 = vpop.eup %19919 }
0x14ed   : > { %18616 = vmatprep.subr.msk.bf16.mxu1 %vm20716_vm8, %v18614_v60  ;;  %6028 = vadd.xlane.f32.xlu1 %v6027_v32  ;;  %v19922_v30 = vpop.eup %19921  ;;  %v6024_v22 = vsel %vm1994_vm9, %v19920_v51, 0.0  ;;  %v15460_v32 = vld [vmem:[%s23460_s1 + $0x388] sm:$0xff] }
0x14ee   : > { %v19924_v2 = vpop.eup %19923  ;;  %v5748_v18 = vmul.f32 %v19922_v30, %v19916_v28 }
0x14ef   : > { %v5749_v48 = vmul.f32 %v19924_v2, %v21483_v7  ;;  %v15443_v2 = vld [vmem:[%s23460_s1 + $0x300] sm:$0xff] }
0x14f1   : > { %6025 = vadd.xlane.f32.xlu1 %v6024_v22  ;;  %v15462_v22 = vld [vmem:[%s23460_s1 + $0x398] sm:$0xff] }
0x14f3   : > { %17827 = vmatmul.mubr.msk.f32.vlgmr.msra.gmra.mrb[50].mxu1 %vm1906_vm5, %v21458_v53 }
0x14f4   : > { %18619 = vmatpush3.bf16.msk.msra.mxu1 %vm20716_vm8, %v18614_v60  ;;  %17840 = vmatprep.mubr.msk.f32.mxu1 %vm1994_vm9, %v5748_v18  ;;  %v15444_v60 = vld [vmem:[%s23460_s1 + $0x308] sm:$0xff]  ;;  %v15459_v18 = vld [vmem:[%s23460_s1 + $0x380] sm:$0xff] }
0x14f5   : > { %17843 = vmatprep.subr.mxu1 %v15358_v3  ;;  %v18636_v30 = vpack.c.bf16 %v15460_v32, %v15444_v60  ;;  %v15419_v60 = vld [vmem:[%s23460_s1 + $0x240] sm:$0xff] }
0x14f7   : > { %17841 = vmatmul.mubr.msk.f32.vlgmr.msra.gmra.mrb[52].mxu1 %vm1994_vm9, %v5749_v48  ;;  %18637 = vmatprep.subr.bf16.mxu0 %v18636_v30  ;;  %v15421_v30 = vld [vmem:[%s23460_s1 + $0x250] sm:$0xff] }
0x14f8   : > { %17844 = vmatpush3.msra.mxu1 %v15358_v3  ;;  %v18638_v3 = vpack.c.bf16 %v15459_v18, %v15443_v2  ;;  %v18664_v2 = vpack.c.bf16 %v15436_v23, %v15420_v43  ;;  %v15477_v23 = vld [vmem:[%s23463_s26 + $0x800] sm:$0xff] }
0x14fa   : > { %18639 = vmatpush1.bf16.msra.mxu0 %v18638_v3  ;;  %v15468_v3 = vld [vmem:[%s23460_s1 + $0x3c8] sm:$0xff] }
0x1502   : > { %19853 = vrot.lane.b32.xlu1 %v21420_v19, %s23470_s10 }
0x157a   : > { %v6029_v42 = vpop.xlane.xlu1 %6028 }
0x157e   : > { %v6026_v38 = vpop.xlane.xlu1 %6025 }
0x157f   : > { %19925 = vrcp.f32 %v6026_v38  ;;  %v15461_v38 = vld [vmem:[%s23460_s1 + $0x390] sm:$0xff] }
0x1580   : > { %19927 = vrcp.f32 %v6029_v42  ;;  %v15445_v42 = vld [vmem:[%s23460_s1 + $0x310] sm:$0xff] }
0x1582   : > { %v19854_v39 = vpop.permute.xlu1 %19853 }
0x1583   : > { %v19856_v53 = vunpack.i.h.bf16 %v19854_v39  ;;  %v19855_v9 = vunpack.i.l.bf16 %v19854_v39  ;;  %v18646_v39 = vpack.c.bf16 %v15461_v38, %v15445_v42  ;;  %v15454_v42 = vld [vmem:[%s23460_s1 + $0x358] sm:$0xff] }
0x1584   : > { %v15470_v38 = vld [vmem:[%s23460_s1 + $0x3d8] sm:$0xff] }
0x1585   : > { %v18626_v61 = vpack.c.bf16 %v19856_v53, %v19855_v9  ;;  %v15416_v53 = vld [vmem:[%s23460_s1 + $0x228] sm:$0xff] }
0x1586   : > { %v15432_v9 = vld [vmem:[%s23460_s1 + $0x2a8] sm:$0xff] }
0x1587   : > { %18628 = vmatprep.subr.msk.bf16.mxu1 %vm20716_vm8, %v18626_v61 }
0x1589   : > { %v19926_v7 = vpop.eup %19925 }
0x158a   : > { %v19928_v50 = vpop.eup %19927  ;;  %v6032_v19 = vmul.f32 %v19926_v7, %v19920_v51  ;;  %v15446_v51 = vld [vmem:[%s23460_s1 + $0x318] sm:$0xff]  ;;  %v18648_v7 = vpack.c.bf16 %v15432_v9, %v15416_v53  ;;  %v15451_v9 = vld [vmem:[%s23460_s1 + $0x340] sm:$0xff] }
0x158b   : > { %v6033_v12 = vmul.f32 %v19928_v50, %v19918_v59  ;;  %v18642_v59 = vpack.c.bf16 %v15429_v46, %v15413_v44  ;;  %v18644_v48 = vpack.c.bf16 %v15462_v22, %v15446_v51  ;;  %v15422_v44 = vld [vmem:[%s23460_s1 + $0x258] sm:$0xff]  ;;  %v15435_v51 = vld [vmem:[%s23460_s1 + $0x2c0] sm:$0xff]  ;;  %v15437_v22 = vld [vmem:[%s23460_s1 + $0x2d0] sm:$0xff] }
0x158c   : > { %18649 = vmatprep.subr.bf16.mxu0 %v18648_v7  ;;  %v18674_v53 = vpack.c.bf16 %v15437_v22, %v15421_v30  ;;  %v15453_v7 = vld [vmem:[%s23460_s1 + $0x350] sm:$0xff]  ;;  %v15496_v30 = vld [vmem:[%s23463_s26 + $0x898] sm:$0xff] }
0x158d   : > { %v15527_v22 = vld [vmem:[%s23463_s26 + $0x990] sm:$0xff] }
0x15ca   : > { %v17842_v10 = vpop.f32.mrb[52].mxu1 }
0x15cb   : > { %v5829_v27 = vpop.f32.mrb[53].mxu1 }
0x15cc   : > { %17845 = vmatprep.mubr.msk.f32.mxu1 %vm1906_vm5, %v5829_v27 }
0x15cd   : > { %17846 = vmatmul.mubr.msk.f32.vlgmr.msra.gmra.mrb[50].mxu1 %vm1906_vm5, %v17842_v10  ;;  %v15434_v10 = vld [vmem:[%s23460_s1 + $0x2b8] sm:$0xff] }
0x15ce   : > { %18631 = vmatpush3.bf16.msk.msra.mxu1 %vm20716_vm8, %v18626_v61  ;;  %17859 = vmatprep.mubr.msk.f32.mxu1 %vm1994_vm9, %v6032_v19  ;;  %v15418_v61 = vld [vmem:[%s23460_s1 + $0x238] sm:$0xff] }
0x15cf   : > { %17862 = vmatprep.subr.mxu1 %v15359_v11  ;;  %v18656_v27 = vpack.c.bf16 %v15434_v10, %v15418_v61  ;;  %v15467_v61 = vld [vmem:[%s23460_s1 + $0x3c0] sm:$0xff]  ;;  %v15469_v10 = vld [vmem:[%s23460_s1 + $0x3d0] sm:$0xff] }
0x15d1   : > { %17860 = vmatmul.mubr.msk.f32.vlgmr.msra.gmra.mrb[54].mxu1 %vm1994_vm9, %v6033_v12 }
0x15d2   : > { %17863 = vmatpush3.msra.mxu1 %v15359_v11 }
0x15d3   : > { %18641 = vmatprep.subr.bf16.mxu1 %v18640_v6 }
0x16a4   : > { %v17861_v13 = vpop.f32.mrb[54].mxu1 }
0x16a5   : > { %v6113_v29 = vpop.f32.mrb[55].mxu1 }
0x16a6   : > { %17864 = vmatprep.mubr.msk.f32.mxu1 %vm1906_vm5, %v6113_v29 }
0x16a7   : > { %17865 = vmatmul.mubr.msk.f32.vlgmr.msra.gmra.mrb[50].mxu1 %vm1906_vm5, %v17861_v13 }
0x16a8   : > { %6817 = vmatprep.mubr.f32.mxu1 %v23471_v25  ;;  %18643 = vmatpush1.bf16.msra.mxu1 %v18642_v59  ;;  %v18662_v59 = vpack.c.bf16 %v15465_v31, %v15449_v40  ;;  %v15493_v40 = vld [vmem:[%s23463_s26 + $0x880] sm:$0xff]  ;;  %v15494_v31 = vld [vmem:[%s23463_s26 + $0x888] sm:$0xff] }
0x16a9   : > { %18645 = vmatprep.subr.bf16.mxu1 %v18644_v48  ;;  %v15452_v48 = vld [vmem:[%s23460_s1 + $0x348] sm:$0xff] }
0x16ac   : > { %18647 = vmatpush1.bf16.msra.mxu1 %v18646_v39  ;;  %v18666_v39 = vpack.c.bf16 %v15435_v51, %v15419_v60  ;;  %v15510_v60 = vld [vmem:[%s23463_s26 + $0x908] sm:$0xff]  ;;  %v15495_v51 = vld [vmem:[%s23463_s26 + $0x890] sm:$0xff] }
0x16ad   : > { %18657 = vmatprep.subr.bf16.mxu1 %v18656_v27  ;;  %v18668_v27 = vpack.c.bf16 %v15468_v3, %v15452_v48  ;;  %v15479_v3 = vld [vmem:[%s23463_s26 + $0x810] sm:$0xff] }
0x177a   : > { %v17866_v49 = vpop.f32.mrb[50].mxu1 }
0x177b   : > { %v6212_v17 = vadd.f32 %v17866_v49, %v15406_v0  ;;  %v6194_v47 = vpop.f32.mrb[51].mxu1  ;;  %v15409_v49 = vld [vmem:[%s23461_s28 + $0x1] ss:$0 sm:$0xff] }
0x177c   : > { %v6211_v15 = vadd.f32 %v15406_v0, %v6194_v47 }
0x177d   : > { %v6214_v16 = vadd.f32 %v6212_v17, %v21395_v62  ;;  %v15415_v17 = vld [vmem:[%s23460_s1 + $0x220] sm:$0xff] }
0x177e   : > { %v6213_v21 = vadd.f32 %v6211_v15, %v21387_v5  ;;  %v15431_v15 = vld [vmem:[%s23460_s1 + $0x2a0] sm:$0xff] }
0x177f   : > { %v6222_v4 = vsel %vm3049_vm11, %v6214_v16, 0.0 }
0x1780   : > { %6223 = vadd.xlane.f32.xlu1 %v6222_v4  ;;  %v6219_v24 = vsel %vm1661_vm4, %v6213_v21, 0.0  ;;  %v15410_v4 = vld [vmem:[%s23462_s16 + $0x1] ss:$0 sm:$0xff]  ;;  %s23480_s16 = sld [smem:[#allocation49_spill]] }
0x1781   : > { %6220 = vadd.xlane.f32.xlu0 %v6219_v24  ;;  %v15448_v24 = vld [vmem:[%s23460_s1 + $0x328] sm:$0xff] }
0x180d   : > { %v6224_v28 = vpop.xlane.xlu1 %6223 }
0x180e   : > { %v6226_v26 = vmul.f32 0.03125, %v6224_v28  ;;  %v6221_v37 = vpop.xlane.xlu0 %6220 }
0x180f   : > { %v6225_v63 = vmul.f32 0.03125, %v6221_v37  ;;  %v15450_v37 = vld [vmem:[%s23460_s1 + $0x338] sm:$0xff] }
0x1810   : > { %v21535_v14 = vsub.f32 %v6214_v16, %v6226_v26  ;;  %v15417_v16 = vld [vmem:[%s23460_s1 + $0x230] sm:$0xff]  ;;  %v15464_v26 = vld [vmem:[%s23460_s1 + $0x3a8] sm:$0xff] }
0x1811   : > { %v6227_v62 = vsub.f32 %v6213_v21, %v6225_v63  ;;  %v15433_v21 = vld [vmem:[%s23460_s1 + $0x2b0] sm:$0xff]  ;;  %v15466_v63 = vld [vmem:[%s23460_s1 + $0x3b8] sm:$0xff]  ;;  %v18652_v36 = vpack.c.bf16 %v15464_v26, %v15448_v24  ;;  %v15472_v24 = vld [vmem:[%s23460_s1 + $0x3e8] sm:$0xff] }
0x1812   : > { %v6230_v58 = vmul.f32 %v21535_v14, %v21535_v14  ;;  %v18660_v41 = vpack.c.bf16 %v15466_v63, %v15450_v37  ;;  %v15474_v26 = vld [vmem:[%s23460_s1 + $0x3f8] sm:$0xff] }
0x1813   : > { %v6229_v5 = vmul.f32 %v6227_v62, %v6227_v62 }
0x1814   : > { %v6234_v34 = vsel %vm3049_vm11, %v6230_v58, 0.0  ;;  %v18658_v58 = vpack.c.bf16 %v15433_v21, %v15417_v16 }
0x1815   : > { %v6231_v55 = vsel %vm1661_vm4, %v6229_v5, 0.0 }
0x1816   : > { %6232 = vadd.xlane.f32.xlu0 %v6231_v55  ;;  %v18650_v55 = vpack.c.bf16 %v15431_v15, %v15415_v17  ;;  %v15439_v17 = vld [vmem:[%s23460_s1 + $0x2e0] sm:$0xff]  ;;  %v15441_v15 = vld [vmem:[%s23460_s1 + $0x2f0] sm:$0xff] }
0x181a   : > { %6235 = vadd.xlane.f32.xlu0 %v6234_v34 }
0x18a3   : > { %v6233_v50 = vpop.xlane.xlu0 %6232 }
0x18a4   : > { %v6237_v19 = vmul.f32 0.03125, %v6233_v50  ;;  %v18676_v50 = vpack.c.bf16 %v15470_v38, %v15454_v42  ;;  %v15480_v42 = vld [vmem:[%s23463_s26 + $0x818] sm:$0xff]  ;;  %v18700_v38 = vpack.c.bf16 %v15496_v30, %v15495_v51  ;;  %v15487_v30 = vld [vmem:[%s23463_s26 + $0x850] sm:$0xff] }
0x18a6   : > { %v6239_v11 = vadd.f32 1e-05, %v6237_v19  ;;  %v15424_v19 = vld [vmem:[%s23460_s1 + $0x268] sm:$0xff] }
0x18a7   : > { %v6236_v12 = vpop.xlane.xlu0 %6235 }
0x18a8   : > { %19929 = vrsqrt.f32 %v6239_v11  ;;  %v6238_v13 = vmul.f32 0.03125, %v6236_v12  ;;  %v15440_v11 = vld [vmem:[%s23460_s1 + $0x2e8] sm:$0xff]  ;;  %v15426_v12 = vld [vmem:[%s23460_s1 + $0x278] sm:$0xff] }
0x18a9   : > { %v18680_v16 = vpack.c.bf16 %v15440_v11, %v15424_v19  ;;  %v15481_v11 = vld [vmem:[%s23463_s26 + $0x820] sm:$0xff] }
0x18aa   : > { %v6240_v29 = vadd.f32 1e-05, %v6238_v13  ;;  %v15442_v13 = vld [vmem:[%s23460_s1 + $0x2f8] sm:$0xff] }
0x18ab   : > { %v18688_v21 = vpack.c.bf16 %v15442_v13, %v15426_v12  ;;  %v15482_v12 = vld [vmem:[%s23463_s26 + $0x828] sm:$0xff] }
0x18ac   : > { %19931 = vrsqrt.f32 %v6240_v29  ;;  %v18670_v29 = vpack.c.bf16 %v15467_v61, %v15451_v9  ;;  %v15512_v9 = vld [vmem:[%s23463_s26 + $0x918] sm:$0xff]  ;;  %v15497_v61 = vld [vmem:[%s23463_s26 + $0x8a0] sm:$0xff] }
0x18b2   : > { %v19930_v0 = vpop.eup %19929 }
0x18b3   : > { %v6243_v47 = vmul.f32 %v19930_v0, %v6227_v62  ;;  %v15447_v62 = vld [vmem:[%s23460_s1 + $0x320] sm:$0xff]  ;;  %v18678_v0 = vpack.c.bf16 %v15469_v10, %v15453_v7  ;;  %v15498_v7 = vld [vmem:[%s23463_s26 + $0x8a8] sm:$0xff] }
0x18b4   : > { %v18654_v46 = vpack.c.bf16 %v15463_v45, %v15447_v62  ;;  %v15473_v62 = vld [vmem:[%s23460_s1 + $0x3f0] sm:$0xff]  ;;  %v15529_v10 = vld [vmem:[%s23463_s26 + $0x9a0] sm:$0xff]  ;;  %v18704_v13 = vpack.c.bf16 %v15498_v7, %v15497_v61 }
0x18b5   : > { %v6251_v28 = vmul.f32 %v15409_v49, %v6243_v47  ;;  %v15425_v47 = vld [vmem:[%s23460_s1 + $0x270] sm:$0xff]  ;;  %v15489_v7 = vld [vmem:[%s23463_s26 + $0x860] sm:$0xff] }
0x18b6   : > { %v19932_v5 = vpop.eup %19931  ;;  %v18690_v63 = vpack.c.bf16 %v15441_v15, %v15425_v47  ;;  %v15500_v47 = vld [vmem:[%s23463_s26 + $0x8b8] sm:$0xff]  ;;  %v15531_v15 = vld [vmem:[%s23463_s26 + $0x9b0] sm:$0xff] }
0x18b7   : > { %v21572_v34 = vadd.f32 %v15410_v4, %v6251_v28  ;;  %v6244_v35 = vmul.f32 %v19932_v5, %v21535_v14  ;;  %v15438_v14 = vld [vmem:[%s23460_s1 + $0x2d8] sm:$0xff]  ;;  %v15455_v5 = vld [vmem:[%s23460_s1 + $0x360] sm:$0xff] }
0x18b8   : > { %v18672_v18 = vpack.c.bf16 %v15438_v14, %v15422_v44  ;;  %v15458_v28 = vld [vmem:[%s23460_s1 + $0x378] sm:$0xff]  ;;  %v15478_v44 = vld [vmem:[%s23463_s26 + $0x808] sm:$0xff]  ;;  %v18696_v14 = vpack.c.bf16 %v15494_v31, %v15493_v40  ;;  %v15485_v31 = vld [vmem:[%s23463_s26 + $0x840] sm:$0xff] }
0x18b9   : > { %v6252_v6 = vmul.f32 %v15409_v49, %v6244_v35  ;;  %15734 = vmatmul.mubr.msk.f32.vlgmr.msra.gmra.mrb[58].mxu0 %vm1661_vm4, %v21572_v34  ;;  %15736 = vmatmul.mubr.msk.f32.vlgmr.msra.gmra.mrb[56].mxu1 %vm1661_vm4, %v21572_v34  ;;  %v15423_v49 = vld [vmem:[%s23460_s1 + $0x260] sm:$0xff]  ;;  %v18692_v45 = vpack.c.bf16 %v15474_v26, %v15458_v28  ;;  %v15484_v28 = vld [vmem:[%s23463_s26 + $0x838] sm:$0xff] }
0x18ba   : > { %18651 = vmatpush1.bf16.msra.mxu0 %v18650_v55  ;;  %18659 = vmatpush1.bf16.msra.mxu1 %v18658_v58  ;;  %v18682_v37 = vpack.c.bf16 %v15439_v17, %v15423_v49  ;;  %v15471_v55 = vld [vmem:[%s23460_s1 + $0x3e0] sm:$0xff]  ;;  %v15457_v58 = vld [vmem:[%s23460_s1 + $0x370] sm:$0xff]  ;;  %v15514_v49 = vld [vmem:[%s23463_s26 + $0x928] sm:$0xff] }
0x18bb   : > { %v21587_v32 = vadd.f32 %v15410_v4, %v6252_v6  ;;  %6746 = vmatprep.mubr.f32.mxu0 %v23471_v25  ;;  %6823 = vmatprep.mubr.f32.mxu1 %v23471_v25  ;;  %v15456_v4 = vld [vmem:[%s23460_s1 + $0x368] sm:$0xff]  ;;  %v18686_v43 = vpack.c.bf16 %v15471_v55, %v15455_v5  ;;  %v18694_v6 = vpack.c.bf16 %v15473_v62, %v15457_v58  ;;  %v15499_v17 = vld [vmem:[%s23463_s26 + $0x8b0] sm:$0xff]  ;;  %v15516_v5 = vld [vmem:[%s23463_s26 + $0x938] sm:$0xff]  ;;  %s23473_s1 = sld [smem:[#allocation43_spill]] }
0x18bc   : > { %18653 = vmatprep.subr.bf16.mxu0 %v18652_v36  ;;  %18661 = vmatprep.subr.bf16.mxu1 %v18660_v41  ;;  %v18684_v35 = vpack.c.bf16 %v15472_v24, %v15456_v4  ;;  %v15525_v36 = vld [vmem:[%s23463_s26 + $0x980] sm:$0xff]  ;;  %v15526_v41 = vld [vmem:[%s23463_s26 + $0x988] sm:$0xff]  ;;  %v15483_v24 = vld [vmem:[%s23463_s26 + $0x830] sm:$0xff]  ;;  %v18708_v26 = vpack.c.bf16 %v15500_v47, %v15499_v17 }
0x18bd   : > { %15735 = vmatmul.mubr.msk.f32.gmra.mrb[60].mxu0 %vm1661_vm4, %v21587_v32  ;;  %15737 = vmatmul.mubr.msk.f32.gmra.mrb[58].mxu1 %vm1661_vm4, %v21587_v32  ;;  %v15501_v55 = vld [vmem:[%s23463_s26 + $0x8c0] sm:$0xff]  ;;  %v15502_v58 = vld [vmem:[%s23463_s26 + $0x8c8] sm:$0xff]  ;;  %v15540_v47 = vld [vmem:[%s23463_s26 + $0x9f8] sm:$0xff] }
0x18be   : > { %18655 = vmatpush1.bf16.msra.mxu0 %v18654_v46  ;;  %18663 = vmatpush1.bf16.msra.mxu1 %v18662_v59  ;;  %v18728_v46 = vpack.c.bf16 %v15526_v41, %v15525_v36  ;;  %v15509_v59 = vld [vmem:[%s23463_s26 + $0x900] sm:$0xff]  ;;  %v15486_v36 = vld [vmem:[%s23463_s26 + $0x848] sm:$0xff]  ;;  %v18712_v41 = vpack.c.bf16 %v15502_v58, %v15501_v55 }
0x18bf   : > { %6894 = vmatprep.mubr.f32.mxu0 %v23471_v25  ;;  %6971 = vmatprep.mubr.f32.mxu1 %v23471_v25  ;;  %v18730_v48 = vpack.c.bf16 %v15510_v60, %v15509_v59  ;;  %v15533_v62 = vld [vmem:[%s23463_s26 + $0x9c0] sm:$0xff]  ;;  %v15536_v59 = vld [vmem:[%s23463_s26 + $0x9d8] sm:$0xff]  ;;  %v18714_v60 = vpack.c.bf16 %v15486_v36, %v15485_v31  ;;  %v15590_v58 = vld [vmem:[%s23463_s26 + $0xb88] sm:$0xff] }
0x18c0   : > { %18665 = vmatprep.subr.bf16.mxu0 %v18664_v2  ;;  %18673 = vmatprep.subr.bf16.mxu1 %v18672_v18  ;;  %v15528_v2 = vld [vmem:[%s23463_s26 + $0x998] sm:$0xff]  ;;  %v18698_v18 = vpack.c.bf16 %v15478_v44, %v15477_v23  ;;  %v15518_v23 = vld [vmem:[%s23463_s26 + $0x948] sm:$0xff]  ;;  %v15503_v44 = vld [vmem:[%s23463_s26 + $0x8d0] sm:$0xff] }
0x18c1   : > { %15738 = vmatmul.mubr.msk.f32.vlgmr.msra.gmra.mrb[62].mxu0 %vm1661_vm4, %v21572_v34  ;;  %15740 = vmatmul.mubr.msk.f32.vlgmr.msra.gmra.mrb[60].mxu1 %vm1661_vm4, %v21572_v34 }
0x18c2   : > { %18667 = vmatpush1.bf16.msra.mxu0 %v18666_v39  ;;  %18675 = vmatpush1.bf16.msra.mxu1 %v18674_v53  ;;  %v18732_v39 = vpack.c.bf16 %v15528_v2, %v15527_v22  ;;  %v15511_v53 = vld [vmem:[%s23463_s26 + $0x910] sm:$0xff]  ;;  %v15488_v22 = vld [vmem:[%s23463_s26 + $0x858] sm:$0xff] }
0x18c3   : > { %6900 = vmatprep.mubr.f32.mxu0 %v23471_v25  ;;  %6977 = vmatprep.mubr.f32.mxu1 %v23471_v25  ;;  %v18734_v19 = vpack.c.bf16 %v15512_v9, %v15511_v53  ;;  %v15538_v53 = vld [vmem:[%s23463_s26 + $0x9e8] sm:$0xff]  ;;  %v18718_v9 = vpack.c.bf16 %v15488_v22, %v15487_v30  ;;  %v15560_v22 = vld [vmem:[%s23463_s26 + $0xa98] sm:$0xff] }
0x18c4   : > { %18669 = vmatprep.subr.bf16.mxu0 %v18668_v27  ;;  %18677 = vmatprep.subr.bf16.mxu1 %v18676_v50  ;;  %v15530_v27 = vld [vmem:[%s23463_s26 + $0x9a8] sm:$0xff]  ;;  %v18702_v50 = vpack.c.bf16 %v15480_v42, %v15479_v3  ;;  %v15520_v3 = vld [vmem:[%s23463_s26 + $0x958] sm:$0xff]  ;;  %v15505_v42 = vld [vmem:[%s23463_s26 + $0x8e0] sm:$0xff] }
0x18c5   : > { %15739 = vmatmul.mubr.msk.f32.gmra.mrb[64].mxu0 %vm1661_vm4, %v21587_v32  ;;  %15741 = vmatmul.mubr.msk.f32.gmra.mrb[62].mxu1 %vm1661_vm4, %v21587_v32 }
0x18c6   : > { %18671 = vmatpush1.bf16.msra.mxu0 %v18670_v29  ;;  %18679 = vmatpush1.bf16.msra.mxu1 %v18678_v0  ;;  %v18736_v29 = vpack.c.bf16 %v15530_v27, %v15529_v10  ;;  %v15513_v0 = vld [vmem:[%s23463_s26 + $0x920] sm:$0xff] }
0x18c7   : > { %7048 = vmatprep.mubr.f32.mxu0 %v23471_v25  ;;  %7125 = vmatprep.mubr.f32.mxu1 %v23471_v25  ;;  %v18738_v4 = vpack.c.bf16 %v15514_v49, %v15513_v0  ;;  %v15508_v0 = vld [vmem:[%s23463_s26 + $0x8f8] sm:$0xff]  ;;  %v15539_v49 = vld [vmem:[%s23463_s26 + $0x9f0] sm:$0xff] }
0x18c8   : > { %18681 = vmatprep.subr.bf16.mxu0 %v18680_v16  ;;  %18689 = vmatprep.subr.bf16.mxu1 %v18688_v21  ;;  %v15532_v16 = vld [vmem:[%s23463_s26 + $0x9b8] sm:$0xff]  ;;  %v18706_v21 = vpack.c.bf16 %v15482_v12, %v15481_v11  ;;  %v15522_v11 = vld [vmem:[%s23463_s26 + $0x968] sm:$0xff] }
0x18c9   : > { %15742 = vmatmul.mubr.msk.f32.vlgmr.msra.gmra.mrb[66].mxu0 %vm1661_vm4, %v21572_v34  ;;  %15744 = vmatmul.mubr.msk.f32.vlgmr.msra.gmra.mrb[64].mxu1 %vm1661_vm4, %v21572_v34 }
0x18ca   : > { %18683 = vmatpush1.bf16.msra.mxu0 %v18682_v37  ;;  %18691 = vmatpush1.bf16.msra.mxu1 %v18690_v63  ;;  %v18740_v37 = vpack.c.bf16 %v15532_v16, %v15531_v15  ;;  %v15515_v63 = vld [vmem:[%s23463_s26 + $0x930] sm:$0xff]  ;;  %v15492_v16 = vld [vmem:[%s23463_s26 + $0x878] sm:$0xff] }
0x18cb   : > { %7054 = vmatprep.mubr.f32.mxu0 %v23471_v25  ;;  %7131 = vmatprep.mubr.f32.mxu1 %v23471_v25  ;;  %v18742_v40 = vpack.c.bf16 %v15516_v5, %v15515_v63  ;;  %v15491_v15 = vld [vmem:[%s23463_s26 + $0x870] sm:$0xff]  ;;  %v15558_v63 = vld [vmem:[%s23463_s26 + $0xa88] sm:$0xff]  ;;  %v15589_v5 = vld [vmem:[%s23463_s26 + $0xb80] sm:$0xff] }
0x18cc   : > { %18685 = vmatprep.subr.bf16.mxu0 %v18684_v35  ;;  %18693 = vmatprep.subr.bf16.mxu1 %v18692_v45  ;;  %v15534_v35 = vld [vmem:[%s23463_s26 + $0x9c8] sm:$0xff]  ;;  %v18710_v45 = vpack.c.bf16 %v15484_v28, %v15483_v24  ;;  %v15523_v24 = vld [vmem:[%s23463_s26 + $0x970] sm:$0xff]  ;;  %v15524_v28 = vld [vmem:[%s23463_s26 + $0x978] sm:$0xff] }
0x18cd   : > { %15743 = vmatmul.mubr.msk.f32.gmra.mrb[68].mxu0 %vm1661_vm4, %v21587_v32  ;;  %15745 = vmatmul.mubr.msk.f32.gmra.mrb[66].mxu1 %vm1661_vm4, %v21587_v32 }
0x18ce   : > { %18687 = vmatpush1.bf16.msra.mxu0 %v18686_v43  ;;  %18695 = vmatpush1.bf16.msra.mxu1 %v18694_v6  ;;  %v18744_v43 = vpack.c.bf16 %v15534_v35, %v15533_v62  ;;  %v15517_v6 = vld [vmem:[%s23463_s26 + $0x940] sm:$0xff]  ;;  %v18792_v62 = vpack.c.bf16 %v15590_v58, %v15589_v5  ;;  %v21727_v35 = vld [vmem:[%s23464_s22 + $0x10] sm:$0xff] }
0x18cf   : > { %7202 = vmatprep.mubr.f32.mxu0 %v23471_v25  ;;  %7279 = vmatprep.mubr.f32.mxu1 %v23471_v25  ;;  %v18746_v51 = vpack.c.bf16 %v15518_v23, %v15517_v6  ;;  %v6597_v31 = vrot.slane %v21727_v35, %v21038_v56  ;;  %v6605_v36 = vrot.slane %v21727_v35, %v21041_v57 }
0x18d0   : > { %18697 = vmatprep.subr.bf16.mxu0 %v18696_v14  ;;  %18729 = vmatprep.subr.bf16.mxu1 %v18728_v46  ;;  %v15504_v14 = vld [vmem:[%s23463_s26 + $0x8d8] sm:$0xff]  ;;  %v15535_v46 = vld [vmem:[%s23463_s26 + $0x9d0] sm:$0xff] }
0x18d1   : > { %15746 = vmatmul.mubr.msk.f32.vlgmr.msra.gmra.mrb[70].mxu0 %vm1661_vm4, %v21572_v34  ;;  %15748 = vmatmul.mubr.msk.f32.vlgmr.msra.gmra.mrb[68].mxu1 %vm1661_vm4, %v21572_v34  ;;  %v18716_v2 = vpack.c.bf16 %v15504_v14, %v15503_v44  ;;  %v15573_v44 = vld [vmem:[%s23463_s26 + $0xb00] sm:$0xff]  ;;  %v15574_v14 = vld [vmem:[%s23463_s26 + $0xb08] sm:$0xff] }
0x18d2   : > { %7208 = vmatprep.mubr.f32.mxu0 %v23471_v25  ;;  %7285 = vmatprep.mubr.f32.mxu1 %v23471_v25 }
0x18d3   : > { %18699 = vmatpush3.bf16.msra.mxu0 %v18698_v18  ;;  %18731 = vmatpush3.bf16.msra.mxu1 %v18730_v48  ;;  %v18748_v18 = vpack.c.bf16 %v15536_v59, %v15535_v46  ;;  %v15519_v48 = vld [vmem:[%s23463_s26 + $0x950] sm:$0xff] }
0x18d4   : > { %18701 = vmatprep.subr.bf16.mxu0 %v18700_v38  ;;  %18733 = vmatprep.subr.bf16.mxu1 %v18732_v39  ;;  %v15506_v38 = vld [vmem:[%s23463_s26 + $0x8e8] sm:$0xff]  ;;  %v15537_v39 = vld [vmem:[%s23463_s26 + $0x9e0] sm:$0xff]  ;;  %v18750_v61 = vpack.c.bf16 %v15520_v3, %v15519_v48  ;;  %v15559_v46 = vld [vmem:[%s23463_s26 + $0xa90] sm:$0xff] }
0x18d5   : > { %15747 = vmatmul.mubr.msk.f32.gmra.mrb[72].mxu0 %vm1661_vm4, %v21587_v32  ;;  %15749 = vmatmul.mubr.msk.f32.gmra.mrb[70].mxu1 %vm1661_vm4, %v21587_v32  ;;  %v18720_v10 = vpack.c.bf16 %v15506_v38, %v15505_v42  ;;  %v18752_v27 = vpack.c.bf16 %v15538_v53, %v15537_v39  ;;  %v18794_v38 = vpack.c.bf16 %v15574_v14, %v15573_v44  ;;  %v15543_v53 = vld [vmem:[%s23463_s26 + $0xa10] sm:$0xff]  ;;  %v15578_v14 = vld [vmem:[%s23463_s26 + $0xb28] sm:$0xff] }
0x18d6   : > { %v21747_v39 = vrot.slane %v21727_v35, %v21054_v1 }
0x18d7   : > { %18703 = vmatpush3.bf16.msra.mxu0 %v18702_v50  ;;  %18735 = vmatpush3.bf16.msra.mxu1 %v18734_v19  ;;  %v15490_v50 = vld [vmem:[%s23463_s26 + $0x868] sm:$0xff]  ;;  %v15521_v19 = vld [vmem:[%s23463_s26 + $0x960] sm:$0xff] }
0x18d8   : > { %18705 = vmatprep.subr.bf16.mxu0 %v18704_v13  ;;  %18737 = vmatprep.subr.bf16.mxu1 %v18736_v29  ;;  %v18722_v12 = vpack.c.bf16 %v15490_v50, %v15489_v7  ;;  %v18754_v13 = vpack.c.bf16 %v15522_v11, %v15521_v19  ;;  %v15507_v29 = vld [vmem:[%s23463_s26 + $0x8f0] sm:$0xff]  ;;  %v15544_v19 = vld [vmem:[%s23463_s26 + $0xa18] sm:$0xff] }
0x18d9   : > { %v18724_v17 = vpack.c.bf16 %v15508_v0, %v15507_v29  ;;  %v15575_v11 = vld [vmem:[%s23463_s26 + $0xb10] sm:$0xff] }
0x18db   : > { %18707 = vmatpush3.bf16.msra.mxu0 %v18706_v21  ;;  %18739 = vmatpush3.bf16.msra.mxu1 %v18738_v4  ;;  %v18756_v21 = vpack.c.bf16 %v15540_v47, %v15539_v49  ;;  %v18726_v4 = vpack.c.bf16 %v15492_v16, %v15491_v15  ;;  %v15576_v47 = vld [vmem:[%s23463_s26 + $0xb18] sm:$0xff]  ;;  %v15561_v15 = vld [vmem:[%s23463_s26 + $0xaa0] sm:$0xff] }
0x18dc   : > { %18709 = vmatprep.subr.bf16.mxu0 %v18708_v26  ;;  %18741 = vmatprep.subr.bf16.mxu1 %v18740_v37  ;;  %v18758_v26 = vpack.c.bf16 %v15524_v28, %v15523_v24  ;;  %v15557_v37 = vld [vmem:[%s23463_s26 + $0xa80] sm:$0xff]  ;;  %v15562_v24 = vld [vmem:[%s23463_s26 + $0xaa8] sm:$0xff] }
0x18dd   : > { %v18760_v55 = vpack.c.bf16 %v15558_v63, %v15557_v37  ;;  %v15593_v28 = vld [vmem:[%s23463_s26 + $0xba0] sm:$0xff] }
0x18de   : > { %v15545_v37 = vld [vmem:[%s23463_s26 + $0xa20] sm:$0xff] }
0x18df   : > { %18711 = vmatpush3.bf16.msra.mxu0 %v18710_v45  ;;  %18743 = vmatpush3.bf16.msra.mxu1 %v18742_v40  ;;  %v6593_v45 = vrot.slane %v21727_v35, %v21029_v52  ;;  %v6601_v40 = vrot.slane %v21727_v35, %v21032_v54 }
0x18e0   : > { %18713 = vmatprep.subr.bf16.mxu0 %v18712_v41  ;;  %18745 = vmatprep.subr.bf16.mxu1 %v18744_v43  ;;  %v15541_v41 = vld [vmem:[%s23463_s26 + $0xa00] sm:$0xff]  ;;  %v15542_v43 = vld [vmem:[%s23463_s26 + $0xa08] sm:$0xff] }
0x18e1   : > { %v18762_v42 = vpack.c.bf16 %v15542_v43, %v15541_v41 }
0x18e3   : > { %18715 = vmatpush3.bf16.msra.mxu0 %v18714_v60  ;;  %18747 = vmatpush3.bf16.msra.mxu1 %v18746_v51 }
0x18e4   : > { %18717 = vmatprep.subr.bf16.mxu0 %v18716_v2  ;;  %18749 = vmatprep.subr.bf16.mxu1 %v18748_v18  ;;  %v15591_v2 = vld [vmem:[%s23463_s26 + $0xb90] sm:$0xff]  ;;  %v15592_v18 = vld [vmem:[%s23463_s26 + $0xb98] sm:$0xff] }
0x18e5   : > { %v18796_v50 = vpack.c.bf16 %v15592_v18, %v15591_v2 }
0x18e7   : > { %18719 = vmatpush3.bf16.msra.mxu0 %v18718_v9  ;;  %18751 = vmatpush3.bf16.msra.mxu1 %v18750_v61 }
0x18e8   : > { %18721 = vmatprep.subr.bf16.mxu0 %v18720_v10  ;;  %18753 = vmatprep.subr.bf16.mxu1 %v18752_v27  ;;  %v18764_v27 = vpack.c.bf16 %v15560_v22, %v15559_v46  ;;  %v15563_v46 = vld [vmem:[%s23463_s26 + $0xab0] sm:$0xff]  ;;  %v15596_v22 = vld [vmem:[%s23463_s26 + $0xbb8] sm:$0xff] }
0x18eb   : > { %18723 = vmatpush3.bf16.msra.mxu0 %v18722_v12  ;;  %18755 = vmatpush3.bf16.msra.mxu1 %v18754_v13 }
0x18ec   : > { %18725 = vmatprep.subr.bf16.mxu0 %v18724_v17  ;;  %18757 = vmatprep.subr.bf16.mxu1 %v18756_v21 }
0x18ef   : > { %18727 = vmatpush3.bf16.msra.mxu0 %v18726_v4  ;;  %18759 = vmatpush3.bf16.msra.mxu1 %v18758_v26  ;;  %v21756_v4 = vrot.slane %v21727_v35, %v21063_v8  ;;  %v15594_v26 = vld [vmem:[%s23463_s26 + $0xba8] sm:$0xff] }
0x18f0   : > { %18761 = vmatprep.subr.bf16.mxu0 %v18760_v55  ;;  %18793 = vmatprep.subr.bf16.mxu1 %v18792_v62  ;;  %v18766_v62 = vpack.c.bf16 %v15544_v19, %v15543_v53  ;;  %v18800_v44 = vpack.c.bf16 %v15594_v26, %v15593_v28  ;;  %v15547_v53 = vld [vmem:[%s23463_s26 + $0xa30] sm:$0xff]  ;;  %v15580_v19 = vld [vmem:[%s23463_s26 + $0xb38] sm:$0xff] }
0x198c   : > { %v6742_v6 = vpop.f32.mrb[58].mxu0  ;;  %v6819_v23 = vpop.f32.mrb[56].mxu1 }
0x198d   : > { %v6743_v59 = vadd.f32 %v6742_v6, %v6593_v45  ;;  %v6820_v60 = vadd.f32 %v6819_v23, %v6601_v40  ;;  %v6744_v51 = vpop.f32.mrb[59].mxu0  ;;  %v6821_v30 = vpop.f32.mrb[57].mxu1  ;;  %v18768_v23 = vpack.c.bf16 %v15562_v24, %v15561_v15  ;;  %v15549_v15 = vld [vmem:[%s23463_s26 + $0xa40] sm:$0xff] }
0x198e   : > { %v6745_v48 = vadd.f32 %v6744_v51, %v6597_v31  ;;  %v6822_v3 = vadd.f32 %v6821_v30, %v6605_v36  ;;  %v15564_v51 = vld [vmem:[%s23463_s26 + $0xab8] sm:$0xff]  ;;  %v15595_v30 = vld [vmem:[%s23463_s26 + $0xbb0] sm:$0xff] }
0x198f   : > { %v7292_v12 = vmax.f32 %v6743_v59, 0.0  ;;  %v7294_v13 = vmax.f32 %v6820_v60, 0.0 }
0x1990   : > { %v7293_v9 = vmax.f32 %v6745_v48, 0.0  ;;  %v7295_v61 = vmax.f32 %v6822_v3, 0.0  ;;  %v6748_v7 = vpop.f32.mrb[60].mxu0  ;;  %v6825_v10 = vpop.f32.mrb[58].mxu1 }
0x1991   : > { %v6749_v29 = vadd.f32 %v6748_v7, %v6593_v45  ;;  %v6826_v0 = vadd.f32 %v6825_v10, %v6601_v40  ;;  %v6750_v49 = vpop.f32.mrb[61].mxu0  ;;  %v6827_v17 = vpop.f32.mrb[59].mxu1  ;;  %v18798_v45 = vpack.c.bf16 %v15576_v47, %v15575_v11  ;;  %v15546_v40 = vld [vmem:[%s23463_s26 + $0xa28] sm:$0xff]  ;;  %v18772_v10 = vpack.c.bf16 %v15564_v51, %v15563_v46  ;;  %v15565_v11 = vld [vmem:[%s23463_s26 + $0xac0] sm:$0xff]  ;;  %v15584_v51 = vld [vmem:[%s23463_s26 + $0xb58] sm:$0xff] }
0x1992   : > { %v6751_v16 = vadd.f32 %v6750_v49, %v6597_v31  ;;  %v6828_v21 = vadd.f32 %v6827_v17, %v6605_v36  ;;  %7394 = vmatprep.mubr.f32.mxu0 %v7293_v9  ;;  %7469 = vmatprep.mubr.f32.mxu1 %v7295_v61  ;;  %v15577_v31 = vld [vmem:[%s23463_s26 + $0xb20] sm:$0xff]  ;;  %v15548_v9 = vld [vmem:[%s23463_s26 + $0xa38] sm:$0xff] }
0x1993   : > { %7395 = vmatmul.mubr.f32.vlgmr.msra.gmra.mrb[74].mxu0 %v7292_v12  ;;  %7470 = vmatmul.mubr.f32.vlgmr.msra.gmra.mrb[72].mxu1 %v7294_v13  ;;  %v7308_v36 = vmax.f32 %v6749_v29, 0.0  ;;  %v7310_v41 = vmax.f32 %v6826_v0, 0.0  ;;  %v15566_v12 = vld [vmem:[%s23463_s26 + $0xac8] sm:$0xff]  ;;  %v15597_v13 = vld [vmem:[%s23463_s26 + $0xbc0] sm:$0xff]  ;;  %v18774_v17 = vpack.c.bf16 %v15548_v9, %v15547_v53 }
0x1994   : > { %v7309_v63 = vmax.f32 %v6751_v16, 0.0  ;;  %v7311_v5 = vmax.f32 %v6828_v21, 0.0  ;;  %18763 = vmatpush3.bf16.msra.mxu0 %v18762_v42  ;;  %18795 = vmatpush3.bf16.msra.mxu1 %v18794_v38  ;;  %v21762_v55 = vpop.f32.mrb[62].mxu0  ;;  %v21764_v58 = vpop.f32.mrb[60].mxu1  ;;  %v18770_v42 = vpack.c.bf16 %v15546_v40, %v15545_v37  ;;  %v18802_v38 = vpack.c.bf16 %v15578_v14, %v15577_v31  ;;  %v15598_v29 = vld [vmem:[%s23463_s26 + $0xbc8] sm:$0xff]  ;;  %v15581_v37 = vld [vmem:[%s23463_s26 + $0xb40] sm:$0xff] }
0x1995   : > { %v6898_v43 = vpop.f32.mrb[63].mxu0  ;;  %v6975_v6 = vpop.f32.mrb[61].mxu1  ;;  %18765 = vmatprep.subr.bf16.mxu0 %v18764_v27  ;;  %18797 = vmatprep.subr.bf16.mxu1 %v18796_v50  ;;  %v18804_v27 = vpack.c.bf16 %v15596_v22, %v15595_v30  ;;  %v15579_v50 = vld [vmem:[%s23463_s26 + $0xb30] sm:$0xff]  ;;  %v15550_v16 = vld [vmem:[%s23463_s26 + $0xa48] sm:$0xff]  ;;  %v18776_v28 = vpack.c.bf16 %v15566_v12, %v15565_v11  ;;  %v18808_v26 = vpack.c.bf16 %v15598_v29, %v15597_v13  ;;  %v15600_v40 = vld [vmem:[%s23463_s26 + $0xbd8] sm:$0xff] }
0x1996   : > { %v6899_v59 = vadd.f32 %v6898_v43, %v21747_v39  ;;  %v6976_v60 = vadd.f32 %v6975_v6, %v21756_v4  ;;  %7399 = vmatprep.mubr.f32.mxu0 %v7309_v63  ;;  %7474 = vmatprep.mubr.f32.mxu1 %v7311_v5  ;;  %v18806_v47 = vpack.c.bf16 %v15580_v19, %v15579_v50  ;;  %v15582_v63 = vld [vmem:[%s23463_s26 + $0xb48] sm:$0xff]  ;;  %v15567_v5 = vld [vmem:[%s23463_s26 + $0xad0] sm:$0xff]  ;;  %v15569_v30 = vld [vmem:[%s23463_s26 + $0xae0] sm:$0xff] }
0x1997   : > { %7400 = vmatmul.mubr.f32.gmra.mrb[76].mxu0 %v7308_v36  ;;  %7475 = vmatmul.mubr.f32.gmra.mrb[74].mxu1 %v7310_v41  ;;  %v18778_v41 = vpack.c.bf16 %v15550_v16, %v15549_v15  ;;  %v18810_v43 = vpack.c.bf16 %v15582_v63, %v15581_v37  ;;  %v15551_v6 = vld [vmem:[%s23463_s26 + $0xa50] sm:$0xff]  ;;  %v15570_v22 = vld [vmem:[%s23463_s26 + $0xae8] sm:$0xff]  ;;  %v15585_v13 = vld [vmem:[%s23463_s26 + $0xb60] sm:$0xff] }
0x1998   : > { %v7297_v2 = vmax.f32 %v6899_v59, 0.0  ;;  %v7299_v18 = vmax.f32 %v6976_v60, 0.0  ;;  %18767 = vmatpush3.bf16.msra.mxu0 %v18766_v62  ;;  %18799 = vmatpush3.bf16.msra.mxu1 %v18798_v45  ;;  %v21775_v48 = vpop.f32.mrb[64].mxu0  ;;  %v21777_v3 = vpop.f32.mrb[62].mxu1  ;;  %v15568_v62 = vld [vmem:[%s23463_s26 + $0xad8] sm:$0xff]  ;;  %v15599_v45 = vld [vmem:[%s23463_s26 + $0xbd0] sm:$0xff]  ;;  %v18784_v11 = vpack.c.bf16 %v15570_v22, %v15569_v30 }
0x1999   : > { %v21781_v61 = vpop.f32.mrb[65].mxu0  ;;  %v21783_v7 = vpop.f32.mrb[63].mxu1  ;;  %18769 = vmatprep.subr.bf16.mxu0 %v18768_v23  ;;  %18801 = vmatprep.subr.bf16.mxu1 %v18800_v44  ;;  %v15552_v23 = vld [vmem:[%s23463_s26 + $0xa58] sm:$0xff]  ;;  %v18780_v46 = vpack.c.bf16 %v15568_v62, %v15567_v5  ;;  %v18812_v59 = vpack.c.bf16 %v15600_v40, %v15599_v45  ;;  %v15583_v60 = vld [vmem:[%s23463_s26 + $0xb50] sm:$0xff]  ;;  %v15586_v29 = vld [vmem:[%s23463_s26 + $0xb68] sm:$0xff] }
0x199a   : > { %7544 = vmatprep.mubr.f32.mxu0 %v7297_v2  ;;  %7619 = vmatprep.mubr.f32.mxu1 %v7299_v18  ;;  %v15601_v2 = vld [vmem:[%s23463_s26 + $0xbe0] sm:$0xff]  ;;  %v15602_v18 = vld [vmem:[%s23463_s26 + $0xbe8] sm:$0xff]  ;;  %v18782_v53 = vpack.c.bf16 %v15552_v23, %v15551_v6  ;;  %v18814_v9 = vpack.c.bf16 %v15584_v51, %v15583_v60  ;;  %v15603_v15 = vld [vmem:[%s23463_s26 + $0xbf0] sm:$0xff]  ;;  %v18818_v5 = vpack.c.bf16 %v15586_v29, %v15585_v13 }
0x199b   : > { %v18816_v12 = vpack.c.bf16 %v15602_v18, %v15601_v2  ;;  %v15604_v16 = vld [vmem:[%s23463_s26 + $0xbf8] sm:$0xff]  ;;  %v15555_v62 = vld [vmem:[%s23463_s26 + $0xa70] sm:$0xff]  ;;  %v15621_v60 = vld [vmem:[%s23463_s26 + $0xc80] sm:$0xff] }
0x199c   : > { %18771 = vmatpush3.bf16.msra.mxu0 %v18770_v42  ;;  %18803 = vmatpush3.bf16.msra.mxu1 %v18802_v38  ;;  %v21791_v0 = vpop.f32.mrb[66].mxu0  ;;  %v21793_v49 = vpop.f32.mrb[64].mxu1  ;;  %v15556_v45 = vld [vmem:[%s23463_s26 + $0xa78] sm:$0xff]  ;;  %v15587_v40 = vld [vmem:[%s23463_s26 + $0xb70] sm:$0xff]  ;;  %v15622_v51 = vld [vmem:[%s23463_s26 + $0xc88] sm:$0xff] }
0x199d   : > { %v21797_v21 = vpop.f32.mrb[67].mxu0  ;;  %v21799_v24 = vpop.f32.mrb[65].mxu1  ;;  %18773 = vmatprep.subr.bf16.mxu0 %v18772_v10  ;;  %18805 = vmatprep.subr.bf16.mxu1 %v18804_v27  ;;  %v15553_v10 = vld [vmem:[%s23463_s26 + $0xa60] sm:$0xff]  ;;  %v15554_v27 = vld [vmem:[%s23463_s26 + $0xa68] sm:$0xff]  ;;  %v21860_v2 = vld [vmem:[%s23464_s22 + $0x18] sm:$0xff]  ;;  %s23488_s22 = sld [smem:[#allocation56_spill]] }
0x199e   : > { %v18786_v63 = vpack.c.bf16 %v15554_v27, %v15553_v10  ;;  %v15653_v30 = vld [vmem:[%s23463_s26 + $0xd80] sm:$0xff]  ;;  %v15654_v22 = vld [vmem:[%s23463_s26 + $0xd88] sm:$0xff]  ;;  %v18824_v10 = vpack.c.bf16 %v15622_v51, %v15621_v60 }
0x199f   : > { %v15606_v18 = vld [vmem:[%s23463_s26 + $0xc08] sm:$0xff]  ;;  %v15637_v27 = vld [vmem:[%s23463_s26 + $0xd00] sm:$0xff] }
0x19a0   : > { %18775 = vmatpush3.bf16.msra.mxu0 %v18774_v17  ;;  %18807 = vmatpush3.bf16.msra.mxu1 %v18806_v47  ;;  %v21807_v31 = vpop.f32.mrb[68].mxu0  ;;  %v21809_v36 = vpop.f32.mrb[66].mxu1  ;;  %v15571_v17 = vld [vmem:[%s23463_s26 + $0xaf0] sm:$0xff]  ;;  %v15572_v47 = vld [vmem:[%s23463_s26 + $0xaf8] sm:$0xff] }
0x19a1   : > { %v21813_v44 = vpop.f32.mrb[69].mxu0  ;;  %v21815_v14 = vpop.f32.mrb[67].mxu1  ;;  %18777 = vmatprep.subr.bf16.mxu0 %v18776_v28  ;;  %18809 = vmatprep.subr.bf16.mxu1 %v18808_v26  ;;  %v6609_v28 = vrot.slane %v21727_v35, %v21144_v20  ;;  %v18788_v23 = vpack.c.bf16 %v15572_v47, %v15571_v17  ;;  %v18856_v17 = vpack.c.bf16 %v15654_v22, %v15653_v30  ;;  %v15624_v47 = vld [vmem:[%s23463_s26 + $0xc98] sm:$0xff] }
0x19a3   : > { %v6897_v13 = vadd.f32 %v21762_v55, %v6609_v28  ;;  %v21882_v55 = vrot.slane %v21860_v2, %v21041_v57 }
0x19a4   : > { %18779 = vmatpush3.bf16.msra.mxu0 %v18778_v41  ;;  %18811 = vmatpush3.bf16.msra.mxu1 %v18810_v43  ;;  %v21823_v42 = vpop.f32.mrb[70].mxu0  ;;  %v21825_v38 = vpop.f32.mrb[68].mxu1  ;;  %v6617_v41 = vrot.slane %v21727_v35, %v21153_v33  ;;  %v15605_v35 = vld [vmem:[%s23463_s26 + $0xc00] sm:$0xff] }
0x19a5   : > { %v21829_v50 = vpop.f32.mrb[71].mxu0  ;;  %v21831_v19 = vpop.f32.mrb[69].mxu1  ;;  %18781 = vmatprep.subr.bf16.mxu0 %v18780_v46  ;;  %18813 = vmatprep.subr.bf16.mxu1 %v18812_v59  ;;  %v18820_v46 = vpack.c.bf16 %v15604_v16, %v15603_v15  ;;  %v15588_v59 = vld [vmem:[%s23463_s26 + $0xb78] sm:$0xff]  ;;  %v15655_v15 = vld [vmem:[%s23463_s26 + $0xd90] sm:$0xff]  ;;  %v7130_v22 = vadd.f32 %v21799_v24, %v21882_v55 }
0x19a6   : > { %v6974_v29 = vadd.f32 %v21764_v58, %v6617_v41  ;;  %v15656_v16 = vld [vmem:[%s23463_s26 + $0xd98] sm:$0xff]  ;;  %v18826_v58 = vpack.c.bf16 %v15606_v18, %v15605_v35  ;;  %v15639_v35 = vld [vmem:[%s23463_s26 + $0xd10] sm:$0xff] }
0x19a7   : > { %v15640_v18 = vld [vmem:[%s23463_s26 + $0xd18] sm:$0xff] }
0x19a8   : > { %18783 = vmatpush3.bf16.msra.mxu0 %v18782_v53  ;;  %18815 = vmatpush3.bf16.msra.mxu1 %v18814_v9  ;;  %v21841_v26 = vpop.f32.mrb[72].mxu0  ;;  %v21843_v37 = vpop.f32.mrb[70].mxu1  ;;  %v18790_v53 = vpack.c.bf16 %v15556_v45, %v15555_v62  ;;  %v18822_v9 = vpack.c.bf16 %v15588_v59, %v15587_v40  ;;  %v21878_v62 = vrot.slane %v21860_v2, %v21038_v56  ;;  %v7296_v40 = vmax.f32 %v6897_v13, 0.0  ;;  %v15608_v59 = vld [vmem:[%s23463_s26 + $0xc18] sm:$0xff] }
0x19a9   : > { %v21850_v43 = vpop.f32.mrb[73].mxu0  ;;  %v21852_v6 = vpop.f32.mrb[71].mxu1  ;;  %18785 = vmatprep.subr.bf16.mxu0 %v18784_v11  ;;  %18817 = vmatprep.subr.bf16.mxu1 %v18816_v12  ;;  %v15638_v11 = vld [vmem:[%s23463_s26 + $0xd08] sm:$0xff]  ;;  %v15623_v12 = vld [vmem:[%s23463_s26 + $0xc90] sm:$0xff] }
0x19aa   : > { %v18858_v45 = vpack.c.bf16 %v15638_v11, %v15637_v27  ;;  %v7053_v30 = vadd.f32 %v21797_v21, %v21878_v62  ;;  %v15610_v27 = vld [vmem:[%s23463_s26 + $0xc28] sm:$0xff] }
0x19ac   : > { %18787 = vmatpush3.bf16.msra.mxu0 %v18786_v63  ;;  %18819 = vmatpush3.bf16.msra.mxu1 %v18818_v5  ;;  %v6905_v63 = vadd.f32 %v21781_v61, %v21747_v39  ;;  %v6982_v5 = vadd.f32 %v21783_v7, %v21756_v4  ;;  %v18828_v39 = vpack.c.bf16 %v15624_v47, %v15623_v12  ;;  %v7298_v4 = vmax.f32 %v6974_v29, 0.0  ;;  %v15642_v47 = vld [vmem:[%s23463_s26 + $0xd28] sm:$0xff] }
0x19ad   : > { %18789 = vmatprep.subr.bf16.mxu0 %v18788_v23  ;;  %18821 = vmatprep.subr.bf16.mxu1 %v18820_v46  ;;  %v18860_v61 = vpack.c.bf16 %v15656_v16, %v15655_v15  ;;  %v6903_v7 = vadd.f32 %v21775_v48, %v6609_v28  ;;  %v6980_v23 = vadd.f32 %v21777_v3, %v6617_v41  ;;  %v15607_v46 = vld [vmem:[%s23463_s26 + $0xc10] sm:$0xff]  ;;  %v15625_v48 = vld [vmem:[%s23463_s26 + $0xca0] sm:$0xff]  ;;  %v15626_v3 = vld [vmem:[%s23463_s26 + $0xca8] sm:$0xff]  ;;  %v7301_v11 = vmax.f32 %v7053_v30, 0.0 }
0x19ae   : > { %v7313_v60 = vmax.f32 %v6905_v63, 0.0  ;;  %v7315_v51 = vmax.f32 %v6982_v5, 0.0  ;;  %v15657_v28 = vld [vmem:[%s23463_s26 + $0xda0] sm:$0xff]  ;;  %v15658_v41 = vld [vmem:[%s23463_s26 + $0xda8] sm:$0xff]  ;;  %v18830_v24 = vpack.c.bf16 %v15608_v59, %v15607_v46  ;;  %v7303_v12 = vmax.f32 %v7130_v22, 0.0  ;;  %v15627_v15 = vld [vmem:[%s23463_s26 + $0xcb0] sm:$0xff] }
0x19af   : > { %v7314_v21 = vmax.f32 %v6980_v23, 0.0  ;;  %v18832_v13 = vpack.c.bf16 %v15626_v3, %v15625_v48  ;;  %v18864_v29 = vpack.c.bf16 %v15658_v41, %v15657_v28  ;;  %v15628_v16 = vld [vmem:[%s23463_s26 + $0xcb8] sm:$0xff]  ;;  %v15659_v63 = vld [vmem:[%s23463_s26 + $0xdb0] sm:$0xff]  ;;  %v15629_v46 = vld [vmem:[%s23463_s26 + $0xcc0] sm:$0xff] }
0x19b0   : > { %18791 = vmatpush3.bf16.msra.mxu0 %v18790_v53  ;;  %18823 = vmatpush3.bf16.msra.mxu1 %v18822_v9  ;;  %v7312_v53 = vmax.f32 %v6903_v7, 0.0  ;;  %v18862_v9 = vpack.c.bf16 %v15640_v18, %v15639_v35  ;;  %v15660_v5 = vld [vmem:[%s23463_s26 + $0xdb8] sm:$0xff]  ;;  %v15643_v7 = vld [vmem:[%s23463_s26 + $0xd30] sm:$0xff]  ;;  %v15630_v59 = vld [vmem:[%s23463_s26 + $0xcc8] sm:$0xff] }
0x19b1   : > { %18825 = vmatprep.subr.bf16.mxu0 %v18824_v10  ;;  %18857 = vmatprep.subr.bf16.mxu1 %v18856_v17  ;;  %v15609_v10 = vld [vmem:[%s23463_s26 + $0xc20] sm:$0xff]  ;;  %v15644_v23 = vld [vmem:[%s23463_s26 + $0xd38] sm:$0xff]  ;;  %v15614_v18 = vld [vmem:[%s23463_s26 + $0xc48] sm:$0xff]  ;;  %v18840_v48 = vpack.c.bf16 %v15630_v59, %v15629_v46 }
0x19b2   : > { %v15641_v17 = vld [vmem:[%s23463_s26 + $0xd20] sm:$0xff]  ;;  %v18870_v22 = vpack.c.bf16 %v15644_v23, %v15643_v7  ;;  %v15646_v41 = vld [vmem:[%s23463_s26 + $0xd48] sm:$0xff]  ;;  %v15635_v46 = vld [vmem:[%s23463_s26 + $0xcf0] sm:$0xff] }
0x19b3   : > { %7545 = vmatmul.mubr.f32.vlgmr.msra.gmra.mrb[78].mxu0 %v7296_v40  ;;  %7620 = vmatmul.mubr.f32.vlgmr.msra.gmra.mrb[76].mxu1 %v7298_v4  ;;  %v18836_v40 = vpack.c.bf16 %v15628_v16, %v15627_v15  ;;  %v18868_v4 = vpack.c.bf16 %v15660_v5, %v15659_v63  ;;  %v15613_v35 = vld [vmem:[%s23463_s26 + $0xc40] sm:$0xff]  ;;  %v15634_v16 = vld [vmem:[%s23463_s26 + $0xce8] sm:$0xff]  ;;  %v15636_v59 = vld [vmem:[%s23463_s26 + $0xcf8] sm:$0xff] }
0x19b4   : > { %7549 = vmatprep.mubr.f32.mxu0 %v7313_v60  ;;  %7624 = vmatprep.mubr.f32.mxu1 %v7315_v51  ;;  %v15661_v60 = vld [vmem:[%s23463_s26 + $0xdc0] sm:$0xff]  ;;  %v15662_v51 = vld [vmem:[%s23463_s26 + $0xdc8] sm:$0xff] }
0x19b5   : > { %18827 = vmatpush3.bf16.msra.mxu0 %v18826_v58  ;;  %18859 = vmatpush3.bf16.msra.mxu1 %v18858_v45  ;;  %v18834_v58 = vpack.c.bf16 %v15610_v27, %v15609_v10  ;;  %v18866_v45 = vpack.c.bf16 %v15642_v47, %v15641_v17  ;;  %v18872_v3 = vpack.c.bf16 %v15662_v51, %v15661_v60  ;;  %v15645_v28 = vld [vmem:[%s23463_s26 + $0xd40] sm:$0xff]  ;;  %v15647_v17 = vld [vmem:[%s23463_s26 + $0xd50] sm:$0xff]  ;;  %v15648_v47 = vld [vmem:[%s23463_s26 + $0xd58] sm:$0xff] }
0x19b6   : > { %18829 = vmatprep.subr.bf16.mxu0 %v18828_v39  ;;  %18861 = vmatprep.subr.bf16.mxu1 %v18860_v61  ;;  %v15611_v39 = vld [vmem:[%s23463_s26 + $0xc30] sm:$0xff]  ;;  %v15612_v61 = vld [vmem:[%s23463_s26 + $0xc38] sm:$0xff]  ;;  %v18842_v10 = vpack.c.bf16 %v15614_v18, %v15613_v35  ;;  %v18874_v27 = vpack.c.bf16 %v15646_v41, %v15645_v28  ;;  %v15633_v15 = vld [vmem:[%s23463_s26 + $0xce0] sm:$0xff]  ;;  %v6633_v28 = vrot.slane %v21860_v2, %v21032_v54 }
0x19b7   : > { %7550 = vmatmul.mubr.f32.gmra.mrb[80].mxu0 %v7312_v53  ;;  %7625 = vmatmul.mubr.f32.gmra.mrb[78].mxu1 %v7314_v21  ;;  %v18838_v30 = vpack.c.bf16 %v15612_v61, %v15611_v39  ;;  %v15631_v53 = vld [vmem:[%s23463_s26 + $0xcd0] sm:$0xff]  ;;  %v15632_v21 = vld [vmem:[%s23463_s26 + $0xcd8] sm:$0xff]  ;;  %v15665_v63 = vld [vmem:[%s23463_s26 + $0xde0] sm:$0xff]  ;;  %v18852_v41 = vpack.c.bf16 %v15636_v59, %v15635_v46 }
0x19b8   : > { %7694 = vmatprep.mubr.f32.mxu0 %v7301_v11  ;;  %7769 = vmatprep.mubr.f32.mxu1 %v7303_v12  ;;  %v15615_v11 = vld [vmem:[%s23463_s26 + $0xc50] sm:$0xff]  ;;  %v15616_v12 = vld [vmem:[%s23463_s26 + $0xc58] sm:$0xff]  ;;  %v15666_v5 = vld [vmem:[%s23463_s26 + $0xde8] sm:$0xff]  ;;  %v7134_v59 = vadd.f32 %v21809_v36, %v6633_v28 }
0x19b9   : > { %18831 = vmatpush3.bf16.msra.mxu0 %v18830_v24  ;;  %18863 = vmatpush3.bf16.msra.mxu1 %v18862_v9  ;;  %v15663_v24 = vld [vmem:[%s23463_s26 + $0xdd0] sm:$0xff]  ;;  %v15664_v9 = vld [vmem:[%s23463_s26 + $0xdd8] sm:$0xff]  ;;  %v15617_v39 = vld [vmem:[%s23463_s26 + $0xc60] sm:$0xff] }
0x19ba   : > { %18833 = vmatprep.subr.bf16.mxu0 %v18832_v13  ;;  %18865 = vmatprep.subr.bf16.mxu1 %v18864_v29  ;;  %v18844_v13 = vpack.c.bf16 %v15632_v21, %v15631_v53  ;;  %v18876_v29 = vpack.c.bf16 %v15664_v9, %v15663_v24  ;;  %v15618_v61 = vld [vmem:[%s23463_s26 + $0xc68] sm:$0xff]  ;;  %v15649_v7 = vld [vmem:[%s23463_s26 + $0xd60] sm:$0xff]  ;;  %v15667_v60 = vld [vmem:[%s23463_s26 + $0xdf0] sm:$0xff] }
0x19bb   : > { %v15650_v23 = vld [vmem:[%s23463_s26 + $0xd68] sm:$0xff]  ;;  %v15668_v51 = vld [vmem:[%s23463_s26 + $0xdf8] sm:$0xff]  ;;  %v15619_v18 = vld [vmem:[%s23463_s26 + $0xc70] sm:$0xff] }
0x19bc   : > { %v18882_v35 = vpack.c.bf16 %v15650_v23, %v15649_v7  ;;  %v18884_v53 = vpack.c.bf16 %v15668_v51, %v15667_v60  ;;  %v15652_v21 = vld [vmem:[%s23463_s26 + $0xd78] sm:$0xff]  ;;  %v15685_v24 = vld [vmem:[%s23463_s26 + $0xe80] sm:$0xff]  ;;  %v15686_v9 = vld [vmem:[%s23463_s26 + $0xe88] sm:$0xff]  ;;  %v21966_v7 = vrot.slane %v21860_v2, %v21054_v1 }
0x19bd   : > { %18835 = vmatpush3.bf16.msra.mxu0 %v18834_v58  ;;  %18867 = vmatpush3.bf16.msra.mxu1 %v18866_v45  ;;  %v18846_v58 = vpack.c.bf16 %v15616_v12, %v15615_v11  ;;  %v18878_v45 = vpack.c.bf16 %v15648_v47, %v15647_v17  ;;  %v15669_v11 = vld [vmem:[%s23463_s26 + $0xe00] sm:$0xff]  ;;  %v15670_v12 = vld [vmem:[%s23463_s26 + $0xe08] sm:$0xff]  ;;  %v18888_v17 = vpack.c.bf16 %v15686_v9, %v15685_v24  ;;  %v15671_v60 = vld [vmem:[%s23463_s26 + $0xe10] sm:$0xff] }
0x19be   : > { %18837 = vmatprep.subr.bf16.mxu0 %v18836_v40  ;;  %18869 = vmatprep.subr.bf16.mxu1 %v18868_v4  ;;  %v18848_v40 = vpack.c.bf16 %v15634_v16, %v15633_v15  ;;  %v18880_v4 = vpack.c.bf16 %v15666_v5, %v15665_v63  ;;  %v15701_v47 = vld [vmem:[%s23463_s26 + $0xf00] sm:$0xff]  ;;  %v15702_v15 = vld [vmem:[%s23463_s26 + $0xf08] sm:$0xff]  ;;  %v15687_v16 = vld [vmem:[%s23463_s26 + $0xe90] sm:$0xff]  ;;  %v7128_v5 = vadd.f32 %v21793_v49, %v6633_v28 }
0x19bf   : > { %v18890_v49 = vpack.c.bf16 %v15670_v12, %v15669_v11  ;;  %v18922_v23 = vpack.c.bf16 %v15702_v15, %v15701_v47  ;;  %v15672_v51 = vld [vmem:[%s23463_s26 + $0xe18] sm:$0xff]  ;;  %v15690_v36 = vld [vmem:[%s23463_s26 + $0xea8] sm:$0xff]  ;;  %v15673_v24 = vld [vmem:[%s23463_s26 + $0xe20] sm:$0xff] }
0x19c0   : > { %v15722_v28 = vld [vmem:[%s23463_s26 + $0xfa8] sm:$0xff]  ;;  %v15692_v47 = vld [vmem:[%s23463_s26 + $0xeb8] sm:$0xff]  ;;  %v15723_v15 = vld [vmem:[%s23463_s26 + $0xfb0] sm:$0xff] }
0x19c1   : > { %18839 = vmatpush3.bf16.msra.mxu0 %v18838_v30  ;;  %18871 = vmatpush3.bf16.msra.mxu1 %v18870_v22  ;;  %v6625_v30 = vrot.slane %v21860_v2, %v21029_v52  ;;  %v18850_v22 = vpack.c.bf16 %v15618_v61, %v15617_v39  ;;  %v15719_v39 = vld [vmem:[%s23463_s26 + $0xf90] sm:$0xff]  ;;  %v15720_v61 = vld [vmem:[%s23463_s26 + $0xf98] sm:$0xff]  ;;  %v15674_v9 = vld [vmem:[%s23463_s26 + $0xe28] sm:$0xff] }
0x19c2   : > { %18841 = vmatprep.subr.bf16.mxu0 %v18840_v48  ;;  %18873 = vmatprep.subr.bf16.mxu1 %v18872_v3  ;;  %v15620_v48 = vld [vmem:[%s23463_s26 + $0xc78] sm:$0xff]  ;;  %v15651_v3 = vld [vmem:[%s23463_s26 + $0xd70] sm:$0xff] }
0x19c3   : > { %v7051_v63 = vadd.f32 %v21791_v0, %v6625_v30  ;;  %v21970_v0 = vrot.slane %v21860_v2, %v21063_v8 }
0x19c5   : > { %18843 = vmatpush3.bf16.msra.mxu0 %v18842_v10  ;;  %18875 = vmatpush3.bf16.msra.mxu1 %v18874_v27  ;;  %v15717_v10 = vld [vmem:[%s23463_s26 + $0xf80] sm:$0xff]  ;;  %v15718_v27 = vld [vmem:[%s23463_s26 + $0xf88] sm:$0xff]  ;;  %v7300_v46 = vmax.f32 %v7051_v63, 0.0  ;;  %v18898_v63 = vpack.c.bf16 %v15674_v9, %v15673_v24 }
0x19c6   : > { %18845 = vmatprep.subr.bf16.mxu0 %v18844_v13  ;;  %18877 = vmatprep.subr.bf16.mxu1 %v18876_v29  ;;  %v18854_v13 = vpack.c.bf16 %v15620_v48, %v15619_v18  ;;  %v18886_v29 = vpack.c.bf16 %v15652_v21, %v15651_v3  ;;  %v7207_v18 = vadd.f32 %v21829_v50, %v21966_v7  ;;  %v15703_v3 = vld [vmem:[%s23463_s26 + $0xf10] sm:$0xff]  ;;  %v7318_v50 = vmax.f32 %v7134_v59, 0.0  ;;  %v15678_v59 = vld [vmem:[%s23463_s26 + $0xe48] sm:$0xff]  ;;  %v15697_v24 = vld [vmem:[%s23463_s26 + $0xee0] sm:$0xff] }
0x19c7   : > { %v7284_v48 = vadd.f32 %v21831_v19, %v21970_v0  ;;  %v18894_v19 = vpack.c.bf16 %v15672_v51, %v15671_v60  ;;  %v15698_v9 = vld [vmem:[%s23463_s26 + $0xee8] sm:$0xff] }
0x19c9   : > { %18847 = vmatpush3.bf16.msra.mxu0 %v18846_v58  ;;  %18879 = vmatpush3.bf16.msra.mxu1 %v18878_v45  ;;  %v18920_v58 = vpack.c.bf16 %v15718_v27, %v15717_v10  ;;  %v15688_v45 = vld [vmem:[%s23463_s26 + $0xe98] sm:$0xff]  ;;  %v7305_v10 = vmax.f32 %v7207_v18, 0.0  ;;  %v7307_v27 = vmax.f32 %v7284_v48, 0.0  ;;  %v15695_v18 = vld [vmem:[%s23463_s26 + $0xed0] sm:$0xff] }
0x19ca   : > { %18849 = vmatprep.subr.bf16.mxu0 %v18848_v40  ;;  %18881 = vmatprep.subr.bf16.mxu1 %v18880_v4  ;;  %v7059_v40 = vadd.f32 %v21813_v44, %v21878_v62  ;;  %v7136_v4 = vadd.f32 %v21815_v14, %v21882_v55  ;;  %v18892_v44 = vpack.c.bf16 %v15688_v45, %v15687_v16  ;;  %v7302_v14 = vmax.f32 %v7128_v5, 0.0  ;;  %v15724_v16 = vld [vmem:[%s23463_s26 + $0xfb8] sm:$0xff] }
0x19cb   : > { %v18924_v62 = vpack.c.bf16 %v15720_v61, %v15719_v39  ;;  %v7057_v55 = vadd.f32 %v21807_v31, %v6625_v30  ;;  %v15689_v31 = vld [vmem:[%s23463_s26 + $0xea0] sm:$0xff]  ;;  %v15676_v45 = vld [vmem:[%s23463_s26 + $0xe38] sm:$0xff]  ;;  %v18932_v61 = vpack.c.bf16 %v15724_v16, %v15723_v15  ;;  %v15714_v16 = vld [vmem:[%s23463_s26 + $0xf68] sm:$0xff] }
0x19cc   : > { %v15721_v30 = vld [vmem:[%s23463_s26 + $0xfa0] sm:$0xff]  ;;  %v18896_v11 = vpack.c.bf16 %v15690_v36, %v15689_v31  ;;  %v15696_v48 = vld [vmem:[%s23463_s26 + $0xed8] sm:$0xff] }
0x19cd   : > { %18851 = vmatpush3.bf16.msra.mxu0 %v18850_v22  ;;  %18883 = vmatpush3.bf16.msra.mxu1 %v18882_v35  ;;  %v7317_v22 = vmax.f32 %v7059_v40, 0.0  ;;  %v7319_v35 = vmax.f32 %v7136_v4, 0.0  ;;  %v18928_v12 = vpack.c.bf16 %v15722_v28, %v15721_v30  ;;  %v15707_v40 = vld [vmem:[%s23463_s26 + $0xf30] sm:$0xff]  ;;  %v15708_v4 = vld [vmem:[%s23463_s26 + $0xf38] sm:$0xff]  ;;  %v15713_v15 = vld [vmem:[%s23463_s26 + $0xf60] sm:$0xff] }
0x19ce   : > { %18853 = vmatprep.subr.bf16.mxu0 %v18852_v41  ;;  %18885 = vmatprep.subr.bf16.mxu1 %v18884_v53  ;;  %v15704_v41 = vld [vmem:[%s23463_s26 + $0xf18] sm:$0xff]  ;;  %v7316_v53 = vmax.f32 %v7057_v55, 0.0  ;;  %v15677_v55 = vld [vmem:[%s23463_s26 + $0xe40] sm:$0xff]  ;;  %v15679_v30 = vld [vmem:[%s23463_s26 + $0xe50] sm:$0xff] }
0x19cf   : > { %v18926_v21 = vpack.c.bf16 %v15704_v41, %v15703_v3  ;;  %v15727_v3 = vld [vmem:[%s23463_s26 + $0xfd0] sm:$0xff]  ;;  %v15728_v41 = vld [vmem:[%s23463_s26 + $0xfd8] sm:$0xff]  ;;  %v18906_v31 = vpack.c.bf16 %v15678_v59, %v15677_v55 }
0x19d0   : > { %v15680_v28 = vld [vmem:[%s23463_s26 + $0xe58] sm:$0xff] }
0x19d1   : > { %18855 = vmatpush3.bf16.msra.mxu0 %v18854_v13  ;;  %18887 = vmatpush3.bf16.msra.mxu1 %v18886_v29  ;;  %v15705_v13 = vld [vmem:[%s23463_s26 + $0xf20] sm:$0xff]  ;;  %v15706_v29 = vld [vmem:[%s23463_s26 + $0xf28] sm:$0xff] }
0x19d2   : > { %18889 = vmatprep.subr.bf16.mxu0 %v18888_v17  ;;  %18921 = vmatprep.subr.bf16.mxu1 %v18920_v58  ;;  %v15691_v17 = vld [vmem:[%s23463_s26 + $0xeb0] sm:$0xff]  ;;  %v18930_v5 = vpack.c.bf16 %v15706_v29, %v15705_v13  ;;  %v15681_v13 = vld [vmem:[%s23463_s26 + $0xe60] sm:$0xff]  ;;  %v15682_v29 = vld [vmem:[%s23463_s26 + $0xe68] sm:$0xff] }
0x19d3   : > { %v15675_v58 = vld [vmem:[%s23463_s26 + $0xe30] sm:$0xff]  ;;  %v18900_v39 = vpack.c.bf16 %v15692_v47, %v15691_v17  ;;  %v18912_v17 = vpack.c.bf16 %v15698_v9, %v15697_v24 }
0x19d4   : > { %7695 = vmatmul.mubr.f32.vlgmr.msra.gmra.mrb[82].mxu0 %v7300_v46  ;;  %7770 = vmatmul.mubr.f32.vlgmr.msra.gmra.mrb[80].mxu1 %v7302_v14  ;;  %v18902_v46 = vpack.c.bf16 %v15676_v45, %v15675_v58  ;;  %v18934_v14 = vpack.c.bf16 %v15708_v4, %v15707_v40  ;;  %v15731_v58 = vld [vmem:[%s23463_s26 + $0xff0] sm:$0xff]  ;;  %v15732_v45 = vld [vmem:[%s23463_s26 + $0xff8] sm:$0xff]  ;;  %v18946_v40 = vpack.c.bf16 %v15714_v16, %v15713_v15 }
0x19d5   : > { %7699 = vmatprep.mubr.f32.mxu0 %v7317_v22  ;;  %7774 = vmatprep.mubr.f32.mxu1 %v7319_v35  ;;  %v15709_v22 = vld [vmem:[%s23463_s26 + $0xf40] sm:$0xff]  ;;  %v15710_v35 = vld [vmem:[%s23463_s26 + $0xf48] sm:$0xff]  ;;  %v15683_v4 = vld [vmem:[%s23463_s26 + $0xe70] sm:$0xff] }
0x19d6   : > { %18891 = vmatpush3.bf16.msra.mxu0 %v18890_v49  ;;  %18923 = vmatpush3.bf16.msra.mxu1 %v18922_v23  ;;  %v15693_v49 = vld [vmem:[%s23463_s26 + $0xec0] sm:$0xff]  ;;  %v15694_v23 = vld [vmem:[%s23463_s26 + $0xec8] sm:$0xff]  ;;  %v18938_v36 = vpack.c.bf16 %v15710_v35, %v15709_v22  ;;  %v7213_v35 = vadd.f32 %v21850_v43, %v21966_v7  ;;  %v7981_v43 = vld [vmem:[%s23473_s1 + $0x10] sm:$0xff] }
0x19d7   : > { %18893 = vmatprep.subr.bf16.mxu0 %v18892_v44  ;;  %18925 = vmatprep.subr.bf16.mxu1 %v18924_v62  ;;  %v15725_v44 = vld [vmem:[%s23463_s26 + $0xfc0] sm:$0xff]  ;;  %v15726_v62 = vld [vmem:[%s23463_s26 + $0xfc8] sm:$0xff]  ;;  %v18904_v60 = vpack.c.bf16 %v15694_v23, %v15693_v49  ;;  %v6649_v49 = vrot.slane %v21860_v2, %v21153_v33  ;;  %v7982_v7 = vld [vmem:[%s23473_s1 + $0x18] sm:$0xff] }
0x19d8   : > { %7700 = vmatmul.mubr.f32.gmra.mrb[84].mxu0 %v7316_v53  ;;  %7775 = vmatmul.mubr.f32.gmra.mrb[82].mxu1 %v7318_v50  ;;  %v18936_v51 = vpack.c.bf16 %v15726_v62, %v15725_v44  ;;  %v18908_v53 = vpack.c.bf16 %v15696_v48, %v15695_v18  ;;  %v18940_v50 = vpack.c.bf16 %v15728_v41, %v15727_v3  ;;  %v15684_v62 = vld [vmem:[%s23463_s26 + $0xe78] sm:$0xff]  ;;  %v7980_v22 = vld [vmem:[%s23473_s1 + $0x8] sm:$0xff] }
0x19d9   : > { %7844 = vmatprep.mubr.f32.mxu0 %v7305_v10  ;;  %7919 = vmatprep.mubr.f32.mxu1 %v7307_v27  ;;  %v15729_v10 = vld [vmem:[%s23463_s26 + $0xfe0] sm:$0xff]  ;;  %v15730_v27 = vld [vmem:[%s23463_s26 + $0xfe8] sm:$0xff]  ;;  %v18948_v44 = vpack.c.bf16 %v15732_v45, %v15731_v58  ;;  %v18918_v55 = vpack.c.bf16 %v15684_v62, %v15683_v4  ;;  %v7290_v18 = vadd.f32 %v21852_v6, %v21970_v0 }
0x19da   : > { %18895 = vmatpush3.bf16.msra.mxu0 %v18894_v19  ;;  %18927 = vmatpush3.bf16.msra.mxu1 %v18926_v21  ;;  %v15711_v19 = vld [vmem:[%s23463_s26 + $0xf50] sm:$0xff]  ;;  %v15712_v21 = vld [vmem:[%s23463_s26 + $0xf58] sm:$0xff]  ;;  %v18944_v47 = vpack.c.bf16 %v15730_v27, %v15729_v10 }
0x19db   : > { %18897 = vmatprep.subr.bf16.mxu0 %v18896_v11  ;;  %18929 = vmatprep.subr.bf16.mxu1 %v18928_v12  ;;  %v18910_v11 = vpack.c.bf16 %v15680_v28, %v15679_v30  ;;  %v18942_v12 = vpack.c.bf16 %v15712_v21, %v15711_v19  ;;  %v7323_v30 = vmax.f32 %v7290_v18, 0.0 }
0x19de   : > { %18899 = vmatpush3.bf16.msra.mxu0 %v18898_v63  ;;  %18931 = vmatpush3.bf16.msra.mxu1 %v18930_v5  ;;  %v15699_v63 = vld [vmem:[%s23463_s26 + $0xef0] sm:$0xff]  ;;  %v15700_v5 = vld [vmem:[%s23463_s26 + $0xef8] sm:$0xff] }
0x19df   : > { %18901 = vmatprep.subr.bf16.mxu0 %v18900_v39  ;;  %18933 = vmatprep.subr.bf16.mxu1 %v18932_v61  ;;  %v6641_v39 = vrot.slane %v21860_v2, %v21144_v20  ;;  %v18914_v61 = vpack.c.bf16 %v15682_v29, %v15681_v13  ;;  %v18916_v23 = vpack.c.bf16 %v15700_v5, %v15699_v63  ;;  %v7979_v2 = vld [vmem:[%s23473_s1] sm:$0xff] }
0x19e0   : > { %v18953_v48 = vpack.c.bf16 %v7980_v22, %v7979_v2 }
0x19e2   : > { %18903 = vmatpush3.bf16.msra.mxu0 %v18902_v46  ;;  %18935 = vmatpush3.bf16.msra.mxu1 %v18934_v14  ;;  %v15715_v46 = vld [vmem:[%s23463_s26 + $0xf70] sm:$0xff]  ;;  %v15716_v14 = vld [vmem:[%s23463_s26 + $0xf78] sm:$0xff]  ;;  %s23491_s26 = sld [smem:[#allocation41_spill]] }
0x19e3   : > { %18905 = vmatprep.subr.bf16.mxu0 %v18904_v60  ;;  %18937 = vmatprep.subr.bf16.mxu1 %v18936_v51  ;;  %v18950_v59 = vpack.c.bf16 %v15716_v14, %v15715_v46  ;;  %v7205_v60 = vadd.f32 %v21823_v42, %v6641_v39  ;;  %v7282_v51 = vadd.f32 %v21825_v38, %v6649_v49 }
0x19e4   : > { %v7211_v42 = vadd.f32 %v21841_v26, %v6641_v39  ;;  %v7288_v38 = vadd.f32 %v21843_v37, %v6649_v49  ;;  %v18956_v26 = vpack.c.bf16 %v7982_v7, %v7981_v43  ;;  %v7978_v37 = vld [vmem:[%s23474_s6] sm:$0x1] }
0x19e5   : > { %v7304_v3 = vmax.f32 %v7205_v60, 0.0  ;;  %v7306_v41 = vmax.f32 %v7282_v51, 0.0 }
0x19e6   : > { %18907 = vmatpush3.bf16.msra.mxu0 %v18906_v31  ;;  %18939 = vmatpush3.bf16.msra.mxu1 %v18938_v36  ;;  %v20252_v31 = vmov 0.0|0.0   ;;  %v7321_v36 = vmax.f32 %v7213_v35, 0.0  ;;  %v7320_v6 = vmax.f32 %v7211_v42, 0.0  ;;  %v7322_v0 = vmax.f32 %v7288_v38, 0.0 }
0x19e7   : > { %18909 = vmatprep.subr.bf16.mxu0 %v18908_v53  ;;  %18941 = vmatprep.subr.bf16.mxu1 %v18940_v50  ;;  %v15750_v50 = vld [vmem:[%s23465_s0 + $0x1] ss:$0 sm:$0xff]  ;;  %s23475_s0 = sld [smem:[#allocation44_spill]] }
0x19ea   : > { %18911 = vmatpush3.bf16.msra.mxu0 %v18910_v11  ;;  %18943 = vmatpush3.bf16.msra.mxu1 %v18942_v12 }
0x19eb   : > { %18913 = vmatprep.subr.bf16.mxu0 %v18912_v17  ;;  %18945 = vmatprep.subr.bf16.mxu1 %v18944_v47 }
0x19ee   : > { %18915 = vmatpush3.bf16.msra.mxu0 %v18914_v61  ;;  %18947 = vmatpush3.bf16.msra.mxu1 %v18946_v40 }
0x19ef   : > { %18917 = vmatprep.subr.bf16.mxu0 %v18916_v23  ;;  %18949 = vmatprep.subr.bf16.mxu1 %v18948_v44 }
0x19f2   : > { %18919 = vmatpush3.bf16.msra.mxu0 %v18918_v55  ;;  %18951 = vmatpush3.bf16.msra.mxu1 %v18950_v59 }
0x19f3   : > { %18952 = vmatprep.subr.bf16.mxu0 %v20252_v31  ;;  %18958 = vmatprep.subr.bf16.mxu1 %v20252_v31 }
0x19f5   : > { %7845 = vmatmul.mubr.f32.vlgmr.msra.gmra.mrb[86].mxu0 %v7304_v3  ;;  %7920 = vmatmul.mubr.f32.vlgmr.msra.gmra.mrb[84].mxu1 %v7306_v41 }
0x19f6   : > { %7849 = vmatprep.mubr.f32.mxu0 %v7321_v36  ;;  %7924 = vmatprep.mubr.f32.mxu1 %v7323_v30 }
0x19f7   : > { %18954 = vmatpush3.bf16.msra.mxu0 %v18953_v48 }
0x19f8   : > { %18955 = vmatprep.subr.bf16.mxu0 %v20252_v31 }
0x19f9   : > { %7850 = vmatmul.mubr.f32.gmra.mrb[88].mxu0 %v7320_v6  ;;  %7925 = vmatmul.mubr.f32.gmra.mrb[86].mxu1 %v7322_v0 }
0x19fa   : > { %17875 = vmatprep.mubr.msk.f32.mxu0 %vm20247_vm0, %v23471_v25  ;;  %17886 = vmatprep.mubr.msk.f32.mxu1 %vm20247_vm0, %v23471_v25 }
0x19fb   : > { %18957 = vmatpush3.bf16.msra.mxu0 %v18956_v26 }
0x19fc   : > { %18964 = vmatprep.subr.bf16.mxu0 %v20252_v31 }
0x19fe   : > { %17876 = vmatmul.mubr.msk.f32.vlgmr.msra.gmra.mrb[90].mxu0 %vm1661_vm4, %v7978_v37 }
0x19ff   : > { %17897 = vmatprep.mubr.msk.f32.mxu0 %vm20247_vm0, %v23471_v25 }
0x1a66   : > { %v16685_v28 = vpop.f32.mrb[74].mxu0  ;;  %v16723_v53 = vpop.f32.mrb[72].mxu1 }
0x1a67   : > { %v16686_v19 = vpop.f32.mrb[75].mxu0  ;;  %v16724_v21 = vpop.f32.mrb[73].mxu1 }
0x1a68   : > { %v16687_v24 = vadd.f32 %v16686_v19, %v16685_v28  ;;  %v16725_v9 = vadd.f32 %v16724_v21, %v16723_v53 }
0x1a6a   : > { %v7397_v10 = vadd.f32 %v16687_v24, %v15750_v50  ;;  %v16688_v27 = vpop.f32.mrb[76].mxu0  ;;  %v16726_v11 = vpop.f32.mrb[74].mxu1 }
0x1a6b   : > { %v16689_v12 = vpop.f32.mrb[77].mxu0  ;;  %v16727_v13 = vpop.f32.mrb[75].mxu1 }
0x1a6c   : > { %v7472_v29 = vadd.f32 %v16725_v9, %v7397_v10  ;;  %v16690_v17 = vadd.f32 %v16689_v12, %v16688_v27  ;;  %v16728_v47 = vadd.f32 %v16727_v13, %v16726_v11 }
0x1a6e   : > { %v7402_v15 = vadd.f32 %v16690_v17, %v15750_v50  ;;  %v7983_v17 = vld [vmem:[%s23475_s0] sm:$0x1] }
0x1a70   : > { %v7477_v16 = vadd.f32 %v16728_v47, %v7402_v15 }
0x1a86   : > { %v16761_v63 = vpop.f32.mrb[78].mxu0  ;;  %v16799_v5 = vpop.f32.mrb[76].mxu1 }
0x1a87   : > { %v16762_v58 = vpop.f32.mrb[79].mxu0  ;;  %v16800_v45 = vpop.f32.mrb[77].mxu1 }
0x1a88   : > { %v16763_v39 = vadd.f32 %v16762_v58, %v16761_v63  ;;  %v16801_v61 = vadd.f32 %v16800_v45, %v16799_v5 }
0x1a8a   : > { %v7547_v40 = vadd.f32 %v16763_v39, %v7472_v29  ;;  %v16764_v4 = vpop.f32.mrb[80].mxu0  ;;  %v16802_v49 = vpop.f32.mrb[78].mxu1 }
0x1a8b   : > { %v16765_v23 = vpop.f32.mrb[81].mxu0  ;;  %v16803_v44 = vpop.f32.mrb[79].mxu1 }
0x1a8c   : > { %v7622_v62 = vadd.f32 %v16801_v61, %v7547_v40  ;;  %v16766_v46 = vadd.f32 %v16765_v23, %v16764_v4  ;;  %v16804_v14 = vadd.f32 %v16803_v44, %v16802_v49 }
0x1a8e   : > { %v7552_v55 = vadd.f32 %v16766_v46, %v7477_v16 }
0x1a90   : > { %v7627_v59 = vadd.f32 %v16804_v14, %v7552_v55 }
0x1aa7   : > { %v16837_v60 = vpop.f32.mrb[82].mxu0  ;;  %v16875_v51 = vpop.f32.mrb[80].mxu1 }
0x1aa8   : > { %v16838_v2 = vpop.f32.mrb[83].mxu0  ;;  %v16876_v22 = vpop.f32.mrb[81].mxu1 }
0x1aa9   : > { %v16839_v35 = vadd.f32 %v16838_v2, %v16837_v60  ;;  %v16877_v18 = vadd.f32 %v16876_v22, %v16875_v51  ;;  %v8083_v2 = vld [vmem:[%s23476_s8] sm:$0xff]  ;;  %v8084_v22 = vld [vmem:[%s23476_s8 + $0x8] sm:$0xff] }
0x1aab   : > { %v7697_v48 = vadd.f32 %v16839_v35, %v7622_v62  ;;  %v16840_v3 = vpop.f32.mrb[84].mxu0  ;;  %v16878_v41 = vpop.f32.mrb[82].mxu1  ;;  %v18965_v35 = vpack.c.bf16 %v8084_v22, %v8083_v2 }
0x1aac   : > { %v16841_v42 = vpop.f32.mrb[85].mxu0  ;;  %v16879_v38 = vpop.f32.mrb[83].mxu1 }
0x1aad   : > { %v7772_v36 = vadd.f32 %v16877_v18, %v7697_v48  ;;  %v16842_v30 = vadd.f32 %v16841_v42, %v16840_v3  ;;  %v16880_v43 = vadd.f32 %v16879_v38, %v16878_v41  ;;  %v8078_v18 = vld [vmem:[%s23477_s9] sm:$0xff]  ;;  %v8079_v48 = vld [vmem:[%s23477_s9 + $0x8] sm:$0xff]  ;;  %18966 = vmatpush3.bf16.msra.mxu0 %v18965_v35  ;;  %v8085_v41 = vld [vmem:[%s23476_s8 + $0x10] sm:$0xff] }
0x1aae   : > { %v18959_v3 = vpack.c.bf16 %v8079_v48, %v8078_v18  ;;  %18967 = vmatprep.subr.bf16.mxu0 %v20252_v31  ;;  %v8086_v42 = vld [vmem:[%s23476_s8 + $0x18] sm:$0xff]  ;;  %v15760_v35 = vld [vmem:[%s23483_s17] ss:$0 sm:$0xff] }
0x1aaf   : > { %v7702_v7 = vadd.f32 %v16842_v30, %v7627_v59  ;;  %v18968_v38 = vpack.c.bf16 %v8086_v42, %v8085_v41  ;;  %v8081_v30 = vld [vmem:[%s23477_s9 + $0x18] sm:$0xff] }
0x1ab0   : > { %18960 = vmatpush3.bf16.msra.mxu1 %v18959_v3 }
0x1ab1   : > { %v7777_v6 = vadd.f32 %v16880_v43, %v7702_v7  ;;  %18961 = vmatprep.subr.bf16.mxu1 %v20252_v31  ;;  %18969 = vmatpush3.bf16.msra.mxu0 %v18968_v38 }
0x1ab2   : > { %17911 = vmatprep.subr.mxu0 %v23471_v25 }
0x1ac8   : > { %v16913_v0 = vpop.f32.mrb[86].mxu0  ;;  %v16951_v26 = vpop.f32.mrb[84].mxu1 }
0x1ac9   : > { %v16914_v37 = vpop.f32.mrb[87].mxu0  ;;  %v16952_v28 = vpop.f32.mrb[85].mxu1 }
0x1aca   : > { %v16915_v53 = vadd.f32 %v16914_v37, %v16913_v0  ;;  %v16953_v50 = vadd.f32 %v16952_v28, %v16951_v26 }
0x1acc   : > { %v7847_v19 = vadd.f32 %v16915_v53, %v7772_v36  ;;  %v16916_v21 = vpop.f32.mrb[88].mxu0  ;;  %v16954_v24 = vpop.f32.mrb[86].mxu1  ;;  %v8080_v36 = vld [vmem:[%s23477_s9 + $0x10] sm:$0xff] }
0x1acd   : > { %v16917_v9 = vpop.f32.mrb[89].mxu0  ;;  %v16955_v10 = vpop.f32.mrb[87].mxu1  ;;  %v18962_v43 = vpack.c.bf16 %v8081_v30, %v8080_v36 }
0x1ace   : > { %v7922_v27 = vadd.f32 %v16953_v50, %v7847_v19  ;;  %v16918_v11 = vadd.f32 %v16917_v9, %v16916_v21  ;;  %v16956_v12 = vadd.f32 %v16955_v10, %v16954_v24  ;;  %v15753_v24 = vld [vmem:[%s23466_s2 + $0x1] ss:$0 sm:$0xff]  ;;  %s23481_s2 = sld [smem:[#allocation48_spill]] }
0x1acf   : > { %18963 = vmatpush3.bf16.msra.mxu1 %v18962_v43 }
0x1ad0   : > { %v7852_v13 = vadd.f32 %v16918_v11, %v7777_v6  ;;  %v7930_v29 = vadd.f32 %v7922_v27, %v21572_v34  ;;  %18970 = vmatprep.subr.bf16.mxu1 %v20252_v31  ;;  %v15754_v11 = vld [vmem:[%s23467_s11 + $0x1] ss:$0 sm:$0xff]  ;;  %s23482_s11 = sld [smem:[#allocation46_spill]] }
0x1ad1   : > { %v8053_v47 = vpop.f32.mrb[90].mxu0 }
0x1ad2   : > { %v7927_v15 = vadd.f32 %v16956_v12, %v7852_v13  ;;  %v7936_v16 = vsel %vm1661_vm4, %v7930_v29, 0.0  ;;  %v17877_v63 = vpop.f32.mrb[91].mxu0  ;;  %v8054_v5 = vadd.f32 %v8053_v47, %v7983_v17  ;;  %v8057_v47 = vld [vmem:[%s23478_s13] sm:$0x1] }
0x1ad3   : > { %7937 = vadd.xlane.f32.xlu0 %v7936_v16  ;;  %v8058_v63 = vld [vmem:[%s23479_s14] sm:$0x1] }
0x1ad4   : > { %v7931_v58 = vadd.f32 %v7927_v15, %v21587_v32  ;;  %v8059_v39 = vsel %vm3049_vm11, %v8054_v5, 0.0 }
0x1ad6   : > { %v7939_v45 = vsel %vm3049_vm11, %v7931_v58, 0.0 }
0x1ad7   : > { %7940 = vadd.xlane.f32.xlu0 %v7939_v45 }
0x1adb   : > { %8060 = vadd.xlane.f32.xlu0 %v8059_v39  ;;  %v8088_v39 = vld [vmem:[%s23480_s16] sm:$0xff] }
0x1b60   : > { %v7938_v61 = vpop.xlane.xlu0 %7937 }
0x1b61   : > { %v7942_v40 = vmul.f32 0.03125, %v7938_v61  ;;  %v8089_v61 = vld [vmem:[%s23480_s16 + $0x8] sm:$0xff] }
0x1b63   : > { %v7944_v4 = vsub.f32 %v7930_v29, %v7942_v40 }
0x1b64   : > { %v7941_v34 = vpop.xlane.xlu0 %7940 }
0x1b65   : > { %v7943_v49 = vmul.f32 0.03125, %v7941_v34  ;;  %v7946_v23 = vmul.f32 %v7944_v4, %v7944_v4  ;;  %v18971_v34 = vpack.c.bf16 %v8089_v61, %v8088_v39 }
0x1b67   : > { %v7945_v44 = vsub.f32 %v7931_v58, %v7943_v49  ;;  %v7948_v62 = vsel %vm1661_vm4, %v7946_v23, 0.0  ;;  %v8090_v23 = vld [vmem:[%s23480_s16 + $0x10] sm:$0xff] }
0x1b68   : > { %7949 = vadd.xlane.f32.xlu1 %v7948_v62  ;;  %v8061_v32 = vpop.xlane.xlu0 %8060 }
0x1b69   : > { %v8062_v46 = vmul.f32 0.03125, %v8061_v32  ;;  %v7947_v14 = vmul.f32 %v7945_v44, %v7945_v44  ;;  %v15758_v32 = vld [vmem:[%s23481_s2] ss:$0 sm:$0xff] }
0x1b6b   : > { %v8063_v55 = vsub.f32 %v8054_v5, %v8062_v46  ;;  %v7951_v59 = vsel %vm3049_vm11, %v7947_v14, 0.0 }
0x1b6c   : > { %7952 = vadd.xlane.f32.xlu0 %v7951_v59  ;;  %v15756_v59 = vld [vmem:[%s23482_s11] ss:$0 sm:$0xff] }
0x1b6d   : > { %v8064_v60 = vmul.f32 %v8063_v55, %v8063_v55 }
0x1b6f   : > { %v8065_v51 = vsel %vm3049_vm11, %v8064_v60, 0.0 }
0x1b70   : > { %8066 = vadd.xlane.f32.xlu1 %v8065_v51 }
0x1bf5   : > { %v7950_v7 = vpop.xlane.xlu1 %7949 }
0x1bf6   : > { %v7954_v6 = vmul.f32 0.03125, %v7950_v7 }
0x1bf8   : > { %v7956_v0 = vadd.f32 1e-05, %v7954_v6 }
0x1bf9   : > { %v7953_v26 = vpop.xlane.xlu0 %7952 }
0x1bfa   : > { %19933 = vrsqrt.f32 %v7956_v0  ;;  %v7955_v37 = vmul.f32 0.03125, %v7953_v26 }
0x1bfc   : > { %v7957_v28 = vadd.f32 1e-05, %v7955_v37 }
0x1bfd   : > { %v8067_v53 = vpop.xlane.xlu1 %8066 }
0x1bfe   : > { %19935 = vrsqrt.f32 %v7957_v28  ;;  %v8068_v50 = vmul.f32 0.03125, %v8067_v53 }
0x1c00   : > { %v8069_v19 = vadd.f32 1e-05, %v8068_v50 }
0x1c02   : > { %19937 = vrsqrt.f32 %v8069_v19 }
0x1c04   : > { %v19934_v21 = vpop.eup %19933 }
0x1c05   : > { %v7960_v9 = vmul.f32 %v19934_v21, %v7944_v4 }
0x1c07   : > { %v7968_v10 = vmul.f32 %v15753_v24, %v7960_v9 }
0x1c08   : > { %v19936_v27 = vpop.eup %19935 }
0x1c09   : > { %v7961_v12 = vmul.f32 %v19936_v27, %v7945_v44  ;;  %v7976_v29 = vadd.f32 %v15754_v11, %v7968_v10  ;;  %v8091_v44 = vld [vmem:[%s23480_s16 + $0x18] sm:$0xff] }
0x1c0a   : > { %v18974_v62 = vpack.c.bf16 %v8091_v44, %v8090_v23 }
0x1c0b   : > { %v7969_v13 = vmul.f32 %v15753_v24, %v7961_v12  ;;  %v8187_v58 = vrot.slane %v7976_v29, 1 }
0x1c0c   : > { %v19938_v17 = vpop.eup %19937 }
0x1c0d   : > { %v8071_v15 = vmul.f32 %v19938_v17, %v8063_v55  ;;  %v7977_v16 = vadd.f32 %v15754_v11, %v7969_v13  ;;  %v8094_v13 = vld [vmem:[%s23484_s18 + $0x8] sm:$0xff] }
0x1c0f   : > { %v8072_v5 = vmul.f32 %v8071_v15, %v8057_v47  ;;  %v8188_v45 = vrot.slane %v7977_v16, 1  ;;  %v8093_v15 = vld [vmem:[%s23484_s18] sm:$0xff] }
0x1c11   : > { %v8073_v40 = vadd.f32 %v8072_v5, %v8058_v63  ;;  %v22086_v4 = vsel %vm8186_vm12, %v8187_v58, %v8188_v45 }
0x1c12   : > { %17898 = vmatmul.mubr.msk.f32.vlgmr.msra.gmra.mrb[92].mxu0 %vm1661_vm4, %v22086_v4 }
0x1c13   : > { %v22091_v49 = vrot.slane %v8073_v40, %v21029_v52  ;;  %17913 = vmatprep.mubr.msk.f32.mxu0 %vm20247_vm0, %v23471_v25 }
0x1c15   : > { %17887 = vmatmul.mubr.msk.f32.vlgmr.msra.gmra.mrb[88].mxu1 %vm1661_vm4, %v22091_v49 }
0x1c16   : > { %18972 = vmatpush3.bf16.msra.mxu1 %v18971_v34  ;;  %17908 = vmatprep.mubr.msk.f32.mxu1 %vm20247_vm0, %v23471_v25 }
0x1c17   : > { %18973 = vmatprep.subr.bf16.mxu1 %v20252_v31 }
0x1c1a   : > { %18975 = vmatpush3.bf16.msra.mxu1 %v18974_v62 }
0x1c1b   : > { %17921 = vmatprep.subr.mxu1 %v23471_v25 }
0x1c1d   : > { %17909 = vmatmul.mubr.msk.f32.vlgmr.msra.gmra.mrb[90].mxu1 %vm1661_vm4, %v22086_v4 }
0x1c1e   : > { %17923 = vmatprep.mubr.msk.f32.mxu1 %vm20247_vm0, %v23471_v25 }
0x1ce5   : > { %v8258_v46 = vpop.f32.mrb[92].mxu0 }
0x1ce6   : > { %v22108_v14 = vadd.f32 %v15758_v32, %v8258_v46  ;;  %v17899_v55 = vpop.f32.mrb[93].mxu0 }
0x1ce8   : > { %v8173_v60 = vpop.f32.mrb[88].mxu1  ;;  %8500 = vrot.lane.b32.xlu0 %v22108_v14, %s23472_s5  ;;  %17912 = vmatpush3.xpose.msk.msra.mxu0 %vm1906_vm5, %v22108_v14 }
0x1ce9   : > { %v8174_v51 = vadd.f32 %v15756_v59, %v8173_v60  ;;  %v17888_v2 = vpop.f32.mrb[89].mxu1  ;;  %17916 = vmatprep.subr.mxu0 %v23471_v25 }
0x1ceb   : > { %v22116_v22 = vmul.f32 0.35355338, %v8174_v51 }
0x1ced   : > { %8498 = vrot.lane.b32.xlu1 %v22116_v22, %s23472_s5  ;;  %17914 = vmatmul.mubr.msk.f32.vlgmr.msra.gmra.mrb[94].mxu0 %vm1906_vm5, %v22116_v22 }
0x1cee   : > { %17918 = vmatprep.mubr.msk.f32.mxu0 %vm20247_vm0, %v23471_v25 }
0x1cf0   : > { %v8334_v18 = vpop.f32.mrb[90].mxu1 }
0x1cf1   : > { %v22125_v48 = vadd.f32 %v15760_v35, %v8334_v18  ;;  %v17910_v3 = vpop.f32.mrb[91].mxu1 }
0x1cf3   : > { %17917 = vmatpush3.msra.mxu0 %v22125_v48 }
0x1cf4   : > { %17926 = vmatprep.subr.mxu0 %v23471_v25 }
0x1d5a   : > { %v8501_v41 = vpop.permute.xlu0 %8500 }
0x1d5b   : > { %17922 = vmatpush3.xpose.msk.msra.mxu1 %vm1906_vm5, %v8501_v41 }
0x1d5c   : > { %17931 = vmatprep.subr.mxu1 %v23471_v25 }
0x1d5f   : > { %v8499_v42 = vpop.permute.xlu1 %8498 }
0x1d60   : > { %17924 = vmatmul.mubr.msk.f32.vlgmr.msra.gmra.mrb[92].mxu1 %vm1906_vm5, %v8499_v42  ;;  %v8095_v42 = vld [vmem:[%s23484_s18 + $0x10] sm:$0xff] }
0x1d61   : > { %17933 = vmatprep.mubr.msk.f32.mxu1 %vm20247_vm0, %v23471_v25  ;;  %17932 = vmatpush3.msra.mxu1 %v8094_v13 }
0x1d62   : > { %17941 = vmatprep.subr.mxu1 %v23471_v25 }
0x1dc0   : > { %v8410_v38 = vpop.f32.mrb[94].mxu0 }
0x1dc1   : > { %v17915_v36 = vpop.f32.mrb[95].mxu0  ;;  %v8414_v30 = vsel %vm1906_vm5, %v8410_v38, -inf }
0x1dc2   : > { %8415 = vmax.xlane.f32.xlu1 %v8414_v30 }
0x1e33   : > { %v8572_v43 = vpop.f32.mrb[92].mxu1 }
0x1e34   : > { %v17925_v7 = vpop.f32.mrb[93].mxu1  ;;  %v8576_v6 = vsel %vm1906_vm5, %v8572_v43, -inf }
0x1e35   : > { %8577 = vmax.xlane.f32.xlu0 %v8576_v6 }
0x1e4f   : > { %v8416_v0 = vpop.xlane.xlu1 %8415 }
0x1e50   : > { %v8417_v26 = vsub.f32 %v8410_v38, %v8416_v0 }
0x1e52   : > { %v8418_v37 = vmul.f32 1.442695, %v8417_v26 }
0x1e54   : > { %19939 = vpow2.f32 %v8418_v37 }
0x1e5e   : > { %v19940_v28 = vpop.eup %19939 }
0x1e5f   : > { %v8420_v53 = vsel %vm1906_vm5, %v19940_v28, 0.0 }
0x1e60   : > { %8421 = vadd.xlane.f32.xlu0 %v8420_v53 }
0x1e76   : > { %8588 = vrot.lane.b32.xlu0 %v22125_v48, %s23472_s5 }
0x1ec2   : > { %v8578_v50 = vpop.xlane.xlu0 %8577 }
0x1ec3   : > { %v8579_v19 = vsub.f32 %v8572_v43, %v8578_v50  ;;  %v8096_v50 = vld [vmem:[%s23484_s18 + $0x18] sm:$0xff] }
0x1ec5   : > { %v8580_v21 = vmul.f32 1.442695, %v8579_v19 }
0x1ec7   : > { %19941 = vpow2.f32 %v8580_v21 }
0x1ed1   : > { %v19942_v24 = vpop.eup %19941 }
0x1ed2   : > { %v8582_v9 = vsel %vm1906_vm5, %v19942_v24, 0.0 }
0x1ed3   : > { %8583 = vadd.xlane.f32.xlu1 %v8582_v9 }
0x1ee4   : > { %8812 = vrot.lane.b32.xlu1 %v22108_v14, %s23469_s3 }
0x1ee8   : > { %8810 = vrot.lane.b32.xlu1 %v22116_v22, %s23469_s3 }
0x1eed   : > { %v8422_v10 = vpop.xlane.xlu0 %8421 }
0x1eee   : > { %19943 = vrcp.f32 %v8422_v10 }
0x1ef1   : > { %v8589_v12 = vpop.permute.xlu0 %8588 }
0x1ef8   : > { %v19944_v27 = vpop.eup %19943 }
0x1ef9   : > { %v8424_v11 = vmul.f32 %v19944_v27, %v19940_v28 }
0x1efb   : > { %17919 = vmatmul.mubr.msk.f32.vlgmr.msra.gmra.mrb[96].mxu0 %vm1906_vm5, %v8424_v11 }
0x1efc   : > { %17927 = vmatpush3.msra.mxu0 %v8589_v12  ;;  %17928 = vmatprep.mubr.msk.f32.mxu0 %vm20247_vm0, %v23471_v25  ;;  %v15778_v12 = vld [vmem:[%s23485_s19] ss:$0 sm:$0xff] }
0x1efd   : > { %17936 = vmatprep.subr.mxu0 %v23471_v25 }
0x1f60   : > { %v8584_v29 = vpop.xlane.xlu1 %8583 }
0x1f61   : > { %19945 = vrcp.f32 %v8584_v29 }
0x1f64   : > { %v8813_v5 = vpop.permute.xlu1 %8812 }
0x1f68   : > { %v8811_v39 = vpop.permute.xlu1 %8810 }
0x1f6b   : > { %v19946_v17 = vpop.eup %19945 }
0x1f6c   : > { %v8586_v47 = vmul.f32 %v19946_v17, %v19942_v24 }
0x1f6e   : > { %17929 = vmatmul.mubr.msk.f32.vlgmr.msra.gmra.mrb[98].mxu0 %vm1906_vm5, %v8586_v47 }
0x1f6f   : > { %17937 = vmatpush3.msra.mxu0 %v8093_v15  ;;  %17938 = vmatprep.mubr.msk.f32.mxu0 %vm20247_vm0, %v23471_v25 }
0x1f70   : > { %17946 = vmatprep.subr.mxu0 %v23471_v25 }
0x1fce   : > { %v8494_v16 = vpop.f32.mrb[96].mxu0 }
0x1fcf   : > { %v17920_v63 = vpop.f32.mrb[97].mxu0  ;;  %17939 = vmatmul.mubr.msk.f32.vlgmr.msra.gmra.mrb[100].mxu0 %vm1906_vm5, %v8494_v16 }
0x1fd0   : > { %17948 = vmatprep.mubr.msk.f32.mxu0 %vm20247_vm0, %v23471_v25 }
0x2041   : > { %v8660_v58 = vpop.f32.mrb[98].mxu0 }
0x2042   : > { %v17930_v45 = vpop.f32.mrb[99].mxu0  ;;  %17934 = vmatmul.mubr.msk.f32.vlgmr.msra.gmra.mrb[94].mxu1 %vm1906_vm5, %v8660_v58 }
0x2043   : > { %17942 = vmatpush3.xpose.msk.msra.mxu1 %vm1906_vm5, %v8813_v5  ;;  %17943 = vmatprep.mubr.msk.f32.mxu1 %vm20247_vm0, %v23471_v25 }
0x2044   : > { %17951 = vmatprep.subr.mxu1 %v23471_v25 }
0x2046   : > { %17944 = vmatmul.mubr.msk.f32.vlgmr.msra.gmra.mrb[96].mxu1 %vm1906_vm5, %v8811_v39 }
0x2047   : > { %17953 = vmatprep.mubr.msk.f32.mxu1 %vm20247_vm0, %v23471_v25  ;;  %17952 = vmatpush3.msra.mxu1 %v8095_v42 }
0x2048   : > { %17961 = vmatprep.subr.mxu1 %v23471_v25 }
0x20a2   : > { %v8806_v61 = vpop.f32.mrb[100].mxu0 }
0x20a3   : > { %v17940_v40 = vpop.f32.mrb[101].mxu0 }
0x20a4   : > { %v9342_v40 = vld [vmem:[%s23486_s20 + $0x88] sm:$0xff] }
0x2115   : > { %v8733_v34 = vpop.f32.mrb[94].mxu1 }
0x2116   : > { %v8807_v23 = vadd.f32 %v8806_v61, %v8733_v34  ;;  %v17935_v44 = vpop.f32.mrb[95].mxu1  ;;  %v9326_v61 = vld [vmem:[%s23486_s20 + $0x8] sm:$0xff]  ;;  %v9328_v34 = vld [vmem:[%s23486_s20 + $0x18] sm:$0xff] }
0x2117   : > { %v9325_v44 = vld [vmem:[%s23486_s20] sm:$0xff] }
0x2119   : > { %v8884_v62 = vpop.f32.mrb[96].mxu1 }
0x211a   : > { %v17945_v32 = vpop.f32.mrb[97].mxu1  ;;  %v8888_v46 = vsel %vm1906_vm5, %v8884_v62, -inf }
0x211b   : > { %8889 = vmax.xlane.f32.xlu1 %v8888_v46 }
0x212c   : > { %9051 = vrot.lane.b32.xlu1 %v22108_v14, %s23470_s10 }
0x2130   : > { %9049 = vrot.lane.b32.xlu1 %v22116_v22, %s23470_s10 }
0x21a8   : > { %v8890_v55 = vpop.xlane.xlu1 %8889 }
0x21a9   : > { %v8891_v59 = vsub.f32 %v8884_v62, %v8890_v55  ;;  %v9341_v62 = vld [vmem:[%s23486_s20 + $0x80] sm:$0xff]  ;;  %v9327_v55 = vld [vmem:[%s23486_s20 + $0x10] sm:$0xff] }
0x21aa   : > { %v18978_v46 = vpack.c.bf16 %v9341_v62, %v9325_v44  ;;  %v9352_v44 = vld [vmem:[%s23486_s20 + $0xd8] sm:$0xff] }
0x21ab   : > { %v8892_v60 = vmul.f32 1.442695, %v8891_v59  ;;  %v9343_v59 = vld [vmem:[%s23486_s20 + $0x90] sm:$0xff] }
0x21ac   : > { %v9052_v22 = vpop.permute.xlu1 %9051 }
0x21ad   : > { %19947 = vpow2.f32 %v8892_v60  ;;  %v18986_v60 = vpack.c.bf16 %v9343_v59, %v9327_v55  ;;  %v9349_v55 = vld [vmem:[%s23486_s20 + $0xc0] sm:$0xff] }
0x21b0   : > { %v9050_v41 = vpop.permute.xlu1 %9049 }
0x21b7   : > { %v19948_v51 = vpop.eup %19947 }
0x21b8   : > { %v8894_v2 = vsel %vm1906_vm5, %v19948_v51, 0.0 }
0x21b9   : > { %8895 = vadd.xlane.f32.xlu0 %v8894_v2  ;;  %v9374_v2 = vld [vmem:[%s23486_s20 + $0x188] sm:$0xff] }
0x21cf   : > { %8899 = vrot.lane.b32.xlu0 %v22125_v48, %s23469_s3 }
0x2246   : > { %v8896_v35 = vpop.xlane.xlu0 %8895 }
0x2247   : > { %19949 = vrcp.f32 %v8896_v35  ;;  %v9360_v35 = vld [vmem:[%s23486_s20 + $0x118] sm:$0xff] }
0x224a   : > { %v8900_v18 = vpop.permute.xlu0 %8899 }
0x224b   : > { %17947 = vmatpush3.msra.mxu0 %v8900_v18 }
0x224c   : > { %17956 = vmatprep.subr.mxu0 %v23471_v25 }
0x2251   : > { %v19950_v14 = vpop.eup %19949 }
0x2252   : > { %v8898_v3 = vmul.f32 %v19950_v14, %v19948_v51  ;;  %v9358_v51 = vld [vmem:[%s23486_s20 + $0x108] sm:$0xff]  ;;  %v9376_v14 = vld [vmem:[%s23486_s20 + $0x198] sm:$0xff] }
0x2253   : > { %v18980_v18 = vpack.c.bf16 %v9374_v2, %v9358_v51  ;;  %v9335_v51 = vld [vmem:[%s23486_s20 + $0x50] sm:$0xff] }
0x2254   : > { %17949 = vmatmul.mubr.msk.f32.vlgmr.msra.gmra.mrb[102].mxu0 %vm1906_vm5, %v8898_v3  ;;  %v9373_v3 = vld [vmem:[%s23486_s20 + $0x180] sm:$0xff]  ;;  %v9351_v2 = vld [vmem:[%s23486_s20 + $0xd0] sm:$0xff] }
0x2255   : > { %17957 = vmatpush3.xpose.msk.msra.mxu0 %vm1906_vm5, %v9052_v22  ;;  %17958 = vmatprep.mubr.msk.f32.mxu0 %vm20247_vm0, %v23471_v25  ;;  %v9357_v22 = vld [vmem:[%s23486_s20 + $0x100] sm:$0xff] }
0x2256   : > { %17966 = vmatprep.subr.mxu0 %v23471_v25  ;;  %v18982_v42 = vpack.c.bf16 %v9373_v3, %v9357_v22  ;;  %v9384_v22 = vld [vmem:[%s23486_s20 + $0x1d8] sm:$0xff] }
0x2258   : > { %17959 = vmatmul.mubr.msk.f32.vlgmr.msra.gmra.mrb[104].mxu0 %vm1906_vm5, %v9050_v41  ;;  %v18988_v41 = vpack.c.bf16 %v9376_v14, %v9360_v35  ;;  %v9366_v35 = vld [vmem:[%s23486_s20 + $0x148] sm:$0xff]  ;;  %v9368_v14 = vld [vmem:[%s23486_s20 + $0x158] sm:$0xff] }
0x2259   : > { %17968 = vmatprep.mubr.msk.f32.mxu0 %vm20247_vm0, %v23471_v25  ;;  %17967 = vmatpush3.msra.mxu0 %v8096_v50 }
0x2327   : > { %v8971_v38 = vpop.f32.mrb[102].mxu0 }
0x2328   : > { %v17950_v36 = vpop.f32.mrb[103].mxu0  ;;  %17954 = vmatmul.mubr.msk.f32.vlgmr.msra.gmra.mrb[98].mxu1 %vm1906_vm5, %v8971_v38  ;;  %v9359_v38 = vld [vmem:[%s23486_s20 + $0x110] sm:$0xff] }
0x2329   : > { %17963 = vmatprep.mubr.msk.f32.mxu1 %vm20247_vm0, %v23471_v25  ;;  %v9375_v36 = vld [vmem:[%s23486_s20 + $0x190] sm:$0xff] }
0x232b   : > { %v9123_v30 = vpop.f32.mrb[104].mxu0 }
0x232c   : > { %v17960_v43 = vpop.f32.mrb[105].mxu0  ;;  %v9127_v7 = vsel %vm1906_vm5, %v9123_v30, -inf }
0x232d   : > { %9128 = vmax.xlane.f32.xlu0 %v9127_v7  ;;  %v9330_v43 = vld [vmem:[%s23486_s20 + $0x28] sm:$0xff] }
0x232e   : > { %v9346_v7 = vld [vmem:[%s23486_s20 + $0xa8] sm:$0xff] }
0x2343   : > { %9138 = vrot.lane.b32.xlu0 %v22125_v48, %s23470_s10 }
0x23ba   : > { %v9129_v6 = vpop.xlane.xlu0 %9128 }
0x23bb   : > { %v9130_v0 = vsub.f32 %v9123_v30, %v9129_v6  ;;  %v18990_v30 = vpack.c.bf16 %v9375_v36, %v9359_v38  ;;  %v9332_v6 = vld [vmem:[%s23486_s20 + $0x38] sm:$0xff]  ;;  %v9381_v38 = vld [vmem:[%s23486_s20 + $0x1c0] sm:$0xff] }
0x23bd   : > { %v9131_v26 = vmul.f32 1.442695, %v9130_v0  ;;  %v18992_v0 = vpack.c.bf16 %v9346_v7, %v9330_v43  ;;  %v9367_v43 = vld [vmem:[%s23486_s20 + $0x150] sm:$0xff] }
0x23be   : > { %v9139_v37 = vpop.permute.xlu0 %9138  ;;  %v9383_v7 = vld [vmem:[%s23486_s20 + $0x1d0] sm:$0xff] }
0x23bf   : > { %19951 = vpow2.f32 %v9131_v26  ;;  %17962 = vmatpush3.msra.mxu1 %v9139_v37  ;;  %v9348_v26 = vld [vmem:[%s23486_s20 + $0xb8] sm:$0xff] }
0x23c0   : > { %v19000_v37 = vpack.c.bf16 %v9348_v26, %v9332_v6  ;;  %v9338_v6 = vld [vmem:[%s23486_s20 + $0x68] sm:$0xff]  ;;  %v9340_v26 = vld [vmem:[%s23486_s20 + $0x78] sm:$0xff] }
0x23c9   : > { %v19952_v28 = vpop.eup %19951 }
0x23ca   : > { %v9133_v53 = vsel %vm1906_vm5, %v19952_v28, 0.0 }
0x23cb   : > { %9134 = vadd.xlane.f32.xlu1 %v9133_v53 }
0x23fb   : > { %v9044_v19 = vpop.f32.mrb[98].mxu1 }
0x23fc   : > { %v9048_v21 = vadd.f32 %v9044_v19, %v8807_v23  ;;  %v17955_v24 = vpop.f32.mrb[99].mxu1  ;;  %v18976_v23 = vpack.c.bf16 %v9342_v40, %v9326_v61  ;;  %v15779_v19 = vld [vmem:[%s23487_s21] ss:$0 sm:$0xff]  ;;  %v9363_v61 = vld [vmem:[%s23486_s20 + $0x130] sm:$0xff] }
0x23fd   : > { %v15780_v24 = vld [vmem:[%s23488_s22] ss:$0 sm:$0xff]  ;;  %v9379_v40 = vld [vmem:[%s23486_s20 + $0x1b0] sm:$0xff] }
0x23fe   : > { %18977 = vmatprep.subr.bf16.mxu1 %v18976_v23  ;;  %v9350_v23 = vld [vmem:[%s23486_s20 + $0xc8] sm:$0xff] }
0x2458   : > { %v9135_v9 = vpop.xlane.xlu1 %9134 }
0x2459   : > { %19953 = vrcp.f32 %v9135_v9  ;;  %v9329_v9 = vld [vmem:[%s23486_s20 + $0x20] sm:$0xff] }
0x2463   : > { %v19954_v10 = vpop.eup %19953 }
0x2464   : > { %v9137_v48 = vmul.f32 %v19954_v10, %v19952_v28  ;;  %v9345_v10 = vld [vmem:[%s23486_s20 + $0xa0] sm:$0xff] }
0x2466   : > { %17964 = vmatmul.mubr.msk.f32.vlgmr.msra.gmra.mrb[100].mxu1 %vm1906_vm5, %v9137_v48 }
0x2467   : > { %9797 = vmatprep.mubr.f32.mxu1 %v23471_v25  ;;  %18979 = vmatpush1.bf16.msra.mxu1 %v18978_v46  ;;  %v9333_v46 = vld [vmem:[%s23486_s20 + $0x40] sm:$0xff] }
0x2468   : > { %18981 = vmatprep.subr.bf16.mxu1 %v18980_v18  ;;  %v9382_v18 = vld [vmem:[%s23486_s20 + $0x1c8] sm:$0xff]  ;;  %v19010_v3 = vpack.c.bf16 %v9349_v55, %v9333_v46  ;;  %v9423_v46 = vld [vmem:[%s20496_s12 + $0x100] sm:$0xff] }
0x2469   : > { %v19012_v36 = vpack.c.bf16 %v9382_v18, %v9366_v35  ;;  %v9424_v55 = vld [vmem:[%s20496_s12 + $0x108] sm:$0xff] }
0x246a   : > { %v19074_v18 = vpack.c.bf16 %v9424_v55, %v9423_v46  ;;  %v9449_v46 = vld [vmem:[%s20496_s12 + $0x1d0] sm:$0xff]  ;;  %v9450_v55 = vld [vmem:[%s20496_s12 + $0x1d8] sm:$0xff] }
0x246b   : > { %18983 = vmatpush1.bf16.msra.mxu1 %v18982_v42  ;;  %v9365_v42 = vld [vmem:[%s23486_s20 + $0x140] sm:$0xff] }
0x246c   : > { %18993 = vmatprep.subr.bf16.mxu1 %v18992_v0  ;;  %v9354_v0 = vld [vmem:[%s23486_s20 + $0xe8] sm:$0xff] }
0x2539   : > { %v9210_v27 = vpop.f32.mrb[100].mxu1 }
0x253a   : > { %v17965_v11 = vpop.f32.mrb[101].mxu1  ;;  %17969 = vmatmul.mubr.msk.f32.vlgmr.msra.gmra.mrb[106].mxu0 %vm1906_vm5, %v9210_v27  ;;  %v9331_v27 = vld [vmem:[%s23486_s20 + $0x30] sm:$0xff] }
0x253b   : > { %9868 = vmatprep.mubr.f32.mxu0 %v23471_v25  ;;  %v9347_v11 = vld [vmem:[%s23486_s20 + $0xb0] sm:$0xff] }
0x260d   : > { %v9283_v13 = vpop.f32.mrb[106].mxu0 }
0x260e   : > { %v9287_v29 = vadd.f32 %v9283_v13, %v9048_v21  ;;  %v17970_v17 = vpop.f32.mrb[107].mxu0  ;;  %v9378_v13 = vld [vmem:[%s23486_s20 + $0x1a8] sm:$0xff] }
0x260f   : > { %v9380_v17 = vld [vmem:[%s23486_s20 + $0x1b8] sm:$0xff] }
0x2610   : > { %v9294_v47 = vadd.f32 %v15778_v12, %v9287_v29  ;;  %v9362_v12 = vld [vmem:[%s23486_s20 + $0x128] sm:$0xff]  ;;  %v9364_v29 = vld [vmem:[%s23486_s20 + $0x138] sm:$0xff] }
0x2612   : > { %v9295_v15 = vadd.f32 %v9294_v47, %v22091_v49  ;;  %v9344_v49 = vld [vmem:[%s23486_s20 + $0x98] sm:$0xff] }
0x2613   : > { %v18984_v32 = vpack.c.bf16 %v9344_v49, %v9328_v34  ;;  %v9334_v34 = vld [vmem:[%s23486_s20 + $0x48] sm:$0xff]  ;;  %v9336_v49 = vld [vmem:[%s23486_s20 + $0x58] sm:$0xff] }
0x2614   : > { %v9298_v16 = vsel %vm1661_vm4, %v9295_v15, 0.0  ;;  %v19008_v59 = vpack.c.bf16 %v9350_v23, %v9334_v34 }
0x2615   : > { %9299 = vadd.xlane.f32.xlu1 %v9298_v16  ;;  %18985 = vmatprep.subr.bf16.mxu0 %v18984_v32  ;;  %v19002_v16 = vpack.c.bf16 %v9347_v11, %v9331_v27  ;;  %v19006_v32 = vpack.c.bf16 %v9379_v40, %v9363_v61  ;;  %v9386_v27 = vld [vmem:[%s23486_s20 + $0x1e8] sm:$0xff]  ;;  %v9372_v11 = vld [vmem:[%s23486_s20 + $0x178] sm:$0xff]  ;;  %v9439_v61 = vld [vmem:[%s20496_s12 + $0x180] sm:$0xff] }
0x2616   : > { %18987 = vmatpush1.bf16.msra.mxu0 %v18986_v60  ;;  %v19016_v60 = vpack.c.bf16 %v9352_v44, %v9336_v49  ;;  %v9440_v40 = vld [vmem:[%s20496_s12 + $0x188] sm:$0xff]  ;;  %v9391_v49 = vld [vmem:[%s20496_s12] sm:$0xff] }
0x2617   : > { %18989 = vmatprep.subr.bf16.mxu0 %v18988_v41  ;;  %v19018_v41 = vpack.c.bf16 %v9351_v2, %v9335_v51  ;;  %v9392_v44 = vld [vmem:[%s20496_s12 + $0x8] sm:$0xff]  ;;  %v9441_v51 = vld [vmem:[%s20496_s12 + $0x190] sm:$0xff]  ;;  %v9442_v2 = vld [vmem:[%s20496_s12 + $0x198] sm:$0xff] }
0x2618   : > { %v19042_v35 = vpack.c.bf16 %v9392_v44, %v9391_v49  ;;  %v9431_v49 = vld [vmem:[%s20496_s12 + $0x140] sm:$0xff]  ;;  %v9432_v44 = vld [vmem:[%s20496_s12 + $0x148] sm:$0xff] }
0x261a   : > { %18991 = vmatpush1.bf16.msra.mxu0 %v18990_v30  ;;  %v19020_v30 = vpack.c.bf16 %v9384_v22, %v9368_v14  ;;  %v9393_v14 = vld [vmem:[%s20496_s12 + $0x10] sm:$0xff]  ;;  %v9394_v22 = vld [vmem:[%s20496_s12 + $0x18] sm:$0xff] }
0x261b   : > { %19001 = vmatprep.subr.bf16.mxu0 %v19000_v37  ;;  %v9356_v37 = vld [vmem:[%s23486_s20 + $0xf8] sm:$0xff] }
0x26a2   : > { %v9300_v63 = vpop.xlane.xlu1 %9299 }
0x26a3   : > { %v9301_v5 = vmul.f32 0.03125, %v9300_v63  ;;  %v9361_v63 = vld [vmem:[%s23486_s20 + $0x120] sm:$0xff] }
0x26a5   : > { %v9302_v58 = vsub.f32 %v9295_v15, %v9301_v5  ;;  %v18994_v15 = vpack.c.bf16 %v9345_v10, %v9329_v9  ;;  %v9377_v5 = vld [vmem:[%s23486_s20 + $0x1a0] sm:$0xff]  ;;  %v9339_v9 = vld [vmem:[%s23486_s20 + $0x70] sm:$0xff] }
0x26a6   : > { %v18998_v62 = vpack.c.bf16 %v9377_v5, %v9361_v63  ;;  %v9355_v10 = vld [vmem:[%s23486_s20 + $0xf0] sm:$0xff] }
0x26a7   : > { %v9303_v45 = vmul.f32 %v9302_v58, %v9302_v58  ;;  %v9371_v63 = vld [vmem:[%s23486_s20 + $0x170] sm:$0xff] }
0x26a8   : > { %v9387_v5 = vld [vmem:[%s23486_s20 + $0x1f0] sm:$0xff] }
0x26a9   : > { %v9304_v39 = vsel %vm1661_vm4, %v9303_v45, 0.0  ;;  %v19038_v23 = vpack.c.bf16 %v9387_v5, %v9371_v63  ;;  %v9447_v63 = vld [vmem:[%s20496_s12 + $0x1c0] sm:$0xff]  ;;  %v9448_v5 = vld [vmem:[%s20496_s12 + $0x1c8] sm:$0xff] }
0x26aa   : > { %9305 = vadd.xlane.f32.xlu1 %v9304_v39  ;;  %v19004_v39 = vpack.c.bf16 %v9380_v17, %v9364_v29  ;;  %v19034_v29 = vpack.c.bf16 %v9355_v10, %v9339_v9  ;;  %v9369_v17 = vld [vmem:[%s23486_s20 + $0x160] sm:$0xff]  ;;  %v9445_v9 = vld [vmem:[%s20496_s12 + $0x1b0] sm:$0xff]  ;;  %v9446_v10 = vld [vmem:[%s20496_s12 + $0x1b8] sm:$0xff] }
0x2737   : > { %v9306_v28 = vpop.xlane.xlu1 %9305 }
0x2738   : > { %v9307_v53 = vmul.f32 0.03125, %v9306_v28  ;;  %v19014_v28 = vpack.c.bf16 %v9381_v38, %v9365_v42  ;;  %v9425_v42 = vld [vmem:[%s20496_s12 + $0x110] sm:$0xff]  ;;  %v9426_v38 = vld [vmem:[%s20496_s12 + $0x118] sm:$0xff] }
0x273a   : > { %v9308_v50 = vadd.f32 1e-05, %v9307_v53  ;;  %v19022_v53 = vpack.c.bf16 %v9383_v7, %v9367_v43  ;;  %v9443_v43 = vld [vmem:[%s20496_s12 + $0x1a0] sm:$0xff]  ;;  %v9444_v7 = vld [vmem:[%s20496_s12 + $0x1a8] sm:$0xff] }
0x273c   : > { %19955 = vrsqrt.f32 %v9308_v50  ;;  %v9337_v50 = vld [vmem:[%s23486_s20 + $0x60] sm:$0xff] }
0x2746   : > { %v19956_v21 = vpop.eup %19955 }
0x2747   : > { %v9310_v48 = vmul.f32 %v19956_v21, %v9302_v58  ;;  %v18996_v58 = vpack.c.bf16 %v9378_v13, %v9362_v12  ;;  %v19024_v21 = vpack.c.bf16 %v9354_v0, %v9338_v6  ;;  %v9388_v12 = vld [vmem:[%s23486_s20 + $0x1f8] sm:$0xff]  ;;  %v19046_v6 = vpack.c.bf16 %v9394_v22, %v9393_v14  ;;  %v9433_v14 = vld [vmem:[%s20496_s12 + $0x150] sm:$0xff] }
0x2748   : > { %v19078_v0 = vpack.c.bf16 %v9426_v38, %v9425_v42  ;;  %v9434_v22 = vld [vmem:[%s20496_s12 + $0x158] sm:$0xff]  ;;  %v9451_v42 = vld [vmem:[%s20496_s12 + $0x1e0] sm:$0xff]  ;;  %v9452_v38 = vld [vmem:[%s20496_s12 + $0x1e8] sm:$0xff] }
0x2749   : > { %v9317_v47 = vmul.f32 %v15779_v19, %v9310_v48  ;;  %v9353_v19 = vld [vmem:[%s23486_s20 + $0xe0] sm:$0xff]  ;;  %v9370_v48 = vld [vmem:[%s23486_s20 + $0x168] sm:$0xff] }
0x274a   : > { %v19026_v13 = vpack.c.bf16 %v9353_v19, %v9337_v50  ;;  %v9427_v50 = vld [vmem:[%s20496_s12 + $0x120] sm:$0xff]  ;;  %v9428_v19 = vld [vmem:[%s20496_s12 + $0x128] sm:$0xff] }
0x274b   : > { %v22233_v45 = vadd.f32 %v15780_v24, %v9317_v47  ;;  %v19032_v24 = vpack.c.bf16 %v9356_v37, %v9340_v26  ;;  %v9385_v47 = vld [vmem:[%s23486_s20 + $0x1e0] sm:$0xff]  ;;  %v9396_v37 = vld [vmem:[%s20496_s12 + $0x28] sm:$0xff] }
0x274c   : > { %v19030_v34 = vpack.c.bf16 %v9385_v47, %v9369_v17  ;;  %v9395_v26 = vld [vmem:[%s20496_s12 + $0x20] sm:$0xff]  ;;  %v9429_v17 = vld [vmem:[%s20496_s12 + $0x130] sm:$0xff]  ;;  %v9430_v47 = vld [vmem:[%s20496_s12 + $0x138] sm:$0xff] }
0x274d   : > { %15781 = vmatmul.mubr.msk.f32.vlgmr.msra.gmra.mrb[102].mxu1 %vm1661_vm4, %v22233_v45  ;;  %15782 = vmatmul.mubr.msk.f32.vlgmr.msra.gmra.mrb[108].mxu0 %vm1661_vm4, %v22233_v45 }
0x274e   : > { %18995 = vmatpush1.bf16.msra.mxu1 %v18994_v15  ;;  %19003 = vmatpush1.bf16.msra.mxu0 %v19002_v16  ;;  %v19028_v15 = vpack.c.bf16 %v9386_v27, %v9370_v48  ;;  %v19036_v16 = vpack.c.bf16 %v9388_v12, %v9372_v11  ;;  %v19050_v48 = vpack.c.bf16 %v9396_v37, %v9395_v26  ;;  %v9397_v11 = vld [vmem:[%s20496_s12 + $0x30] sm:$0xff]  ;;  %v9398_v12 = vld [vmem:[%s20496_s12 + $0x38] sm:$0xff]  ;;  %v9435_v26 = vld [vmem:[%s20496_s12 + $0x160] sm:$0xff] }
0x274f   : > { %18997 = vmatprep.subr.bf16.mxu1 %v18996_v58  ;;  %19005 = vmatprep.subr.bf16.mxu0 %v19004_v39  ;;  %v9407_v58 = vld [vmem:[%s20496_s12 + $0x80] sm:$0xff]  ;;  %v9408_v39 = vld [vmem:[%s20496_s12 + $0x88] sm:$0xff]  ;;  %v19082_v27 = vpack.c.bf16 %v9428_v19, %v9427_v50  ;;  %v9421_v50 = vld [vmem:[%s20496_s12 + $0xf0] sm:$0xff] }
0x2750   : > { %9939 = vmatprep.mubr.f32.mxu1 %v23471_v25  ;;  %10010 = vmatprep.mubr.f32.mxu0 %v23471_v25  ;;  %v9436_v37 = vld [vmem:[%s20496_s12 + $0x168] sm:$0xff]  ;;  %v9422_v19 = vld [vmem:[%s20496_s12 + $0xf8] sm:$0xff] }
0x2752   : > { %18999 = vmatpush1.bf16.msra.mxu1 %v18998_v62  ;;  %19007 = vmatpush1.bf16.msra.mxu0 %v19006_v32  ;;  %v19040_v62 = vpack.c.bf16 %v9408_v39, %v9407_v58  ;;  %v19072_v32 = vpack.c.bf16 %v9440_v40, %v9439_v61  ;;  %v19054_v58 = vpack.c.bf16 %v9398_v12, %v9397_v11  ;;  %v9399_v61 = vld [vmem:[%s20496_s12 + $0x40] sm:$0xff]  ;;  %v9400_v40 = vld [vmem:[%s20496_s12 + $0x48] sm:$0xff]  ;;  %v9437_v12 = vld [vmem:[%s20496_s12 + $0x170] sm:$0xff] }
0x2753   : > { %19009 = vmatprep.subr.bf16.mxu1 %v19008_v59  ;;  %19017 = vmatprep.subr.bf16.mxu0 %v19016_v60  ;;  %v9409_v59 = vld [vmem:[%s20496_s12 + $0x90] sm:$0xff]  ;;  %v9410_v60 = vld [vmem:[%s20496_s12 + $0x98] sm:$0xff]  ;;  %v19086_v39 = vpack.c.bf16 %v9430_v47, %v9429_v17  ;;  %v9471_v17 = vld [vmem:[%s20496_s12 + $0x280] sm:$0xff] }
0x2754   : > { %v9472_v47 = vld [vmem:[%s20496_s12 + $0x288] sm:$0xff] }
0x2755   : > { %15783 = vmatmul.mubr.msk.f32.vlgmr.msra.gmra.mrb[104].mxu1 %vm1661_vm4, %v22233_v45  ;;  %15784 = vmatmul.mubr.msk.f32.vlgmr.msra.gmra.mrb[110].mxu0 %vm1661_vm4, %v22233_v45 }
0x2756   : > { %19011 = vmatpush1.bf16.msra.mxu1 %v19010_v3  ;;  %19019 = vmatpush1.bf16.msra.mxu0 %v19018_v41  ;;  %v19044_v3 = vpack.c.bf16 %v9410_v60, %v9409_v59  ;;  %v19076_v41 = vpack.c.bf16 %v9442_v2, %v9441_v51  ;;  %v19058_v59 = vpack.c.bf16 %v9400_v40, %v9399_v61  ;;  %v9401_v51 = vld [vmem:[%s20496_s12 + $0x50] sm:$0xff]  ;;  %v9402_v2 = vld [vmem:[%s20496_s12 + $0x58] sm:$0xff] }
0x2757   : > { %19013 = vmatprep.subr.bf16.mxu1 %v19012_v36  ;;  %19021 = vmatprep.subr.bf16.mxu0 %v19020_v30  ;;  %v9411_v36 = vld [vmem:[%s20496_s12 + $0xa0] sm:$0xff]  ;;  %v9412_v30 = vld [vmem:[%s20496_s12 + $0xa8] sm:$0xff]  ;;  %v19090_v60 = vpack.c.bf16 %v9432_v44, %v9431_v49 }
0x2758   : > { %10081 = vmatprep.mubr.f32.mxu1 %v23471_v25  ;;  %10152 = vmatprep.mubr.f32.mxu0 %v23471_v25  ;;  %v9455_v44 = vld [vmem:[%s20496_s12 + $0x200] sm:$0xff] }
0x275a   : > { %19015 = vmatpush1.bf16.msra.mxu1 %v19014_v28  ;;  %19023 = vmatpush1.bf16.msra.mxu0 %v19022_v53  ;;  %v19048_v28 = vpack.c.bf16 %v9412_v30, %v9411_v36  ;;  %v19080_v53 = vpack.c.bf16 %v9444_v7, %v9443_v43  ;;  %v19062_v36 = vpack.c.bf16 %v9402_v2, %v9401_v51  ;;  %v9403_v43 = vld [vmem:[%s20496_s12 + $0x60] sm:$0xff]  ;;  %v9488_v51 = vld [vmem:[%s20496_s12 + $0x308] sm:$0xff]  ;;  %v9473_v2 = vld [vmem:[%s20496_s12 + $0x290] sm:$0xff] }
0x275b   : > { %19025 = vmatprep.subr.bf16.mxu1 %v19024_v21  ;;  %19033 = vmatprep.subr.bf16.mxu0 %v19032_v24  ;;  %v9413_v21 = vld [vmem:[%s20496_s12 + $0xb0] sm:$0xff]  ;;  %v9414_v24 = vld [vmem:[%s20496_s12 + $0xb8] sm:$0xff]  ;;  %v19094_v30 = vpack.c.bf16 %v9434_v22, %v9433_v14 }
0x275c   : > { %v9474_v14 = vld [vmem:[%s20496_s12 + $0x298] sm:$0xff]  ;;  %v9505_v22 = vld [vmem:[%s20496_s12 + $0x390] sm:$0xff] }
0x275d   : > { %15785 = vmatmul.mubr.msk.f32.vlgmr.msra.gmra.mrb[106].mxu1 %vm1661_vm4, %v22233_v45  ;;  %15786 = vmatmul.mubr.msk.f32.vlgmr.msra.gmra.mrb[112].mxu0 %vm1661_vm4, %v22233_v45 }
0x275e   : > { %19027 = vmatpush1.bf16.msra.mxu1 %v19026_v13  ;;  %19035 = vmatpush1.bf16.msra.mxu0 %v19034_v29  ;;  %v19052_v13 = vpack.c.bf16 %v9414_v24, %v9413_v21  ;;  %v19084_v29 = vpack.c.bf16 %v9446_v10, %v9445_v9  ;;  %v9453_v21 = vld [vmem:[%s20496_s12 + $0x1f0] sm:$0xff]  ;;  %v19068_v24 = vpack.c.bf16 %v9422_v19, %v9421_v50  ;;  %v9454_v9 = vld [vmem:[%s20496_s12 + $0x1f8] sm:$0xff] }
0x275f   : > { %19029 = vmatprep.subr.bf16.mxu1 %v19028_v15  ;;  %19037 = vmatprep.subr.bf16.mxu0 %v19036_v16  ;;  %v9415_v15 = vld [vmem:[%s20496_s12 + $0xc0] sm:$0xff]  ;;  %v9416_v16 = vld [vmem:[%s20496_s12 + $0xc8] sm:$0xff]  ;;  %v9405_v10 = vld [vmem:[%s20496_s12 + $0x70] sm:$0xff] }
0x2760   : > { %10223 = vmatprep.mubr.f32.mxu1 %v23471_v25  ;;  %10294 = vmatprep.mubr.f32.mxu0 %v23471_v25 }
0x2762   : > { %19031 = vmatpush1.bf16.msra.mxu1 %v19030_v34  ;;  %19039 = vmatpush1.bf16.msra.mxu0 %v19038_v23  ;;  %v19056_v34 = vpack.c.bf16 %v9416_v16, %v9415_v15  ;;  %v19088_v23 = vpack.c.bf16 %v9448_v5, %v9447_v63  ;;  %v9503_v15 = vld [vmem:[%s20496_s12 + $0x380] sm:$0xff]  ;;  %v19104_v16 = vpack.c.bf16 %v9472_v47, %v9471_v17  ;;  %v9504_v63 = vld [vmem:[%s20496_s12 + $0x388] sm:$0xff] }
0x2763   : > { %19041 = vmatprep.subr.bf16.mxu1 %v19040_v62  ;;  %19073 = vmatprep.subr.bf16.mxu0 %v19072_v32  ;;  %v9417_v62 = vld [vmem:[%s20496_s12 + $0xd0] sm:$0xff]  ;;  %v9418_v32 = vld [vmem:[%s20496_s12 + $0xd8] sm:$0xff]  ;;  %v19136_v5 = vpack.c.bf16 %v9504_v63, %v9503_v15  ;;  %v9492_v63 = vld [vmem:[%s20496_s12 + $0x328] sm:$0xff] }
0x2765   : > { %15787 = vmatmul.mubr.msk.f32.vlgmr.msra.gmra.mrb[108].mxu1 %vm1661_vm4, %v22233_v45  ;;  %15788 = vmatmul.mubr.msk.f32.vlgmr.msra.gmra.mrb[114].mxu0 %vm1661_vm4, %v22233_v45 }
0x2766   : > { %19043 = vmatpush3.bf16.msra.mxu1 %v19042_v35  ;;  %19075 = vmatpush3.bf16.msra.mxu0 %v19074_v18  ;;  %v19060_v35 = vpack.c.bf16 %v9418_v32, %v9417_v62  ;;  %v19092_v18 = vpack.c.bf16 %v9450_v55, %v9449_v46  ;;  %v9456_v62 = vld [vmem:[%s20496_s12 + $0x208] sm:$0xff] }
0x2767   : > { %19045 = vmatprep.subr.bf16.mxu1 %v19044_v3  ;;  %19077 = vmatprep.subr.bf16.mxu0 %v19076_v41  ;;  %v9419_v3 = vld [vmem:[%s20496_s12 + $0xe0] sm:$0xff]  ;;  %v9420_v41 = vld [vmem:[%s20496_s12 + $0xe8] sm:$0xff] }
0x2768   : > { %v19064_v7 = vpack.c.bf16 %v9420_v41, %v9419_v3  ;;  %v9506_v3 = vld [vmem:[%s20496_s12 + $0x398] sm:$0xff] }
0x276a   : > { %19047 = vmatpush3.bf16.msra.mxu1 %v19046_v6  ;;  %19079 = vmatpush3.bf16.msra.mxu0 %v19078_v0  ;;  %v19096_v6 = vpack.c.bf16 %v9452_v38, %v9451_v42  ;;  %v9404_v0 = vld [vmem:[%s20496_s12 + $0x68] sm:$0xff]  ;;  %v19106_v38 = vpack.c.bf16 %v9456_v62, %v9455_v44 }
0x276b   : > { %19049 = vmatprep.subr.bf16.mxu1 %v19048_v28  ;;  %19081 = vmatprep.subr.bf16.mxu0 %v19080_v53  ;;  %v19066_v28 = vpack.c.bf16 %v9404_v0, %v9403_v43  ;;  %v19098_v53 = vpack.c.bf16 %v9436_v37, %v9435_v26  ;;  %v9458_v43 = vld [vmem:[%s20496_s12 + $0x218] sm:$0xff]  ;;  %v19108_v0 = vpack.c.bf16 %v9474_v14, %v9473_v2  ;;  %v9489_v37 = vld [vmem:[%s20496_s12 + $0x310] sm:$0xff]  ;;  %v9511_v14 = vld [vmem:[%s20496_s12 + $0x3c0] sm:$0xff] }
0x276c   : > { %v19140_v26 = vpack.c.bf16 %v9506_v3, %v9505_v22  ;;  %v9494_v2 = vld [vmem:[%s20496_s12 + $0x338] sm:$0xff]  ;;  %v9512_v22 = vld [vmem:[%s20496_s12 + $0x3c8] sm:$0xff] }
0x276e   : > { %19051 = vmatpush3.bf16.msra.mxu1 %v19050_v48  ;;  %19083 = vmatpush3.bf16.msra.mxu0 %v19082_v27  ;;  %v9406_v48 = vld [vmem:[%s20496_s12 + $0x78] sm:$0xff]  ;;  %v19100_v27 = vpack.c.bf16 %v9454_v9, %v9453_v21  ;;  %v9476_v21 = vld [vmem:[%s20496_s12 + $0x2a8] sm:$0xff] }
0x276f   : > { %19053 = vmatprep.subr.bf16.mxu1 %v19052_v13  ;;  %19085 = vmatprep.subr.bf16.mxu0 %v19084_v29  ;;  %v19070_v11 = vpack.c.bf16 %v9406_v48, %v9405_v10  ;;  %v9438_v13 = vld [vmem:[%s20496_s12 + $0x178] sm:$0xff]  ;;  %v9508_v9 = vld [vmem:[%s20496_s12 + $0x3a8] sm:$0xff] }
0x2770   : > { %v19102_v29 = vpack.c.bf16 %v9438_v13, %v9437_v12  ;;  %v9459_v12 = vld [vmem:[%s20496_s12 + $0x220] sm:$0xff]  ;;  %v9460_v13 = vld [vmem:[%s20496_s12 + $0x228] sm:$0xff] }
0x2771   : > { %v19114_v62 = vpack.c.bf16 %v9460_v13, %v9459_v12 }
0x2772   : > { %19055 = vmatpush3.bf16.msra.mxu1 %v19054_v58  ;;  %19087 = vmatpush3.bf16.msra.mxu0 %v19086_v39  ;;  %v22360_v58 = vld [vmem:[%s20491_s25] sm:$0xff] }
0x2773   : > { %19057 = vmatprep.subr.bf16.mxu1 %v19056_v34  ;;  %19089 = vmatprep.subr.bf16.mxu0 %v19088_v23  ;;  %v9653_v39 = vrot.slane %v22360_v58, %v21029_v52  ;;  %v9661_v61 = vrot.slane %v22360_v58, %v21032_v54  ;;  %v9657_v40 = vrot.slane %v22360_v58, %v21038_v56 }
0x2774   : > { %v9665_v34 = vrot.slane %v22360_v58, %v21041_v57  ;;  %v9673_v50 = vrot.slane %v22360_v58, %v21054_v1  ;;  %v9681_v19 = vrot.slane %v22360_v58, %v21063_v8 }
0x2776   : > { %19059 = vmatpush3.bf16.msra.mxu1 %v19058_v59  ;;  %19091 = vmatpush3.bf16.msra.mxu0 %v19090_v60  ;;  %v9487_v60 = vld [vmem:[%s20496_s12 + $0x300] sm:$0xff] }
0x2777   : > { %19061 = vmatprep.subr.bf16.mxu1 %v19060_v35  ;;  %19093 = vmatprep.subr.bf16.mxu0 %v19092_v18 }
0x277a   : > { %19063 = vmatpush3.bf16.msra.mxu1 %v19062_v36  ;;  %19095 = vmatpush3.bf16.msra.mxu0 %v19094_v30  ;;  %v19138_v36 = vpack.c.bf16 %v9488_v51, %v9487_v60  ;;  %v9457_v30 = vld [vmem:[%s20496_s12 + $0x210] sm:$0xff] }
0x277b   : > { %19065 = vmatprep.subr.bf16.mxu1 %v19064_v7  ;;  %19097 = vmatprep.subr.bf16.mxu0 %v19096_v6  ;;  %v9493_v51 = vld [vmem:[%s20496_s12 + $0x330] sm:$0xff] }
0x277e   : > { %19067 = vmatpush3.bf16.msra.mxu1 %v19066_v28  ;;  %19099 = vmatpush3.bf16.msra.mxu0 %v19098_v53  ;;  %v9490_v28 = vld [vmem:[%s20496_s12 + $0x318] sm:$0xff]  ;;  %v9475_v53 = vld [vmem:[%s20496_s12 + $0x2a0] sm:$0xff] }
0x277f   : > { %19069 = vmatprep.subr.bf16.mxu1 %v19068_v24  ;;  %19101 = vmatprep.subr.bf16.mxu0 %v19100_v27  ;;  %v9507_v24 = vld [vmem:[%s20496_s12 + $0x3a0] sm:$0xff]  ;;  %v19110_v27 = vpack.c.bf16 %v9458_v43, %v9457_v30  ;;  %v19112_v47 = vpack.c.bf16 %v9476_v21, %v9475_v53  ;;  %v9464_v30 = vld [vmem:[%s20496_s12 + $0x248] sm:$0xff]  ;;  %v9482_v53 = vld [vmem:[%s20496_s12 + $0x2d8] sm:$0xff] }
0x2780   : > { %v19144_v15 = vpack.c.bf16 %v9508_v9, %v9507_v24  ;;  %v22427_v21 = vld [vmem:[%s20491_s25 + $0x8] sm:$0xff] }
0x2781   : > { %v9709_v12 = vrot.slane %v22427_v21, %v21153_v33 }
0x2782   : > { %19071 = vmatpush3.bf16.msra.mxu1 %v19070_v11  ;;  %19103 = vmatpush3.bf16.msra.mxu0 %v19102_v29  ;;  %v19142_v11 = vpack.c.bf16 %v9490_v28, %v9489_v37  ;;  %v9496_v37 = vld [vmem:[%s20496_s12 + $0x348] sm:$0xff]  ;;  %v9481_v28 = vld [vmem:[%s20496_s12 + $0x2d0] sm:$0xff] }
0x2783   : > { %19105 = vmatprep.subr.bf16.mxu1 %v19104_v16  ;;  %19137 = vmatprep.subr.bf16.mxu0 %v19136_v5  ;;  %v9491_v16 = vld [vmem:[%s20496_s12 + $0x320] sm:$0xff]  ;;  %v9477_v5 = vld [vmem:[%s20496_s12 + $0x2b0] sm:$0xff]  ;;  %v19124_v13 = vpack.c.bf16 %v9482_v53, %v9481_v28  ;;  %v9536_v53 = vld [vmem:[%s20496_s12 + $0x488] sm:$0xff] }
0x2784   : > { %v9535_v28 = vld [vmem:[%s20496_s12 + $0x480] sm:$0xff] }
0x2820   : > { %v9799_v23 = vpop.f32.mrb[102].mxu1  ;;  %v9870_v49 = vpop.f32.mrb[108].mxu0 }
0x2821   : > { %v9800_v32 = vadd.f32 %v9799_v23, %v9653_v39  ;;  %v9871_v46 = vadd.f32 %v9870_v49, %v9661_v61  ;;  %v9801_v55 = vpop.f32.mrb[103].mxu1  ;;  %v9872_v59 = vpop.f32.mrb[109].mxu0  ;;  %v9510_v23 = vld [vmem:[%s20496_s12 + $0x3b8] sm:$0xff] }
0x2822   : > { %v9802_v35 = vadd.f32 %v9801_v55, %v9657_v40  ;;  %v9873_v18 = vadd.f32 %v9872_v59, %v9665_v34  ;;  %v9478_v40 = vld [vmem:[%s20496_s12 + $0x2b8] sm:$0xff]  ;;  %v9509_v34 = vld [vmem:[%s20496_s12 + $0x3b0] sm:$0xff] }
0x2823   : > { %v10301_v7 = vmax.f32 %v9800_v32, 0.0  ;;  %v10303_v6 = vmax.f32 %v9871_v46, 0.0  ;;  %v19146_v32 = vpack.c.bf16 %v9492_v63, %v9491_v16  ;;  %v9461_v46 = vld [vmem:[%s20496_s12 + $0x230] sm:$0xff]  ;;  %v9462_v55 = vld [vmem:[%s20496_s12 + $0x238] sm:$0xff]  ;;  %v19116_v59 = vpack.c.bf16 %v9478_v40, %v9477_v5  ;;  %v9484_v16 = vld [vmem:[%s20496_s12 + $0x2e8] sm:$0xff] }
0x2824   : > { %v10302_v41 = vmax.f32 %v9802_v35, 0.0  ;;  %v10304_v42 = vmax.f32 %v9873_v18, 0.0  ;;  %v19148_v60 = vpack.c.bf16 %v9510_v23, %v9509_v34  ;;  %v9479_v35 = vld [vmem:[%s20496_s12 + $0x2c0] sm:$0xff]  ;;  %v9480_v18 = vld [vmem:[%s20496_s12 + $0x2c8] sm:$0xff] }
0x2825   : > { %v9515_v63 = vld [vmem:[%s20496_s12 + $0x3e0] sm:$0xff]  ;;  %v9516_v5 = vld [vmem:[%s20496_s12 + $0x3e8] sm:$0xff] }
0x2826   : > { %10387 = vmatprep.mubr.f32.mxu1 %v10302_v41  ;;  %10457 = vmatprep.mubr.f32.mxu0 %v10304_v42  ;;  %v19118_v42 = vpack.c.bf16 %v9462_v55, %v9461_v46  ;;  %v9467_v23 = vld [vmem:[%s20496_s12 + $0x260] sm:$0xff]  ;;  %v19160_v55 = vpack.c.bf16 %v9516_v5, %v9515_v63  ;;  %v9552_v63 = vld [vmem:[%s20496_s12 + $0x508] sm:$0xff]  ;;  %v9537_v5 = vld [vmem:[%s20496_s12 + $0x490] sm:$0xff] }
0x2827   : > { %10388 = vmatmul.mubr.f32.vlgmr.msra.gmra.mrb[110].mxu1 %v10301_v7  ;;  %10458 = vmatmul.mubr.f32.vlgmr.msra.gmra.mrb[116].mxu0 %v10303_v6  ;;  %v19120_v6 = vpack.c.bf16 %v9480_v18, %v9479_v35  ;;  %v9517_v35 = vld [vmem:[%s20496_s12 + $0x3f0] sm:$0xff]  ;;  %v9518_v18 = vld [vmem:[%s20496_s12 + $0x3f8] sm:$0xff] }
0x2828   : > { %v22390_v10 = vpop.f32.mrb[104].mxu1  ;;  %v22392_v48 = vpop.f32.mrb[110].mxu0  ;;  %19107 = vmatpush3.bf16.msra.mxu1 %v19106_v38  ;;  %19139 = vmatpush3.bf16.msra.mxu0 %v19138_v36  ;;  %v19150_v38 = vpack.c.bf16 %v9494_v2, %v9493_v51  ;;  %v9463_v36 = vld [vmem:[%s20496_s12 + $0x240] sm:$0xff]  ;;  %v9485_v51 = vld [vmem:[%s20496_s12 + $0x2f0] sm:$0xff]  ;;  %v9486_v2 = vld [vmem:[%s20496_s12 + $0x2f8] sm:$0xff] }
0x2829   : > { %v9943_v29 = vpop.f32.mrb[105].mxu1  ;;  %v10014_v17 = vpop.f32.mrb[111].mxu0  ;;  %19109 = vmatprep.subr.bf16.mxu1 %v19108_v0  ;;  %19141 = vmatprep.subr.bf16.mxu0 %v19140_v26  ;;  %v19152_v0 = vpack.c.bf16 %v9512_v22, %v9511_v14  ;;  %v9495_v26 = vld [vmem:[%s20496_s12 + $0x340] sm:$0xff]  ;;  %v19122_v24 = vpack.c.bf16 %v9464_v30, %v9463_v36  ;;  %v9669_v14 = vrot.slane %v22360_v58, %v21144_v20  ;;  %v9470_v36 = vld [vmem:[%s20496_s12 + $0x278] sm:$0xff]  ;;  %v9501_v30 = vld [vmem:[%s20496_s12 + $0x370] sm:$0xff] }
0x282a   : > { %v9944_v39 = vadd.f32 %v9943_v29, %v9673_v50  ;;  %v10015_v61 = vadd.f32 %v10014_v17, %v9681_v19  ;;  %v9513_v50 = vld [vmem:[%s20496_s12 + $0x3d0] sm:$0xff]  ;;  %v9514_v19 = vld [vmem:[%s20496_s12 + $0x3d8] sm:$0xff]  ;;  %v19154_v9 = vpack.c.bf16 %v9496_v37, %v9495_v26  ;;  %v19164_v26 = vpack.c.bf16 %v9518_v18, %v9517_v35  ;;  %v9539_v35 = vld [vmem:[%s20496_s12 + $0x4a0] sm:$0xff] }
0x282b   : > { %v19156_v29 = vpack.c.bf16 %v9514_v19, %v9513_v50  ;;  %v9497_v17 = vld [vmem:[%s20496_s12 + $0x350] sm:$0xff]  ;;  %v9502_v37 = vld [vmem:[%s20496_s12 + $0x378] sm:$0xff]  ;;  %v9689_v50 = vrot.slane %v22427_v21, %v21038_v56  ;;  %v9567_v19 = vld [vmem:[%s20496_s12 + $0x580] sm:$0xff] }
0x282c   : > { %v10306_v49 = vmax.f32 %v9944_v39, 0.0  ;;  %v10308_v44 = vmax.f32 %v10015_v61, 0.0  ;;  %19111 = vmatpush3.bf16.msra.mxu1 %v19110_v27  ;;  %19143 = vmatpush3.bf16.msra.mxu0 %v19142_v11  ;;  %v9465_v27 = vld [vmem:[%s20496_s12 + $0x250] sm:$0xff]  ;;  %v9466_v11 = vld [vmem:[%s20496_s12 + $0x258] sm:$0xff]  ;;  %v9540_v18 = vld [vmem:[%s20496_s12 + $0x4a8] sm:$0xff] }
0x282d   : > { %19113 = vmatprep.subr.bf16.mxu1 %v19112_v47  ;;  %19145 = vmatprep.subr.bf16.mxu0 %v19144_v15  ;;  %v9498_v47 = vld [vmem:[%s20496_s12 + $0x358] sm:$0xff]  ;;  %v9483_v15 = vld [vmem:[%s20496_s12 + $0x2e0] sm:$0xff]  ;;  %v19126_v40 = vpack.c.bf16 %v9466_v11, %v9465_v27  ;;  %v19166_v27 = vpack.c.bf16 %v9502_v37, %v9501_v30  ;;  %v19168_v11 = vpack.c.bf16 %v9536_v53, %v9535_v28  ;;  %v9556_v28 = vld [vmem:[%s20496_s12 + $0x528] sm:$0xff] }
0x282e   : > { %10527 = vmatprep.mubr.f32.mxu1 %v10306_v49  ;;  %10597 = vmatprep.mubr.f32.mxu0 %v10308_v44  ;;  %v19158_v34 = vpack.c.bf16 %v9498_v47, %v9497_v17  ;;  %v9468_v49 = vld [vmem:[%s20496_s12 + $0x268] sm:$0xff]  ;;  %v19128_v46 = vpack.c.bf16 %v9484_v16, %v9483_v15  ;;  %v9519_v17 = vld [vmem:[%s20496_s12 + $0x400] sm:$0xff]  ;;  %v19176_v30 = vpack.c.bf16 %v9540_v18, %v9539_v35  ;;  %v9541_v53 = vld [vmem:[%s20496_s12 + $0x4b0] sm:$0xff] }
0x282f   : > { %v19130_v22 = vpack.c.bf16 %v9468_v49, %v9467_v23  ;;  %v9520_v47 = vld [vmem:[%s20496_s12 + $0x408] sm:$0xff]  ;;  %v9551_v16 = vld [vmem:[%s20496_s12 + $0x500] sm:$0xff]  ;;  %v9530_v35 = vld [vmem:[%s20496_s12 + $0x458] sm:$0xff] }
0x2830   : > { %v22410_v3 = vpop.f32.mrb[106].mxu1  ;;  %v22412_v41 = vpop.f32.mrb[112].mxu0  ;;  %19115 = vmatpush3.bf16.msra.mxu1 %v19114_v62  ;;  %19147 = vmatpush3.bf16.msra.mxu0 %v19146_v32  ;;  %v9561_v18 = vld [vmem:[%s20496_s12 + $0x550] sm:$0xff] }
0x2831   : > { %v22416_v43 = vpop.f32.mrb[107].mxu1  ;;  %v22418_v7 = vpop.f32.mrb[113].mxu0  ;;  %19117 = vmatprep.subr.bf16.mxu1 %v19116_v59  ;;  %19149 = vmatprep.subr.bf16.mxu0 %v19148_v60  ;;  %v9499_v59 = vld [vmem:[%s20496_s12 + $0x360] sm:$0xff]  ;;  %v9500_v60 = vld [vmem:[%s20496_s12 + $0x368] sm:$0xff] }
0x2832   : > { %v10086_v15 = vadd.f32 %v22416_v43, %v9689_v50  ;;  %v19202_v43 = vpack.c.bf16 %v9552_v63, %v9551_v16  ;;  %v9542_v50 = vld [vmem:[%s20496_s12 + $0x4b8] sm:$0xff]  ;;  %v9575_v16 = vld [vmem:[%s20496_s12 + $0x5c0] sm:$0xff]  ;;  %v9576_v63 = vld [vmem:[%s20496_s12 + $0x5c8] sm:$0xff] }
0x2834   : > { %19119 = vmatpush3.bf16.msra.mxu1 %v19118_v42  ;;  %19151 = vmatpush3.bf16.msra.mxu0 %v19150_v38  ;;  %v19162_v42 = vpack.c.bf16 %v9500_v60, %v9499_v59  ;;  %v9469_v38 = vld [vmem:[%s20496_s12 + $0x270] sm:$0xff] }
0x2835   : > { %19121 = vmatprep.subr.bf16.mxu1 %v19120_v6  ;;  %19153 = vmatprep.subr.bf16.mxu0 %v19152_v0  ;;  %v9677_v6 = vrot.slane %v22360_v58, %v21153_v33  ;;  %v19132_v0 = vpack.c.bf16 %v9486_v2, %v9485_v51  ;;  %v19134_v58 = vpack.c.bf16 %v9470_v36, %v9469_v38  ;;  %v9553_v59 = vld [vmem:[%s20496_s12 + $0x510] sm:$0xff]  ;;  %v9554_v2 = vld [vmem:[%s20496_s12 + $0x518] sm:$0xff] }
0x2836   : > { %v19206_v36 = vpack.c.bf16 %v9554_v2, %v9553_v59  ;;  %v9578_v59 = vld [vmem:[%s20496_s12 + $0x5d8] sm:$0xff]  ;;  %v9529_v2 = vld [vmem:[%s20496_s12 + $0x450] sm:$0xff] }
0x2838   : > { %v22439_v39 = vpop.f32.mrb[108].mxu1  ;;  %v10296_v61 = vpop.f32.mrb[114].mxu0  ;;  %19123 = vmatpush3.bf16.msra.mxu1 %v19122_v24  ;;  %19155 = vmatpush3.bf16.msra.mxu0 %v19154_v9  ;;  %v9568_v24 = vld [vmem:[%s20496_s12 + $0x588] sm:$0xff]  ;;  %v9697_v9 = vrot.slane %v22427_v21, %v21041_v57 }
0x2839   : > { %v22443_v44 = vadd.f32 %v10296_v61, %v9709_v12  ;;  %v22445_v62 = vpop.f32.mrb[109].mxu1  ;;  %v22447_v32 = vpop.f32.mrb[115].mxu0  ;;  %19125 = vmatprep.subr.bf16.mxu1 %v19124_v13  ;;  %19157 = vmatprep.subr.bf16.mxu0 %v19156_v29  ;;  %v9942_v12 = vadd.f32 %v22390_v10, %v9669_v14  ;;  %v10013_v13 = vadd.f32 %v22392_v48, %v9677_v6  ;;  %v9570_v10 = vld [vmem:[%s20496_s12 + $0x598] sm:$0xff]  ;;  %v9523_v6 = vld [vmem:[%s20496_s12 + $0x420] sm:$0xff] }
0x283a   : > { %v19200_v29 = vpack.c.bf16 %v9568_v24, %v9567_v19  ;;  %v10157_v61 = vadd.f32 %v22418_v7, %v9697_v9  ;;  %v19170_v48 = vpack.c.bf16 %v9520_v47, %v9519_v17  ;;  %v10310_v7 = vmax.f32 %v10086_v15, 0.0  ;;  %v9573_v19 = vld [vmem:[%s20496_s12 + $0x5b0] sm:$0xff]  ;;  %v9574_v24 = vld [vmem:[%s20496_s12 + $0x5b8] sm:$0xff]  ;;  %v9543_v47 = vld [vmem:[%s20496_s12 + $0x4c0] sm:$0xff] }
0x283b   : > { %v10305_v23 = vmax.f32 %v9942_v12, 0.0  ;;  %v10307_v49 = vmax.f32 %v10013_v13, 0.0  ;;  %v9526_v12 = vld [vmem:[%s20496_s12 + $0x438] sm:$0xff]  ;;  %v9557_v13 = vld [vmem:[%s20496_s12 + $0x530] sm:$0xff]  ;;  %v9544_v15 = vld [vmem:[%s20496_s12 + $0x4c8] sm:$0xff] }
0x283c   : > { %19127 = vmatpush3.bf16.msra.mxu1 %v19126_v40  ;;  %19159 = vmatpush3.bf16.msra.mxu0 %v19158_v34  ;;  %v9538_v40 = vld [vmem:[%s20496_s12 + $0x498] sm:$0xff]  ;;  %v9569_v34 = vld [vmem:[%s20496_s12 + $0x590] sm:$0xff]  ;;  %v10312_v14 = vmax.f32 %v10157_v61, 0.0 }
0x283d   : > { %19129 = vmatprep.subr.bf16.mxu1 %v19128_v46  ;;  %19161 = vmatprep.subr.bf16.mxu0 %v19160_v55  ;;  %v9521_v46 = vld [vmem:[%s20496_s12 + $0x410] sm:$0xff]  ;;  %v9522_v55 = vld [vmem:[%s20496_s12 + $0x418] sm:$0xff]  ;;  %v19172_v60 = vpack.c.bf16 %v9538_v40, %v9537_v5  ;;  %v19204_v51 = vpack.c.bf16 %v9570_v10, %v9569_v34  ;;  %v19184_v40 = vpack.c.bf16 %v9544_v15, %v9543_v47  ;;  %v9527_v34 = vld [vmem:[%s20496_s12 + $0x440] sm:$0xff] }
0x283e   : > { %v19174_v38 = vpack.c.bf16 %v9522_v55, %v9521_v46  ;;  %v9558_v17 = vld [vmem:[%s20496_s12 + $0x538] sm:$0xff]  ;;  %v9528_v10 = vld [vmem:[%s20496_s12 + $0x448] sm:$0xff]  ;;  %v9577_v55 = vld [vmem:[%s20496_s12 + $0x5d0] sm:$0xff] }
0x283f   : > { %v19214_v61 = vpack.c.bf16 %v9558_v17, %v9557_v13  ;;  %v9546_v46 = vld [vmem:[%s20496_s12 + $0x4d8] sm:$0xff]  ;;  %v9533_v17 = vld [vmem:[%s20496_s12 + $0x470] sm:$0xff] }
0x2840   : > { %19131 = vmatpush3.bf16.msra.mxu1 %v19130_v22  ;;  %19163 = vmatpush3.bf16.msra.mxu0 %v19162_v42  ;;  %v9571_v22 = vld [vmem:[%s20496_s12 + $0x5a0] sm:$0xff]  ;;  %v9572_v42 = vld [vmem:[%s20496_s12 + $0x5a8] sm:$0xff]  ;;  %v9534_v47 = vld [vmem:[%s20496_s12 + $0x478] sm:$0xff] }
0x2841   : > { %19133 = vmatprep.subr.bf16.mxu1 %v19132_v0  ;;  %19165 = vmatprep.subr.bf16.mxu0 %v19164_v26  ;;  %v9524_v0 = vld [vmem:[%s20496_s12 + $0x428] sm:$0xff]  ;;  %v9555_v26 = vld [vmem:[%s20496_s12 + $0x520] sm:$0xff]  ;;  %v19208_v37 = vpack.c.bf16 %v9572_v42, %v9571_v22  ;;  %v9562_v22 = vld [vmem:[%s20496_s12 + $0x558] sm:$0xff] }
0x2842   : > { %v19178_v9 = vpack.c.bf16 %v9524_v0, %v9523_v6  ;;  %v9547_v42 = vld [vmem:[%s20496_s12 + $0x4e0] sm:$0xff]  ;;  %v19190_v6 = vpack.c.bf16 %v9530_v35, %v9529_v2  ;;  %v19222_v0 = vpack.c.bf16 %v9562_v22, %v9561_v18  ;;  %v9565_v15 = vld [vmem:[%s20496_s12 + $0x570] sm:$0xff]  ;;  %v9616_v35 = vld [vmem:[%s20496_s12 + $0x708] sm:$0xff] }
0x2843   : > { %v9615_v2 = vld [vmem:[%s20496_s12 + $0x700] sm:$0xff] }
0x2844   : > { %19135 = vmatpush3.bf16.msra.mxu1 %v19134_v58  ;;  %19167 = vmatpush3.bf16.msra.mxu0 %v19166_v27  ;;  %v19210_v58 = vpack.c.bf16 %v9556_v28, %v9555_v26  ;;  %v19180_v27 = vpack.c.bf16 %v9542_v50, %v9541_v53  ;;  %v9532_v28 = vld [vmem:[%s20496_s12 + $0x468] sm:$0xff]  ;;  %v9563_v53 = vld [vmem:[%s20496_s12 + $0x560] sm:$0xff] }
0x2845   : > { %19169 = vmatprep.subr.bf16.mxu1 %v19168_v11  ;;  %19201 = vmatprep.subr.bf16.mxu0 %v19200_v29  ;;  %v9525_v11 = vld [vmem:[%s20496_s12 + $0x430] sm:$0xff]  ;;  %v19212_v29 = vpack.c.bf16 %v9574_v24, %v9573_v19  ;;  %v9564_v19 = vld [vmem:[%s20496_s12 + $0x568] sm:$0xff] }
0x2846   : > { %v19182_v5 = vpack.c.bf16 %v9526_v12, %v9525_v11  ;;  %v9549_v24 = vld [vmem:[%s20496_s12 + $0x4f0] sm:$0xff]  ;;  %v9685_v12 = vrot.slane %v22427_v21, %v21029_v52  ;;  %v19226_v13 = vpack.c.bf16 %v9564_v19, %v9563_v53  ;;  %v9604_v53 = vld [vmem:[%s20496_s12 + $0x6a8] sm:$0xff] }
0x2847   : > { %10528 = vmatmul.mubr.f32.vlgmr.msra.gmra.mrb[112].mxu1 %v10305_v23  ;;  %10598 = vmatmul.mubr.f32.vlgmr.msra.gmra.mrb[118].mxu0 %v10307_v49  ;;  %v19216_v23 = vpack.c.bf16 %v9576_v63, %v9575_v16  ;;  %v9560_v49 = vld [vmem:[%s20496_s12 + $0x548] sm:$0xff]  ;;  %v9693_v16 = vrot.slane %v22427_v21, %v21032_v54 }
0x2848   : > { %19171 = vmatpush3.bf16.msra.mxu1 %v19170_v48  ;;  %10667 = vmatprep.mubr.f32.mxu1 %v10310_v7  ;;  %v9559_v48 = vld [vmem:[%s20496_s12 + $0x540] sm:$0xff]  ;;  %v19186_v7 = vpack.c.bf16 %v9528_v10, %v9527_v34  ;;  %v9705_v34 = vrot.slane %v22427_v21, %v21054_v1 }
0x2849   : > { %19203 = vmatpush3.bf16.msra.mxu0 %v19202_v43  ;;  %10737 = vmatprep.mubr.f32.mxu0 %v10312_v14  ;;  %v9545_v43 = vld [vmem:[%s20496_s12 + $0x4d0] sm:$0xff]  ;;  %v19220_v14 = vpack.c.bf16 %v9578_v59, %v9577_v55  ;;  %v9631_v10 = vld [vmem:[%s20496_s12 + $0x780] sm:$0xff] }
0x284a   : > { %19173 = vmatprep.subr.bf16.mxu1 %v19172_v60  ;;  %19205 = vmatprep.subr.bf16.mxu0 %v19204_v51  ;;  %v19218_v60 = vpack.c.bf16 %v9560_v49, %v9559_v48  ;;  %v19188_v51 = vpack.c.bf16 %v9546_v46, %v9545_v43  ;;  %v9632_v48 = vld [vmem:[%s20496_s12 + $0x788] sm:$0xff]  ;;  %v19198_v49 = vpack.c.bf16 %v9534_v47, %v9533_v17  ;;  %v9583_v59 = vld [vmem:[%s20496_s12 + $0x600] sm:$0xff] }
0x284b   : > { %v10084_v43 = vadd.f32 %v22410_v3, %v9685_v12  ;;  %v10228_v18 = vadd.f32 %v22445_v62, %v9705_v34  ;;  %v9601_v3 = vld [vmem:[%s20496_s12 + $0x690] sm:$0xff]  ;;  %v9619_v17 = vld [vmem:[%s20496_s12 + $0x720] sm:$0xff] }
0x284c   : > { %19175 = vmatpush3.bf16.msra.mxu1 %v19174_v38  ;;  %v9548_v38 = vld [vmem:[%s20496_s12 + $0x4e8] sm:$0xff]  ;;  %v9617_v62 = vld [vmem:[%s20496_s12 + $0x710] sm:$0xff] }
0x284d   : > { %19207 = vmatpush3.bf16.msra.mxu0 %v19206_v36  ;;  %19177 = vmatprep.subr.bf16.mxu1 %v19176_v30  ;;  %v9579_v36 = vld [vmem:[%s20496_s12 + $0x5e0] sm:$0xff]  ;;  %v9580_v30 = vld [vmem:[%s20496_s12 + $0x5e8] sm:$0xff]  ;;  %v19192_v26 = vpack.c.bf16 %v9548_v38, %v9547_v42  ;;  %v9633_v38 = vld [vmem:[%s20496_s12 + $0x790] sm:$0xff] }
0x284e   : > { %19209 = vmatprep.subr.bf16.mxu0 %v19208_v37  ;;  %v9531_v37 = vld [vmem:[%s20496_s12 + $0x460] sm:$0xff]  ;;  %v19224_v50 = vpack.c.bf16 %v9580_v30, %v9579_v36  ;;  %v10309_v36 = vmax.f32 %v10084_v43, 0.0  ;;  %v19266_v30 = vpack.c.bf16 %v9616_v35, %v9615_v2 }
0x284f   : > { %v19194_v11 = vpack.c.bf16 %v9532_v28, %v9531_v37  ;;  %v9618_v28 = vld [vmem:[%s20496_s12 + $0x718] sm:$0xff] }
0x2850   : > { %19179 = vmatpush3.bf16.msra.mxu1 %v19178_v9  ;;  %v9550_v9 = vld [vmem:[%s20496_s12 + $0x4f8] sm:$0xff] }
0x2851   : > { %19211 = vmatpush3.bf16.msra.mxu0 %v19210_v58  ;;  %19181 = vmatprep.subr.bf16.mxu1 %v19180_v27  ;;  %v9581_v58 = vld [vmem:[%s20496_s12 + $0x5f0] sm:$0xff]  ;;  %v9582_v27 = vld [vmem:[%s20496_s12 + $0x5f8] sm:$0xff] }
0x2852   : > { %19213 = vmatprep.subr.bf16.mxu0 %v19212_v29  ;;  %v19196_v29 = vpack.c.bf16 %v9550_v9, %v9549_v24  ;;  %v19228_v63 = vpack.c.bf16 %v9582_v27, %v9581_v58  ;;  %v9635_v24 = vld [vmem:[%s20496_s12 + $0x7a0] sm:$0xff]  ;;  %v9636_v9 = vld [vmem:[%s20496_s12 + $0x7a8] sm:$0xff] }
0x2853   : > { %v19272_v47 = vpack.c.bf16 %v9636_v9, %v9635_v24  ;;  %v9643_v24 = vld [vmem:[%s20496_s12 + $0x7e0] sm:$0xff]  ;;  %v9644_v9 = vld [vmem:[%s20496_s12 + $0x7e8] sm:$0xff] }
0x2854   : > { %19183 = vmatpush3.bf16.msra.mxu1 %v19182_v5  ;;  %v9566_v5 = vld [vmem:[%s20496_s12 + $0x578] sm:$0xff] }
0x2855   : > { %19215 = vmatpush3.bf16.msra.mxu0 %v19214_v61  ;;  %19185 = vmatprep.subr.bf16.mxu1 %v19184_v40  ;;  %v9599_v61 = vld [vmem:[%s20496_s12 + $0x680] sm:$0xff]  ;;  %v9600_v40 = vld [vmem:[%s20496_s12 + $0x688] sm:$0xff]  ;;  %v19230_v46 = vpack.c.bf16 %v9566_v5, %v9565_v15  ;;  %v9637_v5 = vld [vmem:[%s20496_s12 + $0x7b0] sm:$0xff] }
0x2856   : > { %19217 = vmatprep.subr.bf16.mxu0 %v19216_v23  ;;  %v9713_v23 = vrot.slane %v22427_v21, %v21063_v8  ;;  %v19232_v55 = vpack.c.bf16 %v9600_v40, %v9599_v61  ;;  %v9620_v15 = vld [vmem:[%s20496_s12 + $0x728] sm:$0xff]  ;;  %v9638_v61 = vld [vmem:[%s20496_s12 + $0x7b8] sm:$0xff] }
0x2857   : > { %v19274_v34 = vpack.c.bf16 %v9620_v15, %v9619_v17  ;;  %v19276_v43 = vpack.c.bf16 %v9638_v61, %v9637_v5  ;;  %v19288_v17 = vpack.c.bf16 %v9644_v9, %v9643_v24  ;;  %v9613_v15 = vld [vmem:[%s20496_s12 + $0x6f0] sm:$0xff]  ;;  %v9646_v5 = vld [vmem:[%s20496_s12 + $0x7f8] sm:$0xff] }
0x2858   : > { %19187 = vmatpush3.bf16.msra.mxu1 %v19186_v7  ;;  %v9584_v7 = vld [vmem:[%s20496_s12 + $0x608] sm:$0xff]  ;;  %v10299_v22 = vadd.f32 %v22447_v32, %v9713_v23  ;;  %v9603_v32 = vld [vmem:[%s20496_s12 + $0x6a0] sm:$0xff]  ;;  %v9590_v23 = vld [vmem:[%s20496_s12 + $0x638] sm:$0xff] }
0x2859   : > { %19219 = vmatpush3.bf16.msra.mxu0 %v19218_v60  ;;  %19189 = vmatprep.subr.bf16.mxu1 %v19188_v51  ;;  %v10155_v60 = vadd.f32 %v22412_v41, %v9693_v16  ;;  %v19264_v51 = vpack.c.bf16 %v9632_v48, %v9631_v10  ;;  %v19234_v42 = vpack.c.bf16 %v9584_v7, %v9583_v59  ;;  %v9634_v41 = vld [vmem:[%s20496_s12 + $0x798] sm:$0xff]  ;;  %v9605_v16 = vld [vmem:[%s20496_s12 + $0x6b0] sm:$0xff]  ;;  %v9608_v59 = vld [vmem:[%s20496_s12 + $0x6c8] sm:$0xff] }
0x285a   : > { %19221 = vmatprep.subr.bf16.mxu0 %v19220_v14  ;;  %v9602_v14 = vld [vmem:[%s20496_s12 + $0x698] sm:$0xff]  ;;  %v19268_v19 = vpack.c.bf16 %v9634_v41, %v9633_v38  ;;  %v10316_v58 = vmax.f32 %v10299_v22, 0.0  ;;  %v19240_v12 = vpack.c.bf16 %v9604_v53, %v9603_v32  ;;  %v9589_v48 = vld [vmem:[%s20496_s12 + $0x630] sm:$0xff]  ;;  %v9639_v7 = vld [vmem:[%s20496_s12 + $0x7c0] sm:$0xff] }
0x285b   : > { %v19236_v37 = vpack.c.bf16 %v9602_v14, %v9601_v3  ;;  %v9592_v3 = vld [vmem:[%s20496_s12 + $0x648] sm:$0xff]  ;;  %v9623_v14 = vld [vmem:[%s20496_s12 + $0x740] sm:$0xff]  ;;  %v9609_v38 = vld [vmem:[%s20496_s12 + $0x6d0] sm:$0xff] }
0x285c   : > { %19191 = vmatpush3.bf16.msra.mxu1 %v19190_v6  ;;  %v9585_v6 = vld [vmem:[%s20496_s12 + $0x610] sm:$0xff]  ;;  %v9610_v41 = vld [vmem:[%s20496_s12 + $0x6d8] sm:$0xff] }
0x285d   : > { %19223 = vmatpush3.bf16.msra.mxu0 %v19222_v0  ;;  %19193 = vmatprep.subr.bf16.mxu1 %v19192_v26  ;;  %v9586_v0 = vld [vmem:[%s20496_s12 + $0x618] sm:$0xff]  ;;  %v10311_v26 = vmax.f32 %v10155_v60, 0.0  ;;  %v9640_v60 = vld [vmem:[%s20496_s12 + $0x7c8] sm:$0xff] }
0x285e   : > { %19225 = vmatprep.subr.bf16.mxu0 %v19224_v50  ;;  %v10314_v50 = vmax.f32 %v10228_v18, 0.0  ;;  %v19238_v27 = vpack.c.bf16 %v9586_v0, %v9585_v6  ;;  %v9591_v18 = vld [vmem:[%s20496_s12 + $0x640] sm:$0xff]  ;;  %v19280_v22 = vpack.c.bf16 %v9640_v60, %v9639_v7  ;;  %v9626_v53 = vld [vmem:[%s20496_s12 + $0x758] sm:$0xff]  ;;  %v10315_v60 = vmax.f32 %v22443_v44, 0.0 }
0x285f   : > { %v19250_v6 = vpack.c.bf16 %v9592_v3, %v9591_v18 }
0x2860   : > { %19195 = vmatpush3.bf16.msra.mxu1 %v19194_v11  ;;  %v19270_v11 = vpack.c.bf16 %v9618_v28, %v9617_v62  ;;  %v19252_v62 = vpack.c.bf16 %v9610_v41, %v9609_v38  ;;  %v9625_v28 = vld [vmem:[%s20496_s12 + $0x750] sm:$0xff] }
0x2861   : > { %19227 = vmatpush3.bf16.msra.mxu0 %v19226_v13  ;;  %19197 = vmatprep.subr.bf16.mxu1 %v19196_v29  ;;  %v9587_v13 = vld [vmem:[%s20496_s12 + $0x620] sm:$0xff]  ;;  %v9588_v29 = vld [vmem:[%s20496_s12 + $0x628] sm:$0xff] }
0x2862   : > { %19229 = vmatprep.subr.bf16.mxu0 %v19228_v63  ;;  %v9606_v63 = vld [vmem:[%s20496_s12 + $0x6b8] sm:$0xff]  ;;  %v19242_v40 = vpack.c.bf16 %v9588_v29, %v9587_v13  ;;  %v9596_v13 = vld [vmem:[%s20496_s12 + $0x668] sm:$0xff]  ;;  %v9627_v29 = vld [vmem:[%s20496_s12 + $0x760] sm:$0xff] }
0x2863   : > { %v19244_v10 = vpack.c.bf16 %v9606_v63, %v9605_v16  ;;  %v9614_v16 = vld [vmem:[%s20496_s12 + $0x6f8] sm:$0xff]  ;;  %v9645_v63 = vld [vmem:[%s20496_s12 + $0x7f0] sm:$0xff] }
0x2864   : > { %19199 = vmatpush3.bf16.msra.mxu1 %v19198_v49  ;;  %v9621_v49 = vld [vmem:[%s20496_s12 + $0x730] sm:$0xff] }
0x2865   : > { %19231 = vmatpush3.bf16.msra.mxu0 %v19230_v46  ;;  %19233 = vmatprep.subr.bf16.mxu1 %v19232_v55  ;;  %v9622_v46 = vld [vmem:[%s20496_s12 + $0x738] sm:$0xff]  ;;  %v9607_v55 = vld [vmem:[%s20496_s12 + $0x6c0] sm:$0xff] }
0x2866   : > { %19265 = vmatprep.subr.bf16.mxu0 %v19264_v51  ;;  %v19246_v51 = vpack.c.bf16 %v9590_v23, %v9589_v48  ;;  %v19278_v2 = vpack.c.bf16 %v9622_v46, %v9621_v49  ;;  %v19248_v35 = vpack.c.bf16 %v9608_v59, %v9607_v55  ;;  %v9597_v48 = vld [vmem:[%s20496_s12 + $0x670] sm:$0xff]  ;;  %v9598_v23 = vld [vmem:[%s20496_s12 + $0x678] sm:$0xff]  ;;  %v19292_v49 = vpack.c.bf16 %v9646_v5, %v9645_v63 }
0x2867   : > { %10668 = vmatmul.mubr.f32.vlgmr.msra.gmra.mrb[114].mxu1 %v10309_v36  ;;  %v9641_v36 = vld [vmem:[%s20496_s12 + $0x7d0] sm:$0xff]  ;;  %v9630_v46 = vld [vmem:[%s20496_s12 + $0x778] sm:$0xff]  ;;  %v19262_v55 = vpack.c.bf16 %v9598_v23, %v9597_v48  ;;  %v15797_v23 = vld [vmem:[%s23490_s24 + $0x20] sm:$0xff] }
0x2868   : > { %10738 = vmatmul.mubr.f32.vlgmr.msra.gmra.mrb[120].mxu0 %v10311_v26  ;;  %19235 = vmatpush3.bf16.msra.mxu1 %v19234_v42  ;;  %v9624_v42 = vld [vmem:[%s20496_s12 + $0x748] sm:$0xff]  ;;  %v9593_v26 = vld [vmem:[%s20496_s12 + $0x650] sm:$0xff] }
0x2869   : > { %10807 = vmatprep.mubr.f32.mxu1 %v10314_v50  ;;  %19267 = vmatpush3.bf16.msra.mxu0 %v19266_v30  ;;  %v9642_v30 = vld [vmem:[%s20496_s12 + $0x7d8] sm:$0xff]  ;;  %v19282_v0 = vpack.c.bf16 %v9624_v42, %v9623_v14  ;;  %v9611_v50 = vld [vmem:[%s20496_s12 + $0x6e0] sm:$0xff] }
0x286a   : > { %10877 = vmatprep.mubr.f32.mxu0 %v10316_v58  ;;  %19237 = vmatprep.subr.bf16.mxu1 %v19236_v37  ;;  %v9594_v37 = vld [vmem:[%s20496_s12 + $0x658] sm:$0xff]  ;;  %v19284_v32 = vpack.c.bf16 %v9642_v30, %v9641_v36 }
0x286b   : > { %19269 = vmatprep.subr.bf16.mxu0 %v19268_v19  ;;  %v9612_v19 = vld [vmem:[%s20496_s12 + $0x6e8] sm:$0xff]  ;;  %v19254_v58 = vpack.c.bf16 %v9594_v37, %v9593_v26 }
0x286c   : > { %19239 = vmatpush3.bf16.msra.mxu1 %v19238_v27  ;;  %v19286_v27 = vpack.c.bf16 %v9626_v53, %v9625_v28 }
0x286d   : > { %19271 = vmatpush3.bf16.msra.mxu0 %v19270_v11  ;;  %19241 = vmatprep.subr.bf16.mxu1 %v19240_v12  ;;  %v19256_v11 = vpack.c.bf16 %v9612_v19, %v9611_v50  ;;  %v9595_v12 = vld [vmem:[%s20496_s12 + $0x660] sm:$0xff] }
0x286e   : > { %19273 = vmatprep.subr.bf16.mxu0 %v19272_v47  ;;  %v9628_v47 = vld [vmem:[%s20496_s12 + $0x768] sm:$0xff]  ;;  %v19258_v61 = vpack.c.bf16 %v9596_v13, %v9595_v12 }
0x2870   : > { %19243 = vmatpush3.bf16.msra.mxu1 %v19242_v40  ;;  %v9701_v40 = vrot.slane %v22427_v21, %v21144_v20 }
0x2871   : > { %19275 = vmatpush3.bf16.msra.mxu0 %v19274_v34  ;;  %19245 = vmatprep.subr.bf16.mxu1 %v19244_v10  ;;  %v19290_v34 = vpack.c.bf16 %v9628_v47, %v9627_v29  ;;  %v19260_v10 = vpack.c.bf16 %v9614_v16, %v9613_v15 }
0x2872   : > { %19277 = vmatprep.subr.bf16.mxu0 %v19276_v43  ;;  %v9629_v43 = vld [vmem:[%s20496_s12 + $0x770] sm:$0xff]  ;;  %v10226_v59 = vadd.f32 %v22439_v39, %v9701_v40 }
0x2873   : > { %v19294_v7 = vpack.c.bf16 %v9630_v46, %v9629_v43  ;;  %v15794_v43 = vld [vmem:[%s23489_s23 + $0x30] sm:$0xff]  ;;  %v15795_v46 = vld [vmem:[%s23489_s23 + $0x38] sm:$0xff] }
0x2874   : > { %19247 = vmatpush3.bf16.msra.mxu1 %v19246_v51  ;;  %v10313_v21 = vmax.f32 %v10226_v59, 0.0  ;;  %v19300_v59 = vpack.c.bf16 %v15795_v46, %v15794_v43 }
0x2875   : > { %19279 = vmatpush3.bf16.msra.mxu0 %v19278_v2  ;;  %19249 = vmatprep.subr.bf16.mxu1 %v19248_v35  ;;  %v15789_v2 = vld [vmem:[#allocation10] ss:$0 sm:$0xff] }
0x2876   : > { %19281 = vmatprep.subr.bf16.mxu0 %v19280_v22 }
0x2878   : > { %19251 = vmatpush3.bf16.msra.mxu1 %v19250_v6 }
0x2879   : > { %19283 = vmatpush3.bf16.msra.mxu0 %v19282_v0  ;;  %19253 = vmatprep.subr.bf16.mxu1 %v19252_v62 }
0x287a   : > { %19285 = vmatprep.subr.bf16.mxu0 %v19284_v32 }
0x287c   : > { %19255 = vmatpush3.bf16.msra.mxu1 %v19254_v58 }
0x287d   : > { %19287 = vmatpush3.bf16.msra.mxu0 %v19286_v27  ;;  %19257 = vmatprep.subr.bf16.mxu1 %v19256_v11 }
0x287e   : > { %19289 = vmatprep.subr.bf16.mxu0 %v19288_v17 }
0x2880   : > { %19259 = vmatpush3.bf16.msra.mxu1 %v19258_v61 }
0x2881   : > { %19291 = vmatpush3.bf16.msra.mxu0 %v19290_v34  ;;  %19261 = vmatprep.subr.bf16.mxu1 %v19260_v10  ;;  %v15792_v34 = vld [vmem:[%s23489_s23 + $0x20] sm:$0xff]  ;;  %v15793_v10 = vld [vmem:[%s23489_s23 + $0x28] sm:$0xff]  ;;  %s23492_s23 = sld [smem:[#allocation38_spill]] }
0x2882   : > { %19293 = vmatprep.subr.bf16.mxu0 %v19292_v49  ;;  %v19297_v48 = vpack.c.bf16 %v15793_v10, %v15792_v34  ;;  %v15798_v49 = vld [vmem:[%s23490_s24 + $0x28] sm:$0xff] }
0x2884   : > { %19263 = vmatpush3.bf16.msra.mxu1 %v19262_v55  ;;  %v15799_v55 = vld [vmem:[%s23490_s24 + $0x30] sm:$0xff] }
0x2885   : > { %19295 = vmatpush3.bf16.msra.mxu0 %v19294_v7  ;;  %19296 = vmatprep.subr.bf16.mxu1 %v20252_v31  ;;  %v15800_v7 = vld [vmem:[%s23490_s24 + $0x38] sm:$0xff]  ;;  %s23493_s24 = sld [smem:[#allocation40_spill]] }
0x2886   : > { %19302 = vmatprep.subr.bf16.mxu0 %v20252_v31 }
0x2887   : > { %10808 = vmatmul.mubr.f32.vlgmr.msra.gmra.mrb[116].mxu1 %v10313_v21  ;;  %v19306_v21 = vpack.c.bf16 %v15800_v7, %v15799_v55  ;;  %v15808_v55 = vld [vmem:[%s23473_s1 + $0x28] sm:$0xff] }
0x2888   : > { %10878 = vmatmul.mubr.f32.vlgmr.msra.gmra.mrb[122].mxu0 %v10315_v60  ;;  %17979 = vmatprep.mubr.msk.f32.mxu1 %vm20247_vm0, %v23471_v25 }
0x2889   : > { %17990 = vmatprep.mubr.msk.f32.mxu0 %vm20247_vm0, %v23471_v25  ;;  %19298 = vmatpush3.bf16.msra.mxu1 %v19297_v48 }
0x288a   : > { %19299 = vmatprep.subr.bf16.mxu1 %v20252_v31 }
0x288d   : > { %19301 = vmatpush3.bf16.msra.mxu1 %v19300_v59 }
0x288e   : > { %19308 = vmatprep.subr.bf16.mxu1 %v20252_v31 }
0x28fa   : > { %v17033_v39 = vpop.f32.mrb[110].mxu1  ;;  %v17068_v51 = vpop.f32.mrb[116].mxu0 }
0x28fb   : > { %v17034_v35 = vpop.f32.mrb[111].mxu1  ;;  %v17069_v18 = vpop.f32.mrb[117].mxu0 }
0x28fc   : > { %v17035_v3 = vadd.f32 %v17034_v35, %v17033_v39  ;;  %v17070_v14 = vadd.f32 %v17069_v18, %v17068_v51  ;;  %v15790_v35 = vld [vmem:[#allocation7] ss:$0 sm:$0xff] }
0x28fe   : > { %v10390_v22 = vadd.f32 %v17035_v3, %v15789_v2  ;;  %v15802_v3 = vld [vmem:[%s23491_s26 + $0x20] sm:$0xff] }
0x2900   : > { %v10460_v42 = vadd.f32 %v17070_v14, %v10390_v22  ;;  %v15803_v14 = vld [vmem:[%s23491_s26 + $0x28] sm:$0xff] }
0x2901   : > { %v15791_v22 = vld [vmem:[#allocation9] ss:$0 sm:$0xff] }
0x291a   : > { %v17103_v44 = vpop.f32.mrb[112].mxu1  ;;  %v17138_v38 = vpop.f32.mrb[118].mxu0 }
0x291b   : > { %v17104_v41 = vpop.f32.mrb[113].mxu1  ;;  %v17139_v36 = vpop.f32.mrb[119].mxu0 }
0x291c   : > { %v17105_v30 = vadd.f32 %v17104_v41, %v17103_v44  ;;  %v17140_v6 = vadd.f32 %v17139_v36, %v17138_v38  ;;  %v19309_v44 = vpack.c.bf16 %v15803_v14, %v15802_v3  ;;  %v15804_v41 = vld [vmem:[%s23491_s26 + $0x30] sm:$0xff]  ;;  %v15805_v36 = vld [vmem:[%s23491_s26 + $0x38] sm:$0xff] }
0x291e   : > { %v10530_v0 = vadd.f32 %v17105_v30, %v10460_v42  ;;  %v19312_v30 = vpack.c.bf16 %v15805_v36, %v15804_v41 }
0x2920   : > { %v10600_v62 = vadd.f32 %v17140_v6, %v10530_v0  ;;  %v15812_v6 = vld [vmem:[%s23492_s23 + $0x1] ss:$0 sm:$0xff] }
0x2921   : > { %v15814_v0 = vld [vmem:[%s23493_s24 + $0x1] ss:$0 sm:$0xff] }
0x293a   : > { %v17173_v26 = vpop.f32.mrb[114].mxu1 }
0x293b   : > { %v17208_v37 = vpop.f32.mrb[120].mxu0  ;;  %v17174_v28 = vpop.f32.mrb[115].mxu1 }
0x293c   : > { %v17175_v32 = vadd.f32 %v17174_v28, %v17173_v26  ;;  %v17209_v53 = vpop.f32.mrb[121].mxu0 }
0x293d   : > { %v17210_v50 = vadd.f32 %v17209_v53, %v17208_v37 }
0x293e   : > { %v10670_v19 = vadd.f32 %v17175_v32, %v10600_v62 }
0x2940   : > { %v10740_v24 = vadd.f32 %v17210_v50, %v10670_v19  ;;  %v15816_v19 = vld [vmem:[%s23474_s6 + $0x1] ss:$0 sm:$0xff] }
0x295a   : > { %v17243_v9 = vpop.f32.mrb[116].mxu1 }
0x295b   : > { %v17278_v58 = vpop.f32.mrb[122].mxu0  ;;  %v17244_v27 = vpop.f32.mrb[117].mxu1 }
0x295c   : > { %v17245_v11 = vadd.f32 %v17244_v27, %v17243_v9  ;;  %v17279_v12 = vpop.f32.mrb[123].mxu0 }
0x295d   : > { %v17280_v13 = vadd.f32 %v17279_v12, %v17278_v58 }
0x295e   : > { %v10810_v29 = vadd.f32 %v17245_v11, %v10740_v24 }
0x2960   : > { %v10880_v17 = vadd.f32 %v17280_v13, %v10810_v29 }
0x2962   : > { %v10883_v47 = vadd.f32 %v10880_v17, %v22233_v45  ;;  %v19303_v45 = vpack.c.bf16 %v15798_v49, %v15797_v23 }
0x2964   : > { %v10886_v15 = vsel %vm1661_vm4, %v10883_v47, 0.0  ;;  %19304 = vmatpush3.bf16.msra.mxu0 %v19303_v45 }
0x2965   : > { %10887 = vadd.xlane.f32.xlu1 %v10886_v15  ;;  %19305 = vmatprep.subr.bf16.mxu0 %v20252_v31 }
0x2968   : > { %19307 = vmatpush3.bf16.msra.mxu0 %v19306_v21 }
0x2969   : > { %18004 = vmatprep.subr.mxu0 %v23471_v25 }
0x29f2   : > { %v10888_v16 = vpop.xlane.xlu1 %10887 }
0x29f3   : > { %v10889_v63 = vmul.f32 0.03125, %v10888_v16 }
0x29f5   : > { %v10890_v5 = vsub.f32 %v10883_v47, %v10889_v63 }
0x29f7   : > { %v10891_v61 = vmul.f32 %v10890_v5, %v10890_v5 }
0x29f9   : > { %v10892_v40 = vsel %vm1661_vm4, %v10891_v61, 0.0 }
0x29fa   : > { %10893 = vadd.xlane.f32.xlu1 %v10892_v40 }
0x2a87   : > { %v10894_v60 = vpop.xlane.xlu1 %10893 }
0x2a88   : > { %v10895_v39 = vmul.f32 0.03125, %v10894_v60 }
0x2a8a   : > { %v10896_v51 = vadd.f32 1e-05, %v10895_v39  ;;  %v15807_v39 = vld [vmem:[%s23473_s1 + $0x20] sm:$0xff] }
0x2a8c   : > { %19957 = vrsqrt.f32 %v10896_v51 }
0x2a96   : > { %v19958_v2 = vpop.eup %19957 }
0x2a97   : > { %v10898_v18 = vmul.f32 %v19958_v2, %v10890_v5 }
0x2a99   : > { %v10905_v42 = vmul.f32 %v15790_v35, %v10898_v18 }
0x2a9b   : > { %v22638_v38 = vadd.f32 %v15791_v22, %v10905_v42 }
0x2a9d   : > { %17980 = vmatmul.mubr.msk.f32.vlgmr.msra.gmra.mrb[118].mxu1 %vm1661_vm4, %v22638_v38  ;;  %17991 = vmatmul.mubr.msk.f32.vlgmr.msra.gmra.mrb[124].mxu0 %vm1661_vm4, %v22638_v38 }
0x2a9e   : > { %19310 = vmatpush3.bf16.msra.mxu1 %v19309_v44  ;;  %18001 = vmatprep.mubr.msk.f32.mxu1 %vm20247_vm0, %v23471_v25 }
0x2a9f   : > { %19311 = vmatprep.subr.bf16.mxu1 %v20252_v31  ;;  %18006 = vmatprep.mubr.msk.f32.mxu0 %vm20247_vm0, %v23471_v25 }
0x2aa2   : > { %19313 = vmatpush3.bf16.msra.mxu1 %v19312_v30 }
0x2aa3   : > { %18014 = vmatprep.subr.mxu1 %v23471_v25 }
0x2aa5   : > { %18002 = vmatmul.mubr.msk.f32.vlgmr.msra.gmra.mrb[120].mxu1 %vm1661_vm4, %v22638_v38 }
0x2aa6   : > { %18016 = vmatprep.mubr.msk.f32.mxu1 %vm20247_vm0, %v23471_v25 }
0x2b70   : > { %v11016_v62 = vpop.f32.mrb[118].mxu1  ;;  %v11093_v26 = vpop.f32.mrb[124].mxu0 }
0x2b71   : > { %v11017_v37 = vadd.f32 %v15812_v6, %v11016_v62  ;;  %v22658_v28 = vadd.f32 %v15814_v0, %v11093_v26  ;;  %v17981_v32 = vpop.f32.mrb[119].mxu1  ;;  %v17992_v53 = vpop.f32.mrb[125].mxu0 }
0x2b73   : > { %v22660_v50 = vmul.f32 0.35355338, %v11017_v37  ;;  %11335 = vrot.lane.b32.xlu0 %v22658_v28, %s23472_s5  ;;  %18005 = vmatpush3.xpose.msk.msra.mxu0 %vm1906_vm5, %v22658_v28 }
0x2b74   : > { %18009 = vmatprep.subr.mxu0 %v23471_v25 }
0x2b75   : > { %11333 = vrot.lane.b32.xlu1 %v22660_v50, %s23472_s5 }
0x2b76   : > { %18007 = vmatmul.mubr.msk.f32.vlgmr.msra.gmra.mrb[126].mxu0 %vm1906_vm5, %v22660_v50 }
0x2b77   : > { %18011 = vmatprep.mubr.msk.f32.mxu0 %vm20247_vm0, %v23471_v25 }
0x2b78   : > { %v11169_v24 = vpop.f32.mrb[120].mxu1 }
0x2b79   : > { %v22674_v9 = vadd.f32 %v15816_v19, %v11169_v24  ;;  %v18003_v58 = vpop.f32.mrb[121].mxu1 }
0x2b7b   : > { %18010 = vmatpush3.msra.mxu0 %v22674_v9 }
0x2b7c   : > { %18019 = vmatprep.subr.mxu0 %v23471_v25 }
0x2be5   : > { %v11336_v27 = vpop.permute.xlu0 %11335 }
0x2be6   : > { %18015 = vmatpush3.xpose.msk.msra.mxu1 %vm1906_vm5, %v11336_v27 }
0x2be7   : > { %v11334_v11 = vpop.permute.xlu1 %11333  ;;  %18024 = vmatprep.subr.mxu1 %v23471_v25 }
0x2be9   : > { %18017 = vmatmul.mubr.msk.f32.vlgmr.msra.gmra.mrb[122].mxu1 %vm1906_vm5, %v11334_v11 }
0x2bea   : > { %18026 = vmatprep.mubr.msk.f32.mxu1 %vm20247_vm0, %v23471_v25  ;;  %18025 = vmatpush3.msra.mxu1 %v15808_v55 }
0x2beb   : > { %18034 = vmatprep.subr.mxu1 %v23471_v25 }
0x2c49   : > { %v11245_v12 = vpop.f32.mrb[126].mxu0 }
0x2c4a   : > { %v18008_v13 = vpop.f32.mrb[127].mxu0  ;;  %v11249_v29 = vsel %vm1906_vm5, %v11245_v12, -inf }
0x2c4b   : > { %11250 = vmax.xlane.f32.xlu0 %v11249_v29 }
0x2cbc   : > { %v11407_v17 = vpop.f32.mrb[122].mxu1 }
0x2cbd   : > { %v18018_v47 = vpop.f32.mrb[123].mxu1  ;;  %v11411_v15 = vsel %vm1906_vm5, %v11407_v17, -inf }
0x2cbe   : > { %11412 = vmax.xlane.f32.xlu1 %v11411_v15 }
0x2ccf   : > { %11647 = vrot.lane.b32.xlu1 %v22658_v28, %s23469_s3 }
0x2cd8   : > { %v11251_v16 = vpop.xlane.xlu0 %11250 }
0x2cd9   : > { %v11252_v63 = vsub.f32 %v11245_v12, %v11251_v16 }
0x2cdb   : > { %v11253_v5 = vmul.f32 1.442695, %v11252_v63 }
0x2cdd   : > { %19959 = vpow2.f32 %v11253_v5 }
0x2ce7   : > { %v19960_v61 = vpop.eup %19959 }
0x2ce8   : > { %v11255_v40 = vsel %vm1906_vm5, %v19960_v61, 0.0 }
0x2ce9   : > { %11256 = vadd.xlane.f32.xlu0 %v11255_v40  ;;  %v15810_v40 = vld [vmem:[%s23473_s1 + $0x38] sm:$0xff] }
0x2d4b   : > { %v11413_v34 = vpop.xlane.xlu1 %11412 }
0x2d4c   : > { %v11414_v10 = vsub.f32 %v11407_v17, %v11413_v34 }
0x2d4e   : > { %v11415_v48 = vmul.f32 1.442695, %v11414_v10 }
0x2d4f   : > { %v11648_v18 = vpop.permute.xlu1 %11647 }
0x2d50   : > { %19961 = vpow2.f32 %v11415_v48 }
0x2d5a   : > { %v19962_v23 = vpop.eup %19961 }
0x2d5b   : > { %v11417_v49 = vsel %vm1906_vm5, %v19962_v23, 0.0 }
0x2d5c   : > { %11418 = vadd.xlane.f32.xlu0 %v11417_v49 }
0x2d72   : > { %11423 = vrot.lane.b32.xlu0 %v22674_v9, %s23472_s5 }
0x2d76   : > { %v11257_v45 = vpop.xlane.xlu0 %11256  ;;  %11645 = vrot.lane.b32.xlu0 %v22660_v50, %s23469_s3 }
0x2d77   : > { %19963 = vrcp.f32 %v11257_v45 }
0x2d81   : > { %v19964_v43 = vpop.eup %19963 }
0x2d82   : > { %v11259_v46 = vmul.f32 %v19964_v43, %v19960_v61 }
0x2d84   : > { %18012 = vmatmul.mubr.msk.f32.vlgmr.msra.gmra.mrb[128].mxu0 %vm1906_vm5, %v11259_v46  ;;  %v15845_v46 = vld [vmem:[%s23476_s8 + $0x28] sm:$0xff] }
0x2d85   : > { %18021 = vmatprep.mubr.msk.f32.mxu0 %vm20247_vm0, %v23471_v25 }
0x2de9   : > { %v11419_v59 = vpop.xlane.xlu0 %11418 }
0x2dea   : > { %19965 = vrcp.f32 %v11419_v59  ;;  %v15846_v59 = vld [vmem:[%s23476_s8 + $0x30] sm:$0xff] }
0x2ded   : > { %v11424_v7 = vpop.permute.xlu0 %11423 }
0x2dee   : > { %18020 = vmatpush3.msra.mxu0 %v11424_v7  ;;  %v15847_v7 = vld [vmem:[%s23476_s8 + $0x38] sm:$0xff] }
0x2def   : > { %18029 = vmatprep.subr.mxu0 %v23471_v25 }
0x2df1   : > { %v11646_v14 = vpop.permute.xlu0 %11645 }
0x2df4   : > { %v19966_v21 = vpop.eup %19965 }
0x2df5   : > { %v11421_v60 = vmul.f32 %v19966_v21, %v19962_v23 }
0x2df7   : > { %18022 = vmatmul.mubr.msk.f32.vlgmr.msra.gmra.mrb[130].mxu0 %vm1906_vm5, %v11421_v60 }
0x2df8   : > { %18030 = vmatpush3.msra.mxu0 %v15807_v39  ;;  %18031 = vmatprep.mubr.msk.f32.mxu0 %vm20247_vm0, %v23471_v25  ;;  %v19324_v39 = vpack.c.bf16 %v15847_v7, %v15846_v59 }
0x2df9   : > { %18039 = vmatprep.subr.mxu0 %v23471_v25 }
0x2e57   : > { %v11329_v51 = vpop.f32.mrb[128].mxu0 }
0x2e58   : > { %v18013_v2 = vpop.f32.mrb[129].mxu0  ;;  %18032 = vmatmul.mubr.msk.f32.vlgmr.msra.gmra.mrb[132].mxu0 %vm1906_vm5, %v11329_v51  ;;  %v15834_v51 = vld [vmem:[%s23475_s0 + $0x1] ss:$0 sm:$0xff] }
0x2e59   : > { %18041 = vmatprep.mubr.msk.f32.mxu0 %vm20247_vm0, %v23471_v25 }
0x2eca   : > { %v11495_v35 = vpop.f32.mrb[130].mxu0 }
0x2ecb   : > { %v18023_v3 = vpop.f32.mrb[131].mxu0  ;;  %18027 = vmatmul.mubr.msk.f32.vlgmr.msra.gmra.mrb[124].mxu1 %vm1906_vm5, %v11495_v35 }
0x2ecc   : > { %18035 = vmatpush3.xpose.msk.msra.mxu1 %vm1906_vm5, %v11648_v18  ;;  %18036 = vmatprep.mubr.msk.f32.mxu1 %vm20247_vm0, %v23471_v25 }
0x2ecd   : > { %18044 = vmatprep.subr.mxu1 %v23471_v25 }
0x2ecf   : > { %18037 = vmatmul.mubr.msk.f32.vlgmr.msra.gmra.mrb[126].mxu1 %vm1906_vm5, %v11646_v14 }
0x2ed0   : > { %18046 = vmatprep.mubr.msk.f32.mxu1 %vm20247_vm0, %v23471_v25 }
0x2f2b   : > { %v11641_v22 = vpop.f32.mrb[132].mxu0 }
0x2f2c   : > { %v18033_v42 = vpop.f32.mrb[133].mxu0 }
0x2f9e   : > { %v11568_v44 = vpop.f32.mrb[124].mxu1 }
0x2f9f   : > { %v11642_v41 = vadd.f32 %v11641_v22, %v11568_v44  ;;  %v18028_v36 = vpop.f32.mrb[125].mxu1  ;;  %v15861_v22 = vld [vmem:[%s23481_s2 + $0x1] ss:$0 sm:$0xff] }
0x2fa2   : > { %v11719_v30 = vpop.f32.mrb[126].mxu1 }
0x2fa3   : > { %v18038_v6 = vpop.f32.mrb[127].mxu1  ;;  %v11723_v0 = vsel %vm1906_vm5, %v11719_v30, -inf }
0x2fa4   : > { %11724 = vmax.xlane.f32.xlu0 %v11723_v0 }
0x2fba   : > { %11734 = vrot.lane.b32.xlu0 %v22674_v9, %s23469_s3 }
0x2fbe   : > { %11884 = vrot.lane.b32.xlu0 %v22660_v50, %s23470_s10 }
0x3031   : > { %v11725_v62 = vpop.xlane.xlu0 %11724 }
0x3032   : > { %v11726_v26 = vsub.f32 %v11719_v30, %v11725_v62 }
0x3034   : > { %v11727_v37 = vmul.f32 1.442695, %v11726_v26  ;;  %v15839_v26 = vld [vmem:[%s23477_s9 + $0x20] sm:$0xff] }
0x3035   : > { %v11735_v32 = vpop.permute.xlu0 %11734 }
0x3036   : > { %19967 = vpow2.f32 %v11727_v37  ;;  %18040 = vmatpush3.msra.mxu0 %v11735_v32  ;;  %v15840_v37 = vld [vmem:[%s23477_s9 + $0x28] sm:$0xff] }
0x3037   : > { %18049 = vmatprep.subr.mxu0 %v23471_v25  ;;  %v19315_v32 = vpack.c.bf16 %v15840_v37, %v15839_v26 }
0x3039   : > { %v11885_v11 = vpop.permute.xlu0 %11884 }
0x3040   : > { %v19968_v53 = vpop.eup %19967 }
0x3041   : > { %v11729_v19 = vsel %vm1906_vm5, %v19968_v53, 0.0 }
0x3042   : > { %11730 = vadd.xlane.f32.xlu1 %v11729_v19  ;;  %v15842_v19 = vld [vmem:[%s23477_s9 + $0x38] sm:$0xff] }
0x3053   : > { %11886 = vrot.lane.b32.xlu1 %v22658_v28, %s23470_s10  ;;  %v15809_v28 = vld [vmem:[%s23473_s1 + $0x30] sm:$0xff] }
0x3054   : > { %18045 = vmatpush3.msra.mxu1 %v15809_v28  ;;  %v15837_v28 = vld [vmem:[%s23478_s13 + $0x1] ss:$0 sm:$0xff] }
0x3055   : > { %18054 = vmatprep.subr.mxu1 %v23471_v25 }
0x30cf   : > { %v11731_v24 = vpop.xlane.xlu1 %11730 }
0x30d0   : > { %19969 = vrcp.f32 %v11731_v24 }
0x30d3   : > { %v11887_v27 = vpop.permute.xlu1 %11886 }
0x30da   : > { %v19970_v58 = vpop.eup %19969 }
0x30db   : > { %v11733_v50 = vmul.f32 %v19970_v58, %v19968_v53  ;;  %v15841_v53 = vld [vmem:[%s23477_s9 + $0x30] sm:$0xff] }
0x30dc   : > { %v19318_v24 = vpack.c.bf16 %v15842_v19, %v15841_v53  ;;  %v15854_v53 = vld [vmem:[%s23484_s18 + $0x20] sm:$0xff] }
0x30dd   : > { %18042 = vmatmul.mubr.msk.f32.vlgmr.msra.gmra.mrb[134].mxu0 %vm1906_vm5, %v11733_v50 }
0x30de   : > { %18050 = vmatpush3.xpose.msk.msra.mxu0 %vm1906_vm5, %v11887_v27  ;;  %18051 = vmatprep.mubr.msk.f32.mxu0 %vm20247_vm0, %v23471_v25 }
0x30df   : > { %18059 = vmatprep.subr.mxu0 %v23471_v25 }
0x30e1   : > { %18052 = vmatmul.mubr.msk.f32.vlgmr.msra.gmra.mrb[136].mxu0 %vm1906_vm5, %v11885_v11 }
0x30e2   : > { %18061 = vmatprep.mubr.msk.f32.mxu0 %vm20247_vm0, %v23471_v25  ;;  %18060 = vmatpush3.msra.mxu0 %v15810_v40 }
0x30e3   : > { %19320 = vmatprep.subr.bf16.mxu0 %v20252_v31 }
0x31b0   : > { %v11806_v12 = vpop.f32.mrb[134].mxu0 }
0x31b1   : > { %v18043_v13 = vpop.f32.mrb[135].mxu0  ;;  %18047 = vmatmul.mubr.msk.f32.vlgmr.msra.gmra.mrb[128].mxu1 %vm1906_vm5, %v11806_v12 }
0x31b2   : > { %18056 = vmatprep.mubr.msk.f32.mxu1 %vm20247_vm0, %v23471_v25  ;;  %v15849_v13 = vld [vmem:[%s23480_s16 + $0x20] sm:$0xff] }
0x31b4   : > { %v11958_v29 = vpop.f32.mrb[136].mxu0 }
0x31b5   : > { %v18053_v17 = vpop.f32.mrb[137].mxu0  ;;  %v11962_v47 = vsel %vm1906_vm5, %v11958_v29, -inf }
0x31b6   : > { %11963 = vmax.xlane.f32.xlu1 %v11962_v47  ;;  %v15838_v17 = vld [vmem:[%s23479_s14 + $0x1] ss:$0 sm:$0xff] }
0x3243   : > { %v11964_v15 = vpop.xlane.xlu1 %11963 }
0x3244   : > { %v11965_v16 = vsub.f32 %v11958_v29, %v11964_v15  ;;  %v15850_v29 = vld [vmem:[%s23480_s16 + $0x28] sm:$0xff] }
0x3245   : > { %v19327_v15 = vpack.c.bf16 %v15850_v29, %v15849_v13 }
0x3246   : > { %v11966_v63 = vmul.f32 1.442695, %v11965_v16 }
0x3248   : > { %19971 = vpow2.f32 %v11966_v63  ;;  %v15851_v63 = vld [vmem:[%s23480_s16 + $0x30] sm:$0xff] }
0x3252   : > { %v19972_v5 = vpop.eup %19971 }
0x3253   : > { %v11968_v61 = vsel %vm1906_vm5, %v19972_v5, 0.0 }
0x3254   : > { %11969 = vadd.xlane.f32.xlu0 %v11968_v61 }
0x326a   : > { %11973 = vrot.lane.b32.xlu0 %v22674_v9, %s23470_s10  ;;  %v15844_v9 = vld [vmem:[%s23476_s8 + $0x20] sm:$0xff] }
0x326b   : > { %v19321_v55 = vpack.c.bf16 %v15845_v46, %v15844_v9 }
0x3284   : > { %v11879_v34 = vpop.f32.mrb[128].mxu1 }
0x3285   : > { %v11883_v10 = vadd.f32 %v11879_v34, %v11642_v41  ;;  %v18048_v48 = vpop.f32.mrb[129].mxu1  ;;  %v15859_v34 = vld [vmem:[%s23482_s11 + $0x1] ss:$0 sm:$0xff] }
0x32e1   : > { %v11970_v23 = vpop.xlane.xlu0 %11969 }
0x32e2   : > { %19973 = vrcp.f32 %v11970_v23 }
0x32e5   : > { %v11974_v49 = vpop.permute.xlu0 %11973 }
0x32e6   : > { %18055 = vmatpush3.msra.mxu1 %v11974_v49 }
0x32e7   : > { %19314 = vmatprep.subr.bf16.mxu1 %v20252_v31 }
0x32ec   : > { %v19974_v45 = vpop.eup %19973 }
0x32ed   : > { %v11972_v43 = vmul.f32 %v19974_v45, %v19972_v5  ;;  %v15852_v5 = vld [vmem:[%s23480_s16 + $0x38] sm:$0xff] }
0x32ee   : > { %v19330_v61 = vpack.c.bf16 %v15852_v5, %v15851_v63 }
0x32ef   : > { %18057 = vmatmul.mubr.msk.f32.vlgmr.msra.gmra.mrb[130].mxu1 %vm1906_vm5, %v11972_v43 }
0x32f0   : > { %18072 = vmatprep.mubr.msk.f32.mxu1 %vm20247_vm0, %v23471_v25  ;;  %19316 = vmatpush3.bf16.msra.mxu1 %v19315_v32 }
0x32f1   : > { %19317 = vmatprep.subr.bf16.mxu1 %v20252_v31 }
0x32f4   : > { %19319 = vmatpush3.bf16.msra.mxu1 %v19318_v24 }
0x32f5   : > { %19326 = vmatprep.subr.bf16.mxu1 %v20252_v31 }
0x33c2   : > { %v12045_v21 = vpop.f32.mrb[130].mxu1 }
0x33c3   : > { %v18058_v60 = vpop.f32.mrb[131].mxu1  ;;  %18062 = vmatmul.mubr.msk.f32.vlgmr.msra.gmra.mrb[138].mxu0 %vm1906_vm5, %v12045_v21 }
0x33c4   : > { %19322 = vmatpush3.bf16.msra.mxu0 %v19321_v55  ;;  %18083 = vmatprep.mubr.msk.f32.mxu0 %vm20247_vm0, %v23471_v25 }
0x33c5   : > { %19323 = vmatprep.subr.bf16.mxu0 %v20252_v31 }
0x33c8   : > { %19325 = vmatpush3.bf16.msra.mxu0 %v19324_v39 }
0x33c9   : > { %18097 = vmatprep.subr.mxu0 %v23471_v25 }
0x33cb   : > { %18084 = vmatmul.mubr.msk.f32.vlgmr.msra.gmra.mrb[140].mxu0 %vm1661_vm4, %v22086_v4 }
0x33cc   : > { %18099 = vmatprep.mubr.msk.f32.mxu0 %vm20247_vm0, %v23471_v25 }
0x3496   : > { %v12118_v2 = vpop.f32.mrb[138].mxu0 }
0x3497   : > { %v12122_v35 = vadd.f32 %v12118_v2, %v11883_v10  ;;  %v18063_v18 = vpop.f32.mrb[139].mxu0 }
0x3499   : > { %v12129_v3 = vadd.f32 %v15834_v51, %v12122_v35 }
0x349b   : > { %v12130_v14 = vadd.f32 %v12129_v3, %v22638_v38 }
0x349d   : > { %v12135_v42 = vsel %vm1661_vm4, %v12130_v14, 0.0 }
0x349e   : > { %v12342_v44 = vpop.f32.mrb[140].mxu0  ;;  %12136 = vadd.xlane.f32.xlu1 %v12135_v42 }
0x349f   : > { %v22764_v41 = vadd.f32 %v15861_v22, %v12342_v44  ;;  %v18085_v36 = vpop.f32.mrb[141].mxu0 }
0x34a1   : > { %18098 = vmatpush3.xpose.msk.msra.mxu0 %vm1906_vm5, %v22764_v41 }
0x34a2   : > { %18102 = vmatprep.subr.mxu0 %v23471_v25 }
0x352b   : > { %v12137_v30 = vpop.xlane.xlu1 %12136 }
0x352c   : > { %v12138_v6 = vmul.f32 0.03125, %v12137_v30 }
0x352e   : > { %v12139_v38 = vsub.f32 %v12130_v14, %v12138_v6 }
0x3530   : > { %v12140_v0 = vmul.f32 %v12139_v38, %v12139_v38 }
0x3532   : > { %v12141_v62 = vsel %vm1661_vm4, %v12140_v0, 0.0  ;;  %v15855_v0 = vld [vmem:[%s23484_s18 + $0x28] sm:$0xff] }
0x3533   : > { %12142 = vadd.xlane.f32.xlu1 %v12141_v62 }
0x3544   : > { %12584 = vrot.lane.b32.xlu1 %v22764_v41, %s23472_s5 }
0x35c0   : > { %v12143_v58 = vpop.xlane.xlu1 %12142 }
0x35c1   : > { %v12144_v50 = vmul.f32 0.03125, %v12143_v58 }
0x35c3   : > { %v12145_v27 = vadd.f32 1e-05, %v12144_v50 }
0x35c4   : > { %v12585_v40 = vpop.permute.xlu1 %12584 }
0x35c5   : > { %19975 = vrsqrt.f32 %v12145_v27 }
0x35cf   : > { %v19976_v11 = vpop.eup %19975 }
0x35d0   : > { %v12147_v12 = vmul.f32 %v19976_v11, %v12139_v38 }
0x35d2   : > { %v12154_v47 = vmul.f32 %v15837_v28, %v12147_v12 }
0x35d4   : > { %v22782_v16 = vadd.f32 %v15838_v17, %v12154_v47 }
0x35d6   : > { %18073 = vmatmul.mubr.msk.f32.vlgmr.msra.gmra.mrb[132].mxu1 %vm1661_vm4, %v22782_v16 }
0x35d7   : > { %19328 = vmatpush3.bf16.msra.mxu1 %v19327_v15  ;;  %18094 = vmatprep.mubr.msk.f32.mxu1 %vm20247_vm0, %v23471_v25 }
0x35d8   : > { %19329 = vmatprep.subr.bf16.mxu1 %v20252_v31 }
0x35db   : > { %19331 = vmatpush3.bf16.msra.mxu1 %v19330_v61 }
0x35dc   : > { %18107 = vmatprep.subr.mxu1 %v23471_v25 }
0x35de   : > { %18095 = vmatmul.mubr.msk.f32.vlgmr.msra.gmra.mrb[134].mxu1 %vm1661_vm4, %v22086_v4  ;;  %v15863_v4 = vld [vmem:[%s23483_s17 + $0x1] ss:$0 sm:$0xff] }
0x35df   : > { %18109 = vmatprep.mubr.msk.f32.mxu1 %vm20247_vm0, %v23471_v25 }
0x35e4   : > { %18108 = vmatpush3.xpose.msk.msra.mxu1 %vm1906_vm5, %v12585_v40 }
0x35e5   : > { %18117 = vmatprep.subr.mxu1 %v23471_v25 }
0x36a9   : > { %v12265_v10 = vpop.f32.mrb[132].mxu1 }
0x36aa   : > { %v12266_v48 = vadd.f32 %v15859_v34, %v12265_v10  ;;  %v18074_v23 = vpop.f32.mrb[133].mxu1 }
0x36ac   : > { %v22799_v49 = vmul.f32 0.35355338, %v12266_v48 }
0x36ae   : > { %12582 = vrot.lane.b32.xlu0 %v22799_v49, %s23472_s5  ;;  %18100 = vmatmul.mubr.msk.f32.vlgmr.msra.gmra.mrb[142].mxu0 %vm1906_vm5, %v22799_v49 }
0x36af   : > { %18104 = vmatprep.mubr.msk.f32.mxu0 %vm20247_vm0, %v23471_v25 }
0x36b1   : > { %v12418_v45 = vpop.f32.mrb[134].mxu1 }
0x36b2   : > { %v22808_v43 = vadd.f32 %v15863_v4, %v12418_v45  ;;  %v18096_v9 = vpop.f32.mrb[135].mxu1 }
0x36b3   : > { %v15856_v9 = vld [vmem:[%s23484_s18 + $0x30] sm:$0xff] }
0x36b4   : > { %18103 = vmatpush3.msra.mxu0 %v22808_v43 }
0x36b5   : > { %18112 = vmatprep.subr.mxu0 %v23471_v25 }
0x3720   : > { %v12583_v46 = vpop.permute.xlu0 %12582 }
0x3721   : > { %18110 = vmatmul.mubr.msk.f32.vlgmr.msra.gmra.mrb[136].mxu1 %vm1906_vm5, %v12583_v46 }
0x3722   : > { %18119 = vmatprep.mubr.msk.f32.mxu1 %vm20247_vm0, %v23471_v25  ;;  %18118 = vmatpush3.msra.mxu1 %v15855_v0 }
0x3723   : > { %18127 = vmatprep.subr.mxu1 %v23471_v25 }
0x3781   : > { %v12494_v55 = vpop.f32.mrb[142].mxu0 }
0x3782   : > { %v18101_v59 = vpop.f32.mrb[143].mxu0  ;;  %v12498_v7 = vsel %vm1906_vm5, %v12494_v55, -inf }
0x3783   : > { %12499 = vmax.xlane.f32.xlu0 %v12498_v7 }
0x37f4   : > { %v12656_v21 = vpop.f32.mrb[136].mxu1 }
0x37f5   : > { %v18111_v60 = vpop.f32.mrb[137].mxu1  ;;  %v12660_v39 = vsel %vm1906_vm5, %v12656_v21, -inf }
0x37f6   : > { %12661 = vmax.xlane.f32.xlu1 %v12660_v39 }
0x3807   : > { %12896 = vrot.lane.b32.xlu1 %v22764_v41, %s23469_s3 }
0x380b   : > { %12894 = vrot.lane.b32.xlu1 %v22799_v49, %s23469_s3 }
0x3810   : > { %v12500_v51 = vpop.xlane.xlu0 %12499 }
0x3811   : > { %v12501_v2 = vsub.f32 %v12494_v55, %v12500_v51 }
0x3813   : > { %v12502_v35 = vmul.f32 1.442695, %v12501_v2 }
0x3815   : > { %19977 = vpow2.f32 %v12502_v35 }
0x381f   : > { %v19978_v18 = vpop.eup %19977 }
0x3820   : > { %v12504_v3 = vsel %vm1906_vm5, %v19978_v18, 0.0 }
0x3821   : > { %12505 = vadd.xlane.f32.xlu0 %v12504_v3  ;;  %v15857_v3 = vld [vmem:[%s23484_s18 + $0x38] sm:$0xff] }
0x3883   : > { %v12662_v14 = vpop.xlane.xlu1 %12661 }
0x3884   : > { %v12663_v22 = vsub.f32 %v12656_v21, %v12662_v14 }
0x3886   : > { %v12664_v42 = vmul.f32 1.442695, %v12663_v22 }
0x3887   : > { %v12897_v58 = vpop.permute.xlu1 %12896 }
0x3888   : > { %19979 = vpow2.f32 %v12664_v42 }
0x388b   : > { %v12895_v11 = vpop.permute.xlu1 %12894 }
0x3892   : > { %v19980_v44 = vpop.eup %19979 }
0x3893   : > { %v12666_v36 = vsel %vm1906_vm5, %v19980_v44, 0.0 }
0x3894   : > { %12667 = vadd.xlane.f32.xlu0 %v12666_v36 }
0x38aa   : > { %12672 = vrot.lane.b32.xlu0 %v22808_v43, %s23472_s5  ;;  %s23494_s5 = sld [smem:[#allocation21_spill]] }
0x38ae   : > { %v12506_v30 = vpop.xlane.xlu0 %12505 }
0x38af   : > { %19981 = vrcp.f32 %v12506_v30 }
0x38b9   : > { %v19982_v6 = vpop.eup %19981 }
0x38ba   : > { %v12508_v38 = vmul.f32 %v19982_v6, %v19978_v18 }
0x38bc   : > { %18105 = vmatmul.mubr.msk.f32.vlgmr.msra.gmra.mrb[144].mxu0 %vm1906_vm5, %v12508_v38  ;;  %v15881_v38 = vld [vmem:[%s23485_s19 + $0x1] ss:$0 sm:$0xff] }
0x38bd   : > { %18114 = vmatprep.mubr.msk.f32.mxu0 %vm20247_vm0, %v23471_v25 }
0x3921   : > { %v12668_v62 = vpop.xlane.xlu0 %12667 }
0x3922   : > { %19983 = vrcp.f32 %v12668_v62 }
0x3925   : > { %v12673_v26 = vpop.permute.xlu0 %12672 }
0x3926   : > { %18113 = vmatpush3.msra.mxu0 %v12673_v26 }
0x3927   : > { %18122 = vmatprep.subr.mxu0 %v23471_v25 }
0x392c   : > { %v19984_v37 = vpop.eup %19983 }
0x392d   : > { %v12670_v32 = vmul.f32 %v19984_v37, %v19980_v44 }
0x392f   : > { %18115 = vmatmul.mubr.msk.f32.vlgmr.msra.gmra.mrb[146].mxu0 %vm1906_vm5, %v12670_v32 }
0x3930   : > { %18123 = vmatpush3.msra.mxu0 %v15854_v53  ;;  %18124 = vmatprep.mubr.msk.f32.mxu0 %vm20247_vm0, %v23471_v25 }
0x3931   : > { %18132 = vmatprep.subr.mxu0 %v23471_v25 }
0x398f   : > { %v12578_v19 = vpop.f32.mrb[144].mxu0 }
0x3990   : > { %v18106_v24 = vpop.f32.mrb[145].mxu0  ;;  %18125 = vmatmul.mubr.msk.f32.vlgmr.msra.gmra.mrb[148].mxu0 %vm1906_vm5, %v12578_v19 }
0x3991   : > { %18134 = vmatprep.mubr.msk.f32.mxu0 %vm20247_vm0, %v23471_v25 }
0x3a02   : > { %v12744_v50 = vpop.f32.mrb[146].mxu0 }
0x3a03   : > { %v18116_v27 = vpop.f32.mrb[147].mxu0  ;;  %18120 = vmatmul.mubr.msk.f32.vlgmr.msra.gmra.mrb[138].mxu1 %vm1906_vm5, %v12744_v50 }
0x3a04   : > { %18128 = vmatpush3.xpose.msk.msra.mxu1 %vm1906_vm5, %v12897_v58  ;;  %18129 = vmatprep.mubr.msk.f32.mxu1 %vm20247_vm0, %v23471_v25 }
0x3a05   : > { %18137 = vmatprep.subr.mxu1 %v23471_v25 }
0x3a07   : > { %18130 = vmatmul.mubr.msk.f32.vlgmr.msra.gmra.mrb[140].mxu1 %vm1906_vm5, %v12895_v11  ;;  %v15887_v11 = vld [vmem:[%s23486_s20 + $0x208] sm:$0xff] }
0x3a08   : > { %18139 = vmatprep.mubr.msk.f32.mxu1 %vm20247_vm0, %v23471_v25  ;;  %18138 = vmatpush3.msra.mxu1 %v15856_v9  ;;  %v15920_v9 = vld [vmem:[%s23486_s20 + $0x310] sm:$0xff] }
0x3a09   : > { %18147 = vmatprep.subr.mxu1 %v23471_v25 }
0x3a63   : > { %v12890_v28 = vpop.f32.mrb[148].mxu0 }
0x3a64   : > { %v18126_v12 = vpop.f32.mrb[149].mxu0 }
0x3a65   : > { %v15889_v12 = vld [vmem:[%s23486_s20 + $0x218] sm:$0xff] }
0x3ad6   : > { %v12817_v13 = vpop.f32.mrb[138].mxu1 }
0x3ad7   : > { %v12891_v29 = vadd.f32 %v12890_v28, %v12817_v13  ;;  %v18121_v17 = vpop.f32.mrb[139].mxu1  ;;  %v15903_v28 = vld [vmem:[%s23486_s20 + $0x288] sm:$0xff] }
0x3ad8   : > { %v19332_v13 = vpack.c.bf16 %v15903_v28, %v15887_v11  ;;  %v15902_v17 = vld [vmem:[%s23486_s20 + $0x280] sm:$0xff]  ;;  %v15940_v11 = vld [vmem:[%s23486_s20 + $0x3b0] sm:$0xff]  ;;  %v15895_v28 = vld [vmem:[%s23486_s20 + $0x248] sm:$0xff] }
0x3ada   : > { %v12968_v47 = vpop.f32.mrb[140].mxu1 }
0x3adb   : > { %v18131_v15 = vpop.f32.mrb[141].mxu1  ;;  %v12972_v63 = vsel %vm1906_vm5, %v12968_v47, -inf }
0x3adc   : > { %12973 = vmax.xlane.f32.xlu1 %v12972_v63  ;;  %v15888_v63 = vld [vmem:[%s23486_s20 + $0x210] sm:$0xff] }
0x3aed   : > { %13135 = vrot.lane.b32.xlu1 %v22764_v41, %s23470_s10 }
0x3af1   : > { %13133 = vrot.lane.b32.xlu1 %v22799_v49, %s23470_s10 }
0x3b69   : > { %v12974_v5 = vpop.xlane.xlu1 %12973 }
0x3b6a   : > { %v12975_v61 = vsub.f32 %v12968_v47, %v12974_v5  ;;  %v15904_v5 = vld [vmem:[%s23486_s20 + $0x290] sm:$0xff] }
0x3b6c   : > { %v12976_v40 = vmul.f32 1.442695, %v12975_v61  ;;  %v19342_v61 = vpack.c.bf16 %v15904_v5, %v15888_v63 }
0x3b6d   : > { %v13136_v49 = vpop.permute.xlu1 %13135 }
0x3b6e   : > { %19985 = vpow2.f32 %v12976_v40  ;;  %v15919_v40 = vld [vmem:[%s23486_s20 + $0x308] sm:$0xff] }
0x3b71   : > { %v13134_v45 = vpop.permute.xlu1 %13133 }
0x3b78   : > { %v19986_v34 = vpop.eup %19985 }
0x3b79   : > { %v12978_v10 = vsel %vm1906_vm5, %v19986_v34, 0.0 }
0x3b7a   : > { %12979 = vadd.xlane.f32.xlu0 %v12978_v10  ;;  %v15921_v10 = vld [vmem:[%s23486_s20 + $0x318] sm:$0xff] }
0x3b90   : > { %12983 = vrot.lane.b32.xlu0 %v22808_v43, %s23469_s3  ;;  %s23495_s3 = sshll.u32 %s23497_s15, 3 }
0x3b91   : > { %s1539_s24 = scalar_lea.vmem %s20506_s4, %s23495_s3 }
0x3c07   : > { %v12980_v48 = vpop.xlane.xlu0 %12979 }
0x3c08   : > { %19987 = vrcp.f32 %v12980_v48 }
0x3c0b   : > { %v12984_v23 = vpop.permute.xlu0 %12983 }
0x3c0c   : > { %18133 = vmatpush3.msra.mxu0 %v12984_v23  ;;  %v15937_v23 = vld [vmem:[%s23486_s20 + $0x398] sm:$0xff] }
0x3c0d   : > { %18142 = vmatprep.subr.mxu0 %v23471_v25 }
0x3c12   : > { %v19988_v41 = vpop.eup %19987 }
0x3c13   : > { %v12982_v4 = vmul.f32 %v19988_v41, %v19986_v34  ;;  %v15935_v34 = vld [vmem:[%s23486_s20 + $0x388] sm:$0xff]  ;;  %v15918_v41 = vld [vmem:[%s23486_s20 + $0x300] sm:$0xff] }
0x3c14   : > { %v19336_v48 = vpack.c.bf16 %v15935_v34, %v15919_v40  ;;  %v15912_v40 = vld [vmem:[%s23486_s20 + $0x2d0] sm:$0xff]  ;;  %v15927_v34 = vld [vmem:[%s23486_s20 + $0x348] sm:$0xff] }
0x3c15   : > { %18135 = vmatmul.mubr.msk.f32.vlgmr.msra.gmra.mrb[150].mxu0 %vm1906_vm5, %v12982_v4  ;;  %v19344_v4 = vpack.c.bf16 %v15937_v23, %v15921_v10  ;;  %v15943_v10 = vld [vmem:[%s23486_s20 + $0x3c8] sm:$0xff]  ;;  %v15945_v23 = vld [vmem:[%s23486_s20 + $0x3d8] sm:$0xff] }
0x3c16   : > { %18143 = vmatpush3.xpose.msk.msra.mxu0 %vm1906_vm5, %v13136_v49  ;;  %18144 = vmatprep.mubr.msk.f32.mxu0 %vm20247_vm0, %v23471_v25  ;;  %v15934_v49 = vld [vmem:[%s23486_s20 + $0x380] sm:$0xff] }
0x3c17   : > { %18152 = vmatprep.subr.mxu0 %v23471_v25 }
0x3c19   : > { %18145 = vmatmul.mubr.msk.f32.vlgmr.msra.gmra.mrb[152].mxu0 %vm1906_vm5, %v13134_v45  ;;  %v19338_v45 = vpack.c.bf16 %v15934_v49, %v15918_v41 }
0x3c1a   : > { %18154 = vmatprep.mubr.msk.f32.mxu0 %vm20247_vm0, %v23471_v25  ;;  %18153 = vmatpush3.msra.mxu0 %v15857_v3  ;;  %v15884_v3 = vld [vmem:[%s23487_s21 + $0x1] ss:$0 sm:$0xff] }
0x3ce8   : > { %v13055_v46 = vpop.f32.mrb[150].mxu0 }
0x3ce9   : > { %v18136_v55 = vpop.f32.mrb[151].mxu0  ;;  %18140 = vmatmul.mubr.msk.f32.vlgmr.msra.gmra.mrb[142].mxu1 %vm1906_vm5, %v13055_v46  ;;  %v15936_v46 = vld [vmem:[%s23486_s20 + $0x390] sm:$0xff] }
0x3cea   : > { %18149 = vmatprep.mubr.msk.f32.mxu1 %vm20247_vm0, %v23471_v25  ;;  %v19346_v55 = vpack.c.bf16 %v15936_v46, %v15920_v9  ;;  %v19368_v9 = vpack.c.bf16 %v15943_v10, %v15927_v34  ;;  %v15954_v10 = vld [vmem:[%s20496_s12 + $0x810] sm:$0xff] }
0x3cec   : > { %v13207_v59 = vpop.f32.mrb[152].mxu0 }
0x3ced   : > { %v18146_v7 = vpop.f32.mrb[153].mxu0  ;;  %v13211_v21 = vsel %vm1906_vm5, %v13207_v59, -inf }
0x3cee   : > { %13212 = vmax.xlane.f32.xlu0 %v13211_v21  ;;  %v15907_v7 = vld [vmem:[%s23486_s20 + $0x2a8] sm:$0xff]  ;;  %v15893_v21 = vld [vmem:[%s23486_s20 + $0x238] sm:$0xff] }
0x3d04   : > { %13222 = vrot.lane.b32.xlu0 %v22808_v43, %s23470_s10 }
0x3d7b   : > { %v13213_v60 = vpop.xlane.xlu0 %13212 }
0x3d7c   : > { %v13214_v39 = vsub.f32 %v13207_v59, %v13213_v60  ;;  %v15891_v59 = vld [vmem:[%s23486_s20 + $0x228] sm:$0xff] }
0x3d7d   : > { %v19348_v60 = vpack.c.bf16 %v15907_v7, %v15891_v59  ;;  %v15944_v59 = vld [vmem:[%s23486_s20 + $0x3d0] sm:$0xff]  ;;  %v15899_v7 = vld [vmem:[%s23486_s20 + $0x268] sm:$0xff] }
0x3d7e   : > { %v13215_v51 = vmul.f32 1.442695, %v13214_v39  ;;  %v15909_v39 = vld [vmem:[%s23486_s20 + $0x2b8] sm:$0xff] }
0x3d7f   : > { %v13223_v2 = vpop.permute.xlu0 %13222 }
0x3d80   : > { %19989 = vpow2.f32 %v13215_v51  ;;  %18148 = vmatpush3.msra.mxu1 %v13223_v2  ;;  %v19356_v51 = vpack.c.bf16 %v15909_v39, %v15893_v21  ;;  %v15915_v21 = vld [vmem:[%s23486_s20 + $0x2e8] sm:$0xff]  ;;  %v15917_v39 = vld [vmem:[%s23486_s20 + $0x2f8] sm:$0xff] }
0x3d81   : > { %19333 = vmatprep.subr.bf16.mxu1 %v19332_v13  ;;  %v15897_v13 = vld [vmem:[%s23486_s20 + $0x258] sm:$0xff] }
0x3d8a   : > { %v19990_v35 = vpop.eup %19989 }
0x3d8b   : > { %v13217_v18 = vsel %vm1906_vm5, %v19990_v35, 0.0 }
0x3d8c   : > { %13218 = vadd.xlane.f32.xlu1 %v13217_v18 }
0x3dbc   : > { %v13128_v14 = vpop.f32.mrb[142].mxu1 }
0x3dbd   : > { %v13132_v22 = vadd.f32 %v13128_v14, %v12891_v29  ;;  %v18141_v42 = vpop.f32.mrb[143].mxu1  ;;  %v15886_v29 = vld [vmem:[%s23486_s20 + $0x200] sm:$0xff] }
0x3dbe   : > { %v19334_v15 = vpack.c.bf16 %v15902_v17, %v15886_v29  ;;  %v15890_v42 = vld [vmem:[%s23486_s20 + $0x220] sm:$0xff] }
0x3e19   : > { %v13219_v44 = vpop.xlane.xlu1 %13218 }
0x3e1a   : > { %19991 = vrcp.f32 %v13219_v44  ;;  %v15906_v44 = vld [vmem:[%s23486_s20 + $0x2a0] sm:$0xff] }
0x3e24   : > { %v19992_v36 = vpop.eup %19991 }
0x3e25   : > { %v13221_v43 = vmul.f32 %v19992_v36, %v19990_v35 }
0x3e27   : > { %18150 = vmatmul.mubr.msk.f32.vlgmr.msra.gmra.mrb[144].mxu1 %vm1906_vm5, %v13221_v43  ;;  %v15892_v43 = vld [vmem:[%s23486_s20 + $0x230] sm:$0xff] }
0x3e28   : > { %13887 = vmatprep.mubr.f32.mxu1 %v23471_v25  ;;  %19335 = vmatpush1.bf16.msra.mxu1 %v19334_v15  ;;  %v15910_v15 = vld [vmem:[%s23486_s20 + $0x2c0] sm:$0xff] }
0x3e29   : > { %19337 = vmatprep.subr.bf16.mxu1 %v19336_v48  ;;  %v15929_v48 = vld [vmem:[%s23486_s20 + $0x358] sm:$0xff] }
0x3e2a   : > { %v19376_v46 = vpack.c.bf16 %v15945_v23, %v15929_v48  ;;  %v15955_v48 = vld [vmem:[%s20496_s12 + $0x818] sm:$0xff] }
0x3e2c   : > { %19339 = vmatpush1.bf16.msra.mxu1 %v19338_v45  ;;  %v15942_v45 = vld [vmem:[%s23486_s20 + $0x3c0] sm:$0xff] }
0x3e2d   : > { %19349 = vmatprep.subr.bf16.mxu1 %v19348_v60  ;;  %v15901_v60 = vld [vmem:[%s23486_s20 + $0x278] sm:$0xff] }
0x3efa   : > { %v13294_v30 = vpop.f32.mrb[144].mxu1 }
0x3efb   : > { %v18151_v6 = vpop.f32.mrb[145].mxu1  ;;  %18155 = vmatmul.mubr.msk.f32.vlgmr.msra.gmra.mrb[154].mxu0 %vm1906_vm5, %v13294_v30  ;;  %v15908_v30 = vld [vmem:[%s23486_s20 + $0x2b0] sm:$0xff] }
0x3efc   : > { %13958 = vmatprep.mubr.f32.mxu0 %v23471_v25  ;;  %v15923_v6 = vld [vmem:[%s23486_s20 + $0x328] sm:$0xff] }
0x3fce   : > { %v13367_v0 = vpop.f32.mrb[154].mxu0 }
0x3fcf   : > { %v13371_v62 = vadd.f32 %v13367_v0, %v13132_v22  ;;  %v18156_v26 = vpop.f32.mrb[155].mxu0  ;;  %v15885_v22 = vld [vmem:[%s23488_s22 + $0x1] ss:$0 sm:$0xff]  ;;  %v15925_v0 = vld [vmem:[%s23486_s20 + $0x338] sm:$0xff] }
0x3fd1   : > { %v13378_v37 = vadd.f32 %v15881_v38, %v13371_v62  ;;  %v15939_v38 = vld [vmem:[%s23486_s20 + $0x3a8] sm:$0xff]  ;;  %v15941_v62 = vld [vmem:[%s23486_s20 + $0x3b8] sm:$0xff] }
0x3fd3   : > { %v13379_v32 = vadd.f32 %v13378_v37, %v22782_v16  ;;  %v15905_v16 = vld [vmem:[%s23486_s20 + $0x298] sm:$0xff]  ;;  %v19350_v37 = vpack.c.bf16 %v15906_v44, %v15890_v42  ;;  %v15916_v42 = vld [vmem:[%s23486_s20 + $0x2f0] sm:$0xff]  ;;  %v15931_v44 = vld [vmem:[%s23486_s20 + $0x368] sm:$0xff] }
0x3fd4   : > { %v19340_v47 = vpack.c.bf16 %v15905_v16, %v15889_v12  ;;  %v15911_v12 = vld [vmem:[%s23486_s20 + $0x2c8] sm:$0xff]  ;;  %v15913_v16 = vld [vmem:[%s23486_s20 + $0x2d8] sm:$0xff] }
0x3fd5   : > { %v13384_v53 = vsel %vm1661_vm4, %v13379_v32, 0.0  ;;  %v19364_v63 = vpack.c.bf16 %v15911_v12, %v15895_v28  ;;  %v19372_v5 = vpack.c.bf16 %v15913_v16, %v15897_v13  ;;  %v15952_v12 = vld [vmem:[%s20496_s12 + $0x800] sm:$0xff]  ;;  %v15953_v13 = vld [vmem:[%s20496_s12 + $0x808] sm:$0xff] }
0x3fd6   : > { %13385 = vadd.xlane.f32.xlu1 %v13384_v53  ;;  %19341 = vmatprep.subr.bf16.mxu0 %v19340_v47  ;;  %v15922_v53 = vld [vmem:[%s23486_s20 + $0x320] sm:$0xff] }
0x3fd7   : > { %19343 = vmatpush1.bf16.msra.mxu0 %v19342_v61  ;;  %v15894_v47 = vld [vmem:[%s23486_s20 + $0x240] sm:$0xff]  ;;  %v15896_v61 = vld [vmem:[%s23486_s20 + $0x250] sm:$0xff] }
0x3fd8   : > { %19345 = vmatprep.subr.bf16.mxu0 %v19344_v4  ;;  %v19366_v41 = vpack.c.bf16 %v15910_v15, %v15894_v47  ;;  %v19374_v49 = vpack.c.bf16 %v15912_v40, %v15896_v61  ;;  %v15926_v4 = vld [vmem:[%s23486_s20 + $0x340] sm:$0xff]  ;;  %v15985_v47 = vld [vmem:[%s20496_s12 + $0x908] sm:$0xff]  ;;  %v15970_v15 = vld [vmem:[%s20496_s12 + $0x890] sm:$0xff]  ;;  %v19398_v40 = vpack.c.bf16 %v15953_v13, %v15952_v12 }
0x3fd9   : > { %v16003_v61 = vld [vmem:[%s20496_s12 + $0x998] sm:$0xff]  ;;  %v15993_v12 = vld [vmem:[%s20496_s12 + $0x948] sm:$0xff]  ;;  %v15978_v13 = vld [vmem:[%s20496_s12 + $0x8d0] sm:$0xff] }
0x3fdb   : > { %19347 = vmatpush1.bf16.msra.mxu0 %v19346_v55  ;;  %v15928_v55 = vld [vmem:[%s23486_s20 + $0x350] sm:$0xff] }
0x3fdc   : > { %19357 = vmatprep.subr.bf16.mxu0 %v19356_v51  ;;  %v19370_v51 = vpack.c.bf16 %v15942_v45, %v15926_v4  ;;  %v15987_v4 = vld [vmem:[%s20496_s12 + $0x918] sm:$0xff]  ;;  %v15972_v45 = vld [vmem:[%s20496_s12 + $0x8a0] sm:$0xff] }
0x4063   : > { %v13386_v19 = vpop.xlane.xlu1 %13385 }
0x4064   : > { %v13387_v24 = vmul.f32 0.03125, %v13386_v19  ;;  %v15938_v19 = vld [vmem:[%s23486_s20 + $0x3a0] sm:$0xff] }
0x4065   : > { %v19354_v29 = vpack.c.bf16 %v15938_v19, %v15922_v53  ;;  %v15948_v53 = vld [vmem:[%s23486_s20 + $0x3f0] sm:$0xff]  ;;  %v15968_v19 = vld [vmem:[%s20496_s12 + $0x880] sm:$0xff] }
0x4066   : > { %v13388_v58 = vsub.f32 %v13379_v32, %v13387_v24  ;;  %v19358_v32 = vpack.c.bf16 %v15908_v30, %v15892_v43  ;;  %v15933_v43 = vld [vmem:[%s23486_s20 + $0x378] sm:$0xff] }
0x4067   : > { %v15949_v30 = vld [vmem:[%s23486_s20 + $0x3f8] sm:$0xff] }
0x4068   : > { %v13389_v50 = vmul.f32 %v13388_v58, %v13388_v58 }
0x406a   : > { %v13390_v27 = vsel %vm1661_vm4, %v13389_v50, 0.0  ;;  %v19360_v50 = vpack.c.bf16 %v15941_v62, %v15925_v0  ;;  %v15930_v0 = vld [vmem:[%s23486_s20 + $0x360] sm:$0xff] }
0x406b   : > { %13391 = vadd.xlane.f32.xlu1 %v13390_v27  ;;  %v15924_v27 = vld [vmem:[%s23486_s20 + $0x330] sm:$0xff]  ;;  %v15946_v62 = vld [vmem:[%s23486_s20 + $0x3e0] sm:$0xff] }
0x406c   : > { %v19362_v17 = vpack.c.bf16 %v15940_v11, %v15924_v27  ;;  %v16001_v27 = vld [vmem:[%s20496_s12 + $0x988] sm:$0xff]  ;;  %v19386_v11 = vpack.c.bf16 %v15946_v62, %v15930_v0  ;;  %v15991_v0 = vld [vmem:[%s20496_s12 + $0x938] sm:$0xff]  ;;  %v15976_v62 = vld [vmem:[%s20496_s12 + $0x8c0] sm:$0xff] }
0x40f8   : > { %v13392_v2 = vpop.xlane.xlu1 %13391 }
0x40f9   : > { %v13393_v35 = vmul.f32 0.03125, %v13392_v2  ;;  %v19378_v2 = vpack.c.bf16 %v15944_v59, %v15928_v55  ;;  %v16005_v55 = vld [vmem:[%s20496_s12 + $0x9a8] sm:$0xff]  ;;  %v19402_v59 = vpack.c.bf16 %v15955_v48, %v15954_v10  ;;  %v15995_v10 = vld [vmem:[%s20496_s12 + $0x958] sm:$0xff]  ;;  %v15980_v48 = vld [vmem:[%s20496_s12 + $0x8e0] sm:$0xff] }
0x40fb   : > { %v13394_v18 = vadd.f32 1e-05, %v13393_v35  ;;  %v15898_v35 = vld [vmem:[%s23486_s20 + $0x260] sm:$0xff] }
0x40fd   : > { %19993 = vrsqrt.f32 %v13394_v18  ;;  %v15914_v18 = vld [vmem:[%s23486_s20 + $0x2e0] sm:$0xff] }
0x4107   : > { %v19994_v14 = vpop.eup %19993 }
0x4108   : > { %v13396_v36 = vmul.f32 %v19994_v14, %v13388_v58  ;;  %v19352_v58 = vpack.c.bf16 %v15939_v38, %v15923_v6  ;;  %v19388_v14 = vpack.c.bf16 %v15917_v39, %v15901_v60  ;;  %v19382_v6 = vpack.c.bf16 %v15914_v18, %v15898_v35  ;;  %v15957_v60 = vld [vmem:[%s20496_s12 + $0x828] sm:$0xff]  ;;  %v15974_v18 = vld [vmem:[%s20496_s12 + $0x8b0] sm:$0xff] }
0x4109   : > { %v15989_v35 = vld [vmem:[%s20496_s12 + $0x928] sm:$0xff] }
0x410a   : > { %v13403_v26 = vmul.f32 %v15884_v3, %v13396_v36  ;;  %v19380_v3 = vpack.c.bf16 %v15915_v21, %v15899_v7  ;;  %v15947_v36 = vld [vmem:[%s23486_s20 + $0x3e8] sm:$0xff]  ;;  %v15956_v21 = vld [vmem:[%s20496_s12 + $0x820] sm:$0xff] }
0x410c   : > { %v22914_v24 = vadd.f32 %v15885_v22, %v13403_v26  ;;  %v15900_v22 = vld [vmem:[%s23486_s20 + $0x270] sm:$0xff]  ;;  %v19384_v26 = vpack.c.bf16 %v15947_v36, %v15931_v44 }
0x410d   : > { %v19390_v38 = vpack.c.bf16 %v15916_v42, %v15900_v22  ;;  %v16007_v22 = vld [vmem:[%s20496_s12 + $0x9b8] sm:$0xff]  ;;  %v19406_v42 = vpack.c.bf16 %v15957_v60, %v15956_v21  ;;  %v15958_v36 = vld [vmem:[%s20496_s12 + $0x830] sm:$0xff]  ;;  %v15997_v21 = vld [vmem:[%s20496_s12 + $0x968] sm:$0xff] }
0x410e   : > { %16208 = vmatmul.mubr.msk.f32.vlgmr.msra.gmra.mrb[146].mxu1 %vm1661_vm4, %v22914_v24  ;;  %16209 = vmatmul.mubr.msk.f32.vlgmr.msra.gmra.mrb[156].mxu0 %vm1661_vm4, %v22914_v24 }
0x410f   : > { %19351 = vmatpush1.bf16.msra.mxu1 %v19350_v37  ;;  %19359 = vmatpush1.bf16.msra.mxu0 %v19358_v32  ;;  %v19392_v37 = vpack.c.bf16 %v15949_v30, %v15933_v43  ;;  %v15932_v32 = vld [vmem:[%s23486_s20 + $0x370] sm:$0xff]  ;;  %v15959_v43 = vld [vmem:[%s20496_s12 + $0x838] sm:$0xff] }
0x4110   : > { %19353 = vmatprep.subr.bf16.mxu1 %v19352_v58  ;;  %19361 = vmatprep.subr.bf16.mxu0 %v19360_v50  ;;  %v15969_v58 = vld [vmem:[%s20496_s12 + $0x888] sm:$0xff]  ;;  %v16000_v50 = vld [vmem:[%s20496_s12 + $0x980] sm:$0xff]  ;;  %v19394_v28 = vpack.c.bf16 %v15948_v53, %v15932_v32  ;;  %v19410_v53 = vpack.c.bf16 %v15959_v43, %v15958_v36  ;;  %v15998_v36 = vld [vmem:[%s20496_s12 + $0x970] sm:$0xff] }
0x4111   : > { %14029 = vmatprep.mubr.f32.mxu1 %v23471_v25  ;;  %14100 = vmatprep.mubr.f32.mxu0 %v23471_v25  ;;  %v19396_v16 = vpack.c.bf16 %v15969_v58, %v15968_v19  ;;  %v16009_v32 = vld [vmem:[%s20496_s12 + $0x9c8] sm:$0xff]  ;;  %v15960_v58 = vld [vmem:[%s20496_s12 + $0x840] sm:$0xff]  ;;  %v15999_v43 = vld [vmem:[%s20496_s12 + $0x978] sm:$0xff] }
0x4113   : > { %19355 = vmatpush1.bf16.msra.mxu1 %v19354_v29  ;;  %19363 = vmatpush1.bf16.msra.mxu0 %v19362_v17  ;;  %v19428_v29 = vpack.c.bf16 %v16001_v27, %v16000_v50  ;;  %v15984_v17 = vld [vmem:[%s20496_s12 + $0x900] sm:$0xff]  ;;  %v15961_v50 = vld [vmem:[%s20496_s12 + $0x848] sm:$0xff] }
0x4114   : > { %19365 = vmatprep.subr.bf16.mxu1 %v19364_v63  ;;  %19373 = vmatprep.subr.bf16.mxu0 %v19372_v5  ;;  %v15971_v63 = vld [vmem:[%s20496_s12 + $0x898] sm:$0xff]  ;;  %v16002_v5 = vld [vmem:[%s20496_s12 + $0x990] sm:$0xff]  ;;  %v19430_v34 = vpack.c.bf16 %v15985_v47, %v15984_v17  ;;  %v19414_v47 = vpack.c.bf16 %v15961_v50, %v15960_v58 }
0x4115   : > { %v19400_v23 = vpack.c.bf16 %v15971_v63, %v15970_v15  ;;  %v16011_v17 = vld [vmem:[%s20496_s12 + $0x9d8] sm:$0xff]  ;;  %v15962_v63 = vld [vmem:[%s20496_s12 + $0x850] sm:$0xff] }
0x4116   : > { %16210 = vmatmul.mubr.msk.f32.vlgmr.msra.gmra.mrb[148].mxu1 %vm1661_vm4, %v22914_v24  ;;  %16211 = vmatmul.mubr.msk.f32.vlgmr.msra.gmra.mrb[158].mxu0 %vm1661_vm4, %v22914_v24 }
0x4117   : > { %19367 = vmatpush1.bf16.msra.mxu1 %v19366_v41  ;;  %19375 = vmatpush1.bf16.msra.mxu0 %v19374_v49  ;;  %v19432_v41 = vpack.c.bf16 %v16003_v61, %v16002_v5  ;;  %v15986_v49 = vld [vmem:[%s20496_s12 + $0x910] sm:$0xff]  ;;  %v15963_v5 = vld [vmem:[%s20496_s12 + $0x858] sm:$0xff] }
0x4118   : > { %19369 = vmatprep.subr.bf16.mxu1 %v19368_v9  ;;  %19377 = vmatprep.subr.bf16.mxu0 %v19376_v46  ;;  %v15973_v9 = vld [vmem:[%s20496_s12 + $0x8a8] sm:$0xff]  ;;  %v16004_v46 = vld [vmem:[%s20496_s12 + $0x9a0] sm:$0xff]  ;;  %v19434_v7 = vpack.c.bf16 %v15987_v4, %v15986_v49  ;;  %v19418_v4 = vpack.c.bf16 %v15963_v5, %v15962_v63  ;;  %v16034_v63 = vld [vmem:[%s20496_s12 + $0xa90] sm:$0xff] }
0x4119   : > { %14171 = vmatprep.mubr.f32.mxu1 %v23471_v25  ;;  %14242 = vmatprep.mubr.f32.mxu0 %v23471_v25  ;;  %v19404_v39 = vpack.c.bf16 %v15973_v9, %v15972_v45  ;;  %v16013_v49 = vld [vmem:[%s20496_s12 + $0x9e8] sm:$0xff]  ;;  %v15964_v9 = vld [vmem:[%s20496_s12 + $0x860] sm:$0xff] }
0x411b   : > { %19371 = vmatpush1.bf16.msra.mxu1 %v19370_v51  ;;  %19379 = vmatpush1.bf16.msra.mxu0 %v19378_v2  ;;  %v19436_v51 = vpack.c.bf16 %v16005_v55, %v16004_v46  ;;  %v15988_v2 = vld [vmem:[%s20496_s12 + $0x920] sm:$0xff] }
0x411c   : > { %19381 = vmatprep.subr.bf16.mxu1 %v19380_v3  ;;  %19389 = vmatprep.subr.bf16.mxu0 %v19388_v14  ;;  %v15975_v3 = vld [vmem:[%s20496_s12 + $0x8b8] sm:$0xff]  ;;  %v16006_v14 = vld [vmem:[%s20496_s12 + $0x9b0] sm:$0xff]  ;;  %v19438_v44 = vpack.c.bf16 %v15989_v35, %v15988_v2 }
0x411d   : > { %v19408_v30 = vpack.c.bf16 %v15975_v3, %v15974_v18  ;;  %v15983_v2 = vld [vmem:[%s20496_s12 + $0x8f8] sm:$0xff]  ;;  %v16014_v35 = vld [vmem:[%s20496_s12 + $0x9f0] sm:$0xff] }
0x411e   : > { %16212 = vmatmul.mubr.msk.f32.vlgmr.msra.gmra.mrb[150].mxu1 %vm1661_vm4, %v22914_v24  ;;  %16213 = vmatmul.mubr.msk.f32.vlgmr.msra.gmra.mrb[160].mxu0 %vm1661_vm4, %v22914_v24  ;;  %v16015_v3 = vld [vmem:[%s20496_s12 + $0x9f8] sm:$0xff] }
0x411f   : > { %19383 = vmatpush1.bf16.msra.mxu1 %v19382_v6  ;;  %19391 = vmatpush1.bf16.msra.mxu0 %v19390_v38  ;;  %v19440_v6 = vpack.c.bf16 %v16007_v22, %v16006_v14  ;;  %v15990_v38 = vld [vmem:[%s20496_s12 + $0x930] sm:$0xff]  ;;  %v15967_v22 = vld [vmem:[%s20496_s12 + $0x878] sm:$0xff] }
0x4120   : > { %19385 = vmatprep.subr.bf16.mxu1 %v19384_v26  ;;  %19393 = vmatprep.subr.bf16.mxu0 %v19392_v37  ;;  %v15977_v26 = vld [vmem:[%s20496_s12 + $0x8c8] sm:$0xff]  ;;  %v16008_v37 = vld [vmem:[%s20496_s12 + $0x9c0] sm:$0xff]  ;;  %v19442_v19 = vpack.c.bf16 %v15991_v0, %v15990_v38  ;;  %v15966_v14 = vld [vmem:[%s20496_s12 + $0x870] sm:$0xff] }
0x4121   : > { %14313 = vmatprep.mubr.f32.mxu1 %v23471_v25  ;;  %14384 = vmatprep.mubr.f32.mxu0 %v23471_v25  ;;  %v19412_v27 = vpack.c.bf16 %v15977_v26, %v15976_v62  ;;  %v16033_v38 = vld [vmem:[%s20496_s12 + $0xa88] sm:$0xff]  ;;  %v16064_v0 = vld [vmem:[%s20496_s12 + $0xb80] sm:$0xff] }
0x4122   : > { %v16065_v26 = vld [vmem:[%s20496_s12 + $0xb88] sm:$0xff] }
0x4123   : > { %19387 = vmatpush1.bf16.msra.mxu1 %v19386_v11  ;;  %19395 = vmatpush1.bf16.msra.mxu0 %v19394_v28  ;;  %v19444_v11 = vpack.c.bf16 %v16009_v32, %v16008_v37  ;;  %v15992_v28 = vld [vmem:[%s20496_s12 + $0x940] sm:$0xff]  ;;  %v19492_v37 = vpack.c.bf16 %v16065_v26, %v16064_v0  ;;  %v23041_v32 = vld [vmem:[%s20491_s25 + $0x10] sm:$0xff] }
0x4124   : > { %19397 = vmatprep.subr.bf16.mxu1 %v19396_v16  ;;  %19429 = vmatprep.subr.bf16.mxu0 %v19428_v29  ;;  %v15979_v16 = vld [vmem:[%s20496_s12 + $0x8d8] sm:$0xff]  ;;  %v16010_v29 = vld [vmem:[%s20496_s12 + $0x9d0] sm:$0xff]  ;;  %v19446_v15 = vpack.c.bf16 %v15993_v12, %v15992_v28  ;;  %v13747_v58 = vrot.slane %v23041_v32, %v21038_v56  ;;  %v13755_v50 = vrot.slane %v23041_v32, %v21041_v57  ;;  %v16016_v28 = vld [vmem:[%s20496_s12 + $0xa00] sm:$0xff] }
0x4125   : > { %v19416_v61 = vpack.c.bf16 %v15979_v16, %v15978_v13  ;;  %v16017_v12 = vld [vmem:[%s20496_s12 + $0xa08] sm:$0xff]  ;;  %v16052_v0 = vld [vmem:[%s20496_s12 + $0xb20] sm:$0xff]  ;;  %v16038_v26 = vld [vmem:[%s20496_s12 + $0xab0] sm:$0xff] }
0x4126   : > { %16214 = vmatmul.mubr.msk.f32.vlgmr.msra.gmra.mrb[152].mxu1 %vm1661_vm4, %v22914_v24  ;;  %16215 = vmatmul.mubr.msk.f32.vlgmr.msra.gmra.mrb[162].mxu0 %vm1661_vm4, %v22914_v24 }
0x4127   : > { %19399 = vmatpush3.bf16.msra.mxu1 %v19398_v40  ;;  %19431 = vmatpush3.bf16.msra.mxu0 %v19430_v34  ;;  %v19448_v40 = vpack.c.bf16 %v16011_v17, %v16010_v29  ;;  %v15994_v34 = vld [vmem:[%s20496_s12 + $0x950] sm:$0xff] }
0x4128   : > { %19401 = vmatprep.subr.bf16.mxu1 %v19400_v23  ;;  %19433 = vmatprep.subr.bf16.mxu0 %v19432_v41  ;;  %v15981_v23 = vld [vmem:[%s20496_s12 + $0x8e8] sm:$0xff]  ;;  %v16012_v41 = vld [vmem:[%s20496_s12 + $0x9e0] sm:$0xff]  ;;  %v19450_v45 = vpack.c.bf16 %v15995_v10, %v15994_v34  ;;  %v16066_v34 = vld [vmem:[%s20496_s12 + $0xb90] sm:$0xff] }
0x4129   : > { %v19420_v46 = vpack.c.bf16 %v15981_v23, %v15980_v48  ;;  %v19452_v55 = vpack.c.bf16 %v16013_v49, %v16012_v41  ;;  %v16067_v10 = vld [vmem:[%s20496_s12 + $0xb98] sm:$0xff]  ;;  %v19462_v41 = vpack.c.bf16 %v16017_v12, %v16016_v28 }
0x412b   : > { %19403 = vmatpush3.bf16.msra.mxu1 %v19402_v59  ;;  %19435 = vmatpush3.bf16.msra.mxu0 %v19434_v7  ;;  %v15965_v59 = vld [vmem:[%s20496_s12 + $0x868] sm:$0xff]  ;;  %v15996_v7 = vld [vmem:[%s20496_s12 + $0x960] sm:$0xff] }
0x412c   : > { %19405 = vmatprep.subr.bf16.mxu1 %v19404_v39  ;;  %19437 = vmatprep.subr.bf16.mxu0 %v19436_v51  ;;  %v19422_v60 = vpack.c.bf16 %v15965_v59, %v15964_v9  ;;  %v19454_v39 = vpack.c.bf16 %v15997_v21, %v15996_v7  ;;  %v15982_v51 = vld [vmem:[%s20496_s12 + $0x8f0] sm:$0xff]  ;;  %v19496_v59 = vpack.c.bf16 %v16067_v10, %v16066_v34  ;;  %v16051_v21 = vld [vmem:[%s20496_s12 + $0xb18] sm:$0xff] }
0x412d   : > { %v19424_v18 = vpack.c.bf16 %v15983_v2, %v15982_v51  ;;  %v16050_v7 = vld [vmem:[%s20496_s12 + $0xb10] sm:$0xff]  ;;  %v13771_v51 = vrot.slane %v23041_v32, %v21063_v8  ;;  %v16037_v2 = vld [vmem:[%s20496_s12 + $0xaa8] sm:$0xff] }
0x412f   : > { %19407 = vmatpush3.bf16.msra.mxu1 %v19406_v42  ;;  %19439 = vmatpush3.bf16.msra.mxu0 %v19438_v44  ;;  %v19456_v42 = vpack.c.bf16 %v16015_v3, %v16014_v35  ;;  %v19426_v44 = vpack.c.bf16 %v15967_v22, %v15966_v14  ;;  %v16068_v35 = vld [vmem:[%s20496_s12 + $0xba0] sm:$0xff] }
0x4130   : > { %19409 = vmatprep.subr.bf16.mxu1 %v19408_v30  ;;  %19441 = vmatprep.subr.bf16.mxu0 %v19440_v6  ;;  %v19458_v30 = vpack.c.bf16 %v15999_v43, %v15998_v36  ;;  %v16032_v6 = vld [vmem:[%s20496_s12 + $0xa80] sm:$0xff]  ;;  %v16021_v36 = vld [vmem:[%s20496_s12 + $0xa28] sm:$0xff] }
0x4131   : > { %v19460_v62 = vpack.c.bf16 %v16033_v38, %v16032_v6 }
0x4133   : > { %19411 = vmatpush3.bf16.msra.mxu1 %v19410_v53  ;;  %19443 = vmatpush3.bf16.msra.mxu0 %v19442_v19  ;;  %v13743_v53 = vrot.slane %v23041_v32, %v21029_v52  ;;  %v13751_v19 = vrot.slane %v23041_v32, %v21032_v54 }
0x4134   : > { %19413 = vmatprep.subr.bf16.mxu1 %v19412_v27  ;;  %19445 = vmatprep.subr.bf16.mxu0 %v19444_v11 }
0x4137   : > { %19415 = vmatpush3.bf16.msra.mxu1 %v19414_v47  ;;  %19447 = vmatpush3.bf16.msra.mxu0 %v19446_v15  ;;  %v16048_v47 = vld [vmem:[%s20496_s12 + $0xb00] sm:$0xff]  ;;  %v16049_v15 = vld [vmem:[%s20496_s12 + $0xb08] sm:$0xff] }
0x4138   : > { %19417 = vmatprep.subr.bf16.mxu1 %v19416_v61  ;;  %19449 = vmatprep.subr.bf16.mxu0 %v19448_v40  ;;  %v16035_v40 = vld [vmem:[%s20496_s12 + $0xa98] sm:$0xff]  ;;  %v19494_v49 = vpack.c.bf16 %v16049_v15, %v16048_v47  ;;  %v16054_v47 = vld [vmem:[%s20496_s12 + $0xb30] sm:$0xff] }
0x4139   : > { %v16055_v15 = vld [vmem:[%s20496_s12 + $0xb38] sm:$0xff] }
0x413b   : > { %19419 = vmatpush3.bf16.msra.mxu1 %v19418_v4  ;;  %19451 = vmatpush3.bf16.msra.mxu0 %v19450_v45  ;;  %v16018_v4 = vld [vmem:[%s20496_s12 + $0xa10] sm:$0xff]  ;;  %v16019_v45 = vld [vmem:[%s20496_s12 + $0xa18] sm:$0xff] }
0x413c   : > { %19421 = vmatprep.subr.bf16.mxu1 %v19420_v46  ;;  %19453 = vmatprep.subr.bf16.mxu0 %v19452_v55  ;;  %v19464_v55 = vpack.c.bf16 %v16035_v40, %v16034_v63  ;;  %v19466_v22 = vpack.c.bf16 %v16019_v45, %v16018_v4  ;;  %v16040_v63 = vld [vmem:[%s20496_s12 + $0xac0] sm:$0xff]  ;;  %v16073_v40 = vld [vmem:[%s20496_s12 + $0xbc8] sm:$0xff] }
0x413f   : > { %19423 = vmatpush3.bf16.msra.mxu1 %v19422_v60  ;;  %19455 = vmatpush3.bf16.msra.mxu0 %v19454_v39  ;;  %v16036_v60 = vld [vmem:[%s20496_s12 + $0xaa0] sm:$0xff]  ;;  %v13763_v39 = vrot.slane %v23041_v32, %v21054_v1 }
0x4140   : > { %19425 = vmatprep.subr.bf16.mxu1 %v19424_v18  ;;  %19457 = vmatprep.subr.bf16.mxu0 %v19456_v42  ;;  %v16069_v18 = vld [vmem:[%s20496_s12 + $0xba8] sm:$0xff]  ;;  %v19498_v42 = vpack.c.bf16 %v16051_v21, %v16050_v7  ;;  %v19468_v6 = vpack.c.bf16 %v16037_v2, %v16036_v60  ;;  %v16042_v7 = vld [vmem:[%s20496_s12 + $0xad0] sm:$0xff]  ;;  %v16043_v21 = vld [vmem:[%s20496_s12 + $0xad8] sm:$0xff] }
0x4141   : > { %v19500_v38 = vpack.c.bf16 %v16069_v18, %v16068_v35  ;;  %v16074_v60 = vld [vmem:[%s20496_s12 + $0xbd0] sm:$0xff] }
0x4142   : > { %v16026_v18 = vld [vmem:[%s20496_s12 + $0xa50] sm:$0xff] }
0x4143   : > { %19427 = vmatpush3.bf16.msra.mxu1 %v19426_v44  ;;  %19459 = vmatpush3.bf16.msra.mxu0 %v19458_v30  ;;  %v16020_v44 = vld [vmem:[%s20496_s12 + $0xa20] sm:$0xff] }
0x4144   : > { %19461 = vmatprep.subr.bf16.mxu1 %v19460_v62  ;;  %19493 = vmatprep.subr.bf16.mxu0 %v19492_v37  ;;  %v16053_v62 = vld [vmem:[%s20496_s12 + $0xb28] sm:$0xff]  ;;  %v19470_v28 = vpack.c.bf16 %v16021_v36, %v16020_v44  ;;  %v19480_v44 = vpack.c.bf16 %v16043_v21, %v16042_v7 }
0x4145   : > { %v19502_v12 = vpack.c.bf16 %v16053_v62, %v16052_v0  ;;  %v16076_v0 = vld [vmem:[%s20496_s12 + $0xbe0] sm:$0xff]  ;;  %v16077_v62 = vld [vmem:[%s20496_s12 + $0xbe8] sm:$0xff] }
0x4146   : > { %v16097_v7 = vld [vmem:[%s20496_s12 + $0xc88] sm:$0xff] }
0x41e1   : > { %v13889_v27 = vpop.f32.mrb[146].mxu1  ;;  %v13960_v11 = vpop.f32.mrb[156].mxu0 }
0x41e2   : > { %v13890_v13 = vadd.f32 %v13889_v27, %v13743_v53  ;;  %v13961_v16 = vadd.f32 %v13960_v11, %v13751_v19  ;;  %v13891_v29 = vpop.f32.mrb[147].mxu1  ;;  %v13962_v17 = vpop.f32.mrb[157].mxu0  ;;  %v16039_v19 = vld [vmem:[%s20496_s12 + $0xab8] sm:$0xff] }
0x41e3   : > { %v13892_v5 = vadd.f32 %v13891_v29, %v13747_v58  ;;  %v13963_v61 = vadd.f32 %v13962_v17, %v13755_v50  ;;  %v16070_v58 = vld [vmem:[%s20496_s12 + $0xbb0] sm:$0xff]  ;;  %v16071_v50 = vld [vmem:[%s20496_s12 + $0xbb8] sm:$0xff]  ;;  %v19472_v29 = vpack.c.bf16 %v16039_v19, %v16038_v26 }
0x41e4   : > { %v14391_v9 = vmax.f32 %v13890_v13, 0.0  ;;  %v14393_v46 = vmax.f32 %v13961_v16, 0.0  ;;  %v16022_v13 = vld [vmem:[%s20496_s12 + $0xa30] sm:$0xff]  ;;  %v16023_v16 = vld [vmem:[%s20496_s12 + $0xa38] sm:$0xff]  ;;  %v19504_v17 = vpack.c.bf16 %v16071_v50, %v16070_v58  ;;  %v16028_v58 = vld [vmem:[%s20496_s12 + $0xa60] sm:$0xff] }
0x41e5   : > { %v14392_v48 = vmax.f32 %v13892_v5, 0.0  ;;  %v14394_v23 = vmax.f32 %v13963_v61, 0.0  ;;  %v16041_v5 = vld [vmem:[%s20496_s12 + $0xac8] sm:$0xff]  ;;  %v16072_v61 = vld [vmem:[%s20496_s12 + $0xbc0] sm:$0xff] }
0x41e6   : > { %v16029_v50 = vld [vmem:[%s20496_s12 + $0xa68] sm:$0xff] }
0x41e7   : > { %14477 = vmatprep.mubr.f32.mxu1 %v14392_v48  ;;  %14547 = vmatprep.mubr.f32.mxu0 %v14394_v23  ;;  %v19474_v48 = vpack.c.bf16 %v16023_v16, %v16022_v13  ;;  %v19506_v23 = vpack.c.bf16 %v16055_v15, %v16054_v47  ;;  %v19516_v13 = vpack.c.bf16 %v16077_v62, %v16076_v0  ;;  %v16060_v16 = vld [vmem:[%s20496_s12 + $0xb60] sm:$0xff]  ;;  %v16047_v47 = vld [vmem:[%s20496_s12 + $0xaf8] sm:$0xff]  ;;  %v16078_v15 = vld [vmem:[%s20496_s12 + $0xbf0] sm:$0xff] }
0x41e8   : > { %14478 = vmatmul.mubr.f32.vlgmr.msra.gmra.mrb[154].mxu1 %v14391_v9  ;;  %14548 = vmatmul.mubr.f32.vlgmr.msra.gmra.mrb[164].mxu0 %v14393_v46  ;;  %v19476_v9 = vpack.c.bf16 %v16041_v5, %v16040_v63  ;;  %v19508_v46 = vpack.c.bf16 %v16073_v40, %v16072_v61  ;;  %v16079_v63 = vld [vmem:[%s20496_s12 + $0xbf8] sm:$0xff]  ;;  %v13759_v5 = vrot.slane %v23041_v32, %v21144_v20  ;;  %v16130_v0 = vld [vmem:[%s20496_s12 + $0xd90] sm:$0xff] }
0x41e9   : > { %v23071_v3 = vpop.f32.mrb[148].mxu1  ;;  %v23073_v14 = vpop.f32.mrb[158].mxu0  ;;  %19463 = vmatpush3.bf16.msra.mxu1 %v19462_v41  ;;  %19495 = vmatpush3.bf16.msra.mxu0 %v19494_v49  ;;  %v16024_v41 = vld [vmem:[%s20496_s12 + $0xa40] sm:$0xff]  ;;  %v16025_v49 = vld [vmem:[%s20496_s12 + $0xa48] sm:$0xff]  ;;  %v19486_v61 = vpack.c.bf16 %v16029_v50, %v16028_v58  ;;  %v16114_v58 = vld [vmem:[%s20496_s12 + $0xd10] sm:$0xff] }
0x41ea   : > { %v14033_v43 = vpop.f32.mrb[149].mxu1  ;;  %v14104_v30 = vpop.f32.mrb[159].mxu0  ;;  %19465 = vmatprep.subr.bf16.mxu1 %v19464_v55  ;;  %19497 = vmatprep.subr.bf16.mxu0 %v19496_v59  ;;  %v16056_v55 = vld [vmem:[%s20496_s12 + $0xb40] sm:$0xff]  ;;  %v16057_v59 = vld [vmem:[%s20496_s12 + $0xb48] sm:$0xff]  ;;  %v19478_v2 = vpack.c.bf16 %v16025_v49, %v16024_v41  ;;  %v16062_v41 = vld [vmem:[%s20496_s12 + $0xb70] sm:$0xff]  ;;  %v13767_v49 = vrot.slane %v23041_v32, %v21153_v33 }
0x41eb   : > { %v14034_v37 = vadd.f32 %v14033_v43, %v13763_v39  ;;  %v14105_v53 = vadd.f32 %v14104_v30, %v13771_v51  ;;  %v16075_v39 = vld [vmem:[%s20496_s12 + $0xbd8] sm:$0xff]  ;;  %v19510_v35 = vpack.c.bf16 %v16057_v59, %v16056_v55  ;;  %v16058_v43 = vld [vmem:[%s20496_s12 + $0xb50] sm:$0xff]  ;;  %v16096_v59 = vld [vmem:[%s20496_s12 + $0xc80] sm:$0xff] }
0x41ec   : > { %v23108_v51 = vld [vmem:[%s20491_s25 + $0x18] sm:$0xff]  ;;  %v19512_v36 = vpack.c.bf16 %v16075_v39, %v16074_v60  ;;  %v16128_v60 = vld [vmem:[%s20496_s12 + $0xd80] sm:$0xff]  ;;  %v16129_v39 = vld [vmem:[%s20496_s12 + $0xd88] sm:$0xff] }
0x41ed   : > { %v14396_v27 = vmax.f32 %v14034_v37, 0.0  ;;  %v14398_v11 = vmax.f32 %v14105_v53, 0.0  ;;  %19467 = vmatpush3.bf16.msra.mxu1 %v19466_v22  ;;  %19499 = vmatpush3.bf16.msra.mxu0 %v19498_v42  ;;  %v16027_v22 = vld [vmem:[%s20496_s12 + $0xa58] sm:$0xff]  ;;  %v13799_v42 = vrot.slane %v23108_v51, %v21153_v33  ;;  %v13779_v21 = vrot.slane %v23108_v51, %v21038_v56 }
0x41ee   : > { %19469 = vmatprep.subr.bf16.mxu1 %v19468_v6  ;;  %19501 = vmatprep.subr.bf16.mxu0 %v19500_v38  ;;  %v16059_v30 = vld [vmem:[%s20496_s12 + $0xb58] sm:$0xff]  ;;  %v16044_v6 = vld [vmem:[%s20496_s12 + $0xae0] sm:$0xff]  ;;  %v16045_v38 = vld [vmem:[%s20496_s12 + $0xae8] sm:$0xff]  ;;  %v19482_v53 = vpack.c.bf16 %v16027_v22, %v16026_v18  ;;  %v14032_v18 = vadd.f32 %v23071_v3, %v13759_v5  ;;  %v14103_v56 = vadd.f32 %v23073_v14, %v13767_v49 }
0x41ef   : > { %14617 = vmatprep.mubr.f32.mxu1 %v14396_v27  ;;  %14687 = vmatprep.mubr.f32.mxu0 %v14398_v11  ;;  %v19514_v19 = vpack.c.bf16 %v16059_v30, %v16058_v43  ;;  %v16063_v55 = vld [vmem:[%s20496_s12 + $0xb78] sm:$0xff]  ;;  %v19556_v22 = vpack.c.bf16 %v16129_v39, %v16128_v60  ;;  %v16113_v43 = vld [vmem:[%s20496_s12 + $0xd08] sm:$0xff]  ;;  %v16098_v30 = vld [vmem:[%s20496_s12 + $0xc90] sm:$0xff] }
0x41f0   : > { %v19522_v32 = vpack.c.bf16 %v16063_v55, %v16062_v41  ;;  %v16131_v3 = vld [vmem:[%s20496_s12 + $0xd98] sm:$0xff]  ;;  %v14395_v62 = vmax.f32 %v14032_v18, 0.0  ;;  %v16117_v49 = vld [vmem:[%s20496_s12 + $0xd28] sm:$0xff]  ;;  %v16134_v55 = vld [vmem:[%s20496_s12 + $0xdb0] sm:$0xff] }
0x41f1   : > { %v23091_v34 = vpop.f32.mrb[150].mxu1  ;;  %v23093_v10 = vpop.f32.mrb[160].mxu0  ;;  %19471 = vmatpush3.bf16.msra.mxu1 %v19470_v28  ;;  %19503 = vmatpush3.bf16.msra.mxu0 %v19502_v12  ;;  %v19484_v12 = vpack.c.bf16 %v16045_v38, %v16044_v6  ;;  %v16099_v38 = vld [vmem:[%s20496_s12 + $0xc98] sm:$0xff]  ;;  %v16086_v39 = vld [vmem:[%s20496_s12 + $0xc30] sm:$0xff]  ;;  %v16104_v18 = vld [vmem:[%s20496_s12 + $0xcc0] sm:$0xff] }
0x41f2   : > { %v23097_v4 = vpop.f32.mrb[151].mxu1  ;;  %v23099_v45 = vpop.f32.mrb[161].mxu0  ;;  %19473 = vmatprep.subr.bf16.mxu1 %v19472_v29  ;;  %19505 = vmatprep.subr.bf16.mxu0 %v19504_v17  ;;  %v16061_v29 = vld [vmem:[%s20496_s12 + $0xb68] sm:$0xff]  ;;  %v16046_v17 = vld [vmem:[%s20496_s12 + $0xaf0] sm:$0xff]  ;;  %v19528_v50 = vpack.c.bf16 %v16099_v38, %v16098_v30 }
0x41f3   : > { %v19518_v40 = vpack.c.bf16 %v16061_v29, %v16060_v16  ;;  %v16100_v16 = vld [vmem:[%s20496_s12 + $0xca0] sm:$0xff]  ;;  %v16101_v29 = vld [vmem:[%s20496_s12 + $0xca8] sm:$0xff] }
0x41f4   : > { %v16089_v30 = vld [vmem:[%s20496_s12 + $0xc48] sm:$0xff] }
0x41f5   : > { %19475 = vmatpush3.bf16.msra.mxu1 %v19474_v48  ;;  %19507 = vmatpush3.bf16.msra.mxu0 %v19506_v23  ;;  %v16030_v48 = vld [vmem:[%s20496_s12 + $0xa70] sm:$0xff]  ;;  %v16031_v23 = vld [vmem:[%s20496_s12 + $0xa78] sm:$0xff] }
0x41f6   : > { %19477 = vmatprep.subr.bf16.mxu1 %v19476_v9  ;;  %19509 = vmatprep.subr.bf16.mxu0 %v19508_v46  ;;  %v19488_v9 = vpack.c.bf16 %v16047_v47, %v16046_v17  ;;  %v19520_v46 = vpack.c.bf16 %v16079_v63, %v16078_v15  ;;  %v19490_v33 = vpack.c.bf16 %v16031_v23, %v16030_v48  ;;  %v16132_v47 = vld [vmem:[%s20496_s12 + $0xda0] sm:$0xff]  ;;  %v16133_v15 = vld [vmem:[%s20496_s12 + $0xda8] sm:$0xff] }
0x41f7   : > { %v16085_v48 = vld [vmem:[%s20496_s12 + $0xc28] sm:$0xff]  ;;  %v16116_v23 = vld [vmem:[%s20496_s12 + $0xd20] sm:$0xff]  ;;  %v19564_v41 = vpack.c.bf16 %v16133_v15, %v16132_v47 }
0x41f8   : > { %v16141_v47 = vld [vmem:[%s20496_s12 + $0xde8] sm:$0xff] }
0x41f9   : > { %v23120_v26 = vpop.f32.mrb[152].mxu1  ;;  %v14386_v37 = vpop.f32.mrb[162].mxu0  ;;  %19479 = vmatpush3.bf16.msra.mxu1 %v19478_v2  ;;  %19511 = vmatpush3.bf16.msra.mxu0 %v19510_v35  ;;  %v13787_v2 = vrot.slane %v23108_v51, %v21041_v57  ;;  %v19524_v35 = vpack.c.bf16 %v16097_v7, %v16096_v59  ;;  %v14176_v57 = vadd.f32 %v23097_v4, %v13779_v21  ;;  %v16135_v59 = vld [vmem:[%s20496_s12 + $0xdb8] sm:$0xff] }
0x41fa   : > { %v23124_v27 = vadd.f32 %v14386_v37, %v13799_v42  ;;  %v23126_v11 = vpop.f32.mrb[153].mxu1  ;;  %v23128_v28 = vpop.f32.mrb[163].mxu0  ;;  %19481 = vmatprep.subr.bf16.mxu1 %v19480_v44  ;;  %19513 = vmatprep.subr.bf16.mxu0 %v19512_v36  ;;  %v16080_v42 = vld [vmem:[%s20496_s12 + $0xc00] sm:$0xff]  ;;  %v16081_v44 = vld [vmem:[%s20496_s12 + $0xc08] sm:$0xff]  ;;  %v14397_v37 = vmax.f32 %v14103_v56, 0.0  ;;  %v19566_v21 = vpack.c.bf16 %v16117_v49, %v16116_v23  ;;  %v16110_v49 = vld [vmem:[%s20496_s12 + $0xcf0] sm:$0xff] }
0x41fb   : > { %v16112_v36 = vld [vmem:[%s20496_s12 + $0xd00] sm:$0xff]  ;;  %v14247_v6 = vadd.f32 %v23099_v45, %v13787_v2  ;;  %v19526_v14 = vpack.c.bf16 %v16081_v44, %v16080_v42  ;;  %v14400_v45 = vmax.f32 %v14176_v57, 0.0  ;;  %v16087_v2 = vld [vmem:[%s20496_s12 + $0xc38] sm:$0xff]  ;;  %v16105_v56 = vld [vmem:[%s20496_s12 + $0xcc8] sm:$0xff] }
0x41fc   : > { %v19558_v4 = vpack.c.bf16 %v16113_v43, %v16112_v36  ;;  %v16137_v42 = vld [vmem:[%s20496_s12 + $0xdc8] sm:$0xff]  ;;  %v19538_v44 = vpack.c.bf16 %v16087_v2, %v16086_v39  ;;  %v19540_v36 = vpack.c.bf16 %v16105_v56, %v16104_v18  ;;  %v16088_v43 = vld [vmem:[%s20496_s12 + $0xc40] sm:$0xff]  ;;  %v16094_v39 = vld [vmem:[%s20496_s12 + $0xc70] sm:$0xff] }
0x41fd   : > { %19483 = vmatpush3.bf16.msra.mxu1 %v19482_v53  ;;  %19515 = vmatpush3.bf16.msra.mxu0 %v19514_v19  ;;  %v16082_v53 = vld [vmem:[%s20496_s12 + $0xc10] sm:$0xff]  ;;  %v16083_v19 = vld [vmem:[%s20496_s12 + $0xc18] sm:$0xff]  ;;  %v14402_v17 = vmax.f32 %v14247_v6, 0.0  ;;  %v16120_v6 = vld [vmem:[%s20496_s12 + $0xd40] sm:$0xff] }
0x41fe   : > { %19485 = vmatprep.subr.bf16.mxu1 %v19484_v12  ;;  %19517 = vmatprep.subr.bf16.mxu0 %v19516_v13  ;;  %v19560_v12 = vpack.c.bf16 %v16131_v3, %v16130_v0  ;;  %v16115_v13 = vld [vmem:[%s20496_s12 + $0xd18] sm:$0xff]  ;;  %v19530_v63 = vpack.c.bf16 %v16083_v19, %v16082_v53  ;;  %v16121_v0 = vld [vmem:[%s20496_s12 + $0xd48] sm:$0xff]  ;;  %v16106_v3 = vld [vmem:[%s20496_s12 + $0xcd0] sm:$0xff] }
0x41ff   : > { %v19562_v5 = vpack.c.bf16 %v16115_v13, %v16114_v58  ;;  %v19574_v53 = vpack.c.bf16 %v16121_v0, %v16120_v6  ;;  %v16090_v58 = vld [vmem:[%s20496_s12 + $0xc50] sm:$0xff]  ;;  %v16123_v13 = vld [vmem:[%s20496_s12 + $0xd58] sm:$0xff]  ;;  %v16160_v56 = vld [vmem:[%s20496_s12 + $0xe80] sm:$0xff] }
0x4200   : > { %v16095_v2 = vld [vmem:[%s20496_s12 + $0xc78] sm:$0xff]  ;;  %v16145_v6 = vld [vmem:[%s20496_s12 + $0xe08] sm:$0xff] }
0x4201   : > { %19487 = vmatpush3.bf16.msra.mxu1 %v19486_v61  ;;  %19519 = vmatpush3.bf16.msra.mxu0 %v19518_v40  ;;  %v19532_v61 = vpack.c.bf16 %v16101_v29, %v16100_v16  ;;  %v16084_v40 = vld [vmem:[%s20496_s12 + $0xc20] sm:$0xff]  ;;  %v16109_v29 = vld [vmem:[%s20496_s12 + $0xce8] sm:$0xff]  ;;  %v16127_v18 = vld [vmem:[%s20496_s12 + $0xd78] sm:$0xff] }
0x4202   : > { %19489 = vmatprep.subr.bf16.mxu1 %v19488_v9  ;;  %19521 = vmatprep.subr.bf16.mxu0 %v19520_v46  ;;  %v16102_v9 = vld [vmem:[%s20496_s12 + $0xcb0] sm:$0xff]  ;;  %v16103_v46 = vld [vmem:[%s20496_s12 + $0xcb8] sm:$0xff]  ;;  %v19534_v7 = vpack.c.bf16 %v16085_v48, %v16084_v40  ;;  %v16108_v16 = vld [vmem:[%s20496_s12 + $0xce0] sm:$0xff] }
0x4203   : > { %v19536_v60 = vpack.c.bf16 %v16103_v46, %v16102_v9  ;;  %v16093_v40 = vld [vmem:[%s20496_s12 + $0xc68] sm:$0xff]  ;;  %v16124_v48 = vld [vmem:[%s20496_s12 + $0xd60] sm:$0xff]  ;;  %v16111_v9 = vld [vmem:[%s20496_s12 + $0xcf8] sm:$0xff] }
0x4204   : > { %v16142_v46 = vld [vmem:[%s20496_s12 + $0xdf0] sm:$0xff] }
0x4205   : > { %19491 = vmatpush3.bf16.msra.mxu1 %v19490_v33  ;;  %19523 = vmatpush3.bf16.msra.mxu0 %v19522_v32  ;;  %v16118_v33 = vld [vmem:[%s20496_s12 + $0xd30] sm:$0xff]  ;;  %v19568_v32 = vpack.c.bf16 %v16135_v59, %v16134_v55  ;;  %v16143_v55 = vld [vmem:[%s20496_s12 + $0xdf8] sm:$0xff] }
0x4206   : > { %19525 = vmatprep.subr.bf16.mxu1 %v19524_v35  ;;  %19557 = vmatprep.subr.bf16.mxu0 %v19556_v22  ;;  %v16119_v35 = vld [vmem:[%s20496_s12 + $0xd38] sm:$0xff]  ;;  %v16136_v22 = vld [vmem:[%s20496_s12 + $0xdc0] sm:$0xff] }
0x4207   : > { %v19570_v57 = vpack.c.bf16 %v16119_v35, %v16118_v33  ;;  %v19572_v38 = vpack.c.bf16 %v16137_v42, %v16136_v22  ;;  %v16126_v33 = vld [vmem:[%s20496_s12 + $0xd70] sm:$0xff]  ;;  %v19584_v35 = vpack.c.bf16 %v16143_v55, %v16142_v46  ;;  %v16161_v22 = vld [vmem:[%s20496_s12 + $0xe88] sm:$0xff]  ;;  %v16192_v42 = vld [vmem:[%s20496_s12 + $0xf80] sm:$0xff] }
0x4208   : > { %14618 = vmatmul.mubr.f32.vlgmr.msra.gmra.mrb[156].mxu1 %v14395_v62  ;;  %14688 = vmatmul.mubr.f32.vlgmr.msra.gmra.mrb[166].mxu0 %v14397_v37  ;;  %v16138_v62 = vld [vmem:[%s20496_s12 + $0xdd0] sm:$0xff]  ;;  %v16139_v37 = vld [vmem:[%s20496_s12 + $0xdd8] sm:$0xff]  ;;  %v16181_v46 = vld [vmem:[%s20496_s12 + $0xf28] sm:$0xff] }
0x4209   : > { %19527 = vmatpush3.bf16.msra.mxu1 %v19526_v14  ;;  %14757 = vmatprep.mubr.f32.mxu1 %v14400_v45  ;;  %v16107_v14 = vld [vmem:[%s20496_s12 + $0xcd8] sm:$0xff]  ;;  %v16166_v55 = vld [vmem:[%s20496_s12 + $0xeb0] sm:$0xff] }
0x420a   : > { %19559 = vmatpush3.bf16.msra.mxu0 %v19558_v4  ;;  %14827 = vmatprep.mubr.f32.mxu0 %v14402_v17  ;;  %v19542_v4 = vpack.c.bf16 %v16089_v30, %v16088_v43  ;;  %v19544_v19 = vpack.c.bf16 %v16107_v14, %v16106_v3  ;;  %v16091_v45 = vld [vmem:[%s20496_s12 + $0xc58] sm:$0xff]  ;;  %v16140_v17 = vld [vmem:[%s20496_s12 + $0xde0] sm:$0xff]  ;;  %v19586_v43 = vpack.c.bf16 %v16127_v18, %v16126_v33  ;;  %v16177_v3 = vld [vmem:[%s20496_s12 + $0xf08] sm:$0xff] }
0x420b   : > { %19529 = vmatprep.subr.bf16.mxu1 %v19528_v50  ;;  %19561 = vmatprep.subr.bf16.mxu0 %v19560_v12  ;;  %v16122_v50 = vld [vmem:[%s20496_s12 + $0xd50] sm:$0xff]  ;;  %v19576_v12 = vpack.c.bf16 %v16139_v37, %v16138_v62  ;;  %v19546_v15 = vpack.c.bf16 %v16091_v45, %v16090_v58  ;;  %v19580_v23 = vpack.c.bf16 %v16141_v47, %v16140_v17  ;;  %v16163_v62 = vld [vmem:[%s20496_s12 + $0xe98] sm:$0xff] }
0x420c   : > { %v19588_v30 = vpack.c.bf16 %v16161_v22, %v16160_v56  ;;  %v16146_v45 = vld [vmem:[%s20496_s12 + $0xe10] sm:$0xff]  ;;  %v16183_v56 = vld [vmem:[%s20496_s12 + $0xf38] sm:$0xff]  ;;  %v16168_v22 = vld [vmem:[%s20496_s12 + $0xec0] sm:$0xff] }
0x420d   : > { %19531 = vmatpush3.bf16.msra.mxu1 %v19530_v63  ;;  %v19578_v63 = vpack.c.bf16 %v16123_v13, %v16122_v50  ;;  %v16147_v50 = vld [vmem:[%s20496_s12 + $0xe18] sm:$0xff]  ;;  %v16150_v33 = vld [vmem:[%s20496_s12 + $0xe30] sm:$0xff] }
0x420e   : > { %19563 = vmatpush3.bf16.msra.mxu0 %v19562_v5  ;;  %19533 = vmatprep.subr.bf16.mxu1 %v19532_v61  ;;  %v19548_v5 = vpack.c.bf16 %v16109_v29, %v16108_v16  ;;  %v16092_v61 = vld [vmem:[%s20496_s12 + $0xc60] sm:$0xff]  ;;  %v16179_v16 = vld [vmem:[%s20496_s12 + $0xf18] sm:$0xff]  ;;  %v16165_v29 = vld [vmem:[%s20496_s12 + $0xea8] sm:$0xff] }
0x420f   : > { %19565 = vmatprep.subr.bf16.mxu0 %v19564_v41  ;;  %v16125_v41 = vld [vmem:[%s20496_s12 + $0xd68] sm:$0xff]  ;;  %v19550_v59 = vpack.c.bf16 %v16093_v40, %v16092_v61  ;;  %v19594_v61 = vpack.c.bf16 %v16147_v50, %v16146_v45  ;;  %v16172_v45 = vld [vmem:[%s20496_s12 + $0xee0] sm:$0xff] }
0x4210   : > { %v16173_v50 = vld [vmem:[%s20496_s12 + $0xee8] sm:$0xff] }
0x4211   : > { %19535 = vmatpush3.bf16.msra.mxu1 %v19534_v7  ;;  %v13775_v7 = vrot.slane %v23108_v51, %v21029_v52  ;;  %v13795_v52 = vrot.slane %v23108_v51, %v21054_v1  ;;  %v16144_v1 = vld [vmem:[%s20496_s12 + $0xe00] sm:$0xff] }
0x4212   : > { %19567 = vmatpush3.bf16.msra.mxu0 %v19566_v21  ;;  %19537 = vmatprep.subr.bf16.mxu1 %v19536_v60  ;;  %v19582_v21 = vpack.c.bf16 %v16125_v41, %v16124_v48  ;;  %v19552_v60 = vpack.c.bf16 %v16111_v9, %v16110_v49  ;;  %v16149_v41 = vld [vmem:[%s20496_s12 + $0xe28] sm:$0xff]  ;;  %v16180_v49 = vld [vmem:[%s20496_s12 + $0xf20] sm:$0xff] }
0x4213   : > { %19569 = vmatprep.subr.bf16.mxu0 %v19568_v32  ;;  %v13783_v32 = vrot.slane %v23108_v51, %v21032_v54  ;;  %v19554_v54 = vpack.c.bf16 %v16095_v2, %v16094_v39  ;;  %v14318_v14 = vadd.f32 %v23126_v11, %v13795_v52  ;;  %v16178_v11 = vld [vmem:[%s20496_s12 + $0xf10] sm:$0xff]  ;;  %v19630_v39 = vpack.c.bf16 %v16181_v46, %v16180_v49  ;;  %v16169_v52 = vld [vmem:[%s20496_s12 + $0xec8] sm:$0xff] }
0x4214   : > { %v19626_v40 = vpack.c.bf16 %v16179_v16, %v16178_v11  ;;  %v16204_v11 = vld [vmem:[%s20496_s12 + $0xfe0] sm:$0xff]  ;;  %v16158_v46 = vld [vmem:[%s20496_s12 + $0xe70] sm:$0xff] }
0x4215   : > { %19539 = vmatpush3.bf16.msra.mxu1 %v19538_v44  ;;  %v16193_v44 = vld [vmem:[%s20496_s12 + $0xf88] sm:$0xff]  ;;  %v14404_v17 = vmax.f32 %v14318_v14, 0.0  ;;  %v16203_v14 = vld [vmem:[%s20496_s12 + $0xfd8] sm:$0xff] }
0x4216   : > { %19571 = vmatpush3.bf16.msra.mxu0 %v19570_v57  ;;  %19541 = vmatprep.subr.bf16.mxu1 %v19540_v36  ;;  %v13803_v57 = vrot.slane %v23108_v51, %v21063_v8  ;;  %v14174_v36 = vadd.f32 %v23091_v34, %v13775_v7  ;;  %v19620_v0 = vpack.c.bf16 %v16193_v44, %v16192_v42  ;;  %v16176_v8 = vld [vmem:[%s20496_s12 + $0xf00] sm:$0xff]  ;;  %v16162_v34 = vld [vmem:[%s20496_s12 + $0xe90] sm:$0xff]  ;;  %v16201_v44 = vld [vmem:[%s20496_s12 + $0xfc8] sm:$0xff] }
0x4217   : > { %19573 = vmatprep.subr.bf16.mxu0 %v19572_v38  ;;  %v14245_v38 = vadd.f32 %v23093_v10, %v13783_v32  ;;  %v16195_v10 = vld [vmem:[%s20496_s12 + $0xf98] sm:$0xff]  ;;  %v19622_v58 = vpack.c.bf16 %v16177_v3, %v16176_v8  ;;  %v19592_v13 = vpack.c.bf16 %v16163_v62, %v16162_v34  ;;  %v16198_v7 = vld [vmem:[%s20496_s12 + $0xfb0] sm:$0xff]  ;;  %v16200_v42 = vld [vmem:[%s20496_s12 + $0xfc0] sm:$0xff] }
0x4218   : > { %v14389_v37 = vadd.f32 %v23128_v28, %v13803_v57  ;;  %v16164_v28 = vld [vmem:[%s20496_s12 + $0xea0] sm:$0xff]  ;;  %v16151_v32 = vld [vmem:[%s20496_s12 + $0xe38] sm:$0xff]  ;;  %v16202_v3 = vld [vmem:[%s20496_s12 + $0xfd0] sm:$0xff] }
0x4219   : > { %19543 = vmatpush3.bf16.msra.mxu1 %v19542_v4  ;;  %v19590_v4 = vpack.c.bf16 %v16145_v6, %v16144_v1  ;;  %v19596_v48 = vpack.c.bf16 %v16165_v29, %v16164_v28  ;;  %v19602_v57 = vpack.c.bf16 %v16151_v32, %v16150_v33  ;;  %v16184_v1 = vld [vmem:[%s20496_s12 + $0xf40] sm:$0xff]  ;;  %v19636_v6 = vpack.c.bf16 %v16201_v44, %v16200_v42  ;;  %v16171_v8 = vld [vmem:[%s20496_s12 + $0xed8] sm:$0xff] }
0x421a   : > { %19575 = vmatpush3.bf16.msra.mxu0 %v19574_v53  ;;  %19545 = vmatprep.subr.bf16.mxu1 %v19544_v19  ;;  %v16194_v53 = vld [vmem:[%s20496_s12 + $0xf90] sm:$0xff]  ;;  %v14399_v19 = vmax.f32 %v14174_v36, 0.0  ;;  %v19604_v36 = vpack.c.bf16 %v16169_v52, %v16168_v22  ;;  %v19612_v28 = vpack.c.bf16 %v16173_v50, %v16172_v45  ;;  %v16156_v29 = vld [vmem:[%s20496_s12 + $0xe60] sm:$0xff] }
0x421b   : > { %19577 = vmatprep.subr.bf16.mxu0 %v19576_v12  ;;  %v14401_v12 = vmax.f32 %v14245_v38, 0.0  ;;  %v19624_v47 = vpack.c.bf16 %v16195_v10, %v16194_v53  ;;  %v16185_v38 = vld [vmem:[%s20496_s12 + $0xf48] sm:$0xff]  ;;  %v16155_v53 = vld [vmem:[%s20496_s12 + $0xe58] sm:$0xff]  ;;  %v16186_v10 = vld [vmem:[%s20496_s12 + $0xf50] sm:$0xff] }
0x421c   : > { %v19638_v62 = vpack.c.bf16 %v16185_v38, %v16184_v1 }
0x421d   : > { %19547 = vmatpush3.bf16.msra.mxu1 %v19546_v15  ;;  %v16196_v15 = vld [vmem:[%s20496_s12 + $0xfa0] sm:$0xff] }
0x421e   : > { %19579 = vmatpush3.bf16.msra.mxu0 %v19578_v63  ;;  %19549 = vmatprep.subr.bf16.mxu1 %v19548_v5  ;;  %v16197_v63 = vld [vmem:[%s20496_s12 + $0xfa8] sm:$0xff]  ;;  %v14406_v5 = vmax.f32 %v14389_v37, 0.0 }
0x421f   : > { %19581 = vmatprep.subr.bf16.mxu0 %v19580_v23  ;;  %v16148_v23 = vld [vmem:[%s20496_s12 + $0xe20] sm:$0xff]  ;;  %v19628_v9 = vpack.c.bf16 %v16197_v63, %v16196_v15  ;;  %v16189_v63 = vld [vmem:[%s20496_s12 + $0xf68] sm:$0xff] }
0x4221   : > { %19551 = vmatpush3.bf16.msra.mxu1 %v19550_v59  ;;  %v16167_v59 = vld [vmem:[%s20496_s12 + $0xeb8] sm:$0xff] }
0x4222   : > { %19583 = vmatpush3.bf16.msra.mxu0 %v19582_v21  ;;  %19553 = vmatprep.subr.bf16.mxu1 %v19552_v60  ;;  %v16199_v21 = vld [vmem:[%s20496_s12 + $0xfb8] sm:$0xff]  ;;  %v19598_v60 = vpack.c.bf16 %v16149_v41, %v16148_v23  ;;  %v19600_v2 = vpack.c.bf16 %v16167_v59, %v16166_v55  ;;  %v13791_v41 = vrot.slane %v23108_v51, %v21144_v20  ;;  %v14405_v51 = vmax.f32 %v23124_v27, 0.0 }
0x4223   : > { %19585 = vmatprep.subr.bf16.mxu0 %v19584_v35  ;;  %v16182_v35 = vld [vmem:[%s20496_s12 + $0xf30] sm:$0xff]  ;;  %v19632_v18 = vpack.c.bf16 %v16199_v21, %v16198_v7  ;;  %v16159_v55 = vld [vmem:[%s20496_s12 + $0xe78] sm:$0xff] }
0x4224   : > { %v16190_v7 = vld [vmem:[%s20496_s12 + $0xf70] sm:$0xff]  ;;  %v16191_v21 = vld [vmem:[%s20496_s12 + $0xf78] sm:$0xff] }
0x4225   : > { %19555 = vmatpush3.bf16.msra.mxu1 %v19554_v54  ;;  %v19634_v54 = vpack.c.bf16 %v16183_v56, %v16182_v35  ;;  %v16216_v35 = vld [vmem:[#allocation10 + $0x1] ss:$0 sm:$0xff] }
0x4226   : > { %19587 = vmatpush3.bf16.msra.mxu0 %v19586_v43  ;;  %19589 = vmatprep.subr.bf16.mxu1 %v19588_v30  ;;  %v16152_v43 = vld [vmem:[%s20496_s12 + $0xe40] sm:$0xff]  ;;  %v16153_v30 = vld [vmem:[%s20496_s12 + $0xe48] sm:$0xff] }
0x4227   : > { %19621 = vmatprep.subr.bf16.mxu0 %v19620_v0  ;;  %v16170_v0 = vld [vmem:[%s20496_s12 + $0xed0] sm:$0xff]  ;;  %v19606_v34 = vpack.c.bf16 %v16153_v30, %v16152_v43 }
0x4228   : > { %14758 = vmatmul.mubr.f32.vlgmr.msra.gmra.mrb[158].mxu1 %v14399_v19  ;;  %v19608_v37 = vpack.c.bf16 %v16171_v8, %v16170_v0  ;;  %v19640_v19 = vpack.c.bf16 %v16203_v14, %v16202_v3 }
0x4229   : > { %14828 = vmatmul.mubr.f32.vlgmr.msra.gmra.mrb[168].mxu0 %v14401_v12  ;;  %19591 = vmatpush3.bf16.msra.mxu1 %v19590_v4  ;;  %v16154_v4 = vld [vmem:[%s20496_s12 + $0xe50] sm:$0xff]  ;;  %v16205_v12 = vld [vmem:[%s20496_s12 + $0xfe8] sm:$0xff] }
0x422a   : > { %14897 = vmatprep.mubr.f32.mxu1 %v14404_v17  ;;  %19623 = vmatpush3.bf16.msra.mxu0 %v19622_v58  ;;  %v16187_v58 = vld [vmem:[%s20496_s12 + $0xf58] sm:$0xff]  ;;  %v16157_v17 = vld [vmem:[%s20496_s12 + $0xe68] sm:$0xff]  ;;  %v19644_v15 = vpack.c.bf16 %v16205_v12, %v16204_v11 }
0x422b   : > { %14967 = vmatprep.mubr.f32.mxu0 %v14406_v5  ;;  %19593 = vmatprep.subr.bf16.mxu1 %v19592_v13  ;;  %v19610_v13 = vpack.c.bf16 %v16155_v53, %v16154_v4  ;;  %v19642_v16 = vpack.c.bf16 %v16187_v58, %v16186_v10  ;;  %v16174_v5 = vld [vmem:[%s20496_s12 + $0xef0] sm:$0xff]  ;;  %v19614_v23 = vpack.c.bf16 %v16157_v17, %v16156_v29  ;;  %v15005_v17 = vld [vmem:[%s23494_s5] sm:$0xff] }
0x422c   : > { %19625 = vmatprep.subr.bf16.mxu0 %v19624_v47  ;;  %v16188_v47 = vld [vmem:[%s20496_s12 + $0xf60] sm:$0xff] }
0x422d   : > { %19595 = vmatpush3.bf16.msra.mxu1 %v19594_v61  ;;  %v16175_v61 = vld [vmem:[%s20496_s12 + $0xef8] sm:$0xff]  ;;  %v19646_v49 = vpack.c.bf16 %v16189_v63, %v16188_v47  ;;  %v15006_v47 = vld [vmem:[%s23494_s5 + $0x8] sm:$0xff]  ;;  %v15007_v63 = vld [vmem:[%s23494_s5 + $0x10] sm:$0xff] }
0x422e   : > { %19627 = vmatpush3.bf16.msra.mxu0 %v19626_v40  ;;  %19597 = vmatprep.subr.bf16.mxu1 %v19596_v48  ;;  %v16206_v40 = vld [vmem:[%s20496_s12 + $0xff0] sm:$0xff]  ;;  %v16207_v48 = vld [vmem:[%s20496_s12 + $0xff8] sm:$0xff] }
0x422f   : > { %19629 = vmatprep.subr.bf16.mxu0 %v19628_v9  ;;  %v19616_v9 = vpack.c.bf16 %v16175_v61, %v16174_v5  ;;  %v19648_v59 = vpack.c.bf16 %v16207_v48, %v16206_v40 }
0x4231   : > { %19599 = vmatpush3.bf16.msra.mxu1 %v19598_v60  ;;  %v19618_v60 = vpack.c.bf16 %v16159_v55, %v16158_v46 }
0x4232   : > { %19631 = vmatpush3.bf16.msra.mxu0 %v19630_v39  ;;  %19601 = vmatprep.subr.bf16.mxu1 %v19600_v2  ;;  %v14316_v39 = vadd.f32 %v23120_v26, %v13791_v41  ;;  %v19650_v2 = vpack.c.bf16 %v16191_v21, %v16190_v7  ;;  %v16217_v41 = vld [vmem:[#allocation7 + $0x1] ss:$0 sm:$0xff] }
0x4233   : > { %19633 = vmatprep.subr.bf16.mxu0 %v19632_v18 }
0x4234   : > { %v14403_v20 = vmax.f32 %v14316_v39, 0.0 }
0x4235   : > { %19603 = vmatpush3.bf16.msra.mxu1 %v19602_v57 }
0x4236   : > { %19635 = vmatpush3.bf16.msra.mxu0 %v19634_v54  ;;  %19605 = vmatprep.subr.bf16.mxu1 %v19604_v36 }
0x4237   : > { %19637 = vmatprep.subr.bf16.mxu0 %v19636_v6 }
0x4239   : > { %19607 = vmatpush3.bf16.msra.mxu1 %v19606_v34 }
0x423a   : > { %19639 = vmatpush3.bf16.msra.mxu0 %v19638_v62  ;;  %19609 = vmatprep.subr.bf16.mxu1 %v19608_v37 }
0x423b   : > { %19641 = vmatprep.subr.bf16.mxu0 %v19640_v19 }
0x423d   : > { %19611 = vmatpush3.bf16.msra.mxu1 %v19610_v13 }
0x423e   : > { %19643 = vmatpush3.bf16.msra.mxu0 %v19642_v16  ;;  %19613 = vmatprep.subr.bf16.mxu1 %v19612_v28 }
0x423f   : > { %19645 = vmatprep.subr.bf16.mxu0 %v19644_v15  ;;  %v19653_v15 = vpack.c.bf16 %v15006_v47, %v15005_v17 }
0x4241   : > { %19615 = vmatpush3.bf16.msra.mxu1 %v19614_v23 }
0x4242   : > { %19647 = vmatpush3.bf16.msra.mxu0 %v19646_v49  ;;  %19617 = vmatprep.subr.bf16.mxu1 %v19616_v9  ;;  %v16218_v9 = vld [vmem:[#allocation9 + $0x1] ss:$0 sm:$0xff] }
0x4243   : > { %19649 = vmatprep.subr.bf16.mxu0 %v19648_v59  ;;  %v16219_v59 = vld [vmem:[#allocation6] ss:$0 sm:$0xff] }
0x4245   : > { %19619 = vmatpush3.bf16.msra.mxu1 %v19618_v60 }
0x4246   : > { %19651 = vmatpush3.bf16.msra.mxu0 %v19650_v2  ;;  %19652 = vmatprep.subr.bf16.mxu1 %v20252_v31 }
0x4248   : > { %14898 = vmatmul.mubr.f32.vlgmr.msra.gmra.mrb[160].mxu1 %v14403_v20 }
0x4249   : > { %14968 = vmatmul.mubr.f32.vlgmr.msra.gmra.mrb[170].mxu0 %v14405_v51  ;;  %18165 = vmatprep.mubr.msk.f32.mxu1 %vm20247_vm0, %v23471_v25 }
0x424a   : > { %19654 = vmatpush3.bf16.msra.mxu1 %v19653_v15 }
0x424b   : > { %19655 = vmatprep.subr.bf16.mxu1 %v20252_v31 }
0x42bb   : > { %v17391_v33 = vpop.f32.mrb[154].mxu1  ;;  %v17426_v32 = vpop.f32.mrb[164].mxu0 }
0x42bc   : > { %v17392_v26 = vpop.f32.mrb[155].mxu1  ;;  %v17427_v18 = vpop.f32.mrb[165].mxu0 }
0x42bd   : > { %v17393_v56 = vadd.f32 %v17392_v26, %v17391_v33  ;;  %v17428_v22 = vadd.f32 %v17427_v18, %v17426_v32 }
0x42bf   : > { %v14480_v52 = vadd.f32 %v17393_v56, %v16216_v35 }
0x42c1   : > { %v14550_v42 = vadd.f32 %v17428_v22, %v14480_v52 }
0x42db   : > { %v17461_v44 = vpop.f32.mrb[156].mxu1  ;;  %v17496_v57 = vpop.f32.mrb[166].mxu0 }
0x42dc   : > { %v17462_v54 = vpop.f32.mrb[157].mxu1  ;;  %v17497_v36 = vpop.f32.mrb[167].mxu0 }
0x42dd   : > { %v17463_v43 = vadd.f32 %v17462_v54, %v17461_v44  ;;  %v17498_v27 = vadd.f32 %v17497_v36, %v17496_v57 }
0x42df   : > { %v14620_v30 = vadd.f32 %v17463_v43, %v14550_v42 }
0x42e1   : > { %v14690_v1 = vadd.f32 %v17498_v27, %v14620_v30 }
0x42fb   : > { %v17531_v6 = vpop.f32.mrb[158].mxu1 }
0x42fc   : > { %v17566_v38 = vpop.f32.mrb[168].mxu0  ;;  %v17532_v25 = vpop.f32.mrb[159].mxu1 }
0x42fd   : > { %v17533_v0 = vadd.f32 %v17532_v25, %v17531_v6  ;;  %v17567_v8 = vpop.f32.mrb[169].mxu0 }
0x42fe   : > { %v17568_v3 = vadd.f32 %v17567_v8, %v17566_v38 }
0x42ff   : > { %v14760_v14 = vadd.f32 %v17533_v0, %v14690_v1 }
0x4301   : > { %v14830_v34 = vadd.f32 %v17568_v3, %v14760_v14 }
0x431b   : > { %v17601_v62 = vpop.f32.mrb[160].mxu1 }
0x431c   : > { %v17636_v37 = vpop.f32.mrb[170].mxu0  ;;  %v17602_v4 = vpop.f32.mrb[161].mxu1 }
0x431d   : > { %v17603_v53 = vadd.f32 %v17602_v4, %v17601_v62  ;;  %v17637_v10 = vpop.f32.mrb[171].mxu0 }
0x431e   : > { %v17638_v19 = vadd.f32 %v17637_v10, %v17636_v37 }
0x431f   : > { %v14900_v58 = vadd.f32 %v17603_v53, %v14830_v34 }
0x4321   : > { %v14970_v45 = vadd.f32 %v17638_v19, %v14900_v58 }
0x4323   : > { %v14973_v50 = vadd.f32 %v14970_v45, %v22914_v24  ;;  %v15008_v24 = vld [vmem:[%s23494_s5 + $0x18] sm:$0xff] }
0x4324   : > { %v19656_v5 = vpack.c.bf16 %v15008_v24, %v15007_v63 }
0x4325   : > { %v14978_v11 = vsel %vm1661_vm4, %v14973_v50, 0.0 }
0x4326   : > { %14979 = vadd.xlane.f32.xlu1 %v14978_v11  ;;  %19657 = vmatpush3.bf16.msra.mxu1 %v19656_v5 }
0x43b3   : > { %v14980_v12 = vpop.xlane.xlu1 %14979 }
0x43b4   : > { %v14981_v13 = vmul.f32 0.03125, %v14980_v12 }
0x43b6   : > { %v14982_v16 = vsub.f32 %v14973_v50, %v14981_v13 }
0x43b8   : > { %v14983_v28 = vmul.f32 %v14982_v16, %v14982_v16 }
0x43ba   : > { %v14984_v29 = vsel %vm1661_vm4, %v14983_v28, 0.0 }
0x43bb   : > { %14985 = vadd.xlane.f32.xlu1 %v14984_v29 }
0x4448   : > { %v14986_v61 = vpop.xlane.xlu1 %14985 }
0x4449   : > { %v14987_v40 = vmul.f32 0.03125, %v14986_v61 }
0x444b   : > { %v14988_v48 = vadd.f32 1e-05, %v14987_v40 }
0x444d   : > { %19995 = vrsqrt.f32 %v14988_v48 }
0x4457   : > { %v19996_v23 = vpop.eup %19995 }
0x4458   : > { %v14990_v49 = vmul.f32 %v19996_v23, %v14982_v16 }
0x445a   : > { %v14997_v46 = vmul.f32 %v16217_v41, %v14990_v49 }
0x445c   : > { %v15004_v55 = vadd.f32 %v16218_v9, %v14997_v46 }
0x445e   : > { %18166 = vmatmul.mubr.msk.f32.vlgmr.msra.gmra.mrb[162].mxu1 %vm1661_vm4, %v15004_v55 }
0x4531   : > { %v15085_v31 = vpop.f32.mrb[162].mxu1 }
0x4532   : > { %v15086_v7 = vadd.f32 %v16219_v59, %v15085_v31  ;;  %v18167_v21 = vpop.f32.mrb[163].mxu1 }
0x4534   : > { %15089 = vst.msk [vmem:[%s1539_s24] sm:$0xff] %vm1549_vm2, %v15086_v7 }
0x4535 PF: > { %s113_s7 = sadd.s32 1, %s20187_s7  }
0x4536   : > { %p110_p0 = scmp.ge.s32.totalorder %s113_s7, 4  }
0x4538   :  { %112 = sbr.rel (!%p110_p0) target bundleno = 113 (0x71), region = 362 }
0x453f   :  { %15109 = vsyncpa [#allocation3], 1 }
0x4540   :  { %15111 = vsyncpa [#allocation3 + $0x1], 1 }
0x4541   :  { %15112 = vsyncpa [#allocation5], 1 }
0x4542   :  { %15113 = vsyncpa [#allocation8], 1 }
0x4543   :  { %15114 = vsyncpa [#allocation11], 1 }

</bundles_post_ra>
